<compile_context>
chip_gen: v6e
topology: v6e:2x2x1
jax: 0.10.0
libtpu: 0.0.40
codegen_flags: <defaults>
</compile_context>

<pallas_src>
import math

import jax
import jax.numpy as jnp
from jax import lax
from jax.experimental import pallas as pl
from jax.experimental.pallas import tpu as pltpu

NHEAD = 4        # nn.TransformerEncoderLayer(..., nhead=4)
LN_EPS = 1e-5    # PyTorch LayerNorm default eps


def _layer_norm(v, g, b):
    mu = jnp.mean(v, axis=-1, keepdims=True)
    var = jnp.mean(jnp.square(v - mu), axis=-1, keepdims=True)
    return (v - mu) * lax.rsqrt(var + LN_EPS) * g + b


def _branch(x_ref, bias_ref, wm_ref, pw_ref, pb_ref, t_refs):
    """proj -> L post-norm transformer layers -> per-token l2 + masked-mean l2.

    Works on the batch-flattened view: M = B*S rows feed every matmul.
    """
    (wqkv, bqkv, wo, bo, g1, be1, w1, b1, w2, b2, g2, be2) = t_refs
    E = pw_ref.shape[1]
    Dh = E // NHEAD
    L = wqkv.shape[0]
    scale = 1.0 / math.sqrt(Dh)

    bias = bias_ref[...]                      # (M, M), built once in the wrapper
    x = x_ref[...]                            # (M, Din)

    # img_proj / cap_proj (nn.Linear) -- bf16 weights, f32 accumulation.
    h = jnp.dot(x.astype(jnp.bfloat16), pw_ref[...],
                preferred_element_type=jnp.float32) + pb_ref[...]

    for l in range(L):
        h16 = h.astype(jnp.bfloat16)
        qkv = jnp.dot(h16, wqkv[l], preferred_element_type=jnp.float32) + bqkv[l]
        wol = wo[l]                           # (E, E) bf16, read once per layer
        attn = None
        for hd in range(NHEAD):
            qh = qkv[:, hd * Dh:(hd + 1) * Dh] * scale
            kh = qkv[:, E + hd * Dh:E + (hd + 1) * Dh]
            vh = qkv[:, 2 * E + hd * Dh:2 * E + (hd + 1) * Dh]
            # scores without an explicit kh.T (contract last dim of both).
            s = lax.dot_general(qh, kh, (((1,), (1,)), ((), ())),
                                preferred_element_type=jnp.float32) + bias
            s = s - jnp.max(s, axis=-1, keepdims=True)
            p = jnp.exp(s)
            p = p * pl.reciprocal(jnp.sum(p, axis=-1, keepdims=True), approx=True)
            head = jnp.dot(p, vh, preferred_element_type=jnp.float32)
            # accumulate through the matching 8-row slice of Wo (no concat).
            contrib = jnp.dot(head.astype(jnp.bfloat16),
                              wol[hd * Dh:(hd + 1) * Dh, :],
                              preferred_element_type=jnp.float32)
            attn = contrib if attn is None else attn + contrib
        h = _layer_norm(h + attn + bo[l], g1[l], be1[l])

        h16 = h.astype(jnp.bfloat16)
        ff = jnp.maximum(
            jnp.dot(h16, w1[l], preferred_element_type=jnp.float32) + b1[l], 0.0)
        ff = jnp.dot(ff.astype(jnp.bfloat16), w2[l],
                     preferred_element_type=jnp.float32) + b2[l]
        h = _layer_norm(h + ff, g2[l], be2[l])

    # F.normalize(full_emb, p=2, dim=2): per-token l2 normalization.
    inv_tok = lax.rsqrt(jnp.maximum(jnp.sum(h * h, axis=-1, keepdims=True), 1e-24))
    seq = h * inv_tok

    # Aggregator (masked mean, 1/len folded into wm) followed by l2norm.
    # TODO(synk): Aggregator internals are not in the reference; masked mean pooling assumed.
    pooled = jnp.dot(wm_ref[...], h, preferred_element_type=jnp.float32)    # (B, E)
    inv_pool = lax.rsqrt(
        jnp.maximum(jnp.sum(pooled * pooled, axis=-1, keepdims=True), 1e-24))
    aggr = pooled * inv_pool
    return seq, aggr


def _make_fused_kernel(shared):
    """Kernel processing caption + image branches in one invocation."""
    def kernel(*refs):
        (cap_bias, img_bias, cap_wm, img_wm, cap_x, img_x,
         cap_pw, cap_pb, img_pw, img_pb) = refs[:10]
        t_cap = refs[10:22]
        if shared:
            t_img = t_cap
            outs = refs[22:]
        else:
            t_img = refs[22:34]
            outs = refs[34:]
        cap_seq_ref, cap_aggr_ref, img_seq_ref, img_aggr_ref = outs

        seq, aggr = _branch(cap_x, cap_bias, cap_wm, cap_pw, cap_pb, t_cap)
        cap_seq_ref[...] = seq
        cap_aggr_ref[...] = aggr

        seq, aggr = _branch(img_x, img_bias, img_wm, img_pw, img_pb, t_img)
        img_seq_ref[...] = seq
        img_aggr_ref[...] = aggr

    return kernel


def _build_masks(lengths, B, S):
    """Flattened-batch attention bias (B*S, B*S) and mean-pool weights (B, B*S)."""
    j = jnp.arange(S)[None, :]
    key_valid = (j < lengths[:, None]).astype(jnp.float32)                 # (B, S)
    same = jnp.eye(B, dtype=jnp.float32)                                   # (B, B)
    valid_keys = same[:, :, None] * key_valid[None, :, :]                  # (B, B, S)
    bias = jnp.where(valid_keys > 0.5, 0.0, -1e9).astype(jnp.float32)      # (B, B, S)
    bias = jnp.broadcast_to(bias[:, None, :, :], (B, S, B, S)).reshape(B * S, B * S)
    counts = jnp.maximum(jnp.sum(key_valid, axis=-1, keepdims=True), 1.0)  # (B, 1)
    wmat = (same[:, :, None] * (key_valid / counts)[None, :, :]).reshape(B, B * S)
    return bias, wmat


def _cast_tparams(t):
    (wqkv, bqkv, wo, bo, g1, be1, w1, b1, w2, b2, g2, be2) = t
    bf = jnp.bfloat16
    return (wqkv.astype(bf), bqkv, wo.astype(bf), bo, g1, be1,
            w1.astype(bf), b1, w2.astype(bf), b2, g2, be2)


def joint_text_image_forward(features, captions, feat_len, cap_len, boxes, params):
    """JointTextImageTransformerEncoder.forward (eval mode)."""
    # TODO(synk): EncoderText / EncoderImage internals are not provided in the
    # reference; they are modeled as identity feature extractors so c_emb /
    # i_emb are the raw (pre-projection) token / region features.
    del boxes
    B, S_img, Dv = features.shape
    _, S_cap, Dc = captions.shape
    E = params["img_proj_w"].shape[1]
    shared = bool(params["shared_transformer"])

    cap_bias, cap_wm = _build_masks(cap_len, B, S_cap)
    img_bias, img_wm = _build_masks(feat_len, B, S_img)

    t1 = _cast_tparams(params["t1"])
    operands = [
        cap_bias, img_bias, cap_wm, img_wm,
        captions.reshape(B * S_cap, Dc), features.reshape(B * S_img, Dv),
        params["cap_proj_w"].astype(jnp.bfloat16), params["cap_proj_b"],
        params["img_proj_w"].astype(jnp.bfloat16), params["img_proj_b"],
        *t1,
    ]
    if not shared:
        operands.extend(_cast_tparams(params["t2"]))

    out_shape = (
        jax.ShapeDtypeStruct((B * S_cap, E), jnp.float32),
        jax.ShapeDtypeStruct((B, E), jnp.float32),
        jax.ShapeDtypeStruct((B * S_img, E), jnp.float32),
        jax.ShapeDtypeStruct((B, E), jnp.float32),
    )
    # Single un-gridded call: every operand lives fully in VMEM (~1 MiB total),
    # no double-buffering, no per-step overhead.
    cap_seq, cap_aggr, img_seq, img_aggr = pl.pallas_call(
        _make_fused_kernel(shared),
        out_shape=out_shape,
        compiler_params=pltpu.CompilerParams(vmem_limit_bytes=32 * 1024 * 1024),
    )(*operands)

    # PyTorch transformer outputs are seq-first (S, B, E).
    full_cap_emb = jnp.transpose(cap_seq.reshape(B, S_cap, E), (1, 0, 2))
    full_img_emb = jnp.transpose(img_seq.reshape(B, S_img, E), (1, 0, 2))
    return img_aggr, cap_aggr, full_img_emb, full_cap_emb


def init_transformer_params(key, E, L, ff):
    keys = jax.random.split(key, 4 * L)

    def w(k, shape, fan_in):
        return jax.random.normal(k, shape, jnp.float32) * (1.0 / math.sqrt(fan_in))

    wqkv = jnp.stack([w(keys[4 * l + 0], (E, 3 * E), E) for l in range(L)])
    bqkv = jnp.zeros((L, 1, 3 * E), jnp.float32)
    wo = jnp.stack([w(keys[4 * l + 1], (E, E), E) for l in range(L)])
    bo = jnp.zeros((L, 1, E), jnp.float32)
    g1 = jnp.ones((L, 1, E), jnp.float32)
    be1 = jnp.zeros((L, 1, E), jnp.float32)
    w1 = jnp.stack([w(keys[4 * l + 2], (E, ff), E) for l in range(L)])
    b1 = jnp.zeros((L, 1, ff), jnp.float32)
    w2 = jnp.stack([w(keys[4 * l + 3], (ff, E), ff) for l in range(L)])
    b2 = jnp.zeros((L, 1, E), jnp.float32)
    g2 = jnp.ones((L, 1, E), jnp.float32)
    be2 = jnp.zeros((L, 1, E), jnp.float32)
    return (wqkv, bqkv, wo, bo, g1, be1, w1, b1, w2, b2, g2, be2)


def _reference_branch(x, lengths, proj_w, proj_b, tparams):
    """Pure-JAX f32 reference mirroring the module math (correctness check)."""
    B, S, _ = x.shape
    E = proj_w.shape[1]
    Dh = E // NHEAD
    idx = jnp.arange(S)[None, :]
    bias = jnp.where(idx < lengths[:, None], 0.0, -1e9)
    (wqkv, bqkv, wo, bo, g1, be1, w1, b1, w2, b2, g2, be2) = tparams
    h = x @ proj_w + proj_b
    L = wqkv.shape[0]
    for l in range(L):
        qkv = h @ wqkv[l] + bqkv[l]
        q, k, v = qkv[..., :E], qkv[..., E:2 * E], qkv[..., 2 * E:]
        q = q.reshape(B, S, NHEAD, Dh)
        k = k.reshape(B, S, NHEAD, Dh)
        v = v.reshape(B, S, NHEAD, Dh)
        s = jnp.einsum('bqhd,bkhd->bhqk', q, k) / math.sqrt(Dh) + bias[:, None, None, :]
        p = jax.nn.softmax(s, axis=-1)
        a = jnp.einsum('bhqk,bkhd->bqhd', p, v).reshape(B, S, E)
        a = a @ wo[l] + bo[l]
        h = _layer_norm(h + a, g1[l], be1[l])
        ff = jnp.maximum(h @ w1[l] + b1[l], 0.0) @ w2[l] + b2[l]
        h = _layer_norm(h + ff, g2[l], be2[l])
    seq = h / jnp.maximum(jnp.linalg.norm(h, axis=-1, keepdims=True), 1e-12)
    valid = (bias > -0.5).astype(jnp.float32)
    count = jnp.maximum(jnp.sum(valid, axis=-1, keepdims=True), 1.0)
    pooled = jnp.einsum('bs,bse->be', valid, h) / count
    aggr = pooled / jnp.maximum(jnp.linalg.norm(pooled, axis=-1, keepdims=True), 1e-12)
    return aggr, seq


if __name__ == "__main__":
    key = jax.random.PRNGKey(0)
    B = 2
    IMG_FEAT_DIM = 64     # opt.image_feat_dim
    TXT_WORD_DIM = 48     # opt.text_word_dim
    EMBED = 32            # opt.embed_size
    LAYERS = 2            # opt.layers
    FFN = 2048            # hardcoded dim_feedforward in the module
    Lv, Lc = 12, 8        # max(feat_len), max(cap_len)

    k1, k2, k3, k4, k5, k6 = jax.random.split(key, 6)
    features = jax.random.normal(k1, (B, Lv, IMG_FEAT_DIM), jnp.float32)
    captions = jax.random.normal(k2, (B, Lc, TXT_WORD_DIM), jnp.float32)
    boxes = jax.random.normal(k3, (B, Lv, 4), jnp.float32)
    feat_len = jnp.array([12, 9], jnp.int32)
    cap_len = jnp.array([8, 6], jnp.int32)

    params = {
        "img_proj_w": jax.random.normal(k4, (IMG_FEAT_DIM, EMBED), jnp.float32)
                      / math.sqrt(IMG_FEAT_DIM),
        "img_proj_b": jnp.zeros((1, EMBED), jnp.float32),
        "cap_proj_w": jax.random.normal(k5, (TXT_WORD_DIM, EMBED), jnp.float32)
                      / math.sqrt(TXT_WORD_DIM),
        "cap_proj_b": jnp.zeros((1, EMBED), jnp.float32),
        "t1": init_transformer_params(k6, EMBED, LAYERS, FFN),
        "t2": None,
        "shared_transformer": True,   # opt.shared_transformer
    }

    outs = joint_text_image_forward(features, captions, feat_len, cap_len, boxes, params)
    outs = jax.block_until_ready(outs)
    img_aggr, cap_aggr, full_img_emb, full_cap_emb = outs

    # Shape checks (PyTorch conventions)
    assert img_aggr.shape == (B, EMBED)
    assert cap_aggr.shape == (B, EMBED)
    assert full_img_emb.shape == (Lv, B, EMBED)
    assert full_cap_emb.shape == (Lc, B, EMBED)

    # Numerical check against a pure-JAX f32 reference of the same math
    # (bf16 weight path must stay within tolerance).
    ref_cap_aggr, ref_cap_seq = _reference_branch(
        captions, cap_len, params["cap_proj_w"], params["cap_proj_b"], params["t1"])
    ref_img_aggr, ref_img_seq = _reference_branch(
        features, feat_len, params["img_proj_w"], params["img_proj_b"], params["t1"])

    ok = True
    for got, ref in [(img_aggr, ref_img_aggr),
                     (cap_aggr, ref_cap_aggr),
                     (full_img_emb, jnp.transpose(ref_img_seq, (1, 0, 2))),
                     (full_cap_emb, jnp.transpose(ref_cap_seq, (1, 0, 2)))]:
        ok = ok and bool(jnp.all(jnp.isfinite(got)))
        ok = ok and bool(jnp.max(jnp.abs(got - ref)) < 2e-2)

    if ok:
        print("KERNEL_OK")
    else:
        print("MISMATCH")
</pallas_src>

<mosaic_0001>
module attributes {stable_mosaic.version = 11 : i64} {
  func.func @kernel(%arg0: memref<16x16xf32, #tpu.memory_space<vmem>>, %arg1: memref<24x24xf32, #tpu.memory_space<vmem>>, %arg2: memref<2x16xf32, #tpu.memory_space<vmem>>, %arg3: memref<2x24xf32, #tpu.memory_space<vmem>>, %arg4: memref<16x48xf32, #tpu.memory_space<vmem>>, %arg5: memref<24x64xf32, #tpu.memory_space<vmem>>, %arg6: memref<48x32xbf16, #tpu.memory_space<vmem>>, %arg7: memref<1x32xf32, #tpu.memory_space<vmem>>, %arg8: memref<64x32xbf16, #tpu.memory_space<vmem>>, %arg9: memref<1x32xf32, #tpu.memory_space<vmem>>, %arg10: memref<2x32x96xbf16, #tpu.memory_space<vmem>>, %arg11: memref<2x1x96xf32, #tpu.memory_space<vmem>>, %arg12: memref<2x32x32xbf16, #tpu.memory_space<vmem>>, %arg13: memref<2x1x32xf32, #tpu.memory_space<vmem>>, %arg14: memref<2x1x32xf32, #tpu.memory_space<vmem>>, %arg15: memref<2x1x32xf32, #tpu.memory_space<vmem>>, %arg16: memref<2x32x2048xbf16, #tpu.memory_space<vmem>>, %arg17: memref<2x1x2048xf32, #tpu.memory_space<vmem>>, %arg18: memref<2x2048x32xbf16, #tpu.memory_space<vmem>>, %arg19: memref<2x1x32xf32, #tpu.memory_space<vmem>>, %arg20: memref<2x1x32xf32, #tpu.memory_space<vmem>>, %arg21: memref<2x1x32xf32, #tpu.memory_space<vmem>>, %arg22: memref<16x32xf32, #tpu.memory_space<vmem>>, %arg23: memref<2x32xf32, #tpu.memory_space<vmem>>, %arg24: memref<24x32xf32, #tpu.memory_space<vmem>>, %arg25: memref<2x32xf32, #tpu.memory_space<vmem>>) attributes {dimension_semantics = [], scalar_prefetch = 0 : i64, scratch_operands = 0 : i64, tpu.core_type = #tpu.core_type<tc>} {
    %c0 = arith.constant 0 : index
    %c0_0 = arith.constant 0 : index
    %0 = vector.load %arg0[%c0, %c0_0] : memref<16x16xf32, #tpu.memory_space<vmem>>, vector<16x16xf32>
    %c0_1 = arith.constant 0 : index
    %c0_2 = arith.constant 0 : index
    %1 = vector.load %arg4[%c0_1, %c0_2] : memref<16x48xf32, #tpu.memory_space<vmem>>, vector<16x48xf32>
    %2 = arith.truncf %1 : vector<16x48xf32> to vector<16x48xbf16>
    %c0_3 = arith.constant 0 : index
    %c0_4 = arith.constant 0 : index
    %3 = vector.load %arg6[%c0_3, %c0_4] : memref<48x32xbf16, #tpu.memory_space<vmem>>, vector<48x32xbf16>
    %cst = arith.constant dense<0.000000e+00> : vector<16x32xf32>
    %4 = tpu.matmul %2, %3, %cst {dimension_numbers = #tpu.dot_dimension_numbers<[1], [0], [0], [1], [0, 0, 1, 1], [], []>} : vector<16x48xbf16>, vector<48x32xbf16>, vector<16x32xf32> -> vector<16x32xf32>
    %c0_5 = arith.constant 0 : index
    %c0_6 = arith.constant 0 : index
    %5 = vector.load %arg7[%c0_5, %c0_6] : memref<1x32xf32, #tpu.memory_space<vmem>>, vector<1x32xf32>
    %6 = vector.broadcast %5 : vector<1x32xf32> to vector<16x32xf32>
    %7 = arith.addf %4, %6 : vector<16x32xf32>
    %8 = arith.truncf %7 : vector<16x32xf32> to vector<16x32xbf16>
    %c0_7 = arith.constant 0 : index
    %c0_8 = arith.constant 0 : index
    %c0_9 = arith.constant 0 : index
    %9 = vector.load %arg10[%c0_7, %c0_8, %c0_9] : memref<2x32x96xbf16, #tpu.memory_space<vmem>>, vector<1x32x96xbf16>
    %10 = vector.shape_cast %9 : vector<1x32x96xbf16> to vector<32x96xbf16>
    %cst_10 = arith.constant dense<0.000000e+00> : vector<16x96xf32>
    %11 = tpu.matmul %8, %10, %cst_10 {dimension_numbers = #tpu.dot_dimension_numbers<[1], [0], [0], [1], [0, 0, 1, 1], [], []>} : vector<16x32xbf16>, vector<32x96xbf16>, vector<16x96xf32> -> vector<16x96xf32>
    %c0_11 = arith.constant 0 : index
    %c0_12 = arith.constant 0 : index
    %c0_13 = arith.constant 0 : index
    %12 = vector.load %arg11[%c0_11, %c0_12, %c0_13] : memref<2x1x96xf32, #tpu.memory_space<vmem>>, vector<1x1x96xf32>
    %13 = vector.shape_cast %12 : vector<1x1x96xf32> to vector<1x96xf32>
    %14 = vector.broadcast %13 : vector<1x96xf32> to vector<16x96xf32>
    %15 = arith.addf %11, %14 : vector<16x96xf32>
    %c0_14 = arith.constant 0 : index
    %c0_15 = arith.constant 0 : index
    %c0_16 = arith.constant 0 : index
    %16 = vector.load %arg12[%c0_14, %c0_15, %c0_16] : memref<2x32x32xbf16, #tpu.memory_space<vmem>>, vector<1x32x32xbf16>
    %17 = vector.shape_cast %16 : vector<1x32x32xbf16> to vector<32x32xbf16>
    %18 = vector.extract_strided_slice %15 {offsets = [0, 0], sizes = [16, 8], strides = [1, 1]} : vector<16x96xf32> to vector<16x8xf32>
    %cst_17 = arith.constant 0.353553385 : f32
    %19 = vector.broadcast %cst_17 : f32 to vector<16x8xf32>
    %20 = arith.mulf %18, %19 : vector<16x8xf32>
    %21 = vector.extract_strided_slice %15 {offsets = [0, 32], sizes = [16, 8], strides = [1, 1]} : vector<16x96xf32> to vector<16x8xf32>
    %22 = vector.extract_strided_slice %15 {offsets = [0, 64], sizes = [16, 8], strides = [1, 1]} : vector<16x96xf32> to vector<16x8xf32>
    %cst_18 = arith.constant dense<0.000000e+00> : vector<16x16xf32>
    %23 = tpu.matmul %20, %21, %cst_18 {dimension_numbers = #tpu.dot_dimension_numbers<[1], [1], [0], [0], [0, 0, 1, 0], [], []>} : vector<16x8xf32>, vector<16x8xf32>, vector<16x16xf32> -> vector<16x16xf32>
    %24 = arith.addf %23, %0 : vector<16x16xf32>
    %cst_19 = arith.constant dense<0xFF800000> : vector<16xf32>
    %25 = vector.multi_reduction <maximumf>, %24, %cst_19 [1] : vector<16x16xf32> to vector<16xf32>
    %26 = vector.shape_cast %25 : vector<16xf32> to vector<16x1xf32>
    %27 = vector.broadcast %26 : vector<16x1xf32> to vector<16x16xf32>
    %28 = arith.subf %24, %27 : vector<16x16xf32>
    %29 = math.exp %28 : vector<16x16xf32>
    %cst_20 = arith.constant dense<0.000000e+00> : vector<16xf32>
    %30 = vector.multi_reduction <add>, %29, %cst_20 [1] : vector<16x16xf32> to vector<16xf32>
    %31 = vector.shape_cast %30 : vector<16xf32> to vector<16x1xf32>
    %32 = tpu.reciprocal %31 {approx = true} : vector<16x1xf32> -> vector<16x1xf32>
    %33 = vector.broadcast %32 : vector<16x1xf32> to vector<16x16xf32>
    %34 = arith.mulf %29, %33 : vector<16x16xf32>
    %cst_21 = arith.constant dense<0.000000e+00> : vector<16x8xf32>
    %35 = tpu.matmul %34, %22, %cst_21 {dimension_numbers = #tpu.dot_dimension_numbers<[1], [0], [0], [1], [0, 0, 1, 1], [], []>} : vector<16x16xf32>, vector<16x8xf32>, vector<16x8xf32> -> vector<16x8xf32>
    %36 = arith.truncf %35 : vector<16x8xf32> to vector<16x8xbf16>
    %37 = vector.extract_strided_slice %17 {offsets = [0, 0], sizes = [8, 32], strides = [1, 1]} : vector<32x32xbf16> to vector<8x32xbf16>
    %cst_22 = arith.constant dense<0.000000e+00> : vector<16x32xf32>
    %38 = tpu.matmul %36, %37, %cst_22 {dimension_numbers = #tpu.dot_dimension_numbers<[1], [0], [0], [1], [0, 0, 1, 1], [], []>} : vector<16x8xbf16>, vector<8x32xbf16>, vector<16x32xf32> -> vector<16x32xf32>
    %39 = vector.extract_strided_slice %15 {offsets = [0, 8], sizes = [16, 8], strides = [1, 1]} : vector<16x96xf32> to vector<16x8xf32>
    %cst_23 = arith.constant 0.353553385 : f32
    %40 = vector.broadcast %cst_23 : f32 to vector<16x8xf32>
    %41 = arith.mulf %39, %40 : vector<16x8xf32>
    %42 = vector.extract_strided_slice %15 {offsets = [0, 40], sizes = [16, 8], strides = [1, 1]} : vector<16x96xf32> to vector<16x8xf32>
    %43 = vector.extract_strided_slice %15 {offsets = [0, 72], sizes = [16, 8], strides = [1, 1]} : vector<16x96xf32> to vector<16x8xf32>
    %cst_24 = arith.constant dense<0.000000e+00> : vector<16x16xf32>
    %44 = tpu.matmul %41, %42, %cst_24 {dimension_numbers = #tpu.dot_dimension_numbers<[1], [1], [0], [0], [0, 0, 1, 0], [], []>} : vector<16x8xf32>, vector<16x8xf32>, vector<16x16xf32> -> vector<16x16xf32>
    %45 = arith.addf %44, %0 : vector<16x16xf32>
    %cst_25 = arith.constant dense<0xFF800000> : vector<16xf32>
    %46 = vector.multi_reduction <maximumf>, %45, %cst_25 [1] : vector<16x16xf32> to vector<16xf32>
    %47 = vector.shape_cast %46 : vector<16xf32> to vector<16x1xf32>
    %48 = vector.broadcast %47 : vector<16x1xf32> to vector<16x16xf32>
    %49 = arith.subf %45, %48 : vector<16x16xf32>
    %50 = math.exp %49 : vector<16x16xf32>
    %cst_26 = arith.constant dense<0.000000e+00> : vector<16xf32>
    %51 = vector.multi_reduction <add>, %50, %cst_26 [1] : vector<16x16xf32> to vector<16xf32>
    %52 = vector.shape_cast %51 : vector<16xf32> to vector<16x1xf32>
    %53 = tpu.reciprocal %52 {approx = true} : vector<16x1xf32> -> vector<16x1xf32>
    %54 = vector.broadcast %53 : vector<16x1xf32> to vector<16x16xf32>
    %55 = arith.mulf %50, %54 : vector<16x16xf32>
    %cst_27 = arith.constant dense<0.000000e+00> : vector<16x8xf32>
    %56 = tpu.matmul %55, %43, %cst_27 {dimension_numbers = #tpu.dot_dimension_numbers<[1], [0], [0], [1], [0, 0, 1, 1], [], []>} : vector<16x16xf32>, vector<16x8xf32>, vector<16x8xf32> -> vector<16x8xf32>
    %57 = arith.truncf %56 : vector<16x8xf32> to vector<16x8xbf16>
    %58 = vector.extract_strided_slice %17 {offsets = [8, 0], sizes = [8, 32], strides = [1, 1]} : vector<32x32xbf16> to vector<8x32xbf16>
    %cst_28 = arith.constant dense<0.000000e+00> : vector<16x32xf32>
    %59 = tpu.matmul %57, %58, %cst_28 {dimension_numbers = #tpu.dot_dimension_numbers<[1], [0], [0], [1], [0, 0, 1, 1], [], []>} : vector<16x8xbf16>, vector<8x32xbf16>, vector<16x32xf32> -> vector<16x32xf32>
    %60 = arith.addf %38, %59 : vector<16x32xf32>
    %61 = vector.extract_strided_slice %15 {offsets = [0, 16], sizes = [16, 8], strides = [1, 1]} : vector<16x96xf32> to vector<16x8xf32>
    %cst_29 = arith.constant 0.353553385 : f32
    %62 = vector.broadcast %cst_29 : f32 to vector<16x8xf32>
    %63 = arith.mulf %61, %62 : vector<16x8xf32>
    %64 = vector.extract_strided_slice %15 {offsets = [0, 48], sizes = [16, 8], strides = [1, 1]} : vector<16x96xf32> to vector<16x8xf32>
    %65 = vector.extract_strided_slice %15 {offsets = [0, 80], sizes = [16, 8], strides = [1, 1]} : vector<16x96xf32> to vector<16x8xf32>
    %cst_30 = arith.constant dense<0.000000e+00> : vector<16x16xf32>
    %66 = tpu.matmul %63, %64, %cst_30 {dimension_numbers = #tpu.dot_dimension_numbers<[1], [1], [0], [0], [0, 0, 1, 0], [], []>} : vector<16x8xf32>, vector<16x8xf32>, vector<16x16xf32> -> vector<16x16xf32>
    %67 = arith.addf %66, %0 : vector<16x16xf32>
    %cst_31 = arith.constant dense<0xFF800000> : vector<16xf32>
    %68 = vector.multi_reduction <maximumf>, %67, %cst_31 [1] : vector<16x16xf32> to vector<16xf32>
    %69 = vector.shape_cast %68 : vector<16xf32> to vector<16x1xf32>
    %70 = vector.broadcast %69 : vector<16x1xf32> to vector<16x16xf32>
    %71 = arith.subf %67, %70 : vector<16x16xf32>
    %72 = math.exp %71 : vector<16x16xf32>
    %cst_32 = arith.constant dense<0.000000e+00> : vector<16xf32>
    %73 = vector.multi_reduction <add>, %72, %cst_32 [1] : vector<16x16xf32> to vector<16xf32>
    %74 = vector.shape_cast %73 : vector<16xf32> to vector<16x1xf32>
    %75 = tpu.reciprocal %74 {approx = true} : vector<16x1xf32> -> vector<16x1xf32>
    %76 = vector.broadcast %75 : vector<16x1xf32> to vector<16x16xf32>
    %77 = arith.mulf %72, %76 : vector<16x16xf32>
    %cst_33 = arith.constant dense<0.000000e+00> : vector<16x8xf32>
    %78 = tpu.matmul %77, %65, %cst_33 {dimension_numbers = #tpu.dot_dimension_numbers<[1], [0], [0], [1], [0, 0, 1, 1], [], []>} : vector<16x16xf32>, vector<16x8xf32>, vector<16x8xf32> -> vector<16x8xf32>
    %79 = arith.truncf %78 : vector<16x8xf32> to vector<16x8xbf16>
    %80 = vector.extract_strided_slice %17 {offsets = [16, 0], sizes = [8, 32], strides = [1, 1]} : vector<32x32xbf16> to vector<8x32xbf16>
    %cst_34 = arith.constant dense<0.000000e+00> : vector<16x32xf32>
    %81 = tpu.matmul %79, %80, %cst_34 {dimension_numbers = #tpu.dot_dimension_numbers<[1], [0], [0], [1], [0, 0, 1, 1], [], []>} : vector<16x8xbf16>, vector<8x32xbf16>, vector<16x32xf32> -> vector<16x32xf32>
    %82 = arith.addf %60, %81 : vector<16x32xf32>
    %83 = vector.extract_strided_slice %15 {offsets = [0, 24], sizes = [16, 8], strides = [1, 1]} : vector<16x96xf32> to vector<16x8xf32>
    %cst_35 = arith.constant 0.353553385 : f32
    %84 = vector.broadcast %cst_35 : f32 to vector<16x8xf32>
    %85 = arith.mulf %83, %84 : vector<16x8xf32>
    %86 = vector.extract_strided_slice %15 {offsets = [0, 56], sizes = [16, 8], strides = [1, 1]} : vector<16x96xf32> to vector<16x8xf32>
    %87 = vector.extract_strided_slice %15 {offsets = [0, 88], sizes = [16, 8], strides = [1, 1]} : vector<16x96xf32> to vector<16x8xf32>
    %cst_36 = arith.constant dense<0.000000e+00> : vector<16x16xf32>
    %88 = tpu.matmul %85, %86, %cst_36 {dimension_numbers = #tpu.dot_dimension_numbers<[1], [1], [0], [0], [0, 0, 1, 0], [], []>} : vector<16x8xf32>, vector<16x8xf32>, vector<16x16xf32> -> vector<16x16xf32>
    %89 = arith.addf %88, %0 : vector<16x16xf32>
    %cst_37 = arith.constant dense<0xFF800000> : vector<16xf32>
    %90 = vector.multi_reduction <maximumf>, %89, %cst_37 [1] : vector<16x16xf32> to vector<16xf32>
    %91 = vector.shape_cast %90 : vector<16xf32> to vector<16x1xf32>
    %92 = vector.broadcast %91 : vector<16x1xf32> to vector<16x16xf32>
    %93 = arith.subf %89, %92 : vector<16x16xf32>
    %94 = math.exp %93 : vector<16x16xf32>
    %cst_38 = arith.constant dense<0.000000e+00> : vector<16xf32>
    %95 = vector.multi_reduction <add>, %94, %cst_38 [1] : vector<16x16xf32> to vector<16xf32>
    %96 = vector.shape_cast %95 : vector<16xf32> to vector<16x1xf32>
    %97 = tpu.reciprocal %96 {approx = true} : vector<16x1xf32> -> vector<16x1xf32>
    %98 = vector.broadcast %97 : vector<16x1xf32> to vector<16x16xf32>
    %99 = arith.mulf %94, %98 : vector<16x16xf32>
    %cst_39 = arith.constant dense<0.000000e+00> : vector<16x8xf32>
    %100 = tpu.matmul %99, %87, %cst_39 {dimension_numbers = #tpu.dot_dimension_numbers<[1], [0], [0], [1], [0, 0, 1, 1], [], []>} : vector<16x16xf32>, vector<16x8xf32>, vector<16x8xf32> -> vector<16x8xf32>
    %101 = arith.truncf %100 : vector<16x8xf32> to vector<16x8xbf16>
    %102 = vector.extract_strided_slice %17 {offsets = [24, 0], sizes = [8, 32], strides = [1, 1]} : vector<32x32xbf16> to vector<8x32xbf16>
    %cst_40 = arith.constant dense<0.000000e+00> : vector<16x32xf32>
    %103 = tpu.matmul %101, %102, %cst_40 {dimension_numbers = #tpu.dot_dimension_numbers<[1], [0], [0], [1], [0, 0, 1, 1], [], []>} : vector<16x8xbf16>, vector<8x32xbf16>, vector<16x32xf32> -> vector<16x32xf32>
    %104 = arith.addf %82, %103 : vector<16x32xf32>
    %105 = arith.addf %7, %104 : vector<16x32xf32>
    %c0_41 = arith.constant 0 : index
    %c0_42 = arith.constant 0 : index
    %c0_43 = arith.constant 0 : index
    %106 = vector.load %arg13[%c0_41, %c0_42, %c0_43] : memref<2x1x32xf32, #tpu.memory_space<vmem>>, vector<1x1x32xf32>
    %107 = vector.shape_cast %106 : vector<1x1x32xf32> to vector<1x32xf32>
    %108 = vector.broadcast %107 : vector<1x32xf32> to vector<16x32xf32>
    %109 = arith.addf %105, %108 : vector<16x32xf32>
    %c0_44 = arith.constant 0 : index
    %c0_45 = arith.constant 0 : index
    %c0_46 = arith.constant 0 : index
    %110 = vector.load %arg14[%c0_44, %c0_45, %c0_46] : memref<2x1x32xf32, #tpu.memory_space<vmem>>, vector<1x1x32xf32>
    %111 = vector.shape_cast %110 : vector<1x1x32xf32> to vector<1x32xf32>
    %c0_47 = arith.constant 0 : index
    %c0_48 = arith.constant 0 : index
    %c0_49 = arith.constant 0 : index
    %112 = vector.load %arg15[%c0_47, %c0_48, %c0_49] : memref<2x1x32xf32, #tpu.memory_space<vmem>>, vector<1x1x32xf32>
    %113 = vector.shape_cast %112 : vector<1x1x32xf32> to vector<1x32xf32>
    %cst_50 = arith.constant dense<0.000000e+00> : vector<16xf32>
    %114 = vector.multi_reduction <add>, %109, %cst_50 [1] : vector<16x32xf32> to vector<16xf32>
    %115 = vector.shape_cast %114 : vector<16xf32> to vector<16x1xf32>
    %cst_51 = arith.constant 3.200000e+01 : f32
    %116 = vector.broadcast %cst_51 : f32 to vector<16x1xf32>
    %117 = arith.divf %115, %116 : vector<16x1xf32>
    %118 = vector.broadcast %117 : vector<16x1xf32> to vector<16x32xf32>
    %119 = arith.subf %109, %118 : vector<16x32xf32>
    %120 = arith.mulf %119, %119 : vector<16x32xf32>
    %cst_52 = arith.constant dense<0.000000e+00> : vector<16xf32>
    %121 = vector.multi_reduction <add>, %120, %cst_52 [1] : vector<16x32xf32> to vector<16xf32>
    %122 = vector.shape_cast %121 : vector<16xf32> to vector<16x1xf32>
    %cst_53 = arith.constant 3.200000e+01 : f32
    %123 = vector.broadcast %cst_53 : f32 to vector<16x1xf32>
    %124 = arith.divf %122, %123 : vector<16x1xf32>
    %125 = vector.broadcast %117 : vector<16x1xf32> to vector<16x32xf32>
    %126 = arith.subf %109, %125 : vector<16x32xf32>
    %cst_54 = arith.constant 9.99999974E-6 : f32
    %127 = vector.broadcast %cst_54 : f32 to vector<16x1xf32>
    %128 = arith.addf %124, %127 : vector<16x1xf32>
    %129 = math.rsqrt %128 : vector<16x1xf32>
    %130 = vector.broadcast %129 : vector<16x1xf32> to vector<16x32xf32>
    %131 = arith.mulf %126, %130 : vector<16x32xf32>
    %132 = vector.broadcast %111 : vector<1x32xf32> to vector<16x32xf32>
    %133 = arith.mulf %131, %132 : vector<16x32xf32>
    %134 = vector.broadcast %113 : vector<1x32xf32> to vector<16x32xf32>
    %135 = arith.addf %133, %134 : vector<16x32xf32>
    %136 = arith.truncf %135 : vector<16x32xf32> to vector<16x32xbf16>
    %c0_55 = arith.constant 0 : index
    %c0_56 = arith.constant 0 : index
    %c0_57 = arith.constant 0 : index
    %137 = vector.load %arg16[%c0_55, %c0_56, %c0_57] : memref<2x32x2048xbf16, #tpu.memory_space<vmem>>, vector<1x32x2048xbf16>
    %138 = vector.shape_cast %137 : vector<1x32x2048xbf16> to vector<32x2048xbf16>
    %cst_58 = arith.constant dense<0.000000e+00> : vector<16x2048xf32>
    %139 = tpu.matmul %136, %138, %cst_58 {dimension_numbers = #tpu.dot_dimension_numbers<[1], [0], [0], [1], [0, 0, 1, 1], [], []>} : vector<16x32xbf16>, vector<32x2048xbf16>, vector<16x2048xf32> -> vector<16x2048xf32>
    %c0_59 = arith.constant 0 : index
    %c0_60 = arith.constant 0 : index
    %c0_61 = arith.constant 0 : index
    %140 = vector.load %arg17[%c0_59, %c0_60, %c0_61] : memref<2x1x2048xf32, #tpu.memory_space<vmem>>, vector<1x1x2048xf32>
    %141 = vector.shape_cast %140 : vector<1x1x2048xf32> to vector<1x2048xf32>
    %142 = vector.broadcast %141 : vector<1x2048xf32> to vector<16x2048xf32>
    %143 = arith.addf %139, %142 : vector<16x2048xf32>
    %cst_62 = arith.constant 0.000000e+00 : f32
    %144 = vector.broadcast %cst_62 : f32 to vector<16x2048xf32>
    %145 = arith.maximumf %143, %144 : vector<16x2048xf32>
    %146 = arith.truncf %145 : vector<16x2048xf32> to vector<16x2048xbf16>
    %c0_63 = arith.constant 0 : index
    %c0_64 = arith.constant 0 : index
    %c0_65 = arith.constant 0 : index
    %147 = vector.load %arg18[%c0_63, %c0_64, %c0_65] : memref<2x2048x32xbf16, #tpu.memory_space<vmem>>, vector<1x2048x32xbf16>
    %148 = vector.shape_cast %147 : vector<1x2048x32xbf16> to vector<2048x32xbf16>
    %cst_66 = arith.constant dense<0.000000e+00> : vector<16x32xf32>
    %149 = tpu.matmul %146, %148, %cst_66 {dimension_numbers = #tpu.dot_dimension_numbers<[1], [0], [0], [1], [0, 0, 1, 1], [], []>} : vector<16x2048xbf16>, vector<2048x32xbf16>, vector<16x32xf32> -> vector<16x32xf32>
    %c0_67 = arith.constant 0 : index
    %c0_68 = arith.constant 0 : index
    %c0_69 = arith.constant 0 : index
    %150 = vector.load %arg19[%c0_67, %c0_68, %c0_69] : memref<2x1x32xf32, #tpu.memory_space<vmem>>, vector<1x1x32xf32>
    %151 = vector.shape_cast %150 : vector<1x1x32xf32> to vector<1x32xf32>
    %152 = vector.broadcast %151 : vector<1x32xf32> to vector<16x32xf32>
    %153 = arith.addf %149, %152 : vector<16x32xf32>
    %154 = arith.addf %135, %153 : vector<16x32xf32>
    %c0_70 = arith.constant 0 : index
    %c0_71 = arith.constant 0 : index
    %c0_72 = arith.constant 0 : index
    %155 = vector.load %arg20[%c0_70, %c0_71, %c0_72] : memref<2x1x32xf32, #tpu.memory_space<vmem>>, vector<1x1x32xf32>
    %156 = vector.shape_cast %155 : vector<1x1x32xf32> to vector<1x32xf32>
    %c0_73 = arith.constant 0 : index
    %c0_74 = arith.constant 0 : index
    %c0_75 = arith.constant 0 : index
    %157 = vector.load %arg21[%c0_73, %c0_74, %c0_75] : memref<2x1x32xf32, #tpu.memory_space<vmem>>, vector<1x1x32xf32>
    %158 = vector.shape_cast %157 : vector<1x1x32xf32> to vector<1x32xf32>
    %cst_76 = arith.constant dense<0.000000e+00> : vector<16xf32>
    %159 = vector.multi_reduction <add>, %154, %cst_76 [1] : vector<16x32xf32> to vector<16xf32>
    %160 = vector.shape_cast %159 : vector<16xf32> to vector<16x1xf32>
    %cst_77 = arith.constant 3.200000e+01 : f32
    %161 = vector.broadcast %cst_77 : f32 to vector<16x1xf32>
    %162 = arith.divf %160, %161 : vector<16x1xf32>
    %163 = vector.broadcast %162 : vector<16x1xf32> to vector<16x32xf32>
    %164 = arith.subf %154, %163 : vector<16x32xf32>
    %165 = arith.mulf %164, %164 : vector<16x32xf32>
    %cst_78 = arith.constant dense<0.000000e+00> : vector<16xf32>
    %166 = vector.multi_reduction <add>, %165, %cst_78 [1] : vector<16x32xf32> to vector<16xf32>
    %167 = vector.shape_cast %166 : vector<16xf32> to vector<16x1xf32>
    %cst_79 = arith.constant 3.200000e+01 : f32
    %168 = vector.broadcast %cst_79 : f32 to vector<16x1xf32>
    %169 = arith.divf %167, %168 : vector<16x1xf32>
    %170 = vector.broadcast %162 : vector<16x1xf32> to vector<16x32xf32>
    %171 = arith.subf %154, %170 : vector<16x32xf32>
    %cst_80 = arith.constant 9.99999974E-6 : f32
    %172 = vector.broadcast %cst_80 : f32 to vector<16x1xf32>
    %173 = arith.addf %169, %172 : vector<16x1xf32>
    %174 = math.rsqrt %173 : vector<16x1xf32>
    %175 = vector.broadcast %174 : vector<16x1xf32> to vector<16x32xf32>
    %176 = arith.mulf %171, %175 : vector<16x32xf32>
    %177 = vector.broadcast %156 : vector<1x32xf32> to vector<16x32xf32>
    %178 = arith.mulf %176, %177 : vector<16x32xf32>
    %179 = vector.broadcast %158 : vector<1x32xf32> to vector<16x32xf32>
    %180 = arith.addf %178, %179 : vector<16x32xf32>
    %181 = arith.truncf %180 : vector<16x32xf32> to vector<16x32xbf16>
    %c1 = arith.constant 1 : index
    %c0_81 = arith.constant 0 : index
    %c0_82 = arith.constant 0 : index
    %182 = vector.load %arg10[%c1, %c0_81, %c0_82] : memref<2x32x96xbf16, #tpu.memory_space<vmem>>, vector<1x32x96xbf16>
    %183 = vector.shape_cast %182 : vector<1x32x96xbf16> to vector<32x96xbf16>
    %cst_83 = arith.constant dense<0.000000e+00> : vector<16x96xf32>
    %184 = tpu.matmul %181, %183, %cst_83 {dimension_numbers = #tpu.dot_dimension_numbers<[1], [0], [0], [1], [0, 0, 1, 1], [], []>} : vector<16x32xbf16>, vector<32x96xbf16>, vector<16x96xf32> -> vector<16x96xf32>
    %c1_84 = arith.constant 1 : index
    %c0_85 = arith.constant 0 : index
    %c0_86 = arith.constant 0 : index
    %185 = vector.load %arg11[%c1_84, %c0_85, %c0_86] : memref<2x1x96xf32, #tpu.memory_space<vmem>>, vector<1x1x96xf32>
    %186 = vector.shape_cast %185 : vector<1x1x96xf32> to vector<1x96xf32>
    %187 = vector.broadcast %186 : vector<1x96xf32> to vector<16x96xf32>
    %188 = arith.addf %184, %187 : vector<16x96xf32>
    %c1_87 = arith.constant 1 : index
    %c0_88 = arith.constant 0 : index
    %c0_89 = arith.constant 0 : index
    %189 = vector.load %arg12[%c1_87, %c0_88, %c0_89] : memref<2x32x32xbf16, #tpu.memory_space<vmem>>, vector<1x32x32xbf16>
    %190 = vector.shape_cast %189 : vector<1x32x32xbf16> to vector<32x32xbf16>
    %191 = vector.extract_strided_slice %188 {offsets = [0, 0], sizes = [16, 8], strides = [1, 1]} : vector<16x96xf32> to vector<16x8xf32>
    %cst_90 = arith.constant 0.353553385 : f32
    %192 = vector.broadcast %cst_90 : f32 to vector<16x8xf32>
    %193 = arith.mulf %191, %192 : vector<16x8xf32>
    %194 = vector.extract_strided_slice %188 {offsets = [0, 32], sizes = [16, 8], strides = [1, 1]} : vector<16x96xf32> to vector<16x8xf32>
    %195 = vector.extract_strided_slice %188 {offsets = [0, 64], sizes = [16, 8], strides = [1, 1]} : vector<16x96xf32> to vector<16x8xf32>
    %cst_91 = arith.constant dense<0.000000e+00> : vector<16x16xf32>
    %196 = tpu.matmul %193, %194, %cst_91 {dimension_numbers = #tpu.dot_dimension_numbers<[1], [1], [0], [0], [0, 0, 1, 0], [], []>} : vector<16x8xf32>, vector<16x8xf32>, vector<16x16xf32> -> vector<16x16xf32>
    %197 = arith.addf %196, %0 : vector<16x16xf32>
    %cst_92 = arith.constant dense<0xFF800000> : vector<16xf32>
    %198 = vector.multi_reduction <maximumf>, %197, %cst_92 [1] : vector<16x16xf32> to vector<16xf32>
    %199 = vector.shape_cast %198 : vector<16xf32> to vector<16x1xf32>
    %200 = vector.broadcast %199 : vector<16x1xf32> to vector<16x16xf32>
    %201 = arith.subf %197, %200 : vector<16x16xf32>
    %202 = math.exp %201 : vector<16x16xf32>
    %cst_93 = arith.constant dense<0.000000e+00> : vector<16xf32>
    %203 = vector.multi_reduction <add>, %202, %cst_93 [1] : vector<16x16xf32> to vector<16xf32>
    %204 = vector.shape_cast %203 : vector<16xf32> to vector<16x1xf32>
    %205 = tpu.reciprocal %204 {approx = true} : vector<16x1xf32> -> vector<16x1xf32>
    %206 = vector.broadcast %205 : vector<16x1xf32> to vector<16x16xf32>
    %207 = arith.mulf %202, %206 : vector<16x16xf32>
    %cst_94 = arith.constant dense<0.000000e+00> : vector<16x8xf32>
    %208 = tpu.matmul %207, %195, %cst_94 {dimension_numbers = #tpu.dot_dimension_numbers<[1], [0], [0], [1], [0, 0, 1, 1], [], []>} : vector<16x16xf32>, vector<16x8xf32>, vector<16x8xf32> -> vector<16x8xf32>
    %209 = arith.truncf %208 : vector<16x8xf32> to vector<16x8xbf16>
    %210 = vector.extract_strided_slice %190 {offsets = [0, 0], sizes = [8, 32], strides = [1, 1]} : vector<32x32xbf16> to vector<8x32xbf16>
    %cst_95 = arith.constant dense<0.000000e+00> : vector<16x32xf32>
    %211 = tpu.matmul %209, %210, %cst_95 {dimension_numbers = #tpu.dot_dimension_numbers<[1], [0], [0], [1], [0, 0, 1, 1], [], []>} : vector<16x8xbf16>, vector<8x32xbf16>, vector<16x32xf32> -> vector<16x32xf32>
    %212 = vector.extract_strided_slice %188 {offsets = [0, 8], sizes = [16, 8], strides = [1, 1]} : vector<16x96xf32> to vector<16x8xf32>
    %cst_96 = arith.constant 0.353553385 : f32
    %213 = vector.broadcast %cst_96 : f32 to vector<16x8xf32>
    %214 = arith.mulf %212, %213 : vector<16x8xf32>
    %215 = vector.extract_strided_slice %188 {offsets = [0, 40], sizes = [16, 8], strides = [1, 1]} : vector<16x96xf32> to vector<16x8xf32>
    %216 = vector.extract_strided_slice %188 {offsets = [0, 72], sizes = [16, 8], strides = [1, 1]} : vector<16x96xf32> to vector<16x8xf32>
    %cst_97 = arith.constant dense<0.000000e+00> : vector<16x16xf32>
    %217 = tpu.matmul %214, %215, %cst_97 {dimension_numbers = #tpu.dot_dimension_numbers<[1], [1], [0], [0], [0, 0, 1, 0], [], []>} : vector<16x8xf32>, vector<16x8xf32>, vector<16x16xf32> -> vector<16x16xf32>
    %218 = arith.addf %217, %0 : vector<16x16xf32>
    %cst_98 = arith.constant dense<0xFF800000> : vector<16xf32>
    %219 = vector.multi_reduction <maximumf>, %218, %cst_98 [1] : vector<16x16xf32> to vector<16xf32>
    %220 = vector.shape_cast %219 : vector<16xf32> to vector<16x1xf32>
    %221 = vector.broadcast %220 : vector<16x1xf32> to vector<16x16xf32>
    %222 = arith.subf %218, %221 : vector<16x16xf32>
    %223 = math.exp %222 : vector<16x16xf32>
    %cst_99 = arith.constant dense<0.000000e+00> : vector<16xf32>
    %224 = vector.multi_reduction <add>, %223, %cst_99 [1] : vector<16x16xf32> to vector<16xf32>
    %225 = vector.shape_cast %224 : vector<16xf32> to vector<16x1xf32>
    %226 = tpu.reciprocal %225 {approx = true} : vector<16x1xf32> -> vector<16x1xf32>
    %227 = vector.broadcast %226 : vector<16x1xf32> to vector<16x16xf32>
    %228 = arith.mulf %223, %227 : vector<16x16xf32>
    %cst_100 = arith.constant dense<0.000000e+00> : vector<16x8xf32>
    %229 = tpu.matmul %228, %216, %cst_100 {dimension_numbers = #tpu.dot_dimension_numbers<[1], [0], [0], [1], [0, 0, 1, 1], [], []>} : vector<16x16xf32>, vector<16x8xf32>, vector<16x8xf32> -> vector<16x8xf32>
    %230 = arith.truncf %229 : vector<16x8xf32> to vector<16x8xbf16>
    %231 = vector.extract_strided_slice %190 {offsets = [8, 0], sizes = [8, 32], strides = [1, 1]} : vector<32x32xbf16> to vector<8x32xbf16>
    %cst_101 = arith.constant dense<0.000000e+00> : vector<16x32xf32>
    %232 = tpu.matmul %230, %231, %cst_101 {dimension_numbers = #tpu.dot_dimension_numbers<[1], [0], [0], [1], [0, 0, 1, 1], [], []>} : vector<16x8xbf16>, vector<8x32xbf16>, vector<16x32xf32> -> vector<16x32xf32>
    %233 = arith.addf %211, %232 : vector<16x32xf32>
    %234 = vector.extract_strided_slice %188 {offsets = [0, 16], sizes = [16, 8], strides = [1, 1]} : vector<16x96xf32> to vector<16x8xf32>
    %cst_102 = arith.constant 0.353553385 : f32
    %235 = vector.broadcast %cst_102 : f32 to vector<16x8xf32>
    %236 = arith.mulf %234, %235 : vector<16x8xf32>
    %237 = vector.extract_strided_slice %188 {offsets = [0, 48], sizes = [16, 8], strides = [1, 1]} : vector<16x96xf32> to vector<16x8xf32>
    %238 = vector.extract_strided_slice %188 {offsets = [0, 80], sizes = [16, 8], strides = [1, 1]} : vector<16x96xf32> to vector<16x8xf32>
    %cst_103 = arith.constant dense<0.000000e+00> : vector<16x16xf32>
    %239 = tpu.matmul %236, %237, %cst_103 {dimension_numbers = #tpu.dot_dimension_numbers<[1], [1], [0], [0], [0, 0, 1, 0], [], []>} : vector<16x8xf32>, vector<16x8xf32>, vector<16x16xf32> -> vector<16x16xf32>
    %240 = arith.addf %239, %0 : vector<16x16xf32>
    %cst_104 = arith.constant dense<0xFF800000> : vector<16xf32>
    %241 = vector.multi_reduction <maximumf>, %240, %cst_104 [1] : vector<16x16xf32> to vector<16xf32>
    %242 = vector.shape_cast %241 : vector<16xf32> to vector<16x1xf32>
    %243 = vector.broadcast %242 : vector<16x1xf32> to vector<16x16xf32>
    %244 = arith.subf %240, %243 : vector<16x16xf32>
    %245 = math.exp %244 : vector<16x16xf32>
    %cst_105 = arith.constant dense<0.000000e+00> : vector<16xf32>
    %246 = vector.multi_reduction <add>, %245, %cst_105 [1] : vector<16x16xf32> to vector<16xf32>
    %247 = vector.shape_cast %246 : vector<16xf32> to vector<16x1xf32>
    %248 = tpu.reciprocal %247 {approx = true} : vector<16x1xf32> -> vector<16x1xf32>
    %249 = vector.broadcast %248 : vector<16x1xf32> to vector<16x16xf32>
    %250 = arith.mulf %245, %249 : vector<16x16xf32>
    %cst_106 = arith.constant dense<0.000000e+00> : vector<16x8xf32>
    %251 = tpu.matmul %250, %238, %cst_106 {dimension_numbers = #tpu.dot_dimension_numbers<[1], [0], [0], [1], [0, 0, 1, 1], [], []>} : vector<16x16xf32>, vector<16x8xf32>, vector<16x8xf32> -> vector<16x8xf32>
    %252 = arith.truncf %251 : vector<16x8xf32> to vector<16x8xbf16>
    %253 = vector.extract_strided_slice %190 {offsets = [16, 0], sizes = [8, 32], strides = [1, 1]} : vector<32x32xbf16> to vector<8x32xbf16>
    %cst_107 = arith.constant dense<0.000000e+00> : vector<16x32xf32>
    %254 = tpu.matmul %252, %253, %cst_107 {dimension_numbers = #tpu.dot_dimension_numbers<[1], [0], [0], [1], [0, 0, 1, 1], [], []>} : vector<16x8xbf16>, vector<8x32xbf16>, vector<16x32xf32> -> vector<16x32xf32>
    %255 = arith.addf %233, %254 : vector<16x32xf32>
    %256 = vector.extract_strided_slice %188 {offsets = [0, 24], sizes = [16, 8], strides = [1, 1]} : vector<16x96xf32> to vector<16x8xf32>
    %cst_108 = arith.constant 0.353553385 : f32
    %257 = vector.broadcast %cst_108 : f32 to vector<16x8xf32>
    %258 = arith.mulf %256, %257 : vector<16x8xf32>
    %259 = vector.extract_strided_slice %188 {offsets = [0, 56], sizes = [16, 8], strides = [1, 1]} : vector<16x96xf32> to vector<16x8xf32>
    %260 = vector.extract_strided_slice %188 {offsets = [0, 88], sizes = [16, 8], strides = [1, 1]} : vector<16x96xf32> to vector<16x8xf32>
    %cst_109 = arith.constant dense<0.000000e+00> : vector<16x16xf32>
    %261 = tpu.matmul %258, %259, %cst_109 {dimension_numbers = #tpu.dot_dimension_numbers<[1], [1], [0], [0], [0, 0, 1, 0], [], []>} : vector<16x8xf32>, vector<16x8xf32>, vector<16x16xf32> -> vector<16x16xf32>
    %262 = arith.addf %261, %0 : vector<16x16xf32>
    %cst_110 = arith.constant dense<0xFF800000> : vector<16xf32>
    %263 = vector.multi_reduction <maximumf>, %262, %cst_110 [1] : vector<16x16xf32> to vector<16xf32>
    %264 = vector.shape_cast %263 : vector<16xf32> to vector<16x1xf32>
    %265 = vector.broadcast %264 : vector<16x1xf32> to vector<16x16xf32>
    %266 = arith.subf %262, %265 : vector<16x16xf32>
    %267 = math.exp %266 : vector<16x16xf32>
    %cst_111 = arith.constant dense<0.000000e+00> : vector<16xf32>
    %268 = vector.multi_reduction <add>, %267, %cst_111 [1] : vector<16x16xf32> to vector<16xf32>
    %269 = vector.shape_cast %268 : vector<16xf32> to vector<16x1xf32>
    %270 = tpu.reciprocal %269 {approx = true} : vector<16x1xf32> -> vector<16x1xf32>
    %271 = vector.broadcast %270 : vector<16x1xf32> to vector<16x16xf32>
    %272 = arith.mulf %267, %271 : vector<16x16xf32>
    %cst_112 = arith.constant dense<0.000000e+00> : vector<16x8xf32>
    %273 = tpu.matmul %272, %260, %cst_112 {dimension_numbers = #tpu.dot_dimension_numbers<[1], [0], [0], [1], [0, 0, 1, 1], [], []>} : vector<16x16xf32>, vector<16x8xf32>, vector<16x8xf32> -> vector<16x8xf32>
    %274 = arith.truncf %273 : vector<16x8xf32> to vector<16x8xbf16>
    %275 = vector.extract_strided_slice %190 {offsets = [24, 0], sizes = [8, 32], strides = [1, 1]} : vector<32x32xbf16> to vector<8x32xbf16>
    %cst_113 = arith.constant dense<0.000000e+00> : vector<16x32xf32>
    %276 = tpu.matmul %274, %275, %cst_113 {dimension_numbers = #tpu.dot_dimension_numbers<[1], [0], [0], [1], [0, 0, 1, 1], [], []>} : vector<16x8xbf16>, vector<8x32xbf16>, vector<16x32xf32> -> vector<16x32xf32>
    %277 = arith.addf %255, %276 : vector<16x32xf32>
    %278 = arith.addf %180, %277 : vector<16x32xf32>
    %c1_114 = arith.constant 1 : index
    %c0_115 = arith.constant 0 : index
    %c0_116 = arith.constant 0 : index
    %279 = vector.load %arg13[%c1_114, %c0_115, %c0_116] : memref<2x1x32xf32, #tpu.memory_space<vmem>>, vector<1x1x32xf32>
    %280 = vector.shape_cast %279 : vector<1x1x32xf32> to vector<1x32xf32>
    %281 = vector.broadcast %280 : vector<1x32xf32> to vector<16x32xf32>
    %282 = arith.addf %278, %281 : vector<16x32xf32>
    %c1_117 = arith.constant 1 : index
    %c0_118 = arith.constant 0 : index
    %c0_119 = arith.constant 0 : index
    %283 = vector.load %arg14[%c1_117, %c0_118, %c0_119] : memref<2x1x32xf32, #tpu.memory_space<vmem>>, vector<1x1x32xf32>
    %284 = vector.shape_cast %283 : vector<1x1x32xf32> to vector<1x32xf32>
    %c1_120 = arith.constant 1 : index
    %c0_121 = arith.constant 0 : index
    %c0_122 = arith.constant 0 : index
    %285 = vector.load %arg15[%c1_120, %c0_121, %c0_122] : memref<2x1x32xf32, #tpu.memory_space<vmem>>, vector<1x1x32xf32>
    %286 = vector.shape_cast %285 : vector<1x1x32xf32> to vector<1x32xf32>
    %cst_123 = arith.constant dense<0.000000e+00> : vector<16xf32>
    %287 = vector.multi_reduction <add>, %282, %cst_123 [1] : vector<16x32xf32> to vector<16xf32>
    %288 = vector.shape_cast %287 : vector<16xf32> to vector<16x1xf32>
    %cst_124 = arith.constant 3.200000e+01 : f32
    %289 = vector.broadcast %cst_124 : f32 to vector<16x1xf32>
    %290 = arith.divf %288, %289 : vector<16x1xf32>
    %291 = vector.broadcast %290 : vector<16x1xf32> to vector<16x32xf32>
    %292 = arith.subf %282, %291 : vector<16x32xf32>
    %293 = arith.mulf %292, %292 : vector<16x32xf32>
    %cst_125 = arith.constant dense<0.000000e+00> : vector<16xf32>
    %294 = vector.multi_reduction <add>, %293, %cst_125 [1] : vector<16x32xf32> to vector<16xf32>
    %295 = vector.shape_cast %294 : vector<16xf32> to vector<16x1xf32>
    %cst_126 = arith.constant 3.200000e+01 : f32
    %296 = vector.broadcast %cst_126 : f32 to vector<16x1xf32>
    %297 = arith.divf %295, %296 : vector<16x1xf32>
    %298 = vector.broadcast %290 : vector<16x1xf32> to vector<16x32xf32>
    %299 = arith.subf %282, %298 : vector<16x32xf32>
    %cst_127 = arith.constant 9.99999974E-6 : f32
    %300 = vector.broadcast %cst_127 : f32 to vector<16x1xf32>
    %301 = arith.addf %297, %300 : vector<16x1xf32>
    %302 = math.rsqrt %301 : vector<16x1xf32>
    %303 = vector.broadcast %302 : vector<16x1xf32> to vector<16x32xf32>
    %304 = arith.mulf %299, %303 : vector<16x32xf32>
    %305 = vector.broadcast %284 : vector<1x32xf32> to vector<16x32xf32>
    %306 = arith.mulf %304, %305 : vector<16x32xf32>
    %307 = vector.broadcast %286 : vector<1x32xf32> to vector<16x32xf32>
    %308 = arith.addf %306, %307 : vector<16x32xf32>
    %309 = arith.truncf %308 : vector<16x32xf32> to vector<16x32xbf16>
    %c1_128 = arith.constant 1 : index
    %c0_129 = arith.constant 0 : index
    %c0_130 = arith.constant 0 : index
    %310 = vector.load %arg16[%c1_128, %c0_129, %c0_130] : memref<2x32x2048xbf16, #tpu.memory_space<vmem>>, vector<1x32x2048xbf16>
    %311 = vector.shape_cast %310 : vector<1x32x2048xbf16> to vector<32x2048xbf16>
    %cst_131 = arith.constant dense<0.000000e+00> : vector<16x2048xf32>
    %312 = tpu.matmul %309, %311, %cst_131 {dimension_numbers = #tpu.dot_dimension_numbers<[1], [0], [0], [1], [0, 0, 1, 1], [], []>} : vector<16x32xbf16>, vector<32x2048xbf16>, vector<16x2048xf32> -> vector<16x2048xf32>
    %c1_132 = arith.constant 1 : index
    %c0_133 = arith.constant 0 : index
    %c0_134 = arith.constant 0 : index
    %313 = vector.load %arg17[%c1_132, %c0_133, %c0_134] : memref<2x1x2048xf32, #tpu.memory_space<vmem>>, vector<1x1x2048xf32>
    %314 = vector.shape_cast %313 : vector<1x1x2048xf32> to vector<1x2048xf32>
    %315 = vector.broadcast %314 : vector<1x2048xf32> to vector<16x2048xf32>
    %316 = arith.addf %312, %315 : vector<16x2048xf32>
    %cst_135 = arith.constant 0.000000e+00 : f32
    %317 = vector.broadcast %cst_135 : f32 to vector<16x2048xf32>
    %318 = arith.maximumf %316, %317 : vector<16x2048xf32>
    %319 = arith.truncf %318 : vector<16x2048xf32> to vector<16x2048xbf16>
    %c1_136 = arith.constant 1 : index
    %c0_137 = arith.constant 0 : index
    %c0_138 = arith.constant 0 : index
    %320 = vector.load %arg18[%c1_136, %c0_137, %c0_138] : memref<2x2048x32xbf16, #tpu.memory_space<vmem>>, vector<1x2048x32xbf16>
    %321 = vector.shape_cast %320 : vector<1x2048x32xbf16> to vector<2048x32xbf16>
    %cst_139 = arith.constant dense<0.000000e+00> : vector<16x32xf32>
    %322 = tpu.matmul %319, %321, %cst_139 {dimension_numbers = #tpu.dot_dimension_numbers<[1], [0], [0], [1], [0, 0, 1, 1], [], []>} : vector<16x2048xbf16>, vector<2048x32xbf16>, vector<16x32xf32> -> vector<16x32xf32>
    %c1_140 = arith.constant 1 : index
    %c0_141 = arith.constant 0 : index
    %c0_142 = arith.constant 0 : index
    %323 = vector.load %arg19[%c1_140, %c0_141, %c0_142] : memref<2x1x32xf32, #tpu.memory_space<vmem>>, vector<1x1x32xf32>
    %324 = vector.shape_cast %323 : vector<1x1x32xf32> to vector<1x32xf32>
    %325 = vector.broadcast %324 : vector<1x32xf32> to vector<16x32xf32>
    %326 = arith.addf %322, %325 : vector<16x32xf32>
    %327 = arith.addf %308, %326 : vector<16x32xf32>
    %c1_143 = arith.constant 1 : index
    %c0_144 = arith.constant 0 : index
    %c0_145 = arith.constant 0 : index
    %328 = vector.load %arg20[%c1_143, %c0_144, %c0_145] : memref<2x1x32xf32, #tpu.memory_space<vmem>>, vector<1x1x32xf32>
    %329 = vector.shape_cast %328 : vector<1x1x32xf32> to vector<1x32xf32>
    %c1_146 = arith.constant 1 : index
    %c0_147 = arith.constant 0 : index
    %c0_148 = arith.constant 0 : index
    %330 = vector.load %arg21[%c1_146, %c0_147, %c0_148] : memref<2x1x32xf32, #tpu.memory_space<vmem>>, vector<1x1x32xf32>
    %331 = vector.shape_cast %330 : vector<1x1x32xf32> to vector<1x32xf32>
    %cst_149 = arith.constant dense<0.000000e+00> : vector<16xf32>
    %332 = vector.multi_reduction <add>, %327, %cst_149 [1] : vector<16x32xf32> to vector<16xf32>
    %333 = vector.shape_cast %332 : vector<16xf32> to vector<16x1xf32>
    %cst_150 = arith.constant 3.200000e+01 : f32
    %334 = vector.broadcast %cst_150 : f32 to vector<16x1xf32>
    %335 = arith.divf %333, %334 : vector<16x1xf32>
    %336 = vector.broadcast %335 : vector<16x1xf32> to vector<16x32xf32>
    %337 = arith.subf %327, %336 : vector<16x32xf32>
    %338 = arith.mulf %337, %337 : vector<16x32xf32>
    %cst_151 = arith.constant dense<0.000000e+00> : vector<16xf32>
    %339 = vector.multi_reduction <add>, %338, %cst_151 [1] : vector<16x32xf32> to vector<16xf32>
    %340 = vector.shape_cast %339 : vector<16xf32> to vector<16x1xf32>
    %cst_152 = arith.constant 3.200000e+01 : f32
    %341 = vector.broadcast %cst_152 : f32 to vector<16x1xf32>
    %342 = arith.divf %340, %341 : vector<16x1xf32>
    %343 = vector.broadcast %335 : vector<16x1xf32> to vector<16x32xf32>
    %344 = arith.subf %327, %343 : vector<16x32xf32>
    %cst_153 = arith.constant 9.99999974E-6 : f32
    %345 = vector.broadcast %cst_153 : f32 to vector<16x1xf32>
    %346 = arith.addf %342, %345 : vector<16x1xf32>
    %347 = math.rsqrt %346 : vector<16x1xf32>
    %348 = vector.broadcast %347 : vector<16x1xf32> to vector<16x32xf32>
    %349 = arith.mulf %344, %348 : vector<16x32xf32>
    %350 = vector.broadcast %329 : vector<1x32xf32> to vector<16x32xf32>
    %351 = arith.mulf %349, %350 : vector<16x32xf32>
    %352 = vector.broadcast %331 : vector<1x32xf32> to vector<16x32xf32>
    %353 = arith.addf %351, %352 : vector<16x32xf32>
    %354 = arith.mulf %353, %353 : vector<16x32xf32>
    %cst_154 = arith.constant dense<0.000000e+00> : vector<16xf32>
    %355 = vector.multi_reduction <add>, %354, %cst_154 [1] : vector<16x32xf32> to vector<16xf32>
    %356 = vector.shape_cast %355 : vector<16xf32> to vector<16x1xf32>
    %cst_155 = arith.constant 1.000000e-24 : f32
    %357 = vector.broadcast %cst_155 : f32 to vector<16x1xf32>
    %358 = arith.maximumf %356, %357 : vector<16x1xf32>
    %359 = math.rsqrt %358 : vector<16x1xf32>
    %360 = vector.broadcast %359 : vector<16x1xf32> to vector<16x32xf32>
    %361 = arith.mulf %353, %360 : vector<16x32xf32>
    %c0_156 = arith.constant 0 : index
    %c0_157 = arith.constant 0 : index
    %362 = vector.load %arg2[%c0_156, %c0_157] : memref<2x16xf32, #tpu.memory_space<vmem>>, vector<2x16xf32>
    %cst_158 = arith.constant dense<0.000000e+00> : vector<2x32xf32>
    %363 = tpu.matmul %362, %353, %cst_158 {dimension_numbers = #tpu.dot_dimension_numbers<[1], [0], [0], [1], [0, 0, 1, 1], [], []>} : vector<2x16xf32>, vector<16x32xf32>, vector<2x32xf32> -> vector<2x32xf32>
    %364 = arith.mulf %363, %363 : vector<2x32xf32>
    %cst_159 = arith.constant dense<0.000000e+00> : vector<2xf32>
    %365 = vector.multi_reduction <add>, %364, %cst_159 [1] : vector<2x32xf32> to vector<2xf32>
    %366 = vector.shape_cast %365 : vector<2xf32> to vector<2x1xf32>
    %cst_160 = arith.constant 1.000000e-24 : f32
    %367 = vector.broadcast %cst_160 : f32 to vector<2x1xf32>
    %368 = arith.maximumf %366, %367 : vector<2x1xf32>
    %369 = math.rsqrt %368 : vector<2x1xf32>
    %370 = vector.broadcast %369 : vector<2x1xf32> to vector<2x32xf32>
    %371 = arith.mulf %363, %370 : vector<2x32xf32>
    %c0_161 = arith.constant 0 : index
    %c0_162 = arith.constant 0 : index
    %372 = vector.load %arg22[%c0_161, %c0_162] : memref<16x32xf32, #tpu.memory_space<vmem>>, vector<16x32xf32>
    tpu.vector_store %arg22[%c0_161, %c0_162], %361 {strides = array<i32>} : memref<16x32xf32, #tpu.memory_space<vmem>>, vector<16x32xf32>,
    %c0_163 = arith.constant 0 : index
    %c0_164 = arith.constant 0 : index
    %373 = vector.load %arg23[%c0_163, %c0_164] : memref<2x32xf32, #tpu.memory_space<vmem>>, vector<2x32xf32>
    tpu.vector_store %arg23[%c0_163, %c0_164], %371 {strides = array<i32>} : memref<2x32xf32, #tpu.memory_space<vmem>>, vector<2x32xf32>,
    %c0_165 = arith.constant 0 : index
    %c0_166 = arith.constant 0 : index
    %374 = vector.load %arg1[%c0_165, %c0_166] : memref<24x24xf32, #tpu.memory_space<vmem>>, vector<24x24xf32>
    %c0_167 = arith.constant 0 : index
    %c0_168 = arith.constant 0 : index
    %375 = vector.load %arg5[%c0_167, %c0_168] : memref<24x64xf32, #tpu.memory_space<vmem>>, vector<24x64xf32>
    %376 = arith.truncf %375 : vector<24x64xf32> to vector<24x64xbf16>
    %c0_169 = arith.constant 0 : index
    %c0_170 = arith.constant 0 : index
    %377 = vector.load %arg8[%c0_169, %c0_170] : memref<64x32xbf16, #tpu.memory_space<vmem>>, vector<64x32xbf16>
    %cst_171 = arith.constant dense<0.000000e+00> : vector<24x32xf32>
    %378 = tpu.matmul %376, %377, %cst_171 {dimension_numbers = #tpu.dot_dimension_numbers<[1], [0], [0], [1], [0, 0, 1, 1], [], []>} : vector<24x64xbf16>, vector<64x32xbf16>, vector<24x32xf32> -> vector<24x32xf32>
    %c0_172 = arith.constant 0 : index
    %c0_173 = arith.constant 0 : index
    %379 = vector.load %arg9[%c0_172, %c0_173] : memref<1x32xf32, #tpu.memory_space<vmem>>, vector<1x32xf32>
    %380 = vector.broadcast %379 : vector<1x32xf32> to vector<24x32xf32>
    %381 = arith.addf %378, %380 : vector<24x32xf32>
    %382 = arith.truncf %381 : vector<24x32xf32> to vector<24x32xbf16>
    %c0_174 = arith.constant 0 : index
    %c0_175 = arith.constant 0 : index
    %c0_176 = arith.constant 0 : index
    %383 = vector.load %arg10[%c0_174, %c0_175, %c0_176] : memref<2x32x96xbf16, #tpu.memory_space<vmem>>, vector<1x32x96xbf16>
    %384 = vector.shape_cast %383 : vector<1x32x96xbf16> to vector<32x96xbf16>
    %cst_177 = arith.constant dense<0.000000e+00> : vector<24x96xf32>
    %385 = tpu.matmul %382, %384, %cst_177 {dimension_numbers = #tpu.dot_dimension_numbers<[1], [0], [0], [1], [0, 0, 1, 1], [], []>} : vector<24x32xbf16>, vector<32x96xbf16>, vector<24x96xf32> -> vector<24x96xf32>
    %c0_178 = arith.constant 0 : index
    %c0_179 = arith.constant 0 : index
    %c0_180 = arith.constant 0 : index
    %386 = vector.load %arg11[%c0_178, %c0_179, %c0_180] : memref<2x1x96xf32, #tpu.memory_space<vmem>>, vector<1x1x96xf32>
    %387 = vector.shape_cast %386 : vector<1x1x96xf32> to vector<1x96xf32>
    %388 = vector.broadcast %387 : vector<1x96xf32> to vector<24x96xf32>
    %389 = arith.addf %385, %388 : vector<24x96xf32>
    %c0_181 = arith.constant 0 : index
    %c0_182 = arith.constant 0 : index
    %c0_183 = arith.constant 0 : index
    %390 = vector.load %arg12[%c0_181, %c0_182, %c0_183] : memref<2x32x32xbf16, #tpu.memory_space<vmem>>, vector<1x32x32xbf16>
    %391 = vector.shape_cast %390 : vector<1x32x32xbf16> to vector<32x32xbf16>
    %392 = vector.extract_strided_slice %389 {offsets = [0, 0], sizes = [24, 8], strides = [1, 1]} : vector<24x96xf32> to vector<24x8xf32>
    %cst_184 = arith.constant 0.353553385 : f32
    %393 = vector.broadcast %cst_184 : f32 to vector<24x8xf32>
    %394 = arith.mulf %392, %393 : vector<24x8xf32>
    %395 = vector.extract_strided_slice %389 {offsets = [0, 32], sizes = [24, 8], strides = [1, 1]} : vector<24x96xf32> to vector<24x8xf32>
    %396 = vector.extract_strided_slice %389 {offsets = [0, 64], sizes = [24, 8], strides = [1, 1]} : vector<24x96xf32> to vector<24x8xf32>
    %cst_185 = arith.constant dense<0.000000e+00> : vector<24x24xf32>
    %397 = tpu.matmul %394, %395, %cst_185 {dimension_numbers = #tpu.dot_dimension_numbers<[1], [1], [0], [0], [0, 0, 1, 0], [], []>} : vector<24x8xf32>, vector<24x8xf32>, vector<24x24xf32> -> vector<24x24xf32>
    %398 = arith.addf %397, %374 : vector<24x24xf32>
    %cst_186 = arith.constant dense<0xFF800000> : vector<24xf32>
    %399 = vector.multi_reduction <maximumf>, %398, %cst_186 [1] : vector<24x24xf32> to vector<24xf32>
    %400 = vector.shape_cast %399 : vector<24xf32> to vector<24x1xf32>
    %401 = vector.broadcast %400 : vector<24x1xf32> to vector<24x24xf32>
    %402 = arith.subf %398, %401 : vector<24x24xf32>
    %403 = math.exp %402 : vector<24x24xf32>
    %cst_187 = arith.constant dense<0.000000e+00> : vector<24xf32>
    %404 = vector.multi_reduction <add>, %403, %cst_187 [1] : vector<24x24xf32> to vector<24xf32>
    %405 = vector.shape_cast %404 : vector<24xf32> to vector<24x1xf32>
    %406 = tpu.reciprocal %405 {approx = true} : vector<24x1xf32> -> vector<24x1xf32>
    %407 = vector.broadcast %406 : vector<24x1xf32> to vector<24x24xf32>
    %408 = arith.mulf %403, %407 : vector<24x24xf32>
    %cst_188 = arith.constant dense<0.000000e+00> : vector<24x8xf32>
    %409 = tpu.matmul %408, %396, %cst_188 {dimension_numbers = #tpu.dot_dimension_numbers<[1], [0], [0], [1], [0, 0, 1, 1], [], []>} : vector<24x24xf32>, vector<24x8xf32>, vector<24x8xf32> -> vector<24x8xf32>
    %410 = arith.truncf %409 : vector<24x8xf32> to vector<24x8xbf16>
    %411 = vector.extract_strided_slice %391 {offsets = [0, 0], sizes = [8, 32], strides = [1, 1]} : vector<32x32xbf16> to vector<8x32xbf16>
    %cst_189 = arith.constant dense<0.000000e+00> : vector<24x32xf32>
    %412 = tpu.matmul %410, %411, %cst_189 {dimension_numbers = #tpu.dot_dimension_numbers<[1], [0], [0], [1], [0, 0, 1, 1], [], []>} : vector<24x8xbf16>, vector<8x32xbf16>, vector<24x32xf32> -> vector<24x32xf32>
    %413 = vector.extract_strided_slice %389 {offsets = [0, 8], sizes = [24, 8], strides = [1, 1]} : vector<24x96xf32> to vector<24x8xf32>
    %cst_190 = arith.constant 0.353553385 : f32
    %414 = vector.broadcast %cst_190 : f32 to vector<24x8xf32>
    %415 = arith.mulf %413, %414 : vector<24x8xf32>
    %416 = vector.extract_strided_slice %389 {offsets = [0, 40], sizes = [24, 8], strides = [1, 1]} : vector<24x96xf32> to vector<24x8xf32>
    %417 = vector.extract_strided_slice %389 {offsets = [0, 72], sizes = [24, 8], strides = [1, 1]} : vector<24x96xf32> to vector<24x8xf32>
    %cst_191 = arith.constant dense<0.000000e+00> : vector<24x24xf32>
    %418 = tpu.matmul %415, %416, %cst_191 {dimension_numbers = #tpu.dot_dimension_numbers<[1], [1], [0], [0], [0, 0, 1, 0], [], []>} : vector<24x8xf32>, vector<24x8xf32>, vector<24x24xf32> -> vector<24x24xf32>
    %419 = arith.addf %418, %374 : vector<24x24xf32>
    %cst_192 = arith.constant dense<0xFF800000> : vector<24xf32>
    %420 = vector.multi_reduction <maximumf>, %419, %cst_192 [1] : vector<24x24xf32> to vector<24xf32>
    %421 = vector.shape_cast %420 : vector<24xf32> to vector<24x1xf32>
    %422 = vector.broadcast %421 : vector<24x1xf32> to vector<24x24xf32>
    %423 = arith.subf %419, %422 : vector<24x24xf32>
    %424 = math.exp %423 : vector<24x24xf32>
    %cst_193 = arith.constant dense<0.000000e+00> : vector<24xf32>
    %425 = vector.multi_reduction <add>, %424, %cst_193 [1] : vector<24x24xf32> to vector<24xf32>
    %426 = vector.shape_cast %425 : vector<24xf32> to vector<24x1xf32>
    %427 = tpu.reciprocal %426 {approx = true} : vector<24x1xf32> -> vector<24x1xf32>
    %428 = vector.broadcast %427 : vector<24x1xf32> to vector<24x24xf32>
    %429 = arith.mulf %424, %428 : vector<24x24xf32>
    %cst_194 = arith.constant dense<0.000000e+00> : vector<24x8xf32>
    %430 = tpu.matmul %429, %417, %cst_194 {dimension_numbers = #tpu.dot_dimension_numbers<[1], [0], [0], [1], [0, 0, 1, 1], [], []>} : vector<24x24xf32>, vector<24x8xf32>, vector<24x8xf32> -> vector<24x8xf32>
    %431 = arith.truncf %430 : vector<24x8xf32> to vector<24x8xbf16>
    %432 = vector.extract_strided_slice %391 {offsets = [8, 0], sizes = [8, 32], strides = [1, 1]} : vector<32x32xbf16> to vector<8x32xbf16>
    %cst_195 = arith.constant dense<0.000000e+00> : vector<24x32xf32>
    %433 = tpu.matmul %431, %432, %cst_195 {dimension_numbers = #tpu.dot_dimension_numbers<[1], [0], [0], [1], [0, 0, 1, 1], [], []>} : vector<24x8xbf16>, vector<8x32xbf16>, vector<24x32xf32> -> vector<24x32xf32>
    %434 = arith.addf %412, %433 : vector<24x32xf32>
    %435 = vector.extract_strided_slice %389 {offsets = [0, 16], sizes = [24, 8], strides = [1, 1]} : vector<24x96xf32> to vector<24x8xf32>
    %cst_196 = arith.constant 0.353553385 : f32
    %436 = vector.broadcast %cst_196 : f32 to vector<24x8xf32>
    %437 = arith.mulf %435, %436 : vector<24x8xf32>
    %438 = vector.extract_strided_slice %389 {offsets = [0, 48], sizes = [24, 8], strides = [1, 1]} : vector<24x96xf32> to vector<24x8xf32>
    %439 = vector.extract_strided_slice %389 {offsets = [0, 80], sizes = [24, 8], strides = [1, 1]} : vector<24x96xf32> to vector<24x8xf32>
    %cst_197 = arith.constant dense<0.000000e+00> : vector<24x24xf32>
    %440 = tpu.matmul %437, %438, %cst_197 {dimension_numbers = #tpu.dot_dimension_numbers<[1], [1], [0], [0], [0, 0, 1, 0], [], []>} : vector<24x8xf32>, vector<24x8xf32>, vector<24x24xf32> -> vector<24x24xf32>
    %441 = arith.addf %440, %374 : vector<24x24xf32>
    %cst_198 = arith.constant dense<0xFF800000> : vector<24xf32>
    %442 = vector.multi_reduction <maximumf>, %441, %cst_198 [1] : vector<24x24xf32> to vector<24xf32>
    %443 = vector.shape_cast %442 : vector<24xf32> to vector<24x1xf32>
    %444 = vector.broadcast %443 : vector<24x1xf32> to vector<24x24xf32>
    %445 = arith.subf %441, %444 : vector<24x24xf32>
    %446 = math.exp %445 : vector<24x24xf32>
    %cst_199 = arith.constant dense<0.000000e+00> : vector<24xf32>
    %447 = vector.multi_reduction <add>, %446, %cst_199 [1] : vector<24x24xf32> to vector<24xf32>
    %448 = vector.shape_cast %447 : vector<24xf32> to vector<24x1xf32>
    %449 = tpu.reciprocal %448 {approx = true} : vector<24x1xf32> -> vector<24x1xf32>
    %450 = vector.broadcast %449 : vector<24x1xf32> to vector<24x24xf32>
    %451 = arith.mulf %446, %450 : vector<24x24xf32>
    %cst_200 = arith.constant dense<0.000000e+00> : vector<24x8xf32>
    %452 = tpu.matmul %451, %439, %cst_200 {dimension_numbers = #tpu.dot_dimension_numbers<[1], [0], [0], [1], [0, 0, 1, 1], [], []>} : vector<24x24xf32>, vector<24x8xf32>, vector<24x8xf32> -> vector<24x8xf32>
    %453 = arith.truncf %452 : vector<24x8xf32> to vector<24x8xbf16>
    %454 = vector.extract_strided_slice %391 {offsets = [16, 0], sizes = [8, 32], strides = [1, 1]} : vector<32x32xbf16> to vector<8x32xbf16>
    %cst_201 = arith.constant dense<0.000000e+00> : vector<24x32xf32>
    %455 = tpu.matmul %453, %454, %cst_201 {dimension_numbers = #tpu.dot_dimension_numbers<[1], [0], [0], [1], [0, 0, 1, 1], [], []>} : vector<24x8xbf16>, vector<8x32xbf16>, vector<24x32xf32> -> vector<24x32xf32>
    %456 = arith.addf %434, %455 : vector<24x32xf32>
    %457 = vector.extract_strided_slice %389 {offsets = [0, 24], sizes = [24, 8], strides = [1, 1]} : vector<24x96xf32> to vector<24x8xf32>
    %cst_202 = arith.constant 0.353553385 : f32
    %458 = vector.broadcast %cst_202 : f32 to vector<24x8xf32>
    %459 = arith.mulf %457, %458 : vector<24x8xf32>
    %460 = vector.extract_strided_slice %389 {offsets = [0, 56], sizes = [24, 8], strides = [1, 1]} : vector<24x96xf32> to vector<24x8xf32>
    %461 = vector.extract_strided_slice %389 {offsets = [0, 88], sizes = [24, 8], strides = [1, 1]} : vector<24x96xf32> to vector<24x8xf32>
    %cst_203 = arith.constant dense<0.000000e+00> : vector<24x24xf32>
    %462 = tpu.matmul %459, %460, %cst_203 {dimension_numbers = #tpu.dot_dimension_numbers<[1], [1], [0], [0], [0, 0, 1, 0], [], []>} : vector<24x8xf32>, vector<24x8xf32>, vector<24x24xf32> -> vector<24x24xf32>
    %463 = arith.addf %462, %374 : vector<24x24xf32>
    %cst_204 = arith.constant dense<0xFF800000> : vector<24xf32>
    %464 = vector.multi_reduction <maximumf>, %463, %cst_204 [1] : vector<24x24xf32> to vector<24xf32>
    %465 = vector.shape_cast %464 : vector<24xf32> to vector<24x1xf32>
    %466 = vector.broadcast %465 : vector<24x1xf32> to vector<24x24xf32>
    %467 = arith.subf %463, %466 : vector<24x24xf32>
    %468 = math.exp %467 : vector<24x24xf32>
    %cst_205 = arith.constant dense<0.000000e+00> : vector<24xf32>
    %469 = vector.multi_reduction <add>, %468, %cst_205 [1] : vector<24x24xf32> to vector<24xf32>
    %470 = vector.shape_cast %469 : vector<24xf32> to vector<24x1xf32>
    %471 = tpu.reciprocal %470 {approx = true} : vector<24x1xf32> -> vector<24x1xf32>
    %472 = vector.broadcast %471 : vector<24x1xf32> to vector<24x24xf32>
    %473 = arith.mulf %468, %472 : vector<24x24xf32>
    %cst_206 = arith.constant dense<0.000000e+00> : vector<24x8xf32>
    %474 = tpu.matmul %473, %461, %cst_206 {dimension_numbers = #tpu.dot_dimension_numbers<[1], [0], [0], [1], [0, 0, 1, 1], [], []>} : vector<24x24xf32>, vector<24x8xf32>, vector<24x8xf32> -> vector<24x8xf32>
    %475 = arith.truncf %474 : vector<24x8xf32> to vector<24x8xbf16>
    %476 = vector.extract_strided_slice %391 {offsets = [24, 0], sizes = [8, 32], strides = [1, 1]} : vector<32x32xbf16> to vector<8x32xbf16>
    %cst_207 = arith.constant dense<0.000000e+00> : vector<24x32xf32>
    %477 = tpu.matmul %475, %476, %cst_207 {dimension_numbers = #tpu.dot_dimension_numbers<[1], [0], [0], [1], [0, 0, 1, 1], [], []>} : vector<24x8xbf16>, vector<8x32xbf16>, vector<24x32xf32> -> vector<24x32xf32>
    %478 = arith.addf %456, %477 : vector<24x32xf32>
    %479 = arith.addf %381, %478 : vector<24x32xf32>
    %c0_208 = arith.constant 0 : index
    %c0_209 = arith.constant 0 : index
    %c0_210 = arith.constant 0 : index
    %480 = vector.load %arg13[%c0_208, %c0_209, %c0_210] : memref<2x1x32xf32, #tpu.memory_space<vmem>>, vector<1x1x32xf32>
    %481 = vector.shape_cast %480 : vector<1x1x32xf32> to vector<1x32xf32>
    %482 = vector.broadcast %481 : vector<1x32xf32> to vector<24x32xf32>
    %483 = arith.addf %479, %482 : vector<24x32xf32>
    %c0_211 = arith.constant 0 : index
    %c0_212 = arith.constant 0 : index
    %c0_213 = arith.constant 0 : index
    %484 = vector.load %arg14[%c0_211, %c0_212, %c0_213] : memref<2x1x32xf32, #tpu.memory_space<vmem>>, vector<1x1x32xf32>
    %485 = vector.shape_cast %484 : vector<1x1x32xf32> to vector<1x32xf32>
    %c0_214 = arith.constant 0 : index
    %c0_215 = arith.constant 0 : index
    %c0_216 = arith.constant 0 : index
    %486 = vector.load %arg15[%c0_214, %c0_215, %c0_216] : memref<2x1x32xf32, #tpu.memory_space<vmem>>, vector<1x1x32xf32>
    %487 = vector.shape_cast %486 : vector<1x1x32xf32> to vector<1x32xf32>
    %cst_217 = arith.constant dense<0.000000e+00> : vector<24xf32>
    %488 = vector.multi_reduction <add>, %483, %cst_217 [1] : vector<24x32xf32> to vector<24xf32>
    %489 = vector.shape_cast %488 : vector<24xf32> to vector<24x1xf32>
    %cst_218 = arith.constant 3.200000e+01 : f32
    %490 = vector.broadcast %cst_218 : f32 to vector<24x1xf32>
    %491 = arith.divf %489, %490 : vector<24x1xf32>
    %492 = vector.broadcast %491 : vector<24x1xf32> to vector<24x32xf32>
    %493 = arith.subf %483, %492 : vector<24x32xf32>
    %494 = arith.mulf %493, %493 : vector<24x32xf32>
    %cst_219 = arith.constant dense<0.000000e+00> : vector<24xf32>
    %495 = vector.multi_reduction <add>, %494, %cst_219 [1] : vector<24x32xf32> to vector<24xf32>
    %496 = vector.shape_cast %495 : vector<24xf32> to vector<24x1xf32>
    %cst_220 = arith.constant 3.200000e+01 : f32
    %497 = vector.broadcast %cst_220 : f32 to vector<24x1xf32>
    %498 = arith.divf %496, %497 : vector<24x1xf32>
    %499 = vector.broadcast %491 : vector<24x1xf32> to vector<24x32xf32>
    %500 = arith.subf %483, %499 : vector<24x32xf32>
    %cst_221 = arith.constant 9.99999974E-6 : f32
    %501 = vector.broadcast %cst_221 : f32 to vector<24x1xf32>
    %502 = arith.addf %498, %501 : vector<24x1xf32>
    %503 = math.rsqrt %502 : vector<24x1xf32>
    %504 = vector.broadcast %503 : vector<24x1xf32> to vector<24x32xf32>
    %505 = arith.mulf %500, %504 : vector<24x32xf32>
    %506 = vector.broadcast %485 : vector<1x32xf32> to vector<24x32xf32>
    %507 = arith.mulf %505, %506 : vector<24x32xf32>
    %508 = vector.broadcast %487 : vector<1x32xf32> to vector<24x32xf32>
    %509 = arith.addf %507, %508 : vector<24x32xf32>
    %510 = arith.truncf %509 : vector<24x32xf32> to vector<24x32xbf16>
    %c0_222 = arith.constant 0 : index
    %c0_223 = arith.constant 0 : index
    %c0_224 = arith.constant 0 : index
    %511 = vector.load %arg16[%c0_222, %c0_223, %c0_224] : memref<2x32x2048xbf16, #tpu.memory_space<vmem>>, vector<1x32x2048xbf16>
    %512 = vector.shape_cast %511 : vector<1x32x2048xbf16> to vector<32x2048xbf16>
    %cst_225 = arith.constant dense<0.000000e+00> : vector<24x2048xf32>
    %513 = tpu.matmul %510, %512, %cst_225 {dimension_numbers = #tpu.dot_dimension_numbers<[1], [0], [0], [1], [0, 0, 1, 1], [], []>} : vector<24x32xbf16>, vector<32x2048xbf16>, vector<24x2048xf32> -> vector<24x2048xf32>
    %c0_226 = arith.constant 0 : index
    %c0_227 = arith.constant 0 : index
    %c0_228 = arith.constant 0 : index
    %514 = vector.load %arg17[%c0_226, %c0_227, %c0_228] : memref<2x1x2048xf32, #tpu.memory_space<vmem>>, vector<1x1x2048xf32>
    %515 = vector.shape_cast %514 : vector<1x1x2048xf32> to vector<1x2048xf32>
    %516 = vector.broadcast %515 : vector<1x2048xf32> to vector<24x2048xf32>
    %517 = arith.addf %513, %516 : vector<24x2048xf32>
    %cst_229 = arith.constant 0.000000e+00 : f32
    %518 = vector.broadcast %cst_229 : f32 to vector<24x2048xf32>
    %519 = arith.maximumf %517, %518 : vector<24x2048xf32>
    %520 = arith.truncf %519 : vector<24x2048xf32> to vector<24x2048xbf16>
    %c0_230 = arith.constant 0 : index
    %c0_231 = arith.constant 0 : index
    %c0_232 = arith.constant 0 : index
    %521 = vector.load %arg18[%c0_230, %c0_231, %c0_232] : memref<2x2048x32xbf16, #tpu.memory_space<vmem>>, vector<1x2048x32xbf16>
    %522 = vector.shape_cast %521 : vector<1x2048x32xbf16> to vector<2048x32xbf16>
    %cst_233 = arith.constant dense<0.000000e+00> : vector<24x32xf32>
    %523 = tpu.matmul %520, %522, %cst_233 {dimension_numbers = #tpu.dot_dimension_numbers<[1], [0], [0], [1], [0, 0, 1, 1], [], []>} : vector<24x2048xbf16>, vector<2048x32xbf16>, vector<24x32xf32> -> vector<24x32xf32>
    %c0_234 = arith.constant 0 : index
    %c0_235 = arith.constant 0 : index
    %c0_236 = arith.constant 0 : index
    %524 = vector.load %arg19[%c0_234, %c0_235, %c0_236] : memref<2x1x32xf32, #tpu.memory_space<vmem>>, vector<1x1x32xf32>
    %525 = vector.shape_cast %524 : vector<1x1x32xf32> to vector<1x32xf32>
    %526 = vector.broadcast %525 : vector<1x32xf32> to vector<24x32xf32>
    %527 = arith.addf %523, %526 : vector<24x32xf32>
    %528 = arith.addf %509, %527 : vector<24x32xf32>
    %c0_237 = arith.constant 0 : index
    %c0_238 = arith.constant 0 : index
    %c0_239 = arith.constant 0 : index
    %529 = vector.load %arg20[%c0_237, %c0_238, %c0_239] : memref<2x1x32xf32, #tpu.memory_space<vmem>>, vector<1x1x32xf32>
    %530 = vector.shape_cast %529 : vector<1x1x32xf32> to vector<1x32xf32>
    %c0_240 = arith.constant 0 : index
    %c0_241 = arith.constant 0 : index
    %c0_242 = arith.constant 0 : index
    %531 = vector.load %arg21[%c0_240, %c0_241, %c0_242] : memref<2x1x32xf32, #tpu.memory_space<vmem>>, vector<1x1x32xf32>
    %532 = vector.shape_cast %531 : vector<1x1x32xf32> to vector<1x32xf32>
    %cst_243 = arith.constant dense<0.000000e+00> : vector<24xf32>
    %533 = vector.multi_reduction <add>, %528, %cst_243 [1] : vector<24x32xf32> to vector<24xf32>
    %534 = vector.shape_cast %533 : vector<24xf32> to vector<24x1xf32>
    %cst_244 = arith.constant 3.200000e+01 : f32
    %535 = vector.broadcast %cst_244 : f32 to vector<24x1xf32>
    %536 = arith.divf %534, %535 : vector<24x1xf32>
    %537 = vector.broadcast %536 : vector<24x1xf32> to vector<24x32xf32>
    %538 = arith.subf %528, %537 : vector<24x32xf32>
    %539 = arith.mulf %538, %538 : vector<24x32xf32>
    %cst_245 = arith.constant dense<0.000000e+00> : vector<24xf32>
    %540 = vector.multi_reduction <add>, %539, %cst_245 [1] : vector<24x32xf32> to vector<24xf32>
    %541 = vector.shape_cast %540 : vector<24xf32> to vector<24x1xf32>
    %cst_246 = arith.constant 3.200000e+01 : f32
    %542 = vector.broadcast %cst_246 : f32 to vector<24x1xf32>
    %543 = arith.divf %541, %542 : vector<24x1xf32>
    %544 = vector.broadcast %536 : vector<24x1xf32> to vector<24x32xf32>
    %545 = arith.subf %528, %544 : vector<24x32xf32>
    %cst_247 = arith.constant 9.99999974E-6 : f32
    %546 = vector.broadcast %cst_247 : f32 to vector<24x1xf32>
    %547 = arith.addf %543, %546 : vector<24x1xf32>
    %548 = math.rsqrt %547 : vector<24x1xf32>
    %549 = vector.broadcast %548 : vector<24x1xf32> to vector<24x32xf32>
    %550 = arith.mulf %545, %549 : vector<24x32xf32>
    %551 = vector.broadcast %530 : vector<1x32xf32> to vector<24x32xf32>
    %552 = arith.mulf %550, %551 : vector<24x32xf32>
    %553 = vector.broadcast %532 : vector<1x32xf32> to vector<24x32xf32>
    %554 = arith.addf %552, %553 : vector<24x32xf32>
    %555 = arith.truncf %554 : vector<24x32xf32> to vector<24x32xbf16>
    %c1_248 = arith.constant 1 : index
    %c0_249 = arith.constant 0 : index
    %c0_250 = arith.constant 0 : index
    %556 = vector.load %arg10[%c1_248, %c0_249, %c0_250] : memref<2x32x96xbf16, #tpu.memory_space<vmem>>, vector<1x32x96xbf16>
    %557 = vector.shape_cast %556 : vector<1x32x96xbf16> to vector<32x96xbf16>
    %cst_251 = arith.constant dense<0.000000e+00> : vector<24x96xf32>
    %558 = tpu.matmul %555, %557, %cst_251 {dimension_numbers = #tpu.dot_dimension_numbers<[1], [0], [0], [1], [0, 0, 1, 1], [], []>} : vector<24x32xbf16>, vector<32x96xbf16>, vector<24x96xf32> -> vector<24x96xf32>
    %c1_252 = arith.constant 1 : index
    %c0_253 = arith.constant 0 : index
    %c0_254 = arith.constant 0 : index
    %559 = vector.load %arg11[%c1_252, %c0_253, %c0_254] : memref<2x1x96xf32, #tpu.memory_space<vmem>>, vector<1x1x96xf32>
    %560 = vector.shape_cast %559 : vector<1x1x96xf32> to vector<1x96xf32>
    %561 = vector.broadcast %560 : vector<1x96xf32> to vector<24x96xf32>
    %562 = arith.addf %558, %561 : vector<24x96xf32>
    %c1_255 = arith.constant 1 : index
    %c0_256 = arith.constant 0 : index
    %c0_257 = arith.constant 0 : index
    %563 = vector.load %arg12[%c1_255, %c0_256, %c0_257] : memref<2x32x32xbf16, #tpu.memory_space<vmem>>, vector<1x32x32xbf16>
    %564 = vector.shape_cast %563 : vector<1x32x32xbf16> to vector<32x32xbf16>
    %565 = vector.extract_strided_slice %562 {offsets = [0, 0], sizes = [24, 8], strides = [1, 1]} : vector<24x96xf32> to vector<24x8xf32>
    %cst_258 = arith.constant 0.353553385 : f32
    %566 = vector.broadcast %cst_258 : f32 to vector<24x8xf32>
    %567 = arith.mulf %565, %566 : vector<24x8xf32>
    %568 = vector.extract_strided_slice %562 {offsets = [0, 32], sizes = [24, 8], strides = [1, 1]} : vector<24x96xf32> to vector<24x8xf32>
    %569 = vector.extract_strided_slice %562 {offsets = [0, 64], sizes = [24, 8], strides = [1, 1]} : vector<24x96xf32> to vector<24x8xf32>
    %cst_259 = arith.constant dense<0.000000e+00> : vector<24x24xf32>
    %570 = tpu.matmul %567, %568, %cst_259 {dimension_numbers = #tpu.dot_dimension_numbers<[1], [1], [0], [0], [0, 0, 1, 0], [], []>} : vector<24x8xf32>, vector<24x8xf32>, vector<24x24xf32> -> vector<24x24xf32>
    %571 = arith.addf %570, %374 : vector<24x24xf32>
    %cst_260 = arith.constant dense<0xFF800000> : vector<24xf32>
    %572 = vector.multi_reduction <maximumf>, %571, %cst_260 [1] : vector<24x24xf32> to vector<24xf32>
    %573 = vector.shape_cast %572 : vector<24xf32> to vector<24x1xf32>
    %574 = vector.broadcast %573 : vector<24x1xf32> to vector<24x24xf32>
    %575 = arith.subf %571, %574 : vector<24x24xf32>
    %576 = math.exp %575 : vector<24x24xf32>
    %cst_261 = arith.constant dense<0.000000e+00> : vector<24xf32>
    %577 = vector.multi_reduction <add>, %576, %cst_261 [1] : vector<24x24xf32> to vector<24xf32>
    %578 = vector.shape_cast %577 : vector<24xf32> to vector<24x1xf32>
    %579 = tpu.reciprocal %578 {approx = true} : vector<24x1xf32> -> vector<24x1xf32>
    %580 = vector.broadcast %579 : vector<24x1xf32> to vector<24x24xf32>
    %581 = arith.mulf %576, %580 : vector<24x24xf32>
    %cst_262 = arith.constant dense<0.000000e+00> : vector<24x8xf32>
    %582 = tpu.matmul %581, %569, %cst_262 {dimension_numbers = #tpu.dot_dimension_numbers<[1], [0], [0], [1], [0, 0, 1, 1], [], []>} : vector<24x24xf32>, vector<24x8xf32>, vector<24x8xf32> -> vector<24x8xf32>
    %583 = arith.truncf %582 : vector<24x8xf32> to vector<24x8xbf16>
    %584 = vector.extract_strided_slice %564 {offsets = [0, 0], sizes = [8, 32], strides = [1, 1]} : vector<32x32xbf16> to vector<8x32xbf16>
    %cst_263 = arith.constant dense<0.000000e+00> : vector<24x32xf32>
    %585 = tpu.matmul %583, %584, %cst_263 {dimension_numbers = #tpu.dot_dimension_numbers<[1], [0], [0], [1], [0, 0, 1, 1], [], []>} : vector<24x8xbf16>, vector<8x32xbf16>, vector<24x32xf32> -> vector<24x32xf32>
    %586 = vector.extract_strided_slice %562 {offsets = [0, 8], sizes = [24, 8], strides = [1, 1]} : vector<24x96xf32> to vector<24x8xf32>
    %cst_264 = arith.constant 0.353553385 : f32
    %587 = vector.broadcast %cst_264 : f32 to vector<24x8xf32>
    %588 = arith.mulf %586, %587 : vector<24x8xf32>
    %589 = vector.extract_strided_slice %562 {offsets = [0, 40], sizes = [24, 8], strides = [1, 1]} : vector<24x96xf32> to vector<24x8xf32>
    %590 = vector.extract_strided_slice %562 {offsets = [0, 72], sizes = [24, 8], strides = [1, 1]} : vector<24x96xf32> to vector<24x8xf32>
    %cst_265 = arith.constant dense<0.000000e+00> : vector<24x24xf32>
    %591 = tpu.matmul %588, %589, %cst_265 {dimension_numbers = #tpu.dot_dimension_numbers<[1], [1], [0], [0], [0, 0, 1, 0], [], []>} : vector<24x8xf32>, vector<24x8xf32>, vector<24x24xf32> -> vector<24x24xf32>
    %592 = arith.addf %591, %374 : vector<24x24xf32>
    %cst_266 = arith.constant dense<0xFF800000> : vector<24xf32>
    %593 = vector.multi_reduction <maximumf>, %592, %cst_266 [1] : vector<24x24xf32> to vector<24xf32>
    %594 = vector.shape_cast %593 : vector<24xf32> to vector<24x1xf32>
    %595 = vector.broadcast %594 : vector<24x1xf32> to vector<24x24xf32>
    %596 = arith.subf %592, %595 : vector<24x24xf32>
    %597 = math.exp %596 : vector<24x24xf32>
    %cst_267 = arith.constant dense<0.000000e+00> : vector<24xf32>
    %598 = vector.multi_reduction <add>, %597, %cst_267 [1] : vector<24x24xf32> to vector<24xf32>
    %599 = vector.shape_cast %598 : vector<24xf32> to vector<24x1xf32>
    %600 = tpu.reciprocal %599 {approx = true} : vector<24x1xf32> -> vector<24x1xf32>
    %601 = vector.broadcast %600 : vector<24x1xf32> to vector<24x24xf32>
    %602 = arith.mulf %597, %601 : vector<24x24xf32>
    %cst_268 = arith.constant dense<0.000000e+00> : vector<24x8xf32>
    %603 = tpu.matmul %602, %590, %cst_268 {dimension_numbers = #tpu.dot_dimension_numbers<[1], [0], [0], [1], [0, 0, 1, 1], [], []>} : vector<24x24xf32>, vector<24x8xf32>, vector<24x8xf32> -> vector<24x8xf32>
    %604 = arith.truncf %603 : vector<24x8xf32> to vector<24x8xbf16>
    %605 = vector.extract_strided_slice %564 {offsets = [8, 0], sizes = [8, 32], strides = [1, 1]} : vector<32x32xbf16> to vector<8x32xbf16>
    %cst_269 = arith.constant dense<0.000000e+00> : vector<24x32xf32>
    %606 = tpu.matmul %604, %605, %cst_269 {dimension_numbers = #tpu.dot_dimension_numbers<[1], [0], [0], [1], [0, 0, 1, 1], [], []>} : vector<24x8xbf16>, vector<8x32xbf16>, vector<24x32xf32> -> vector<24x32xf32>
    %607 = arith.addf %585, %606 : vector<24x32xf32>
    %608 = vector.extract_strided_slice %562 {offsets = [0, 16], sizes = [24, 8], strides = [1, 1]} : vector<24x96xf32> to vector<24x8xf32>
    %cst_270 = arith.constant 0.353553385 : f32
    %609 = vector.broadcast %cst_270 : f32 to vector<24x8xf32>
    %610 = arith.mulf %608, %609 : vector<24x8xf32>
    %611 = vector.extract_strided_slice %562 {offsets = [0, 48], sizes = [24, 8], strides = [1, 1]} : vector<24x96xf32> to vector<24x8xf32>
    %612 = vector.extract_strided_slice %562 {offsets = [0, 80], sizes = [24, 8], strides = [1, 1]} : vector<24x96xf32> to vector<24x8xf32>
    %cst_271 = arith.constant dense<0.000000e+00> : vector<24x24xf32>
    %613 = tpu.matmul %610, %611, %cst_271 {dimension_numbers = #tpu.dot_dimension_numbers<[1], [1], [0], [0], [0, 0, 1, 0], [], []>} : vector<24x8xf32>, vector<24x8xf32>, vector<24x24xf32> -> vector<24x24xf32>
    %614 = arith.addf %613, %374 : vector<24x24xf32>
    %cst_272 = arith.constant dense<0xFF800000> : vector<24xf32>
    %615 = vector.multi_reduction <maximumf>, %614, %cst_272 [1] : vector<24x24xf32> to vector<24xf32>
    %616 = vector.shape_cast %615 : vector<24xf32> to vector<24x1xf32>
    %617 = vector.broadcast %616 : vector<24x1xf32> to vector<24x24xf32>
    %618 = arith.subf %614, %617 : vector<24x24xf32>
    %619 = math.exp %618 : vector<24x24xf32>
    %cst_273 = arith.constant dense<0.000000e+00> : vector<24xf32>
    %620 = vector.multi_reduction <add>, %619, %cst_273 [1] : vector<24x24xf32> to vector<24xf32>
    %621 = vector.shape_cast %620 : vector<24xf32> to vector<24x1xf32>
    %622 = tpu.reciprocal %621 {approx = true} : vector<24x1xf32> -> vector<24x1xf32>
    %623 = vector.broadcast %622 : vector<24x1xf32> to vector<24x24xf32>
    %624 = arith.mulf %619, %623 : vector<24x24xf32>
    %cst_274 = arith.constant dense<0.000000e+00> : vector<24x8xf32>
    %625 = tpu.matmul %624, %612, %cst_274 {dimension_numbers = #tpu.dot_dimension_numbers<[1], [0], [0], [1], [0, 0, 1, 1], [], []>} : vector<24x24xf32>, vector<24x8xf32>, vector<24x8xf32> -> vector<24x8xf32>
    %626 = arith.truncf %625 : vector<24x8xf32> to vector<24x8xbf16>
    %627 = vector.extract_strided_slice %564 {offsets = [16, 0], sizes = [8, 32], strides = [1, 1]} : vector<32x32xbf16> to vector<8x32xbf16>
    %cst_275 = arith.constant dense<0.000000e+00> : vector<24x32xf32>
    %628 = tpu.matmul %626, %627, %cst_275 {dimension_numbers = #tpu.dot_dimension_numbers<[1], [0], [0], [1], [0, 0, 1, 1], [], []>} : vector<24x8xbf16>, vector<8x32xbf16>, vector<24x32xf32> -> vector<24x32xf32>
    %629 = arith.addf %607, %628 : vector<24x32xf32>
    %630 = vector.extract_strided_slice %562 {offsets = [0, 24], sizes = [24, 8], strides = [1, 1]} : vector<24x96xf32> to vector<24x8xf32>
    %cst_276 = arith.constant 0.353553385 : f32
    %631 = vector.broadcast %cst_276 : f32 to vector<24x8xf32>
    %632 = arith.mulf %630, %631 : vector<24x8xf32>
    %633 = vector.extract_strided_slice %562 {offsets = [0, 56], sizes = [24, 8], strides = [1, 1]} : vector<24x96xf32> to vector<24x8xf32>
    %634 = vector.extract_strided_slice %562 {offsets = [0, 88], sizes = [24, 8], strides = [1, 1]} : vector<24x96xf32> to vector<24x8xf32>
    %cst_277 = arith.constant dense<0.000000e+00> : vector<24x24xf32>
    %635 = tpu.matmul %632, %633, %cst_277 {dimension_numbers = #tpu.dot_dimension_numbers<[1], [1], [0], [0], [0, 0, 1, 0], [], []>} : vector<24x8xf32>, vector<24x8xf32>, vector<24x24xf32> -> vector<24x24xf32>
    %636 = arith.addf %635, %374 : vector<24x24xf32>
    %cst_278 = arith.constant dense<0xFF800000> : vector<24xf32>
    %637 = vector.multi_reduction <maximumf>, %636, %cst_278 [1] : vector<24x24xf32> to vector<24xf32>
    %638 = vector.shape_cast %637 : vector<24xf32> to vector<24x1xf32>
    %639 = vector.broadcast %638 : vector<24x1xf32> to vector<24x24xf32>
    %640 = arith.subf %636, %639 : vector<24x24xf32>
    %641 = math.exp %640 : vector<24x24xf32>
    %cst_279 = arith.constant dense<0.000000e+00> : vector<24xf32>
    %642 = vector.multi_reduction <add>, %641, %cst_279 [1] : vector<24x24xf32> to vector<24xf32>
    %643 = vector.shape_cast %642 : vector<24xf32> to vector<24x1xf32>
    %644 = tpu.reciprocal %643 {approx = true} : vector<24x1xf32> -> vector<24x1xf32>
    %645 = vector.broadcast %644 : vector<24x1xf32> to vector<24x24xf32>
    %646 = arith.mulf %641, %645 : vector<24x24xf32>
    %cst_280 = arith.constant dense<0.000000e+00> : vector<24x8xf32>
    %647 = tpu.matmul %646, %634, %cst_280 {dimension_numbers = #tpu.dot_dimension_numbers<[1], [0], [0], [1], [0, 0, 1, 1], [], []>} : vector<24x24xf32>, vector<24x8xf32>, vector<24x8xf32> -> vector<24x8xf32>
    %648 = arith.truncf %647 : vector<24x8xf32> to vector<24x8xbf16>
    %649 = vector.extract_strided_slice %564 {offsets = [24, 0], sizes = [8, 32], strides = [1, 1]} : vector<32x32xbf16> to vector<8x32xbf16>
    %cst_281 = arith.constant dense<0.000000e+00> : vector<24x32xf32>
    %650 = tpu.matmul %648, %649, %cst_281 {dimension_numbers = #tpu.dot_dimension_numbers<[1], [0], [0], [1], [0, 0, 1, 1], [], []>} : vector<24x8xbf16>, vector<8x32xbf16>, vector<24x32xf32> -> vector<24x32xf32>
    %651 = arith.addf %629, %650 : vector<24x32xf32>
    %652 = arith.addf %554, %651 : vector<24x32xf32>
    %c1_282 = arith.constant 1 : index
    %c0_283 = arith.constant 0 : index
    %c0_284 = arith.constant 0 : index
    %653 = vector.load %arg13[%c1_282, %c0_283, %c0_284] : memref<2x1x32xf32, #tpu.memory_space<vmem>>, vector<1x1x32xf32>
    %654 = vector.shape_cast %653 : vector<1x1x32xf32> to vector<1x32xf32>
    %655 = vector.broadcast %654 : vector<1x32xf32> to vector<24x32xf32>
    %656 = arith.addf %652, %655 : vector<24x32xf32>
    %c1_285 = arith.constant 1 : index
    %c0_286 = arith.constant 0 : index
    %c0_287 = arith.constant 0 : index
    %657 = vector.load %arg14[%c1_285, %c0_286, %c0_287] : memref<2x1x32xf32, #tpu.memory_space<vmem>>, vector<1x1x32xf32>
    %658 = vector.shape_cast %657 : vector<1x1x32xf32> to vector<1x32xf32>
    %c1_288 = arith.constant 1 : index
    %c0_289 = arith.constant 0 : index
    %c0_290 = arith.constant 0 : index
    %659 = vector.load %arg15[%c1_288, %c0_289, %c0_290] : memref<2x1x32xf32, #tpu.memory_space<vmem>>, vector<1x1x32xf32>
    %660 = vector.shape_cast %659 : vector<1x1x32xf32> to vector<1x32xf32>
    %cst_291 = arith.constant dense<0.000000e+00> : vector<24xf32>
    %661 = vector.multi_reduction <add>, %656, %cst_291 [1] : vector<24x32xf32> to vector<24xf32>
    %662 = vector.shape_cast %661 : vector<24xf32> to vector<24x1xf32>
    %cst_292 = arith.constant 3.200000e+01 : f32
    %663 = vector.broadcast %cst_292 : f32 to vector<24x1xf32>
    %664 = arith.divf %662, %663 : vector<24x1xf32>
    %665 = vector.broadcast %664 : vector<24x1xf32> to vector<24x32xf32>
    %666 = arith.subf %656, %665 : vector<24x32xf32>
    %667 = arith.mulf %666, %666 : vector<24x32xf32>
    %cst_293 = arith.constant dense<0.000000e+00> : vector<24xf32>
    %668 = vector.multi_reduction <add>, %667, %cst_293 [1] : vector<24x32xf32> to vector<24xf32>
    %669 = vector.shape_cast %668 : vector<24xf32> to vector<24x1xf32>
    %cst_294 = arith.constant 3.200000e+01 : f32
    %670 = vector.broadcast %cst_294 : f32 to vector<24x1xf32>
    %671 = arith.divf %669, %670 : vector<24x1xf32>
    %672 = vector.broadcast %664 : vector<24x1xf32> to vector<24x32xf32>
    %673 = arith.subf %656, %672 : vector<24x32xf32>
    %cst_295 = arith.constant 9.99999974E-6 : f32
    %674 = vector.broadcast %cst_295 : f32 to vector<24x1xf32>
    %675 = arith.addf %671, %674 : vector<24x1xf32>
    %676 = math.rsqrt %675 : vector<24x1xf32>
    %677 = vector.broadcast %676 : vector<24x1xf32> to vector<24x32xf32>
    %678 = arith.mulf %673, %677 : vector<24x32xf32>
    %679 = vector.broadcast %658 : vector<1x32xf32> to vector<24x32xf32>
    %680 = arith.mulf %678, %679 : vector<24x32xf32>
    %681 = vector.broadcast %660 : vector<1x32xf32> to vector<24x32xf32>
    %682 = arith.addf %680, %681 : vector<24x32xf32>
    %683 = arith.truncf %682 : vector<24x32xf32> to vector<24x32xbf16>
    %c1_296 = arith.constant 1 : index
    %c0_297 = arith.constant 0 : index
    %c0_298 = arith.constant 0 : index
    %684 = vector.load %arg16[%c1_296, %c0_297, %c0_298] : memref<2x32x2048xbf16, #tpu.memory_space<vmem>>, vector<1x32x2048xbf16>
    %685 = vector.shape_cast %684 : vector<1x32x2048xbf16> to vector<32x2048xbf16>
    %cst_299 = arith.constant dense<0.000000e+00> : vector<24x2048xf32>
    %686 = tpu.matmul %683, %685, %cst_299 {dimension_numbers = #tpu.dot_dimension_numbers<[1], [0], [0], [1], [0, 0, 1, 1], [], []>} : vector<24x32xbf16>, vector<32x2048xbf16>, vector<24x2048xf32> -> vector<24x2048xf32>
    %c1_300 = arith.constant 1 : index
    %c0_301 = arith.constant 0 : index
    %c0_302 = arith.constant 0 : index
    %687 = vector.load %arg17[%c1_300, %c0_301, %c0_302] : memref<2x1x2048xf32, #tpu.memory_space<vmem>>, vector<1x1x2048xf32>
    %688 = vector.shape_cast %687 : vector<1x1x2048xf32> to vector<1x2048xf32>
    %689 = vector.broadcast %688 : vector<1x2048xf32> to vector<24x2048xf32>
    %690 = arith.addf %686, %689 : vector<24x2048xf32>
    %cst_303 = arith.constant 0.000000e+00 : f32
    %691 = vector.broadcast %cst_303 : f32 to vector<24x2048xf32>
    %692 = arith.maximumf %690, %691 : vector<24x2048xf32>
    %693 = arith.truncf %692 : vector<24x2048xf32> to vector<24x2048xbf16>
    %c1_304 = arith.constant 1 : index
    %c0_305 = arith.constant 0 : index
    %c0_306 = arith.constant 0 : index
    %694 = vector.load %arg18[%c1_304, %c0_305, %c0_306] : memref<2x2048x32xbf16, #tpu.memory_space<vmem>>, vector<1x2048x32xbf16>
    %695 = vector.shape_cast %694 : vector<1x2048x32xbf16> to vector<2048x32xbf16>
    %cst_307 = arith.constant dense<0.000000e+00> : vector<24x32xf32>
    %696 = tpu.matmul %693, %695, %cst_307 {dimension_numbers = #tpu.dot_dimension_numbers<[1], [0], [0], [1], [0, 0, 1, 1], [], []>} : vector<24x2048xbf16>, vector<2048x32xbf16>, vector<24x32xf32> -> vector<24x32xf32>
    %c1_308 = arith.constant 1 : index
    %c0_309 = arith.constant 0 : index
    %c0_310 = arith.constant 0 : index
    %697 = vector.load %arg19[%c1_308, %c0_309, %c0_310] : memref<2x1x32xf32, #tpu.memory_space<vmem>>, vector<1x1x32xf32>
    %698 = vector.shape_cast %697 : vector<1x1x32xf32> to vector<1x32xf32>
    %699 = vector.broadcast %698 : vector<1x32xf32> to vector<24x32xf32>
    %700 = arith.addf %696, %699 : vector<24x32xf32>
    %701 = arith.addf %682, %700 : vector<24x32xf32>
    %c1_311 = arith.constant 1 : index
    %c0_312 = arith.constant 0 : index
    %c0_313 = arith.constant 0 : index
    %702 = vector.load %arg20[%c1_311, %c0_312, %c0_313] : memref<2x1x32xf32, #tpu.memory_space<vmem>>, vector<1x1x32xf32>
    %703 = vector.shape_cast %702 : vector<1x1x32xf32> to vector<1x32xf32>
    %c1_314 = arith.constant 1 : index
    %c0_315 = arith.constant 0 : index
    %c0_316 = arith.constant 0 : index
    %704 = vector.load %arg21[%c1_314, %c0_315, %c0_316] : memref<2x1x32xf32, #tpu.memory_space<vmem>>, vector<1x1x32xf32>
    %705 = vector.shape_cast %704 : vector<1x1x32xf32> to vector<1x32xf32>
    %cst_317 = arith.constant dense<0.000000e+00> : vector<24xf32>
    %706 = vector.multi_reduction <add>, %701, %cst_317 [1] : vector<24x32xf32> to vector<24xf32>
    %707 = vector.shape_cast %706 : vector<24xf32> to vector<24x1xf32>
    %cst_318 = arith.constant 3.200000e+01 : f32
    %708 = vector.broadcast %cst_318 : f32 to vector<24x1xf32>
    %709 = arith.divf %707, %708 : vector<24x1xf32>
    %710 = vector.broadcast %709 : vector<24x1xf32> to vector<24x32xf32>
    %711 = arith.subf %701, %710 : vector<24x32xf32>
    %712 = arith.mulf %711, %711 : vector<24x32xf32>
    %cst_319 = arith.constant dense<0.000000e+00> : vector<24xf32>
    %713 = vector.multi_reduction <add>, %712, %cst_319 [1] : vector<24x32xf32> to vector<24xf32>
    %714 = vector.shape_cast %713 : vector<24xf32> to vector<24x1xf32>
    %cst_320 = arith.constant 3.200000e+01 : f32
    %715 = vector.broadcast %cst_320 : f32 to vector<24x1xf32>
    %716 = arith.divf %714, %715 : vector<24x1xf32>
    %717 = vector.broadcast %709 : vector<24x1xf32> to vector<24x32xf32>
    %718 = arith.subf %701, %717 : vector<24x32xf32>
    %cst_321 = arith.constant 9.99999974E-6 : f32
    %719 = vector.broadcast %cst_321 : f32 to vector<24x1xf32>
    %720 = arith.addf %716, %719 : vector<24x1xf32>
    %721 = math.rsqrt %720 : vector<24x1xf32>
    %722 = vector.broadcast %721 : vector<24x1xf32> to vector<24x32xf32>
    %723 = arith.mulf %718, %722 : vector<24x32xf32>
    %724 = vector.broadcast %703 : vector<1x32xf32> to vector<24x32xf32>
    %725 = arith.mulf %723, %724 : vector<24x32xf32>
    %726 = vector.broadcast %705 : vector<1x32xf32> to vector<24x32xf32>
    %727 = arith.addf %725, %726 : vector<24x32xf32>
    %728 = arith.mulf %727, %727 : vector<24x32xf32>
    %cst_322 = arith.constant dense<0.000000e+00> : vector<24xf32>
    %729 = vector.multi_reduction <add>, %728, %cst_322 [1] : vector<24x32xf32> to vector<24xf32>
    %730 = vector.shape_cast %729 : vector<24xf32> to vector<24x1xf32>
    %cst_323 = arith.constant 1.000000e-24 : f32
    %731 = vector.broadcast %cst_323 : f32 to vector<24x1xf32>
    %732 = arith.maximumf %730, %731 : vector<24x1xf32>
    %733 = math.rsqrt %732 : vector<24x1xf32>
    %734 = vector.broadcast %733 : vector<24x1xf32> to vector<24x32xf32>
    %735 = arith.mulf %727, %734 : vector<24x32xf32>
    %c0_324 = arith.constant 0 : index
    %c0_325 = arith.constant 0 : index
    %736 = vector.load %arg3[%c0_324, %c0_325] : memref<2x24xf32, #tpu.memory_space<vmem>>, vector<2x24xf32>
    %cst_326 = arith.constant dense<0.000000e+00> : vector<2x32xf32>
    %737 = tpu.matmul %736, %727, %cst_326 {dimension_numbers = #tpu.dot_dimension_numbers<[1], [0], [0], [1], [0, 0, 1, 1], [], []>} : vector<2x24xf32>, vector<24x32xf32>, vector<2x32xf32> -> vector<2x32xf32>
    %738 = arith.mulf %737, %737 : vector<2x32xf32>
    %cst_327 = arith.constant dense<0.000000e+00> : vector<2xf32>
    %739 = vector.multi_reduction <add>, %738, %cst_327 [1] : vector<2x32xf32> to vector<2xf32>
    %740 = vector.shape_cast %739 : vector<2xf32> to vector<2x1xf32>
    %cst_328 = arith.constant 1.000000e-24 : f32
    %741 = vector.broadcast %cst_328 : f32 to vector<2x1xf32>
    %742 = arith.maximumf %740, %741 : vector<2x1xf32>
    %743 = math.rsqrt %742 : vector<2x1xf32>
    %744 = vector.broadcast %743 : vector<2x1xf32> to vector<2x32xf32>
    %745 = arith.mulf %737, %744 : vector<2x32xf32>
    %c0_329 = arith.constant 0 : index
    %c0_330 = arith.constant 0 : index
    %746 = vector.load %arg24[%c0_329, %c0_330] : memref<24x32xf32, #tpu.memory_space<vmem>>, vector<24x32xf32>
    tpu.vector_store %arg24[%c0_329, %c0_330], %735 {strides = array<i32>} : memref<24x32xf32, #tpu.memory_space<vmem>>, vector<24x32xf32>,
    %c0_331 = arith.constant 0 : index
    %c0_332 = arith.constant 0 : index
    %747 = vector.load %arg25[%c0_331, %c0_332] : memref<2x32xf32, #tpu.memory_space<vmem>>, vector<2x32xf32>
    tpu.vector_store %arg25[%c0_331, %c0_332], %745 {strides = array<i32>} : memref<2x32xf32, #tpu.memory_space<vmem>>, vector<2x32xf32>,
    return
  }
}

</mosaic_0001>

<bundles_post_ra>
// kernel: tpu_custom_call.1
= control target key start
LH: loop header
LB: loop body
LE: loop exit
PB: predicated region body
PF: predicated region fallthrough
CT: control target
= control target key end

     0   :  { %s22032_s0 = inlined_call_operand.vmem [shape: f32[16,16], index: 0, kind: input, shape index: {}]   ;;  %s22033_s1 = inlined_call_operand.vmem [shape: f32[24,24], index: 1, kind: input, shape index: {}]   ;;  %s22034_s2 = inlined_call_operand.vmem [shape: f32[2,16], index: 2, kind: input, shape index: {}]   ;;  %s22035_s3 = inlined_call_operand.vmem [shape: f32[2,24], index: 3, kind: input, shape index: {}]   ;;  %s22036_s4 = inlined_call_operand.vmem [shape: f32[16,48], index: 4, kind: input, shape index: {}]   ;;  %s22037_s5 = inlined_call_operand.vmem [shape: f32[24,64], index: 5, kind: input, shape index: {}]   ;;  %s22038_s6 = inlined_call_operand.vmem [shape: bf16[48,32], index: 6, kind: input, shape index: {}]   ;;  %s22039_s7 = inlined_call_operand.vmem [shape: f32[1,32], index: 7, kind: input, shape index: {}]   ;;  %s22040_s8 = inlined_call_operand.vmem [shape: bf16[64,32], index: 8, kind: input, shape index: {}]   ;;  %s22041_s9 = inlined_call_operand.vmem [shape: f32[1,32], index: 9, kind: input, shape index: {}]   ;;  %s22042_s10 = inlined_call_operand.vmem [shape: bf16[2,32,96], index: 10, kind: input, shape index: {}]   ;;  %s22043_s11 = inlined_call_operand.vmem [shape: f32[2,1,96], index: 11, kind: input, shape index: {}]   ;;  %s22044_s12 = inlined_call_operand.vmem [shape: bf16[2,32,32], index: 12, kind: input, shape index: {}]   ;;  %s22045_s13 = inlined_call_operand.vmem [shape: f32[2,1,32], index: 13, kind: input, shape index: {}]   ;;  %s22046_s14 = inlined_call_operand.vmem [shape: f32[2,1,32], index: 14, kind: input, shape index: {}]   ;;  %s22047_s15 = inlined_call_operand.vmem [shape: f32[2,1,32], index: 15, kind: input, shape index: {}]   ;;  %s22048_s16 = inlined_call_operand.vmem [shape: bf16[2,32,2048], index: 16, kind: input, shape index: {}]   ;;  %s22049_s17 = inlined_call_operand.vmem [shape: f32[2,1,2048], index: 17, kind: input, shape index: {}]   ;;  %s22050_s18 = inlined_call_operand.vmem [shape: bf16[2,2048,32], index: 18, kind: input, shape index: {}]   ;;  %s22051_s19 = inlined_call_operand.vmem [shape: f32[2,1,32], index: 19, kind: input, shape index: {}]   ;;  %s22052_s20 = inlined_call_operand.vmem [shape: f32[2,1,32], index: 20, kind: input, shape index: {}]   ;;  %s22053_s21 = inlined_call_operand.vmem [shape: f32[2,1,32], index: 21, kind: input, shape index: {}]   ;;  %s22054_s22 = inlined_call_operand.hbm [shape: f32[16,32], index: 22, kind: output, shape index: {0}]   ;;  %s22055_s23 = inlined_call_operand.hbm [shape: f32[2,32], index: 23, kind: output, shape index: {1}]   ;;  %s22056_s24 = inlined_call_operand.hbm [shape: f32[24,32], index: 24, kind: output, shape index: {2}]   ;;  %s22057_s25 = inlined_call_operand.hbm [shape: f32[2,32], index: 25, kind: output, shape index: {3}]  }
   0x1   :  { %22089 = sst [smem:[#allocation12_spill]] %s22032_s0 }
   0x2   :  { %22090 = sst [smem:[#allocation13_spill]] %s22033_s1 }
   0x3   :  { %22091 = sst [smem:[#allocation14_spill]] %s22034_s2 }
   0x4   :  { %22092 = sst [smem:[#allocation15_spill]] %s22035_s3 }
   0x5   :  { %22093 = sst [smem:[#allocation16_spill]] %s22036_s4 }
   0x6   :  { %22094 = sst [smem:[#allocation17_spill]] %s22037_s5 }
   0x7   :  { %22095 = sst [smem:[#allocation18_spill]] %s22038_s6 }
   0x8   :  { %22096 = sst [smem:[#allocation19_spill]] %s22039_s7 }
   0x9   :  { %22097 = sst [smem:[#allocation20_spill]] %s22040_s8 }
   0xa   :  { %22098 = sst [smem:[#allocation21_spill]] %s22041_s9 }
   0xb   :  { %22099 = sst [smem:[#allocation22_spill]] %s22045_s13 }
   0xc   :  { %22100 = sst [smem:[#allocation23_spill]] %s22046_s14 }
   0xd   :  { %22101 = sst [smem:[#allocation24_spill]] %s22047_s15 }
   0xe   :  { %22102 = sst [smem:[#allocation25_spill]] %s22054_s22 }
   0xf   :  { %22103 = sst [smem:[#allocation26_spill]] %s22055_s23 }
  0x10   :  { %22104 = sst [smem:[#allocation27_spill]] %s22056_s24 }
  0x11   :  { %22105 = sst [smem:[#allocation28_spill]] %s22057_s25 }
  0x12   :  { %31 = vsyncpa [#allocation3], 0 }
  0x13   :  { %32 = vsyncpa [#allocation5], 0  ;;  %s22106_s6 = sld [smem:[#allocation18_spill]]  ;;  %v18033_v1 = vmov 0.0   ;;  %vm18034_vm0 = vmmov 0   ;;  %vm115_vm1 = vcmask 392192  }
  0x14   :  { %16655 = vmatprep.subr.bf16.mxu0 %v18033_v1  ;;  %16665 = vmatprep.subr.bf16.mxu1 %v18033_v1  ;;  %s22107_s27 = sld [smem:[#allocation16_spill]]  ;;  %v17204_v7 = vld [vmem:[%s22042_s10 + $0x8] sm:$0xff]   ;;  %v17205_v8 = vld [vmem:[%s22042_s10] sm:$0xff]   ;;  %vm184_vm2 = vcmask 261120  }
  0x15   :  { %16661 = vmatprep.mubr.msk.bf16.mxu0 %vm18034_vm0, %v18033_v1  ;;  %16669 = vmatprep.mubr.msk.bf16.mxu1 %vm18034_vm0, %v18033_v1  ;;  %s22108_s30 = sld [smem:[#allocation19_spill]] }
  0x16   :  { %16666 = vmatpush3.bf16.msra.mxu1 %v17204_v7 }
  0x17   :  { %16667 = vmatprep.subr.bf16.mxu1 %v18033_v1 }
  0x19   :  { %v17201_v0 = vld [vmem:[%s22106_s6 + $0x10] sm:$0xff]   ;;  %v17202_v2 = vld [vmem:[%s22106_s6 + $0x8] sm:$0xff]   ;;  %v17203_v3 = vld [vmem:[%s22106_s6] sm:$0xff]  }
  0x1a   :  { %16656 = vmatpush3.bf16.msra.mxu0 %v17201_v0  ;;  %v81_v4 = vld [vmem:[%s22107_s27] sm:$0xff]  ;;  %v82_v5 = vld [vmem:[%s22107_s27 + $0x8] sm:$0xff]  ;;  %16668 = vmatpush3.bf16.msra.mxu1 %v17205_v8 }
  0x1b   :  { %16657 = vmatprep.subr.bf16.mxu0 %v18033_v1  ;;  %v83_v6 = vpack.c.bf16 %v82_v5, %v81_v4  ;;  %v14126_v9 = vld [vmem:[%s22108_s30] ss:$0 sm:$0xff] }
  0x1e   :  { %16658 = vmatpush3.bf16.msra.mxu0 %v17202_v2 }
  0x1f   :  { %16659 = vmatprep.subr.bf16.mxu0 %v18033_v1 }
  0x22   :  { %16660 = vmatpush3.bf16.msra.mxu0 %v17203_v3 }
  0x25   :  { %16662 = vmatmul.mubr.msk.bf16.vlgmr.msra.gmra.mxu0 %vm115_vm1, %v83_v6 }
  0xe5   :  { %v153_v10 = vpop.f32.mrf.mxu0 }
  0xe6   :  { %v18216_v13 = vadd.f32 %v14126_v9, %v153_v10 }
  0xe7   :  { %v16663_v11 = vpop.f32.mrf.mxu0 }
  0xe9   :  { %v156_v12 = vpop.f32.mrf.mxu0 }
  0xea   :  { %v18218_v14 = vadd.f32 %v14126_v9, %v156_v12 }
  0xeb   :  { %v16664_v15 = vpop.f32.mrf.mxu0 }
  0xec   :  { %v160_v16 = vpack.c.bf16 %v18218_v14, %v18216_v13 }
  0xee   :  { %16670 = vmatmul.mubr.msk.bf16.vlgmr.msra.gmra.mxu1 %vm184_vm2, %v160_v16 }
  0xef   :  { %33 = vsyncpa [#allocation8], 0  ;;  %v14131_v17 = vld [vmem:[%s22043_s11] ss:$0 sm:$0xff]  ;;  %vm241_vm3 = vcmask 64512   ;;  %s22080_s26 = smov 88  }
  0xf0   :  { %s22084_s1 = smov 96   ;;  %s22078_s8 = smov 120   ;;  %vm327_vm4 = vcmask 130048   ;;  %vm642_vm5 = vcmask 1043456   ;;  %vm6727_vm6 = vcmask 523264   ;;  %vm6972_vm7 = vcmask 195584  }
  0xf1   :  { %s22109_s28 = sld [smem:[#allocation12_spill]]  ;;  %s22082_s0 = smov 64   ;;  %vm6670_vm8 = vcmask 254976  }
  0xf2   :  { %s22076_s29 = smov 56   ;;  %s22074_s2 = smov 80  }
  0xf3   :  { %s22072_s6 = smov 112   ;;  %s22070_s4 = smov 48  }
  0xf4   :  { %s22068_s9 = smov 72   ;;  %s22066_s5 = smov 104  }
  0xf5   :  { %s22064_s3 = smov 40   ;;  %s22111_s30 = smov 80  }
  0xf6   :  { %s22112_s7 = smov 112   ;;  %s22116_s27 = smov 40  }
  0xf7   :  { %v18268_v32 = vld [vmem:[%s22109_s28 + $0x8] sm:$0xff]  ;;  %v18273_v34 = vld [vmem:[%s22109_s28] sm:$0xff]  ;;  %s22121_s25 = smov 96   ;;  %s22125_s24 = smov 120  }
 0x1ae   :  { %v222_v18 = vpop.f32.mrf.mxu1 }
 0x1af   :  { %v18226_v19 = vadd.f32 %v14131_v17, %v222_v18  ;;  %v230_v18 = vld [vmem:[%s22044_s12 + $0x4] sm:$0xf] }
 0x1b0   :  { %v16671_v20 = vpop.f32.mrf.mxu1 }
 0x1b1   :  { %v18229_v21 = vmul.f32 0.35355338, %v18226_v19 }
 0x1b2   :  { %v225_v22 = vpop.f32.mrf.mxu1 }
 0x1b3   :  { %v18231_v23 = vadd.f32 %v14131_v17, %v225_v22  ;;  %16677 = vmatprep.mubr.msk.f32.mxu1 %vm241_vm3, %v18229_v21 }
 0x1b4   :  { %v16672_v24 = vpop.f32.mrf.mxu1 }
 0x1b5   :  { %444 = vrot.lane.b32.xlu1 %v18231_v23, %s22080_s26  ;;  %239 = vrot.lane.b32.xlu0 %v18231_v23, %s22084_s1  ;;  %v18244_v25 = vmul.f32 0.35355338, %v18231_v23 }
 0x1b9   :  { %442 = vrot.lane.b32.xlu1 %v18226_v19, %s22080_s26  ;;  %237 = vrot.lane.b32.xlu0 %v18226_v19, %s22084_s1 }
 0x1bd   :  { %438 = vrot.lane.b32.xlu0 %v18229_v21, %s22078_s8  ;;  %440 = vrot.lane.b32.xlu1 %v18244_v25, %s22078_s8 }
 0x227   :  { %v240_v26 = vpop.permute.xlu0 %239  ;;  %v445_v27 = vpop.permute.xlu1 %444 }
 0x228   :  { %16673 = vmatprep.subr.msk.mxu1 %vm241_vm3, %v240_v26 }
 0x229   :  { %16674 = vmatpush3.xpose.msk.msra.mxu1 %vm241_vm3, %v240_v26  ;;  %v644_v26 = vsel %vm642_vm5, %v230_v18, 0 }
 0x22b   :  { %v238_v28 = vpop.permute.xlu0 %237  ;;  %v443_v30 = vpop.permute.xlu1 %442 }
 0x22c   :  { %16675 = vmatprep.subr.msk.mxu1 %vm241_vm3, %v238_v28 }
 0x22d   :  { %16676 = vmatpush3.xpose.msk.msra.mxu1 %vm241_vm3, %v238_v28  ;;  %v229_v28 = vld [vmem:[%s22044_s12] sm:$0xf] }
 0x22e   :  { %16687 = vmatprep.subr.msk.mxu1 %vm241_vm3, %v445_v27 }
 0x22f   :  { %v439_v29 = vpop.permute.xlu0 %438  ;;  %v441_v31 = vpop.permute.xlu1 %440 }
 0x230   :  { %16678 = vmatmul.mubr.msk.f32.vlgmr.msra.gmra.mxu1 %vm241_vm3, %v18244_v25 }
 0x231   :  { %16688 = vmatpush3.xpose.msk.msra.mxu1 %vm241_vm3, %v445_v27  ;;  %16691 = vmatprep.mubr.msk.f32.mxu1 %vm241_vm3, %v439_v29  ;;  %v691_v29 = vsel %vm642_vm5, %v229_v28, 0 }
 0x232   :  { %16689 = vmatprep.subr.msk.mxu1 %vm241_vm3, %v443_v30 }
 0x235   :  { %16690 = vmatpush3.xpose.msk.msra.mxu1 %vm241_vm3, %v443_v30 }
 0x236   :  { %16707 = vmatprep.subr.bf16.mxu1 %v18033_v1 }
 0x238   :  { %16692 = vmatmul.mubr.msk.f32.vlgmr.msra.gmra.mxu1 %vm241_vm3, %v441_v31 }
 0x239   :  { %16709 = vmatprep.mubr.msk.bf16.mxu1 %vm18034_vm0, %v18033_v1  ;;  %16708 = vmatpush3.bf16.msra.mxu1 %v691_v29 }
 0x2f0   :  { %v16679_v33 = vpop.f32.mrf.mxu1 }
 0x2f1   :  { %v324_v35 = vadd.f32 %v16679_v33, %v18268_v32 }
 0x2f2   :  { %v318_v36 = vpop.f32.mrf.mxu1 }
 0x2f3   :  { %v319_v37 = vadd.f32 %v318_v36, %v18273_v34  ;;  %v331_v38 = vsel %vm327_vm4, %v324_v35, -inf }
 0x2f4   :  { %332 = vmax.xlane.f32.xlu1 %v331_v38 }
 0x2f5   :  { %v328_v39 = vsel %vm327_vm4, %v319_v37, -inf }
 0x2f6   :  { %329 = vmax.xlane.f32.xlu0 %v328_v39 }
 0x2f8   :  { %v16693_v40 = vpop.f32.mrf.mxu1 }
 0x2f9   :  { %v526_v43 = vadd.f32 %v16693_v40, %v18268_v32 }
 0x2fa   :  { %v520_v41 = vpop.f32.mrf.mxu1 }
 0x2fb   :  { %v521_v42 = vadd.f32 %v520_v41, %v18273_v34  ;;  %v532_v45 = vsel %vm327_vm4, %v526_v43, -inf }
 0x2fd   :  { %v529_v44 = vsel %vm327_vm4, %v521_v42, -inf }
 0x2fe   :  { %530 = vmax.xlane.f32.xlu0 %v529_v44 }
 0x302   :  { %533 = vmax.xlane.f32.xlu0 %v532_v45 }
 0x305   :  { %352 = vrot.lane.b32.xlu1 %v18231_v23, %s22082_s0 }
 0x37d   :  { %v333_v46 = vpop.xlane.xlu1 %332 }
 0x37e   :  { %v335_v47 = vsub.f32 %v324_v35, %v333_v46 }
 0x37f   :  { %v330_v48 = vpop.xlane.xlu0 %329 }
 0x380   :  { %v338_v49 = vmul.f32 1.442695, %v335_v47  ;;  %v334_v50 = vsub.f32 %v319_v37, %v330_v48 }
 0x381   :  { %v353_v51 = vpop.permute.xlu1 %352 }
 0x382   :  { %17728 = vpow2.f32 %v338_v49  ;;  %v336_v52 = vmul.f32 1.442695, %v334_v50  ;;  %16680 = vmatprep.subr.mxu0 %v353_v51 }
 0x383   :  { %16681 = vmatpush3.msra.mxu0 %v353_v51 }
 0x384   :  { %17730 = vpow2.f32 %v336_v52 }
 0x387   :  { %v531_v53 = vpop.xlane.xlu0 %530 }
 0x388   :  { %v535_v63 = vsub.f32 %v521_v42, %v531_v53 }
 0x38a   :  { %v537_v0 = vmul.f32 1.442695, %v535_v63 }
 0x38b   :  { %v534_v54 = vpop.xlane.xlu0 %533 }
 0x38c   :  { %v536_v55 = vsub.f32 %v526_v43, %v534_v54 }
 0x38e   :  { %v539_v56 = vmul.f32 1.442695, %v536_v55 }
 0x38f   :  { %v17729_v57 = vpop.eup %17728 }
 0x390   :  { %17732 = vpow2.f32 %v539_v56  ;;  %v343_v58 = vsel %vm327_vm4, %v17729_v57, 0.0 }
 0x391   :  { %v17731_v59 = vpop.eup %17730  ;;  %344 = vadd.xlane.f32.xlu0 %v343_v58  ;;  %17734 = vpow2.f32 %v537_v0 }
 0x392   :  { %v340_v60 = vsel %vm327_vm4, %v17731_v59, 0.0 }
 0x393   :  { %341 = vadd.xlane.f32.xlu1 %v340_v60 }
 0x39d   :  { %v17733_v61 = vpop.eup %17732 }
 0x39e   :  { %v544_v62 = vsel %vm327_vm4, %v17733_v61, 0.0  ;;  %v17735_v2 = vpop.eup %17734 }
 0x39f   :  { %545 = vadd.xlane.f32.xlu0 %v544_v62  ;;  %v541_v3 = vsel %vm327_vm4, %v17735_v2, 0.0 }
 0x3a4   :  { %553 = vrot.lane.b32.xlu1 %v18231_v23, %s22076_s29 }
 0x3b5   :  { %350 = vrot.lane.b32.xlu0 %v18226_v19, %s22082_s0 }
 0x3b9   :  { %740 = vrot.lane.b32.xlu0 %v18231_v23, %s22074_s2 }
 0x3bd   :  { %734 = vrot.lane.b32.xlu0 %v18229_v21, %s22072_s6 }
 0x3c8   :  { %542 = vadd.xlane.f32.xlu1 %v541_v3 }
 0x3d9   :  { %551 = vrot.lane.b32.xlu1 %v18226_v19, %s22076_s29  ;;  %s22120_s29 = sld [smem:[#allocation14_spill]] }
 0x3dd   :  { %738 = vrot.lane.b32.xlu1 %v18226_v19, %s22074_s2  ;;  %s22118_s2 = sld [smem:[#allocation17_spill]] }
 0x3e1   :  { %736 = vrot.lane.b32.xlu1 %v18244_v25, %s22072_s6  ;;  %s22115_s6 = smov 104  }
 0x41a   :  { %v345_v4 = vpop.xlane.xlu0 %344 }
 0x41b   :  { %17736 = vrcp.f32 %v345_v4 }
 0x41c   :  { %v342_v5 = vpop.xlane.xlu1 %341 }
 0x41d   :  { %17738 = vrcp.f32 %v342_v5 }
 0x420   :  { %v554_v12 = vpop.permute.xlu1 %553 }
 0x428   :  { %v546_v6 = vpop.xlane.xlu0 %545  ;;  %v17737_v7 = vpop.eup %17736 }
 0x429   :  { %v349_v11 = vmul.f32 %v17737_v7, %v17729_v57  ;;  %17740 = vrcp.f32 %v546_v6 }
 0x42a   :  { %v17739_v8 = vpop.eup %17738 }
 0x42b   :  { %v348_v9 = vmul.f32 %v17739_v8, %v17731_v59 }
 0x42c   :  { %v351_v10 = vpop.permute.xlu0 %350 }
 0x42d   :  { %16682 = vmatprep.subr.mxu0 %v351_v10  ;;  %16684 = vmatprep.mubr.msk.f32.mxu0 %vm327_vm4, %v348_v9 }
 0x42e   :  { %16683 = vmatpush3.msra.mxu0 %v351_v10 }
 0x42f   :  { %16685 = vmatmul.mubr.msk.f32.vlgmr.msra.gmra.mxu0 %vm327_vm4, %v349_v11  ;;  %16694 = vmatprep.subr.mxu0 %v554_v12 }
 0x430   :  { %16695 = vmatpush3.msra.mxu0 %v554_v12  ;;  %v741_v27 = vpop.permute.xlu0 %740 }
 0x434   :  { %v735_v38 = vpop.permute.xlu0 %734 }
 0x436   :  { %v17741_v17 = vpop.eup %17740 }
 0x437   :  { %v550_v24 = vmul.f32 %v17741_v17, %v17733_v61 }
 0x451   :  { %v543_v15 = vpop.xlane.xlu1 %542 }
 0x452   :  { %17742 = vrcp.f32 %v543_v15 }
 0x455   :  { %v552_v16 = vpop.permute.xlu1 %551 }
 0x456   :  { %16696 = vmatprep.subr.mxu0 %v552_v16 }
 0x457   :  { %16697 = vmatpush3.msra.mxu0 %v552_v16  ;;  %v231_v16 = vld [vmem:[%s22044_s12 + $0x8] sm:$0xf] }
 0x458   :  { %16701 = vmatprep.subr.bf16.mxu0 %v18033_v1  ;;  %v939_v17 = vsel %vm642_vm5, %v231_v16, 0  ;;  %v1307_v16 = vld [vmem:[%s22048_s16 + $0x80] sm:$0xff] }
 0x459   :  { %v739_v39 = vpop.permute.xlu1 %738 }
 0x45d   :  { %v737_v40 = vpop.permute.xlu1 %736 }
 0x45f   :  { %v17743_v20 = vpop.eup %17742 }
 0x460   :  { %v549_v22 = vmul.f32 %v17743_v20, %v17735_v2 }
 0x462   :  { %16698 = vmatprep.mubr.msk.f32.mxu0 %vm327_vm4, %v549_v22 }
 0x463   :  { %16699 = vmatmul.mubr.msk.f32.vlgmr.msra.gmra.mxu0 %vm327_vm4, %v550_v24 }
 0x464   :  { %16702 = vmatpush3.bf16.msra.mxu0 %v644_v26  ;;  %16703 = vmatprep.mubr.msk.bf16.mxu0 %vm18034_vm0, %v18033_v1 }
 0x465   :  { %16713 = vmatprep.subr.msk.mxu0 %vm241_vm3, %v741_v27 }
 0x4ef   :  { %v16686_v30 = vpop.f32.mrf.mxu0 }
 0x4f1   :  { %v428_v31 = vpop.f32.mrf.mxu0 }
 0x4f2   :  { %v437_v33 = vpack.c.bf16 %v16686_v30, %v428_v31 }
 0x4f4   :  { %16710 = vmatmul.mubr.msk.bf16.vlgmr.msra.gmra.mxu1 %vm241_vm3, %v437_v33 }
 0x523   :  { %v16700_v35 = vpop.f32.mrf.mxu0 }
 0x525   :  { %v629_v36 = vpop.f32.mrf.mxu0 }
 0x526   :  { %v638_v37 = vpack.c.bf16 %v16700_v35, %v629_v36 }
 0x528   :  { %16704 = vmatmul.mubr.msk.bf16.vlgmr.msra.gmra.mxu0 %vm241_vm3, %v638_v37 }
 0x529   :  { %16714 = vmatpush3.xpose.msk.msra.mxu0 %vm241_vm3, %v741_v27  ;;  %16717 = vmatprep.mubr.msk.f32.mxu0 %vm241_vm3, %v735_v38 }
 0x52a   :  { %16715 = vmatprep.subr.msk.mxu0 %vm241_vm3, %v739_v39 }
 0x52d   :  { %16716 = vmatpush3.xpose.msk.msra.mxu0 %vm241_vm3, %v739_v39 }
 0x52e   :  { %16727 = vmatprep.subr.bf16.mxu0 %v18033_v1 }
 0x530   :  { %16718 = vmatmul.mubr.msk.f32.vlgmr.msra.gmra.mxu0 %vm241_vm3, %v737_v40 }
 0x531   :  { %16729 = vmatprep.mubr.msk.bf16.mxu0 %vm18034_vm0, %v18033_v1  ;;  %16728 = vmatpush3.bf16.msra.mxu0 %v939_v17  ;;  %v1315_v17 = vld [vmem:[%s22048_s16 + $0xc0] sm:$0xff] }
 0x5b4   :  { %v727_v41 = vpop.f32.mrf.mxu1 }
 0x5b6   :  { %v16711_v42 = vpop.f32.mrf.mxu1 }
 0x5b8   :  { %v730_v43 = vpop.f32.mrf.mxu1 }
 0x5ba   :  { %v16712_v44 = vpop.f32.mrf.mxu1 }
 0x5e8   :  { %v680_v45 = vpop.f32.mrf.mxu0 }
 0x5e9   :  { %v18329_v46 = vadd.f32 %v727_v41, %v680_v45 }
 0x5ea   :  { %v16705_v47 = vpop.f32.mrf.mxu0 }
 0x5ec   :  { %v683_v48 = vpop.f32.mrf.mxu0 }
 0x5ed   :  { %v18331_v49 = vadd.f32 %v730_v43, %v683_v48 }
 0x5ee   :  { %v16706_v50 = vpop.f32.mrf.mxu0 }
 0x5f0   :  { %v16719_v51 = vpop.f32.mrf.mxu0 }
 0x5f1   :  { %v822_v52 = vadd.f32 %v16719_v51, %v18268_v32 }
 0x5f2   :  { %v816_v53 = vpop.f32.mrf.mxu0 }
 0x5f3   :  { %v817_v54 = vadd.f32 %v816_v53, %v18273_v34  ;;  %v828_v55 = vsel %vm327_vm4, %v822_v52, -inf }
 0x5f4   :  { %829 = vmax.xlane.f32.xlu1 %v828_v55 }
 0x5f5   :  { %v825_v56 = vsel %vm327_vm4, %v817_v54, -inf }
 0x5f6   :  { %826 = vmax.xlane.f32.xlu0 %v825_v56 }
 0x605   :  { %849 = vrot.lane.b32.xlu1 %v18231_v23, %s22070_s4 }
 0x609   :  { %990 = vrot.lane.b32.xlu1 %v18231_v23, %s22068_s9 }
 0x60d   :  { %988 = vrot.lane.b32.xlu1 %v18226_v19, %s22068_s9  ;;  %s22113_s9 = smov 48  }
 0x611   :  { %986 = vrot.lane.b32.xlu1 %v18244_v25, %s22066_s5 }
 0x67d   :  { %v830_v57 = vpop.xlane.xlu1 %829 }
 0x67e   :  { %v832_v58 = vsub.f32 %v822_v52, %v830_v57 }
 0x67f   :  { %v827_v59 = vpop.xlane.xlu0 %826 }
 0x680   :  { %v835_v60 = vmul.f32 1.442695, %v832_v58  ;;  %v831_v61 = vsub.f32 %v817_v54, %v827_v59 }
 0x681   :  { %v850_v62 = vpop.permute.xlu1 %849 }
 0x682   :  { %17744 = vpow2.f32 %v835_v60  ;;  %v833_v63 = vmul.f32 1.442695, %v831_v61  ;;  %16720 = vmatprep.subr.mxu1 %v850_v62  ;;  %v14163_v61 = vld [vmem:[%s22045_s13] ss:$0 sm:$0xff] }
 0x683   :  { %16721 = vmatpush3.msra.mxu1 %v850_v62 }
 0x684   :  { %17746 = vpow2.f32 %v833_v63 }
 0x685   :  { %v991_v7 = vpop.permute.xlu1 %990 }
 0x68f   :  { %v17745_v0 = vpop.eup %17744 }
 0x690   :  { %v840_v2 = vsel %vm327_vm4, %v17745_v0, 0.0 }
 0x691   :  { %v17747_v3 = vpop.eup %17746  ;;  %841 = vadd.xlane.f32.xlu0 %v840_v2 }
 0x692   :  { %v837_v4 = vsel %vm327_vm4, %v17747_v3, 0.0 }
 0x695   :  { %838 = vadd.xlane.f32.xlu0 %v837_v4 }
 0x6ab   :  { %847 = vrot.lane.b32.xlu0 %v18226_v19, %s22070_s4  ;;  %s22119_s4 = sld [smem:[#allocation21_spill]] }
 0x6af   :  { %984 = vrot.lane.b32.xlu0 %v18229_v21, %s22066_s5  ;;  %v989_v21 = vpop.permute.xlu1 %988  ;;  %s22114_s5 = smov 72  }
 0x6b3   :  { %v987_v15 = vpop.permute.xlu1 %986 }
 0x71a   :  { %v842_v25 = vpop.xlane.xlu0 %841 }
 0x71b   :  { %17748 = vrcp.f32 %v842_v25 }
 0x71e   :  { %v839_v5 = vpop.xlane.xlu0 %838 }
 0x71f   :  { %17750 = vrcp.f32 %v839_v5 }
 0x722   :  { %v848_v6 = vpop.permute.xlu0 %847 }
 0x723   :  { %16722 = vmatprep.subr.mxu1 %v848_v6 }
 0x724   :  { %16723 = vmatpush3.msra.mxu1 %v848_v6 }
 0x725   :  { %16733 = vmatprep.subr.msk.mxu1 %vm241_vm3, %v991_v7 }
 0x726   :  { %v985_v12 = vpop.permute.xlu0 %984 }
 0x728   :  { %v17749_v8 = vpop.eup %17748 }
 0x729   :  { %v846_v11 = vmul.f32 %v17749_v8, %v17745_v0 }
 0x72c   :  { %v17751_v9 = vpop.eup %17750 }
 0x72d   :  { %v845_v10 = vmul.f32 %v17751_v9, %v17747_v3 }
 0x72f   :  { %16724 = vmatprep.mubr.msk.f32.mxu1 %vm327_vm4, %v845_v10 }
 0x730   :  { %16725 = vmatmul.mubr.msk.f32.vlgmr.msra.gmra.mxu1 %vm327_vm4, %v846_v11 }
 0x731   :  { %16734 = vmatpush3.xpose.msk.msra.mxu1 %vm241_vm3, %v991_v7  ;;  %16737 = vmatprep.mubr.msk.f32.mxu1 %vm241_vm3, %v985_v12 }
 0x732   :  { %16735 = vmatprep.subr.msk.mxu1 %vm241_vm3, %v989_v21 }
 0x735   :  { %16736 = vmatpush3.xpose.msk.msra.mxu1 %vm241_vm3, %v989_v21 }
 0x736   :  { %16747 = vmatprep.subr.bf16.mxu1 %v18033_v1 }
 0x738   :  { %16738 = vmatmul.mubr.msk.f32.vlgmr.msra.gmra.mxu1 %vm241_vm3, %v987_v15 }
 0x739   :  { %16749 = vmatprep.mubr.msk.bf16.mxu1 %vm18034_vm0, %v18033_v1 }
 0x7f0   :  { %v16726_v18 = vpop.f32.mrf.mxu1 }
 0x7f2   :  { %v925_v20 = vpop.f32.mrf.mxu1 }
 0x7f3   :  { %v934_v22 = vpack.c.bf16 %v16726_v18, %v925_v20  ;;  %v1308_v18 = vld [vmem:[%s22048_s16 + $0x88] sm:$0xff]  ;;  %v14183_v20 = vcombine.high %v1307_v16, %v1315_v17 }
 0x7f5   :  { %16730 = vmatmul.mubr.msk.bf16.vlgmr.msra.gmra.mxu0 %vm241_vm3, %v934_v22  ;;  %v1316_v22 = vld [vmem:[%s22048_s16 + $0xc8] sm:$0xff] }
 0x7f8   :  { %v16739_v24 = vpop.f32.mrf.mxu1 }
 0x7f9   :  { %v1072_v26 = vadd.f32 %v16739_v24, %v18268_v32  ;;  %v14182_v24 = vcombine.low %v1307_v16, %v1315_v17  ;;  %v1313_v17 = vld [vmem:[%s22048_s16 + $0xb0] sm:$0xff] }
 0x7fa   :  { %v1066_v27 = vpop.f32.mrf.mxu1 }
 0x7fb   :  { %v1067_v28 = vadd.f32 %v1066_v27, %v18273_v34  ;;  %v1078_v29 = vsel %vm327_vm4, %v1072_v26, -inf  ;;  %v14185_v27 = vcombine.high %v1308_v18, %v1316_v22 }
 0x7fc   :  { %1079 = vmax.xlane.f32.xlu1 %v1078_v29  ;;  %v1299_v29 = vld [vmem:[%s22048_s16 + $0x40] sm:$0xff] }
 0x7fd   :  { %v1075_v30 = vsel %vm327_vm4, %v1067_v28, -inf }
 0x7fe   :  { %1076 = vmax.xlane.f32.xlu0 %v1075_v30  ;;  %v1292_v30 = vld [vmem:[%s22048_s16 + $0x8] sm:$0xff] }
 0x80d   :  { %1099 = vrot.lane.b32.xlu1 %v18231_v23, %s22064_s3 }
 0x885   :  { %v1080_v31 = vpop.xlane.xlu1 %1079 }
 0x886   :  { %v1082_v33 = vsub.f32 %v1072_v26, %v1080_v31  ;;  %v14184_v26 = vcombine.low %v1308_v18, %v1316_v22  ;;  %v1321_v18 = vld [vmem:[%s22048_s16 + $0xf0] sm:$0xff]  ;;  %v1322_v22 = vld [vmem:[%s22048_s16 + $0xf8] sm:$0xff] }
 0x887   :  { %v1077_v35 = vpop.xlane.xlu0 %1076 }
 0x888   :  { %v1085_v36 = vmul.f32 1.442695, %v1082_v33  ;;  %v1081_v37 = vsub.f32 %v1067_v28, %v1077_v35  ;;  %v1291_v28 = vld [vmem:[%s22048_s16] sm:$0xff]  ;;  %v1300_v33 = vld [vmem:[%s22048_s16 + $0x48] sm:$0xff] }
 0x889   :  { %v1100_v38 = vpop.permute.xlu1 %1099  ;;  %v14167_v31 = vcombine.high %v1291_v28, %v1299_v29  ;;  %v14166_v35 = vcombine.low %v1291_v28, %v1299_v29  ;;  %v1297_v29 = vld [vmem:[%s22048_s16 + $0x30] sm:$0xff] }
 0x88a   :  { %17752 = vpow2.f32 %v1085_v36  ;;  %v1083_v32 = vmul.f32 1.442695, %v1081_v37  ;;  %16740 = vmatprep.subr.mxu0 %v1100_v38  ;;  %v14168_v36 = vcombine.low %v1292_v30, %v1300_v33  ;;  %v14169_v37 = vcombine.high %v1292_v30, %v1300_v33  ;;  %v1305_v30 = vld [vmem:[%s22048_s16 + $0x70] sm:$0xff]  ;;  %v1306_v33 = vld [vmem:[%s22048_s16 + $0x78] sm:$0xff] }
 0x88b   :  { %16741 = vmatpush3.msra.mxu0 %v1100_v38  ;;  %v1309_v38 = vld [vmem:[%s22048_s16 + $0x90] sm:$0xff] }
 0x88c   :  { %17754 = vpow2.f32 %v1083_v32  ;;  %v1317_v32 = vld [vmem:[%s22048_s16 + $0xd0] sm:$0xff] }
 0x897   :  { %v17753_v34 = vpop.eup %17752 }
 0x898   :  { %v1090_v39 = vsel %vm327_vm4, %v17753_v34, 0.0 }
 0x899   :  { %v17755_v40 = vpop.eup %17754  ;;  %1091 = vadd.xlane.f32.xlu0 %v1090_v39  ;;  %v14187_v39 = vcombine.high %v1309_v38, %v1317_v32 }
 0x89a   :  { %v1087_v41 = vsel %vm327_vm4, %v17755_v40, 0.0 }
 0x89d   :  { %1088 = vadd.xlane.f32.xlu0 %v1087_v41  ;;  %v18046_v41 = vmov 0  }
 0x8b3   :  { %1097 = vrot.lane.b32.xlu0 %v18226_v19, %s22064_s3  ;;  %v232_v19 = vld [vmem:[%s22044_s12 + $0xc] sm:$0xf]  ;;  %s22124_s3 = smov 88  }
 0x8b5   :  { %v975_v23 = vpop.f32.mrf.mxu0 }
 0x8b6   :  { %v982_v42 = vadd.f32 %v975_v23, %v18329_v46  ;;  %v1189_v46 = vsel %vm642_vm5, %v232_v19, 0  ;;  %v14186_v23 = vcombine.low %v1309_v38, %v1317_v32  ;;  %v14178_v32 = vcombine.low %v1297_v29, %v1305_v30 }
 0x8b7   :  { %v16731_v43 = vpop.f32.mrf.mxu0  ;;  %16748 = vmatpush3.bf16.msra.mxu1 %v1189_v46 }
 0x8b8   :  { %1625 = vmatprep.subr.bf16.mxu1 %v14185_v27  ;;  %v14195_v27 = vcombine.high %v1313_v17, %v1321_v18 }
 0x8b9   :  { %v978_v44 = vpop.f32.mrf.mxu0 }
 0x8ba   :  { %v983_v45 = vadd.f32 %v978_v44, %v18331_v49 }
 0x8bb   :  { %v16732_v47 = vpop.f32.mrf.mxu0 }
 0x922   :  { %v1092_v48 = vpop.xlane.xlu0 %1091 }
 0x923   :  { %17756 = vrcp.f32 %v1092_v48 }
 0x926   :  { %v1089_v50 = vpop.xlane.xlu0 %1088 }
 0x927   :  { %17758 = vrcp.f32 %v1089_v50 }
 0x92a   :  { %v1098_v51 = vpop.permute.xlu0 %1097 }
 0x92b   :  { %16742 = vmatprep.subr.mxu0 %v1098_v51 }
 0x92c   :  { %16743 = vmatpush3.msra.mxu0 %v1098_v51 }
 0x92d   :  { %1582 = vmatprep.subr.bf16.mxu0 %v14183_v20  ;;  %v1314_v20 = vld [vmem:[%s22048_s16 + $0xb8] sm:$0xff] }
 0x92e   :  { %v14197_v28 = vcombine.high %v1314_v20, %v1322_v22 }
 0x930   :  { %v17757_v52 = vpop.eup %17756 }
 0x931   :  { %v1096_v55 = vmul.f32 %v17757_v52, %v17753_v34  ;;  %v1310_v34 = vld [vmem:[%s22048_s16 + $0x98] sm:$0xff] }
 0x934   :  { %v17759_v53 = vpop.eup %17758 }
 0x935   :  { %v1095_v54 = vmul.f32 %v17759_v53, %v17755_v40  ;;  %v1318_v40 = vld [vmem:[%s22048_s16 + $0xd8] sm:$0xff] }
 0x936   :  { %v14189_v43 = vcombine.high %v1310_v34, %v1318_v40 }
 0x937   :  { %16744 = vmatprep.mubr.msk.f32.mxu0 %vm327_vm4, %v1095_v54  ;;  %v14164_v54 = vld [vmem:[%s22046_s14] ss:$0 sm:$0xff] }
 0x938   :  { %16745 = vmatmul.mubr.msk.f32.vlgmr.msra.gmra.mxu0 %vm327_vm4, %v1096_v55 }
 0x939   :  { %1583 = vmatpush1.bf16.msra.mxu0 %v14182_v24  ;;  %1602 = vmatprep.mubr.bf16.mxu0 %v18046_v41 }
 0x93a   :  { %1584 = vmatprep.subr.bf16.mxu0 %v14167_v31  ;;  %v1298_v31 = vld [vmem:[%s22048_s16 + $0x38] sm:$0xff] }
 0x93b   :  { %v14181_v38 = vcombine.high %v1298_v31, %v1306_v33 }
 0x93d   :  { %1585 = vmatpush1.bf16.msra.mxu0 %v14166_v35  ;;  %v14194_v35 = vcombine.low %v1313_v17, %v1321_v18 }
 0x93e   :  { %1668 = vmatprep.subr.bf16.mxu0 %v14187_v39  ;;  %v17206_v39 = vld [vmem:[%s22050_s18 + $0x78] sm:$0xff]  }
 0x9f8   :  { %v16746_v49 = vpop.f32.mrf.mxu0 }
 0x9fa   :  { %v1175_v56 = vpop.f32.mrf.mxu0 }
 0x9fb   :  { %v1184_v57 = vpack.c.bf16 %v16746_v49, %v1175_v56  ;;  %v14165_v49 = vld [vmem:[%s22047_s15] ss:$0 sm:$0xff] }
 0x9fd   :  { %16750 = vmatmul.mubr.msk.bf16.vlgmr.msra.gmra.mxu1 %vm241_vm3, %v1184_v57  ;;  %v1293_v57 = vld [vmem:[%s22048_s16 + $0x10] sm:$0xff] }
 0x9fe   :  { %1626 = vmatpush1.bf16.msra.mxu1 %v14184_v26  ;;  %1645 = vmatprep.mubr.bf16.mxu1 %v18046_v41 }
 0x9ff   :  { %1627 = vmatprep.subr.bf16.mxu1 %v14169_v37  ;;  %v14179_v37 = vcombine.high %v1297_v29, %v1305_v30 }
 0xa02   :  { %1628 = vmatpush1.bf16.msra.mxu1 %v14168_v36  ;;  %v14196_v36 = vcombine.low %v1314_v20, %v1322_v22 }
 0xa03   :  { %1711 = vmatprep.subr.bf16.mxu1 %v14189_v43  ;;  %v17210_v43 = vld [vmem:[%s22050_s18 + $0x70] sm:$0xff]  }
 0xabd   :  { %v1225_v58 = vpop.f32.mrf.mxu1 }
 0xabe   :  { %v1232_v59 = vadd.f32 %v1225_v58, %v982_v42  ;;  %v14188_v42 = vcombine.low %v1310_v34, %v1318_v40  ;;  %v1301_v58 = vld [vmem:[%s22048_s16 + $0x50] sm:$0xff]  ;;  %v14180_v34 = vcombine.low %v1298_v31, %v1306_v33  ;;  %v17207_v40 = vld [vmem:[%s22050_s18 + $0xf8] sm:$0xff]  }
 0xabf   :  { %v16751_v60 = vpop.f32.mrf.mxu1 }
 0xac0   :  { %v1234_v62 = vadd.f32 %v1232_v59, %v18216_v13  ;;  %v1294_v59 = vld [vmem:[%s22048_s16 + $0x18] sm:$0xff] }
 0xac1   :  { %v1228_v63 = vpop.f32.mrf.mxu1  ;;  %v1302_v60 = vld [vmem:[%s22048_s16 + $0x58] sm:$0xff] }
 0xac2   :  { %v1233_v0 = vadd.f32 %v1228_v63, %v983_v45  ;;  %v1243_v2 = vadd.f32 %v14163_v61, %v1234_v62 }
 0xac3   :  { %v16752_v3 = vpop.f32.mrf.mxu1 }
 0xac4   :  { %v1235_v4 = vadd.f32 %v1233_v0, %v18218_v14  ;;  %v1247_v25 = vsel %vm184_vm2, %v1243_v2, 0.0  ;;  %v14171_v0 = vcombine.high %v1293_v57, %v1301_v58  ;;  %v1311_v3 = vld [vmem:[%s22048_s16 + $0xa0] sm:$0xff] }
 0xac5   :  { %1248 = vadd.xlane.f32.xlu1 %v1247_v25  ;;  %v1312_v25 = vld [vmem:[%s22048_s16 + $0xa8] sm:$0xff] }
 0xac6   :  { %v1244_v5 = vadd.f32 %v14163_v61, %v1235_v4  ;;  %v1319_v4 = vld [vmem:[%s22048_s16 + $0xe0] sm:$0xff] }
 0xac8   :  { %v1250_v6 = vsel %vm184_vm2, %v1244_v5, 0.0 }
 0xac9   :  { %1251 = vadd.xlane.f32.xlu0 %v1250_v6  ;;  %v14170_v6 = vcombine.low %v1293_v57, %v1301_v58  ;;  %v17225_v57 = vld [vmem:[%s22050_s18 + $0x98] sm:$0xff]   ;;  %v17226_v58 = vld [vmem:[%s22050_s18 + $0x50] sm:$0xff]  }
 0xb4e   :  { %v1249_v7 = vpop.xlane.xlu1 %1248 }
 0xb4f   :  { %v1254_v8 = vmul.f32 0.03125, %v1249_v7  ;;  %v14172_v7 = vcombine.low %v1294_v59, %v1302_v60 }
 0xb51   :  { %v1256_v9 = vsub.f32 %v1243_v2, %v1254_v8  ;;  %v14173_v2 = vcombine.high %v1294_v59, %v1302_v60  ;;  %v14191_v8 = vcombine.high %v1311_v3, %v1319_v4  ;;  %v17227_v59 = vld [vmem:[%s22050_s18 + $0xd0] sm:$0xff]  }
 0xb52   :  { %v1252_v10 = vpop.xlane.xlu0 %1251  ;;  %v17228_v60 = vld [vmem:[%s22050_s18 + $0x10] sm:$0xff]  }
 0xb53   :  { %v1255_v11 = vmul.f32 0.03125, %v1252_v10  ;;  %v1258_v12 = vmul.f32 %v1256_v9, %v1256_v9  ;;  %v1295_v10 = vld [vmem:[%s22048_s16 + $0x20] sm:$0xff] }
 0xb55   :  { %v1257_v13 = vsub.f32 %v1244_v5, %v1255_v11  ;;  %v1260_v21 = vsel %vm184_vm2, %v1258_v12, 0.0  ;;  %v1320_v5 = vld [vmem:[%s22048_s16 + $0xe8] sm:$0xff]  ;;  %v1303_v11 = vld [vmem:[%s22048_s16 + $0x60] sm:$0xff] }
 0xb56   :  { %1261 = vadd.xlane.f32.xlu1 %v1260_v21  ;;  %v1296_v12 = vld [vmem:[%s22048_s16 + $0x28] sm:$0xff]  ;;  %v14190_v21 = vcombine.low %v1311_v3, %v1319_v4  ;;  %v14174_v24 = vcombine.low %v1295_v10, %v1303_v11 }
 0xb57   :  { %v1259_v15 = vmul.f32 %v1257_v13, %v1257_v13  ;;  %v17232_v3 = vld [vmem:[%s22050_s18 + $0x8] sm:$0xff]  }
 0xb58   :  { %v17233_v4 = vld [vmem:[%s22050_s18 + $0x88] sm:$0xff]  }
 0xb59   :  { %v1263_v14 = vsel %vm184_vm2, %v1259_v15, 0.0  ;;  %v14192_v15 = vcombine.low %v1312_v25, %v1320_v5 }
 0xb5a   :  { %1264 = vadd.xlane.f32.xlu0 %v1263_v14  ;;  %v14175_v14 = vcombine.high %v1295_v10, %v1303_v11  ;;  %v1327_v10 = vlaneseq }
 0xb5c   :  { %v18631_v11 = vshrl.u32 %v1327_v10, 7  ;;  %v17245_v10 = vld [vmem:[%s22050_s18 + $0x1b0] sm:$0xff]  }
 0xb5e   :  { %v18659_v30 = vsub.s32 7, %v18631_v11 }
 0xbdf   :  { %v1262_v44 = vpop.xlane.xlu1 %1261 }
 0xbe0   :  { %v1266_v45 = vmul.f32 0.03125, %v1262_v44  ;;  %v17211_v44 = vld [vmem:[%s22050_s18 + $0xf0] sm:$0xff]  }
 0xbe2   :  { %v1268_v47 = vadd.f32 1e-05, %v1266_v45  ;;  %v17212_v45 = vld [vmem:[%s22050_s18 + $0x30] sm:$0xff]  }
 0xbe3   :  { %v1265_v48 = vpop.xlane.xlu0 %1264 }
 0xbe4   :  { %17760 = vrsqrt.f32 %v1268_v47  ;;  %v1267_v50 = vmul.f32 0.03125, %v1265_v48  ;;  %v17213_v47 = vld [vmem:[%s22050_s18 + $0xb0] sm:$0xff]   ;;  %v17214_v48 = vld [vmem:[%s22050_s18 + $0x68] sm:$0xff]  }
 0xbe6   :  { %v1269_v51 = vadd.f32 1e-05, %v1267_v50  ;;  %v17215_v50 = vld [vmem:[%s22050_s18 + $0xe8] sm:$0xff]  }
 0xbe8   :  { %17762 = vrsqrt.f32 %v1269_v51  ;;  %v17216_v51 = vld [vmem:[%s22050_s18 + $0x28] sm:$0xff]  }
 0xbf1   :  { %v17761_v52 = vpop.eup %17760 }
 0xbf2   :  { %v1272_v53 = vmul.f32 %v17761_v52, %v1256_v9  ;;  %v14193_v9 = vcombine.high %v1312_v25, %v1320_v5  ;;  %v17217_v52 = vld [vmem:[%s22050_s18 + $0xa8] sm:$0xff]   ;;  %v17234_v25 = vld [vmem:[%s22050_s18 + $0x40] sm:$0xff]  }
 0xbf3   :  { %v17235_v5 = vld [vmem:[%s22050_s18 + $0xc0] sm:$0xff]  }
 0xbf4   :  { %v1280_v19 = vmul.f32 %v14164_v54, %v1272_v53  ;;  %v17218_v53 = vld [vmem:[%s22050_s18 + $0x60] sm:$0xff]  }
 0xbf5   :  { %v17763_v55 = vpop.eup %17762 }
 0xbf6   :  { %v1273_v46 = vmul.f32 %v17763_v55, %v1257_v13  ;;  %v18451_v61 = vadd.f32 %v14165_v49, %v1280_v19  ;;  %v1304_v13 = vld [vmem:[%s22048_s16 + $0x68] sm:$0xff]  ;;  %v17220_v55 = vld [vmem:[%s22050_s18 + $0x20] sm:$0xff]  }
 0xbf7   :  { %v14177_v16 = vcombine.high %v1296_v12, %v1304_v13  ;;  %v14176_v26 = vcombine.low %v1296_v12, %v1304_v13  ;;  %v17221_v19 = vld [vmem:[%s22050_s18 + $0xa0] sm:$0xff]   ;;  %v18634_v12 = vsub.s32 1, %v18631_v11  ;;  %v18637_v13 = vsub.s32 3, %v18631_v11 }
 0xbf8   :  { %v1281_v56 = vmul.f32 %v14164_v54, %v1273_v46  ;;  %v17219_v54 = vld [vmem:[%s22050_s18 + $0xe0] sm:$0xff]   ;;  %v17222_v46 = vld [vmem:[%s22050_s18 + $0x58] sm:$0xff]  }
 0xbfa   :  { %v18453_v62 = vadd.f32 %v14165_v49, %v1281_v56  ;;  %v17223_v49 = vld [vmem:[%s22050_s18 + $0xd8] sm:$0xff]  }
 0xbfb   :  { %v17224_v56 = vld [vmem:[%s22050_s18 + $0x18] sm:$0xff]  }
 0xbfc   :  { %v18457_v63 = vpack.c.bf16 %v18453_v62, %v18451_v61 }
 0xbfe   :  { %14198 = vmatmul.mubr.msk.bf16.vlgmr.msra.gmra.mxu0 %vm184_vm2, %v18457_v63  ;;  %14199 = vmatmul.mubr.msk.bf16.vlgmr.msra.gmra.mxu1 %vm184_vm2, %v18457_v63 }
 0xbff   :  { %1669 = vmatpush1.bf16.msra.mxu0 %v14186_v23  ;;  %1712 = vmatpush1.bf16.msra.mxu1 %v14188_v42  ;;  %v17208_v23 = vld [vmem:[%s22050_s18 + $0x38] sm:$0xff]  }
 0xc00   :  { %1670 = vmatprep.subr.bf16.mxu0 %v14171_v0  ;;  %1713 = vmatprep.subr.bf16.mxu1 %v14173_v2  ;;  %v17209_v42 = vld [vmem:[%s22050_s18 + $0xb8] sm:$0xff]   ;;  %v17230_v0 = vld [vmem:[%s22050_s18 + $0x48] sm:$0xff]  }
 0xc01   :  { %1688 = vmatprep.mubr.bf16.mxu0 %v18046_v41  ;;  %1731 = vmatprep.mubr.bf16.mxu1 %v18046_v41  ;;  %v17231_v2 = vld [vmem:[%s22050_s18 + $0xc8] sm:$0xff]  }
 0xc03   :  { %1671 = vmatpush1.bf16.msra.mxu0 %v14170_v6  ;;  %1714 = vmatpush1.bf16.msra.mxu1 %v14172_v7  ;;  %v17236_v6 = vld [vmem:[%s22050_s18] sm:$0xff]  }
 0xc04   :  { %1754 = vmatprep.subr.bf16.mxu0 %v14191_v8  ;;  %1797 = vmatprep.subr.bf16.mxu1 %v14193_v9  ;;  %v17237_v7 = vld [vmem:[%s22050_s18 + $0x80] sm:$0xff]   ;;  %v17238_v8 = vld [vmem:[%s22050_s18 + $0x178] sm:$0xff]  }
 0xc05   :  { %v17239_v9 = vld [vmem:[%s22050_s18 + $0x1f8] sm:$0xff]  }
 0xc06   :  { %14200 = vmatmul.mubr.msk.bf16.vlgmr.msra.gmra.mxu0 %vm184_vm2, %v18457_v63  ;;  %14201 = vmatmul.mubr.msk.bf16.vlgmr.msra.gmra.mxu1 %vm184_vm2, %v18457_v63 }
 0xc07   :  { %1755 = vmatpush1.bf16.msra.mxu0 %v14190_v21  ;;  %1798 = vmatpush1.bf16.msra.mxu1 %v14192_v15  ;;  %v18640_v21 = vsub.s32 0, %v18631_v11  ;;  %v18643_v15 = vsub.s32 2, %v18631_v11 }
 0xc08   :  { %1756 = vmatprep.subr.bf16.mxu0 %v14175_v14  ;;  %1799 = vmatprep.subr.bf16.mxu1 %v14177_v16  ;;  %v18648_v14 = vld [vmem:[%s22049_s17] sm:$0xff] }
 0xc09   :  { %1774 = vmatprep.mubr.bf16.mxu0 %v18046_v41  ;;  %1817 = vmatprep.mubr.bf16.mxu1 %v18046_v41  ;;  %v1334_v18 = vrot.slane %v18648_v14, %v18634_v12  ;;  %v1342_v20 = vrot.slane %v18648_v14, %v18637_v13  ;;  %v1330_v22 = vrot.slane %v18648_v14, %v18640_v21 }
 0xc0b   :  { %1757 = vmatpush1.bf16.msra.mxu0 %v14174_v24  ;;  %1800 = vmatpush1.bf16.msra.mxu1 %v14176_v26  ;;  %v1338_v24 = vrot.slane %v18648_v14, %v18643_v15 }
 0xc0c   :  { %1840 = vmatprep.subr.bf16.mxu0 %v14195_v27  ;;  %1883 = vmatprep.subr.bf16.mxu1 %v14197_v28 }
 0xc0e   :  { %14202 = vmatmul.mubr.msk.bf16.vlgmr.msra.gmra.mxu0 %vm184_vm2, %v18457_v63  ;;  %14203 = vmatmul.mubr.msk.bf16.vlgmr.msra.gmra.mxu1 %vm184_vm2, %v18457_v63 }
 0xc0f   :  { %1841 = vmatpush1.bf16.msra.mxu0 %v14194_v35  ;;  %1884 = vmatpush1.bf16.msra.mxu1 %v14196_v36 }
 0xc10   :  { %1842 = vmatprep.subr.bf16.mxu0 %v14179_v37  ;;  %1885 = vmatprep.subr.bf16.mxu1 %v14181_v38 }
 0xc11   :  { %1860 = vmatprep.mubr.bf16.mxu0 %v18046_v41  ;;  %1903 = vmatprep.mubr.bf16.mxu1 %v18046_v41 }
 0xc13   :  { %1843 = vmatpush1.bf16.msra.mxu0 %v14178_v32  ;;  %1886 = vmatpush1.bf16.msra.mxu1 %v14180_v34 }
 0xc14   :  { %15671 = vmatprep.subr.bf16.mxu0 %v17206_v39  ;;  %15693 = vmatprep.subr.bf16.mxu1 %v17207_v40  ;;  %v18662_v39 = vsub.s32 5, %v18631_v11 }
 0xc16   :  { %14204 = vmatmul.mubr.msk.bf16.vlgmr.msra.gmra.mxu0 %vm184_vm2, %v18457_v63  ;;  %14205 = vmatmul.mubr.msk.bf16.vlgmr.msra.gmra.mxu1 %vm184_vm2, %v18457_v63  ;;  %v17229_v63 = vld [vmem:[%s22050_s18 + $0x90] sm:$0xff]  }
 0xc17   :  { %15672 = vmatpush3.bf16.msra.mxu0 %v17208_v23  ;;  %15694 = vmatpush3.bf16.msra.mxu1 %v17209_v42 }
 0xc18   :  { %15673 = vmatprep.subr.bf16.mxu0 %v17210_v43  ;;  %15695 = vmatprep.subr.bf16.mxu1 %v17211_v44 }
 0xc1b   :  { %15674 = vmatpush3.bf16.msra.mxu0 %v17212_v45  ;;  %15696 = vmatpush3.bf16.msra.mxu1 %v17213_v47  ;;  %v1358_v47 = vrot.slane %v18648_v14, %v18659_v30 }
 0xc1c   :  { %15675 = vmatprep.subr.bf16.mxu0 %v17214_v48  ;;  %15697 = vmatprep.subr.bf16.mxu1 %v17215_v50 }
 0xc1f   :  { %15676 = vmatpush3.bf16.msra.mxu0 %v17216_v51  ;;  %15698 = vmatpush3.bf16.msra.mxu1 %v17217_v52 }
 0xc20   :  { %15677 = vmatprep.subr.bf16.mxu0 %v17218_v53  ;;  %15699 = vmatprep.subr.bf16.mxu1 %v17219_v54 }
 0xc23   :  { %15678 = vmatpush3.bf16.msra.mxu0 %v17220_v55  ;;  %15700 = vmatpush3.bf16.msra.mxu1 %v17221_v19  ;;  %v1350_v55 = vrot.slane %v18648_v14, %v18662_v39 }
 0xc24   :  { %15679 = vmatprep.subr.bf16.mxu0 %v17222_v46  ;;  %15701 = vmatprep.subr.bf16.mxu1 %v17223_v49 }
 0xc27   :  { %15680 = vmatpush3.bf16.msra.mxu0 %v17224_v56  ;;  %15702 = vmatpush3.bf16.msra.mxu1 %v17225_v57  ;;  %v17240_v57 = vld [vmem:[%s22050_s18 + $0x138] sm:$0xff]  }
 0xc28   :  { %15681 = vmatprep.subr.bf16.mxu0 %v17226_v58  ;;  %15703 = vmatprep.subr.bf16.mxu1 %v17227_v59  ;;  %v17241_v58 = vld [vmem:[%s22050_s18 + $0x1b8] sm:$0xff]  }
 0xc2b   :  { %15682 = vmatpush3.bf16.msra.mxu0 %v17228_v60  ;;  %15704 = vmatpush3.bf16.msra.mxu1 %v17229_v63 }
 0xc2c   :  { %15683 = vmatprep.subr.bf16.mxu0 %v17230_v0  ;;  %15705 = vmatprep.subr.bf16.mxu1 %v17231_v2  ;;  %v17242_v2 = vld [vmem:[%s22050_s18 + $0x170] sm:$0xff]  }
 0xc2f   :  { %15684 = vmatpush3.bf16.msra.mxu0 %v17232_v3  ;;  %15706 = vmatpush3.bf16.msra.mxu1 %v17233_v4  ;;  %v17243_v3 = vld [vmem:[%s22050_s18 + $0x1f0] sm:$0xff]  }
 0xc30   :  { %15685 = vmatprep.subr.bf16.mxu0 %v17234_v25  ;;  %15707 = vmatprep.subr.bf16.mxu1 %v17235_v5 }
 0xc33   :  { %15686 = vmatpush3.bf16.msra.mxu0 %v17236_v6  ;;  %15708 = vmatpush3.bf16.msra.mxu1 %v17237_v7 }
 0xc34   :  { %15715 = vmatprep.subr.bf16.mxu0 %v17238_v8  ;;  %15737 = vmatprep.subr.bf16.mxu1 %v17239_v9  ;;  %v17244_v9 = vld [vmem:[%s22050_s18 + $0x130] sm:$0xff]  }
 0xcbe   :  { %v1604_v16 = vpop.f32.mrf.mxu0  ;;  %v1647_v17 = vpop.f32.mrf.mxu1 }
 0xcbf   :  { %v1605_v37 = vadd.f32 %v1604_v16, %v1330_v22  ;;  %v1648_v38 = vadd.f32 %v1647_v17, %v1338_v24  ;;  %v17246_v16 = vld [vmem:[%s22050_s18 + $0x168] sm:$0xff]  }
 0xcc0   :  { %v1606_v26 = vpop.f32.mrf.mxu0  ;;  %v1649_v27 = vpop.f32.mrf.mxu1  ;;  %v17247_v17 = vld [vmem:[%s22050_s18 + $0x1e8] sm:$0xff]  }
 0xcc1   :  { %v1607_v31 = vadd.f32 %v1606_v26, %v1334_v18  ;;  %v1650_v33 = vadd.f32 %v1649_v27, %v1342_v20  ;;  %v1914_v53 = vmax.f32 %v1605_v37, 0.0  ;;  %v1916_v54 = vmax.f32 %v1648_v38, 0.0  ;;  %v17248_v27 = vld [vmem:[%s22050_s18 + $0x128] sm:$0xff]   ;;  %v17252_v37 = vld [vmem:[%s22050_s18 + $0x120] sm:$0xff]  }
 0xcc2   :  { %v1608_v28 = vpop.f32.mrf.mxu0  ;;  %v1651_v29 = vpop.f32.mrf.mxu1  ;;  %v17253_v38 = vld [vmem:[%s22050_s18 + $0x1a0] sm:$0xff]  }
 0xcc3   :  { %v1609_v35 = vadd.f32 %v1608_v28, %v1330_v22  ;;  %v1652_v36 = vadd.f32 %v1651_v29, %v1338_v24  ;;  %v1915_v48 = vmax.f32 %v1607_v31, 0.0  ;;  %v1917_v50 = vmax.f32 %v1650_v33, 0.0  ;;  %v17249_v28 = vld [vmem:[%s22050_s18 + $0x1a8] sm:$0xff]   ;;  %v17250_v31 = vld [vmem:[%s22050_s18 + $0x160] sm:$0xff]  }
 0xcc4   :  { %v1610_v32 = vpop.f32.mrf.mxu0  ;;  %v1653_v34 = vpop.f32.mrf.mxu1  ;;  %v17251_v33 = vld [vmem:[%s22050_s18 + $0x1e0] sm:$0xff]  }
 0xcc5   :  { %v1611_v40 = vadd.f32 %v1610_v32, %v1334_v18  ;;  %v1654_v23 = vadd.f32 %v1653_v34, %v1342_v20  ;;  %v1930_v42 = vmax.f32 %v1609_v35, 0.0  ;;  %v1932_v43 = vmax.f32 %v1652_v36, 0.0  ;;  %v17254_v32 = vld [vmem:[%s22050_s18 + $0x158] sm:$0xff]  }
 0xcc6   :  { %v18664_v44 = vpop.f32.mrf.mxu0  ;;  %v18666_v45 = vpop.f32.mrf.mxu1  ;;  %v17255_v34 = vld [vmem:[%s22050_s18 + $0x1d8] sm:$0xff]  }
 0xcc7   :  { %v1931_v51 = vmax.f32 %v1611_v40, 0.0  ;;  %v1933_v52 = vmax.f32 %v1654_v23, 0.0  ;;  %v1946_v59 = vpack.c.bf16 %v1930_v42, %v1914_v53  ;;  %v1948_v60 = vpack.c.bf16 %v1932_v43, %v1916_v54  ;;  %v17256_v42 = vld [vmem:[%s22050_s18 + $0x118] sm:$0xff]   ;;  %v17260_v54 = vld [vmem:[%s22050_s18 + $0x110] sm:$0xff]  }
 0xcc8   :  { %v1692_v19 = vpop.f32.mrf.mxu0  ;;  %v1735_v46 = vpop.f32.mrf.mxu1  ;;  %v17257_v43 = vld [vmem:[%s22050_s18 + $0x198] sm:$0xff]  }
 0xcc9   :  { %v1949_v49 = vpack.c.bf16 %v1933_v52, %v1917_v50  ;;  %v1947_v56 = vpack.c.bf16 %v1931_v51, %v1915_v48  ;;  %v1736_v4 = vadd.f32 %v1735_v46, %v1358_v47  ;;  %v1693_v25 = vadd.f32 %v1692_v19, %v1350_v55  ;;  %v17259_v48 = vld [vmem:[%s22050_s18 + $0x1d0] sm:$0xff]   ;;  %v17263_v19 = vld [vmem:[%s22050_s18 + $0x1c8] sm:$0xff]  }
 0xcca   :  { %v18678_v63 = vpop.f32.mrf.mxu0  ;;  %v18680_v0 = vpop.f32.mrf.mxu1  ;;  %v18741_v50 = vsub.s32 4, %v18631_v11  ;;  %v18744_v51 = vsub.s32 6, %v18631_v11  ;;  %v17262_v11 = vld [vmem:[%s22050_s18 + $0x148] sm:$0xff]  }
 0xccb   :  { %3025 = vmatprep.mubr.bf16.mxu0 %v1947_v56  ;;  %3066 = vmatprep.mubr.bf16.mxu1 %v1949_v49  ;;  %v1921_v18 = vmax.f32 %v1736_v4, 0.0  ;;  %v1919_v24 = vmax.f32 %v1693_v25, 0.0  ;;  %v18769_v56 = vld [vmem:[%s22049_s17 + $0x8] sm:$0xff]  ;;  %v17266_v25 = vld [vmem:[%s22050_s18 + $0x140] sm:$0xff]  }
 0xccc   :  { %v1696_v5 = vpop.f32.mrf.mxu0  ;;  %v1739_v6 = vpop.f32.mrf.mxu1  ;;  %3026 = vmatmul.mubr.bf16.vlgmr.msra.gmra.mxu0 %v1946_v59  ;;  %3067 = vmatmul.mubr.bf16.vlgmr.msra.gmra.mxu1 %v1948_v60  ;;  %v1346_v46 = vrot.slane %v18648_v14, %v18741_v50  ;;  %v1354_v49 = vrot.slane %v18648_v14, %v18744_v51  ;;  %v17264_v60 = vld [vmem:[%s22050_s18 + $0x108] sm:$0xff]   ;;  %v1374_v4 = vrot.slane %v18769_v56, %v18637_v13 }
 0xccd   :  { %v1697_v7 = vadd.f32 %v1696_v5, %v1350_v55  ;;  %v1740_v8 = vadd.f32 %v1739_v6, %v1358_v47  ;;  %15716 = vmatpush3.bf16.msra.mxu0 %v17240_v57  ;;  %15738 = vmatpush3.bf16.msra.mxu1 %v17241_v58  ;;  %v17258_v47 = vld [vmem:[%s22050_s18 + $0x150] sm:$0xff]   ;;  %v1366_v58 = vrot.slane %v18769_v56, %v18634_v12  ;;  %v17265_v14 = vld [vmem:[%s22050_s18 + $0x188] sm:$0xff]   ;;  %v17267_v5 = vld [vmem:[%s22050_s18 + $0x1c0] sm:$0xff]  }
 0xcce   :  { %15717 = vmatprep.subr.bf16.mxu0 %v17242_v2  ;;  %15739 = vmatprep.subr.bf16.mxu1 %v17243_v3  ;;  %v18712_v35 = vpop.f32.mrf.mxu0  ;;  %v18714_v36 = vpop.f32.mrf.mxu1  ;;  %v17261_v55 = vld [vmem:[%s22050_s18 + $0x190] sm:$0xff]   ;;  %v1695_v2 = vadd.f32 %v18678_v63, %v1346_v46  ;;  %v1738_v3 = vadd.f32 %v18680_v0, %v1354_v49  ;;  %v1734_v63 = vadd.f32 %v18666_v45, %v1354_v49  ;;  %v17271_v45 = vld [vmem:[%s22050_s18 + $0x2f8] sm:$0xff]  }
 0xccf   :  { %v1935_v20 = vmax.f32 %v1697_v7, 0.0  ;;  %v1937_v22 = vmax.f32 %v1740_v8, 0.0  ;;  %v1691_v7 = vadd.f32 %v18664_v44, %v1346_v46  ;;  %v17270_v44 = vld [vmem:[%s22050_s18 + $0x278] sm:$0xff]   ;;  %v17284_v46 = vld [vmem:[%s22050_s18 + $0x220] sm:$0xff]  }
 0xcd0   :  { %v1778_v40 = vpop.f32.mrf.mxu0  ;;  %v1821_v23 = vpop.f32.mrf.mxu1 }
 0xcd1   :  { %v1953_v26 = vpack.c.bf16 %v1937_v22, %v1921_v18  ;;  %15718 = vmatpush3.bf16.msra.mxu0 %v17244_v9  ;;  %15740 = vmatpush3.bf16.msra.mxu1 %v17245_v10  ;;  %v1951_v29 = vpack.c.bf16 %v1935_v20, %v1919_v24  ;;  %v1779_v0 = vadd.f32 %v1778_v40, %v1366_v58  ;;  %v17268_v9 = vld [vmem:[%s22050_s18 + $0x100] sm:$0xff]   ;;  %v1918_v22 = vmax.f32 %v1691_v7, 0.0 }
 0xcd2   :  { %15719 = vmatprep.subr.bf16.mxu0 %v17246_v16  ;;  %15741 = vmatprep.subr.bf16.mxu1 %v17247_v17  ;;  %v18746_v52 = vpop.f32.mrf.mxu0  ;;  %v18748_v53 = vpop.f32.mrf.mxu1  ;;  %v17269_v10 = vld [vmem:[%s22050_s18 + $0x180] sm:$0xff]   ;;  %v1934_v16 = vmax.f32 %v1695_v2, 0.0  ;;  %v1936_v17 = vmax.f32 %v1738_v3, 0.0  ;;  %v1822_v18 = vadd.f32 %v1821_v23, %v1374_v4  ;;  %v1920_v24 = vmax.f32 %v1734_v63, 0.0  ;;  %v17276_v23 = vld [vmem:[%s22050_s18 + $0x230] sm:$0xff]   ;;  %v17289_v3 = vld [vmem:[%s22050_s18 + $0x298] sm:$0xff]  }
 0xcd3   :  { %3148 = vmatprep.mubr.bf16.mxu1 %v1953_v26  ;;  %3107 = vmatprep.mubr.bf16.mxu0 %v1951_v29  ;;  %v17293_v63 = vld [vmem:[%s22050_s18 + $0x290] sm:$0xff]  }
 0xcd4   :  { %v1782_v57 = vpop.f32.mrf.mxu0  ;;  %v1825_v59 = vpop.f32.mrf.mxu1  ;;  %v1950_v29 = vpack.c.bf16 %v1934_v16, %v1918_v22  ;;  %v17298_v22 = vld [vmem:[%s22050_s18 + $0x240] sm:$0xff]  }
 0xcd5   :  { %15720 = vmatpush3.bf16.msra.mxu0 %v17248_v27  ;;  %15742 = vmatpush3.bf16.msra.mxu1 %v17249_v28  ;;  %v1783_v6 = vadd.f32 %v1782_v57, %v1366_v58  ;;  %v1826_v8 = vadd.f32 %v1825_v59, %v1374_v4  ;;  %v1923_v27 = vmax.f32 %v1779_v0, 0.0  ;;  %v17272_v28 = vld [vmem:[%s22050_s18 + $0x238] sm:$0xff]   ;;  %v17285_v57 = vld [vmem:[%s22050_s18 + $0x2a0] sm:$0xff]   ;;  %v17290_v4 = vld [vmem:[%s22050_s18 + $0x250] sm:$0xff]  }
 0xcd6   :  { %15721 = vmatprep.subr.bf16.mxu0 %v17250_v31  ;;  %15743 = vmatprep.subr.bf16.mxu1 %v17251_v33  ;;  %v1952_v31 = vpack.c.bf16 %v1936_v17, %v1920_v24  ;;  %v1925_v33 = vmax.f32 %v1822_v18, 0.0  ;;  %v18844_v49 = vpop.f32.mrf.mxu1  ;;  %v17286_v58 = vld [vmem:[%s22050_s18 + $0x258] sm:$0xff]   ;;  %v17295_v0 = vld [vmem:[%s22050_s18 + $0x2c8] sm:$0xff]  }
 0xcd7   :  { %v1939_v20 = vmax.f32 %v1783_v6, 0.0  ;;  %v1941_v26 = vmax.f32 %v1826_v8, 0.0  ;;  %v17287_v59 = vld [vmem:[%s22050_s18 + $0x2d8] sm:$0xff]   ;;  %v17292_v6 = vld [vmem:[%s22050_s18 + $0x210] sm:$0xff]   ;;  %v17294_v8 = vld [vmem:[%s22050_s18 + $0x248] sm:$0xff]  }
 0xcd8   :  { %v1907_v2 = vpop.f32.mrf.mxu1  ;;  %v17296_v17 = vld [vmem:[%s22050_s18 + $0x208] sm:$0xff]  }
 0xcd9   :  { %15722 = vmatpush3.bf16.msra.mxu0 %v17252_v37  ;;  %15744 = vmatpush3.bf16.msra.mxu1 %v17253_v38  ;;  %v17273_v37 = vld [vmem:[%s22050_s18 + $0x2b8] sm:$0xff]   ;;  %v1955_v38 = vpack.c.bf16 %v1939_v20, %v1923_v27  ;;  %v1957_v40 = vpack.c.bf16 %v1941_v26, %v1925_v33  ;;  %v17297_v20 = vld [vmem:[%s22050_s18 + $0x288] sm:$0xff]   ;;  %v1390_v26 = vrot.slane %v18769_v56, %v18659_v30  ;;  %v17300_v33 = vld [vmem:[%s22050_s18 + $0x200] sm:$0xff]  }
 0xcda   :  { %15723 = vmatprep.subr.bf16.mxu0 %v17254_v32  ;;  %15745 = vmatprep.subr.bf16.mxu1 %v17255_v34  ;;  %v17274_v32 = vld [vmem:[%s22050_s18 + $0x270] sm:$0xff]   ;;  %v18872_v7 = vpop.f32.mrf.mxu1 }
 0xcdb   :  { %v17275_v34 = vld [vmem:[%s22050_s18 + $0x2f0] sm:$0xff]  }
 0xcdd   :  { %15724 = vmatpush3.bf16.msra.mxu0 %v17256_v42  ;;  %15746 = vmatpush3.bf16.msra.mxu1 %v17257_v43  ;;  %v17277_v42 = vld [vmem:[%s22050_s18 + $0x2b0] sm:$0xff]   ;;  %v17278_v43 = vld [vmem:[%s22050_s18 + $0x268] sm:$0xff]  }
 0xcde   :  { %15725 = vmatprep.subr.bf16.mxu0 %v17258_v47  ;;  %15747 = vmatprep.subr.bf16.mxu1 %v17259_v48  ;;  %v17279_v47 = vld [vmem:[%s22050_s18 + $0x2e8] sm:$0xff]  }
 0xcdf   :  { %v17280_v48 = vld [vmem:[%s22050_s18 + $0x228] sm:$0xff]  }
 0xce1   :  { %15726 = vmatpush3.bf16.msra.mxu0 %v17260_v54  ;;  %15748 = vmatpush3.bf16.msra.mxu1 %v17261_v55  ;;  %v17281_v54 = vld [vmem:[%s22050_s18 + $0x2a8] sm:$0xff]   ;;  %v17282_v55 = vld [vmem:[%s22050_s18 + $0x260] sm:$0xff]  }
 0xce2   :  { %15727 = vmatprep.subr.bf16.mxu0 %v17262_v11  ;;  %15749 = vmatprep.subr.bf16.mxu1 %v17263_v19  ;;  %v17283_v11 = vld [vmem:[%s22050_s18 + $0x2e0] sm:$0xff]   ;;  %v18839_v19 = vpop.f32.mrf.mxu0 }
 0xce5   :  { %15728 = vmatpush3.bf16.msra.mxu0 %v17264_v60  ;;  %15750 = vmatpush3.bf16.msra.mxu1 %v17265_v14  ;;  %v1864_v60 = vpop.f32.mrf.mxu0  ;;  %v17288_v14 = vld [vmem:[%s22050_s18 + $0x218] sm:$0xff]  }
 0xce6   :  { %15729 = vmatprep.subr.bf16.mxu0 %v17266_v25  ;;  %15751 = vmatprep.subr.bf16.mxu1 %v17267_v5  ;;  %v17291_v25 = vld [vmem:[%s22050_s18 + $0x2d0] sm:$0xff]  }
 0xce7   :  { %v18867_v5 = vpop.f32.mrf.mxu0 }
 0xce9   :  { %15730 = vmatpush3.bf16.msra.mxu0 %v17268_v9  ;;  %15752 = vmatpush3.bf16.msra.mxu1 %v17269_v10  ;;  %v1362_v9 = vrot.slane %v18769_v56, %v18640_v21  ;;  %v1370_v10 = vrot.slane %v18769_v56, %v18643_v15  ;;  %v1868_v16 = vpop.f32.mrf.mxu0 }
 0xcea   :  { %15759 = vmatprep.subr.bf16.mxu0 %v17270_v44  ;;  %15781 = vmatprep.subr.bf16.mxu1 %v17271_v45  ;;  %v1382_v44 = vrot.slane %v18769_v56, %v18662_v39  ;;  %v1911_v45 = vpop.f32.mrf.mxu1 }
 0xceb   :  { %v1781_v18 = vadd.f32 %v18746_v52, %v1362_v9  ;;  %v1824_v24 = vadd.f32 %v18748_v53, %v1370_v10  ;;  %v17299_v52 = vld [vmem:[%s22050_s18 + $0x2c0] sm:$0xff]   ;;  %v1777_v27 = vadd.f32 %v18712_v35, %v1362_v9  ;;  %v17302_v35 = vld [vmem:[%s22050_s18 + $0x378] sm:$0xff]  }
 0xcec   :  { %3108 = vmatmul.mubr.bf16.vlgmr.msra.gmra.mxu0 %v1950_v29  ;;  %3149 = vmatmul.mubr.bf16.vlgmr.msra.gmra.mxu1 %v1952_v31  ;;  %v1820_v29 = vadd.f32 %v18714_v36, %v1370_v10  ;;  %v1912_v31 = vadd.f32 %v1911_v45, %v1390_v26  ;;  %v1908_v36 = vadd.f32 %v1907_v2, %v1390_v26  ;;  %v17309_v2 = vld [vmem:[%s22050_s18 + $0x3b0] sm:$0xff]   ;;  %v17317_v9 = vld [vmem:[%s22050_s18 + $0x3a0] sm:$0xff]   ;;  %v17318_v10 = vld [vmem:[%s22050_s18 + $0x358] sm:$0xff]  }
 0xced   :  { %15760 = vmatpush3.bf16.msra.mxu0 %v17272_v28  ;;  %3189 = vmatprep.mubr.bf16.mxu0 %v1955_v38  ;;  %v1869_v28 = vadd.f32 %v1868_v16, %v1382_v44  ;;  %v1938_v53 = vmax.f32 %v1781_v18, 0.0  ;;  %v17301_v38 = vld [vmem:[%s22050_s18 + $0x280] sm:$0xff]   ;;  %v17319_v16 = vld [vmem:[%s22050_s18 + $0x3d8] sm:$0xff]   ;;  %v17323_v45 = vld [vmem:[%s22050_s18 + $0x3d0] sm:$0xff]  }
 0xcee   :  { %15782 = vmatpush3.bf16.msra.mxu1 %v17273_v37  ;;  %3230 = vmatprep.mubr.bf16.mxu1 %v1957_v40  ;;  %v1865_v37 = vadd.f32 %v1864_v60, %v1382_v44  ;;  %v1922_v40 = vmax.f32 %v1777_v27, 0.0  ;;  %v17321_v18 = vld [vmem:[%s22050_s18 + $0x398] sm:$0xff]   ;;  %v17322_v44 = vld [vmem:[%s22050_s18 + $0x350] sm:$0xff]   ;;  %v17327_v26 = vld [vmem:[%s22050_s18 + $0x3c8] sm:$0xff]   ;;  %v1386_v27 = vrot.slane %v18769_v56, %v18744_v51 }
 0xcef   :  { %15761 = vmatprep.subr.bf16.mxu0 %v17274_v32  ;;  %15783 = vmatprep.subr.bf16.mxu1 %v17275_v34  ;;  %v1940_v32 = vmax.f32 %v1824_v24, 0.0  ;;  %v17303_v34 = vld [vmem:[%s22050_s18 + $0x3f8] sm:$0xff]   ;;  %v17326_v24 = vld [vmem:[%s22050_s18 + $0x348] sm:$0xff]  }
 0xcf1   :  { %15762 = vmatpush3.bf16.msra.mxu0 %v17276_v23  ;;  %v1943_v23 = vmax.f32 %v1869_v28, 0.0  ;;  %v17328_v28 = vld [vmem:[%s22050_s18 + $0x308] sm:$0xff]  }
 0xcf2   :  { %15784 = vmatpush3.bf16.msra.mxu1 %v17277_v42  ;;  %15763 = vmatprep.subr.bf16.mxu0 %v17278_v43  ;;  %v1924_v42 = vmax.f32 %v1820_v29, 0.0  ;;  %v1945_v43 = vmax.f32 %v1912_v31, 0.0  ;;  %v17329_v31 = vld [vmem:[%s22050_s18 + $0x388] sm:$0xff]  }
 0xcf3   :  { %15785 = vmatprep.subr.bf16.mxu1 %v17279_v47  ;;  %v17304_v47 = vld [vmem:[%s22050_s18 + $0x338] sm:$0xff]  }
 0xcf5   :  { %15764 = vmatpush3.bf16.msra.mxu0 %v17280_v48  ;;  %v1954_v48 = vpack.c.bf16 %v1938_v53, %v1922_v40  ;;  %v1910_v53 = vadd.f32 %v18872_v7, %v1386_v27  ;;  %v17333_v7 = vld [vmem:[%s22050_s18 + $0x380] sm:$0xff]  }
 0xcf6   :  { %15786 = vmatpush3.bf16.msra.mxu1 %v17281_v54  ;;  %15765 = vmatprep.subr.bf16.mxu0 %v17282_v55  ;;  %v1927_v54 = vmax.f32 %v1865_v37, 0.0  ;;  %v17305_v55 = vld [vmem:[%s22050_s18 + $0x3b8] sm:$0xff]  }
 0xcf7   :  { %15787 = vmatprep.subr.bf16.mxu1 %v17283_v11  ;;  %v1956_v11 = vpack.c.bf16 %v1940_v32, %v1924_v42  ;;  %v1944_v32 = vmax.f32 %v1910_v53, 0.0 }
 0xcf9   :  { %15766 = vmatpush3.bf16.msra.mxu0 %v17284_v46  ;;  %v1929_v46 = vmax.f32 %v1908_v36, 0.0 }
 0xcfa   :  { %15788 = vmatpush3.bf16.msra.mxu1 %v17285_v57  ;;  %15767 = vmatprep.subr.bf16.mxu0 %v17286_v58  ;;  %v17306_v57 = vld [vmem:[%s22050_s18 + $0x370] sm:$0xff]   ;;  %v1959_v58 = vpack.c.bf16 %v1943_v23, %v1927_v54 }
 0xcfb   :  { %15789 = vmatprep.subr.bf16.mxu1 %v17287_v59  ;;  %v17307_v59 = vld [vmem:[%s22050_s18 + $0x3f0] sm:$0xff]   ;;  %v1961_v60 = vpack.c.bf16 %v1945_v43, %v1929_v46 }
 0xcfd   :  { %15768 = vmatpush3.bf16.msra.mxu0 %v17288_v14  ;;  %v17308_v14 = vld [vmem:[%s22050_s18 + $0x330] sm:$0xff]  }
 0xcfe   :  { %15790 = vmatpush3.bf16.msra.mxu1 %v17289_v3  ;;  %15769 = vmatprep.subr.bf16.mxu0 %v17290_v4  ;;  %v17310_v3 = vld [vmem:[%s22050_s18 + $0x368] sm:$0xff]  }
 0xcff   :  { %15791 = vmatprep.subr.bf16.mxu1 %v17291_v25  ;;  %v17311_v4 = vld [vmem:[%s22050_s18 + $0x3e8] sm:$0xff]  }
 0xd00   :  { %v17312_v25 = vld [vmem:[%s22050_s18 + $0x328] sm:$0xff]  }
 0xd01   :  { %15770 = vmatpush3.bf16.msra.mxu0 %v17292_v6  ;;  %v17313_v6 = vld [vmem:[%s22050_s18 + $0x3a8] sm:$0xff]  }
 0xd02   :  { %15792 = vmatpush3.bf16.msra.mxu1 %v17293_v63  ;;  %15771 = vmatprep.subr.bf16.mxu0 %v17294_v8  ;;  %v17314_v63 = vld [vmem:[%s22050_s18 + $0x360] sm:$0xff]  }
 0xd03   :  { %15793 = vmatprep.subr.bf16.mxu1 %v17295_v0  ;;  %v17315_v8 = vld [vmem:[%s22050_s18 + $0x3e0] sm:$0xff]  }
 0xd04   :  { %v17316_v0 = vld [vmem:[%s22050_s18 + $0x320] sm:$0xff]  }
 0xd05   :  { %15772 = vmatpush3.bf16.msra.mxu0 %v17296_v17  ;;  %v17320_v17 = vld [vmem:[%s22050_s18 + $0x318] sm:$0xff]  }
 0xd06   :  { %15794 = vmatpush3.bf16.msra.mxu1 %v17297_v20  ;;  %15773 = vmatprep.subr.bf16.mxu0 %v17298_v22  ;;  %v17324_v20 = vld [vmem:[%s22050_s18 + $0x310] sm:$0xff]  }
 0xd07   :  { %15795 = vmatprep.subr.bf16.mxu1 %v17299_v52  ;;  %v17325_v22 = vld [vmem:[%s22050_s18 + $0x390] sm:$0xff]   ;;  %v1378_v52 = vrot.slane %v18769_v56, %v18741_v50  ;;  %v17331_v56 = vld [vmem:[%s22050_s18 + $0x3c0] sm:$0xff]  }
 0xd09   :  { %15774 = vmatpush3.bf16.msra.mxu0 %v17300_v33  ;;  %v1867_v29 = vadd.f32 %v18867_v5, %v1378_v52  ;;  %v17330_v33 = vld [vmem:[%s22050_s18 + $0x340] sm:$0xff]   ;;  %v1863_v37 = vadd.f32 %v18839_v19, %v1378_v52  ;;  %v1906_v5 = vadd.f32 %v18844_v49, %v1386_v27 }
 0xd0a   :  { %15796 = vmatpush3.bf16.msra.mxu1 %v17301_v38  ;;  %15803 = vmatprep.subr.bf16.mxu0 %v17302_v35  ;;  %v17332_v38 = vld [vmem:[%s22050_s18 + $0x300] sm:$0xff]  }
 0xd0b   :  { %15825 = vmatprep.subr.bf16.mxu1 %v17303_v34  ;;  %v1942_v35 = vmax.f32 %v1867_v29, 0.0  ;;  %v1926_v36 = vmax.f32 %v1863_v37, 0.0  ;;  %v1928_v34 = vmax.f32 %v1906_v5, 0.0 }
 0xd0c   :  { %3190 = vmatmul.mubr.bf16.vlgmr.msra.gmra.mxu0 %v1954_v48 }
 0xd0d   :  { %3231 = vmatmul.mubr.bf16.vlgmr.msra.gmra.mxu1 %v1956_v11  ;;  %15804 = vmatpush3.bf16.msra.mxu0 %v17304_v47  ;;  %v1958_v19 = vpack.c.bf16 %v1942_v35, %v1926_v36  ;;  %v1960_v49 = vpack.c.bf16 %v1944_v32, %v1928_v34 }
 0xd0e   :  { %3271 = vmatprep.mubr.bf16.mxu0 %v1959_v58  ;;  %15826 = vmatpush3.bf16.msra.mxu1 %v17305_v55 }
 0xd0f   :  { %3312 = vmatprep.mubr.bf16.mxu1 %v1961_v60  ;;  %15805 = vmatprep.subr.bf16.mxu0 %v17306_v57 }
 0xd10   :  { %15827 = vmatprep.subr.bf16.mxu1 %v17307_v59 }
 0xd11   :  { %15806 = vmatpush3.bf16.msra.mxu0 %v17308_v14 }
 0xd12   :  { %15828 = vmatpush3.bf16.msra.mxu1 %v17309_v2  ;;  %15807 = vmatprep.subr.bf16.mxu0 %v17310_v3  ;;  %v14206_v3 = vld [vmem:[%s22051_s19] ss:$0 sm:$0xff] }
 0xd13   :  { %15829 = vmatprep.subr.bf16.mxu1 %v17311_v4 }
 0xd15   :  { %15808 = vmatpush3.bf16.msra.mxu0 %v17312_v25 }
 0xd16   :  { %15830 = vmatpush3.bf16.msra.mxu1 %v17313_v6  ;;  %15809 = vmatprep.subr.bf16.mxu0 %v17314_v63 }
 0xd17   :  { %15831 = vmatprep.subr.bf16.mxu1 %v17315_v8 }
 0xd19   :  { %15810 = vmatpush3.bf16.msra.mxu0 %v17316_v0 }
 0xd1a   :  { %15832 = vmatpush3.bf16.msra.mxu1 %v17317_v9  ;;  %15811 = vmatprep.subr.bf16.mxu0 %v17318_v10 }
 0xd1b   :  { %15833 = vmatprep.subr.bf16.mxu1 %v17319_v16 }
 0xd1d   :  { %15812 = vmatpush3.bf16.msra.mxu0 %v17320_v17 }
 0xd1e   :  { %15834 = vmatpush3.bf16.msra.mxu1 %v17321_v18  ;;  %15813 = vmatprep.subr.bf16.mxu0 %v17322_v44 }
 0xd1f   :  { %15835 = vmatprep.subr.bf16.mxu1 %v17323_v45 }
 0xd21   :  { %15814 = vmatpush3.bf16.msra.mxu0 %v17324_v20 }
 0xd22   :  { %15836 = vmatpush3.bf16.msra.mxu1 %v17325_v22  ;;  %15815 = vmatprep.subr.bf16.mxu0 %v17326_v24 }
 0xd23   :  { %15837 = vmatprep.subr.bf16.mxu1 %v17327_v26 }
 0xd25   :  { %15816 = vmatpush3.bf16.msra.mxu0 %v17328_v28 }
 0xd26   :  { %15838 = vmatpush3.bf16.msra.mxu1 %v17329_v31  ;;  %15817 = vmatprep.subr.bf16.mxu0 %v17330_v33 }
 0xd27   :  { %15839 = vmatprep.subr.bf16.mxu1 %v17331_v56 }
 0xd29   :  { %15818 = vmatpush3.bf16.msra.mxu0 %v17332_v38 }
 0xd2a   :  { %15840 = vmatpush3.bf16.msra.mxu1 %v17333_v7  ;;  %16753 = vmatprep.subr.bf16.mxu0 %v18033_v1 }
 0xd2c   :  { %3272 = vmatmul.mubr.bf16.vlgmr.msra.gmra.mxu0 %v1958_v19 }
 0xd2d   :  { %3313 = vmatmul.mubr.bf16.vlgmr.msra.gmra.mxu1 %v1960_v49  ;;  %16757 = vmatprep.mubr.msk.bf16.mxu0 %vm18034_vm0, %v18033_v1 }
 0xd8c   :  { %v15687_v40 = vpop.f32.mrf.mxu0  ;;  %v15709_v23 = vpop.f32.mrf.mxu1 }
 0xd8e   :  { %v15688_v42 = vpop.f32.mrf.mxu0  ;;  %v15710_v43 = vpop.f32.mrf.mxu1 }
 0xd8f   :  { %v15689_v2 = vadd.f32 %v15688_v42, %v15687_v40  ;;  %v15711_v9 = vadd.f32 %v15710_v43, %v15709_v23 }
 0xd90   :  { %v15690_v47 = vpop.f32.mrf.mxu0  ;;  %v15712_v48 = vpop.f32.mrf.mxu1 }
 0xd91   :  { %v3028_v6 = vadd.f32 %v15689_v2, %v14206_v3 }
 0xd92   :  { %v15691_v54 = vpop.f32.mrf.mxu0  ;;  %v15713_v11 = vpop.f32.mrf.mxu1 }
 0xd93   :  { %v15692_v63 = vadd.f32 %v15691_v54, %v15690_v47  ;;  %v3069_v16 = vadd.f32 %v15711_v9, %v3028_v6  ;;  %v15714_v45 = vadd.f32 %v15713_v11, %v15712_v48 }
 0xd95   :  { %v3031_v17 = vadd.f32 %v15692_v63, %v14206_v3 }
 0xd97   :  { %v3072_v24 = vadd.f32 %v15714_v45, %v3031_v17  ;;  %v17335_v17 = vld [vmem:[%s22042_s10 + $0x10] sm:$0xff]  }
 0xdac   :  { %v15731_v55 = vpop.f32.mrf.mxu0  ;;  %v15753_v46 = vpop.f32.mrf.mxu1 }
 0xdae   :  { %v15732_v57 = vpop.f32.mrf.mxu0  ;;  %v15754_v58 = vpop.f32.mrf.mxu1 }
 0xdaf   :  { %v15733_v10 = vadd.f32 %v15732_v57, %v15731_v55  ;;  %v15755_v26 = vadd.f32 %v15754_v58, %v15753_v46 }
 0xdb0   :  { %v15734_v59 = vpop.f32.mrf.mxu0  ;;  %v15756_v60 = vpop.f32.mrf.mxu1 }
 0xdb1   :  { %v3110_v20 = vadd.f32 %v15733_v10, %v3069_v16 }
 0xdb2   :  { %v15735_v14 = vpop.f32.mrf.mxu0  ;;  %v15757_v25 = vpop.f32.mrf.mxu1 }
 0xdb3   :  { %v15736_v22 = vadd.f32 %v15735_v14, %v15734_v59  ;;  %v3151_v29 = vadd.f32 %v15755_v26, %v3110_v20  ;;  %v15758_v33 = vadd.f32 %v15757_v25, %v15756_v60 }
 0xdb5   :  { %v3113_v31 = vadd.f32 %v15736_v22, %v3072_v24 }
 0xdb7   :  { %v3154_v38 = vadd.f32 %v15758_v33, %v3113_v31  ;;  %v14336_v33 = vld [vmem:[%s22053_s21] ss:$0 sm:$0xff] }
 0xdcc   :  { %v15775_v4 = vpop.f32.mrf.mxu0 }
 0xdcd   :  { %v15797_v8 = vpop.f32.mrf.mxu1 }
 0xdce   :  { %v15776_v0 = vpop.f32.mrf.mxu0 }
 0xdcf   :  { %v15798_v18 = vpop.f32.mrf.mxu1  ;;  %v15777_v52 = vadd.f32 %v15776_v0, %v15775_v4 }
 0xdd0   :  { %v15778_v44 = vpop.f32.mrf.mxu0  ;;  %v15799_v35 = vadd.f32 %v15798_v18, %v15797_v8 }
 0xdd1   :  { %v15800_v27 = vpop.f32.mrf.mxu1  ;;  %v3192_v53 = vadd.f32 %v15777_v52, %v3151_v29 }
 0xdd2   :  { %v15779_v28 = vpop.f32.mrf.mxu0 }
 0xdd3   :  { %v15780_v56 = vadd.f32 %v15779_v28, %v15778_v44  ;;  %v15801_v37 = vpop.f32.mrf.mxu1  ;;  %v3233_v36 = vadd.f32 %v15799_v35, %v3192_v53 }
 0xdd4   :  { %v15802_v23 = vadd.f32 %v15801_v37, %v15800_v27  ;;  %v14335_v27 = vld [vmem:[%s22052_s20] ss:$0 sm:$0xff] }
 0xdd5   :  { %v3195_v34 = vadd.f32 %v15780_v56, %v3154_v38  ;;  %v14342_v38 = vld [vmem:[%s22043_s11 + $0x1] ss:$0 sm:$0xff] }
 0xdd7   :  { %v3236_v54 = vadd.f32 %v15802_v23, %v3195_v34 }
 0xdec   :  { %v15819_v5 = vpop.f32.mrf.mxu0 }
 0xded   :  { %v15841_v7 = vpop.f32.mrf.mxu1 }
 0xdee   :  { %v15820_v32 = vpop.f32.mrf.mxu0 }
 0xdef   :  { %v15821_v19 = vadd.f32 %v15820_v32, %v15819_v5  ;;  %v15842_v49 = vpop.f32.mrf.mxu1 }
 0xdf0   :  { %v15822_v40 = vpop.f32.mrf.mxu0  ;;  %v15843_v43 = vadd.f32 %v15842_v49, %v15841_v7 }
 0xdf1   :  { %v3274_v42 = vadd.f32 %v15821_v19, %v3233_v36  ;;  %v15844_v47 = vpop.f32.mrf.mxu1 }
 0xdf2   :  { %v15823_v48 = vpop.f32.mrf.mxu0 }
 0xdf3   :  { %v3315_v55 = vadd.f32 %v15843_v43, %v3274_v42  ;;  %v15824_v11 = vadd.f32 %v15823_v48, %v15822_v40  ;;  %v15845_v46 = vpop.f32.mrf.mxu1 }
 0xdf4   :  { %v15846_v58 = vadd.f32 %v15845_v46, %v15844_v47 }
 0xdf5   :  { %v3277_v57 = vadd.f32 %v15824_v11, %v3236_v54  ;;  %v3321_v59 = vadd.f32 %v3315_v55, %v18451_v61  ;;  %v19094_v11 = vld [vmem:[%s22109_s28 + $0x8] sm:$0xff] }
 0xdf7   :  { %v3318_v60 = vadd.f32 %v15846_v58, %v3277_v57  ;;  %v3325_v14 = vsel %vm184_vm2, %v3321_v59, 0.0  ;;  %v19100_v58 = vld [vmem:[%s22109_s28] sm:$0xff]  ;;  %s22110_s28 = smov 56  }
 0xdf8   :  { %3326 = vadd.xlane.f32.xlu1 %v3325_v14 }
 0xdf9   :  { %v3322_v2 = vadd.f32 %v3318_v60, %v18453_v62  ;;  %v17334_v62 = vld [vmem:[%s22042_s10 + $0x18] sm:$0xff]  }
 0xdfa   :  { %16754 = vmatpush3.bf16.msra.mxu0 %v17334_v62 }
 0xdfb   :  { %v3328_v3 = vsel %vm184_vm2, %v3322_v2, 0.0  ;;  %16755 = vmatprep.subr.bf16.mxu0 %v18033_v1 }
 0xdfc   :  { %3329 = vadd.xlane.f32.xlu0 %v3328_v3 }
 0xdfe   :  { %16756 = vmatpush3.bf16.msra.mxu0 %v17335_v17 }
 0xe81   :  { %v3327_v4 = vpop.xlane.xlu1 %3326 }
 0xe82   :  { %v3331_v25 = vmul.f32 0.03125, %v3327_v4 }
 0xe84   :  { %v3333_v6 = vsub.f32 %v3321_v59, %v3331_v25 }
 0xe85   :  { %v3330_v63 = vpop.xlane.xlu0 %3329 }
 0xe86   :  { %v3332_v8 = vmul.f32 0.03125, %v3330_v63  ;;  %v3335_v0 = vmul.f32 %v3333_v6, %v3333_v6 }
 0xe88   :  { %v3334_v9 = vsub.f32 %v3322_v2, %v3332_v8  ;;  %v3337_v10 = vsel %vm184_vm2, %v3335_v0, 0.0 }
 0xe89   :  { %3338 = vadd.xlane.f32.xlu1 %v3337_v10 }
 0xe8a   :  { %v3336_v61 = vmul.f32 %v3334_v9, %v3334_v9 }
 0xe8c   :  { %v3340_v16 = vsel %vm184_vm2, %v3336_v61, 0.0 }
 0xe8d   :  { %3341 = vadd.xlane.f32.xlu0 %v3340_v16 }
 0xf12   :  { %v3339_v18 = vpop.xlane.xlu1 %3338 }
 0xf13   :  { %v3343_v44 = vmul.f32 0.03125, %v3339_v18 }
 0xf15   :  { %v3345_v45 = vadd.f32 1e-05, %v3343_v44 }
 0xf16   :  { %v3342_v20 = vpop.xlane.xlu0 %3341 }
 0xf17   :  { %17764 = vrsqrt.f32 %v3345_v45  ;;  %v3344_v22 = vmul.f32 0.03125, %v3342_v20 }
 0xf19   :  { %v3346_v24 = vadd.f32 1e-05, %v3344_v22 }
 0xf1b   :  { %17766 = vrsqrt.f32 %v3346_v24 }
 0xf24   :  { %v17765_v26 = vpop.eup %17764 }
 0xf25   :  { %v3349_v52 = vmul.f32 %v17765_v26, %v3333_v6 }
 0xf27   :  { %v3357_v31 = vmul.f32 %v14335_v27, %v3349_v52 }
 0xf28   :  { %v17767_v28 = vpop.eup %17766 }
 0xf29   :  { %v3350_v29 = vmul.f32 %v17767_v28, %v3334_v9  ;;  %v19042_v56 = vadd.f32 %v14336_v33, %v3357_v31 }
 0xf2b   :  { %v3358_v53 = vmul.f32 %v14335_v27, %v3350_v29 }
 0xf2d   :  { %v19044_v37 = vadd.f32 %v14336_v33, %v3358_v53  ;;  %v14347_v53 = vld [vmem:[%s22044_s12 + $0x14] sm:$0xf] }
 0xf2f   :  { %v3367_v5 = vpack.c.bf16 %v19044_v37, %v19042_v56 }
 0xf31   :  { %16758 = vmatmul.mubr.msk.bf16.vlgmr.msra.gmra.mxu0 %vm184_vm2, %v3367_v5  ;;  %v3850_v5 = vsel %vm642_vm5, %v14347_v53, 0 }
 0xff1   :  { %v3430_v35 = vpop.f32.mrf.mxu0 }
 0xff2   :  { %v19052_v7 = vadd.f32 %v14342_v38, %v3430_v35 }
 0xff3   :  { %v16759_v32 = vpop.f32.mrf.mxu0 }
 0xff4   :  { %3446 = vrot.lane.b32.xlu0 %v19052_v7, %s22084_s1  ;;  %v19057_v36 = vmul.f32 0.35355338, %v19052_v7 }
 0xff5   :  { %v3433_v34 = vpop.f32.mrf.mxu0 }
 0xff6   :  { %v19059_v19 = vadd.f32 %v14342_v38, %v3433_v34  ;;  %16765 = vmatprep.mubr.msk.f32.mxu1 %vm241_vm3, %v19057_v36 }
 0xff7   :  { %v16760_v49 = vpop.f32.mrf.mxu0 }
 0xff8   :  { %3645 = vrot.lane.b32.xlu0 %v19057_v36, %s22078_s8  ;;  %3448 = vrot.lane.b32.xlu1 %v19059_v19, %s22084_s1  ;;  %v19072_v40 = vmul.f32 0.35355338, %v19059_v19  ;;  %s22127_s1 = sld [smem:[#allocation23_spill]] }
 0xffc   :  { %3651 = vrot.lane.b32.xlu1 %v19059_v19, %s22080_s26 }
0x1000   :  { %3649 = vrot.lane.b32.xlu1 %v19052_v7, %s22080_s26  ;;  %s22117_s26 = sld [smem:[#allocation20_spill]] }
0x1004   :  { %3647 = vrot.lane.b32.xlu1 %v19072_v40, %s22078_s8 }
0x1066   :  { %v3447_v23 = vpop.permute.xlu0 %3446 }
0x106a   :  { %v3646_v42 = vpop.permute.xlu0 %3645  ;;  %v3449_v43 = vpop.permute.xlu1 %3448 }
0x106b   :  { %16761 = vmatprep.subr.msk.mxu1 %vm241_vm3, %v3449_v43  ;;  %16779 = vmatprep.mubr.msk.f32.mxu0 %vm241_vm3, %v3646_v42 }
0x106c   :  { %16762 = vmatpush3.xpose.msk.msra.mxu1 %vm241_vm3, %v3449_v43 }
0x106d   :  { %16763 = vmatprep.subr.msk.mxu1 %vm241_vm3, %v3447_v23 }
0x106e   :  { %v3652_v47 = vpop.permute.xlu1 %3651 }
0x106f   :  { %16775 = vmatprep.subr.msk.mxu0 %vm241_vm3, %v3652_v47 }
0x1070   :  { %16764 = vmatpush3.xpose.msk.msra.mxu1 %vm241_vm3, %v3447_v23  ;;  %16776 = vmatpush3.xpose.msk.msra.mxu0 %vm241_vm3, %v3652_v47 }
0x1072   :  { %v3650_v48 = vpop.permute.xlu1 %3649 }
0x1073   :  { %16766 = vmatmul.mubr.msk.f32.vlgmr.msra.gmra.mxu1 %vm241_vm3, %v19072_v40  ;;  %16777 = vmatprep.subr.msk.mxu0 %vm241_vm3, %v3650_v48 }
0x1074   :  { %16778 = vmatpush3.xpose.msk.msra.mxu0 %vm241_vm3, %v3650_v48 }
0x1075   :  { %16789 = vmatprep.subr.bf16.mxu0 %v18033_v1 }
0x1076   :  { %v3648_v54 = vpop.permute.xlu1 %3647 }
0x1077   :  { %16780 = vmatmul.mubr.msk.f32.vlgmr.msra.gmra.mxu0 %vm241_vm3, %v3648_v54 }
0x1078   :  { %16791 = vmatprep.mubr.msk.bf16.mxu0 %vm18034_vm0, %v18033_v1  ;;  %16790 = vmatpush3.bf16.msra.mxu0 %v3850_v5 }
0x1133   :  { %v16767_v55 = vpop.f32.mrf.mxu1 }
0x1134   :  { %v3532_v46 = vadd.f32 %v19094_v11, %v16767_v55 }
0x1135   :  { %v3526_v57 = vpop.f32.mrf.mxu1 }
0x1136   :  { %v3527_v59 = vadd.f32 %v19100_v58, %v3526_v57  ;;  %v3538_v60 = vsel %vm327_vm4, %v3532_v46, -inf }
0x1137   :  { %3539 = vmax.xlane.f32.xlu1 %v3538_v60  ;;  %v16781_v14 = vpop.f32.mrf.mxu0 }
0x1138   :  { %v3535_v2 = vsel %vm327_vm4, %v3527_v59, -inf  ;;  %v3733_v25 = vadd.f32 %v19094_v11, %v16781_v14  ;;  %v14346_v14 = vld [vmem:[%s22044_s12 + $0x10] sm:$0xf] }
0x1139   :  { %3536 = vmax.xlane.f32.xlu0 %v3535_v2  ;;  %v3727_v3 = vpop.f32.mrf.mxu0  ;;  %v3897_v2 = vsel %vm642_vm5, %v14346_v14, 0 }
0x113a   :  { %v3728_v4 = vadd.f32 %v19100_v58, %v3727_v3  ;;  %v3739_v63 = vsel %vm327_vm4, %v3733_v25, -inf }
0x113c   :  { %v3736_v6 = vsel %vm327_vm4, %v3728_v4, -inf }
0x113d   :  { %3737 = vmax.xlane.f32.xlu0 %v3736_v6 }
0x1141   :  { %3740 = vmax.xlane.f32.xlu0 %v3739_v63 }
0x1148   :  { %3559 = vrot.lane.b32.xlu1 %v19059_v19, %s22082_s0 }
0x114c   :  { %3760 = vrot.lane.b32.xlu1 %v19059_v19, %s22110_s28 }
0x11c0   :  { %v3540_v8 = vpop.xlane.xlu1 %3539 }
0x11c1   :  { %v3542_v0 = vsub.f32 %v3532_v46, %v3540_v8 }
0x11c2   :  { %v3537_v9 = vpop.xlane.xlu0 %3536 }
0x11c3   :  { %v3545_v10 = vmul.f32 1.442695, %v3542_v0  ;;  %v3541_v61 = vsub.f32 %v3527_v59, %v3537_v9 }
0x11c4   :  { %v3560_v16 = vpop.permute.xlu1 %3559 }
0x11c5   :  { %17768 = vpow2.f32 %v3545_v10  ;;  %v3543_v62 = vmul.f32 1.442695, %v3541_v61  ;;  %16768 = vmatprep.subr.mxu1 %v3560_v16 }
0x11c6   :  { %16769 = vmatpush3.msra.mxu1 %v3560_v16  ;;  %v3738_v17 = vpop.xlane.xlu0 %3737 }
0x11c7   :  { %17770 = vpow2.f32 %v3543_v62  ;;  %v3742_v18 = vsub.f32 %v3728_v4, %v3738_v17 }
0x11c8   :  { %v3761_v38 = vpop.permute.xlu1 %3760 }
0x11c9   :  { %v3744_v44 = vmul.f32 1.442695, %v3742_v18 }
0x11ca   :  { %v3741_v45 = vpop.xlane.xlu0 %3740 }
0x11cb   :  { %17772 = vpow2.f32 %v3744_v44  ;;  %v3743_v20 = vsub.f32 %v3733_v25, %v3741_v45 }
0x11cd   :  { %v3746_v22 = vmul.f32 1.442695, %v3743_v20 }
0x11cf   :  { %17774 = vpow2.f32 %v3746_v22 }
0x11d2   :  { %v17769_v24 = vpop.eup %17768 }
0x11d3   :  { %v3550_v26 = vsel %vm327_vm4, %v17769_v24, 0.0 }
0x11d4   :  { %v17771_v52 = vpop.eup %17770  ;;  %3551 = vadd.xlane.f32.xlu0 %v3550_v26 }
0x11d5   :  { %v3547_v27 = vsel %vm327_vm4, %v17771_v52, 0.0 }
0x11d6   :  { %3548 = vadd.xlane.f32.xlu1 %v3547_v27 }
0x11d8   :  { %v17773_v28 = vpop.eup %17772 }
0x11d9   :  { %v3748_v29 = vsel %vm327_vm4, %v17773_v28, 0.0 }
0x11da   :  { %3749 = vadd.xlane.f32.xlu1 %v3748_v29 }
0x11dc   :  { %v17775_v31 = vpop.eup %17774 }
0x11dd   :  { %v3751_v33 = vsel %vm327_vm4, %v17775_v31, 0.0 }
0x11de   :  { %3752 = vadd.xlane.f32.xlu0 %v3751_v33 }
0x11eb   :  { %3758 = vrot.lane.b32.xlu1 %v19052_v7, %s22110_s28 }
0x11ef   :  { %3944 = vrot.lane.b32.xlu1 %v19052_v7, %s22111_s30 }
0x11f3   :  { %3942 = vrot.lane.b32.xlu1 %v19072_v40, %s22112_s7 }
0x11f4   :  { %3557 = vrot.lane.b32.xlu0 %v19052_v7, %s22082_s0  ;;  %s22122_s0 = sld [smem:[#allocation13_spill]] }
0x11f8   :  { %3946 = vrot.lane.b32.xlu0 %v19059_v19, %s22111_s30 }
0x11fc   :  { %3940 = vrot.lane.b32.xlu0 %v19057_v36, %s22112_s7 }
0x125d   :  { %v3552_v35 = vpop.xlane.xlu0 %3551 }
0x125e   :  { %17776 = vrcp.f32 %v3552_v35 }
0x125f   :  { %v3549_v32 = vpop.xlane.xlu1 %3548 }
0x1260   :  { %17778 = vrcp.f32 %v3549_v32 }
0x1263   :  { %v3750_v34 = vpop.xlane.xlu1 %3749 }
0x1264   :  { %17780 = vrcp.f32 %v3750_v34 }
0x1267   :  { %v3753_v49 = vpop.xlane.xlu0 %3752  ;;  %v3759_v46 = vpop.permute.xlu1 %3758 }
0x1268   :  { %17782 = vrcp.f32 %v3753_v49 }
0x126b   :  { %v3558_v23 = vpop.permute.xlu0 %3557  ;;  %v17777_v42 = vpop.eup %17776 }
0x126c   :  { %16770 = vmatprep.subr.mxu1 %v3558_v23  ;;  %v3556_v54 = vmul.f32 %v17777_v42, %v17769_v24  ;;  %v3945_v9 = vpop.permute.xlu1 %3944 }
0x126d   :  { %v17779_v43 = vpop.eup %17778  ;;  %16771 = vmatpush3.msra.mxu1 %v3558_v23 }
0x126e   :  { %16782 = vmatprep.subr.mxu1 %v3761_v38  ;;  %v3555_v47 = vmul.f32 %v17779_v43, %v17771_v52 }
0x126f   :  { %v3947_v48 = vpop.permute.xlu0 %3946 }
0x1270   :  { %16772 = vmatprep.mubr.msk.f32.mxu1 %vm327_vm4, %v3555_v47  ;;  %16801 = vmatprep.subr.msk.mxu0 %vm241_vm3, %v3947_v48  ;;  %v3943_v10 = vpop.permute.xlu1 %3942 }
0x1271   :  { %v17781_v55 = vpop.eup %17780  ;;  %16773 = vmatmul.mubr.msk.f32.vlgmr.msra.gmra.mxu1 %vm327_vm4, %v3556_v54 }
0x1272   :  { %16783 = vmatpush3.msra.mxu1 %v3761_v38  ;;  %v3756_v57 = vmul.f32 %v17781_v55, %v17773_v28 }
0x1273   :  { %16784 = vmatprep.subr.mxu1 %v3759_v46  ;;  %v3941_v0 = vpop.permute.xlu0 %3940 }
0x1274   :  { %16785 = vmatpush3.msra.mxu1 %v3759_v46  ;;  %16786 = vmatprep.mubr.msk.f32.mxu1 %vm327_vm4, %v3756_v57 }
0x1275   :  { %v17783_v59 = vpop.eup %17782  ;;  %16795 = vmatprep.subr.bf16.mxu1 %v18033_v1 }
0x1276   :  { %v3757_v60 = vmul.f32 %v17783_v59, %v17775_v31 }
0x1278   :  { %16787 = vmatmul.mubr.msk.f32.vlgmr.msra.gmra.mxu1 %vm327_vm4, %v3757_v60 }
0x1279   :  { %16797 = vmatprep.mubr.msk.bf16.mxu1 %vm18034_vm0, %v18033_v1  ;;  %16796 = vmatpush3.bf16.msra.mxu1 %v3897_v2  ;;  %v14348_v2 = vld [vmem:[%s22044_s12 + $0x18] sm:$0xf] }
0x1331   :  { %v16774_v3 = vpop.f32.mrf.mxu1 }
0x1333   :  { %v3635_v4 = vpop.f32.mrf.mxu1 }
0x1334   :  { %v3644_v25 = vpack.c.bf16 %v16774_v3, %v3635_v4  ;;  %v4145_v3 = vsel %vm642_vm5, %v14348_v2, 0 }
0x1336   :  { %16798 = vmatmul.mubr.msk.bf16.vlgmr.msra.gmra.mxu1 %vm241_vm3, %v3644_v25 }
0x1338   :  { %v16788_v6 = vpop.f32.mrf.mxu1 }
0x133a   :  { %v3836_v63 = vpop.f32.mrf.mxu1 }
0x133b   :  { %v3845_v8 = vpack.c.bf16 %v16788_v6, %v3836_v63 }
0x133d   :  { %16792 = vmatmul.mubr.msk.bf16.vlgmr.msra.gmra.mxu0 %vm241_vm3, %v3845_v8 }
0x133e   :  { %16802 = vmatpush3.xpose.msk.msra.mxu0 %vm241_vm3, %v3947_v48  ;;  %16805 = vmatprep.mubr.msk.f32.mxu0 %vm241_vm3, %v3941_v0 }
0x133f   :  { %16803 = vmatprep.subr.msk.mxu0 %vm241_vm3, %v3945_v9 }
0x1342   :  { %16804 = vmatpush3.xpose.msk.msra.mxu0 %vm241_vm3, %v3945_v9 }
0x1343   :  { %16815 = vmatprep.subr.bf16.mxu0 %v18033_v1 }
0x1345   :  { %16806 = vmatmul.mubr.msk.f32.vlgmr.msra.gmra.mxu0 %vm241_vm3, %v3943_v10 }
0x1346   :  { %16817 = vmatprep.mubr.msk.bf16.mxu0 %vm18034_vm0, %v18033_v1  ;;  %16816 = vmatpush3.bf16.msra.mxu0 %v4145_v3 }
0x13f6   :  { %v3933_v61 = vpop.f32.mrf.mxu1 }
0x13f8   :  { %v16799_v16 = vpop.f32.mrf.mxu1 }
0x13fa   :  { %v3936_v62 = vpop.f32.mrf.mxu1 }
0x13fc   :  { %v16800_v17 = vpop.f32.mrf.mxu1 }
0x13fd   :  { %v3886_v18 = vpop.f32.mrf.mxu0 }
0x13fe   :  { %v19155_v44 = vadd.f32 %v3933_v61, %v3886_v18 }
0x13ff   :  { %v16793_v45 = vpop.f32.mrf.mxu0 }
0x1401   :  { %v3889_v20 = vpop.f32.mrf.mxu0 }
0x1402   :  { %v19157_v22 = vadd.f32 %v3936_v62, %v3889_v20 }
0x1403   :  { %v16794_v24 = vpop.f32.mrf.mxu0 }
0x1405   :  { %v16807_v26 = vpop.f32.mrf.mxu0 }
0x1406   :  { %v4028_v52 = vadd.f32 %v19094_v11, %v16807_v26 }
0x1407   :  { %v4022_v27 = vpop.f32.mrf.mxu0 }
0x1408   :  { %v4023_v28 = vadd.f32 %v19100_v58, %v4022_v27  ;;  %v4034_v29 = vsel %vm327_vm4, %v4028_v52, -inf }
0x1409   :  { %4035 = vmax.xlane.f32.xlu1 %v4034_v29 }
0x140a   :  { %v4031_v31 = vsel %vm327_vm4, %v4023_v28, -inf }
0x140b   :  { %4032 = vmax.xlane.f32.xlu0 %v4031_v31 }
0x141a   :  { %4055 = vrot.lane.b32.xlu1 %v19059_v19, %s22113_s9 }
0x141e   :  { %4196 = vrot.lane.b32.xlu1 %v19059_v19, %s22114_s5 }
0x1422   :  { %4194 = vrot.lane.b32.xlu1 %v19052_v7, %s22114_s5 }
0x1426   :  { %4192 = vrot.lane.b32.xlu1 %v19072_v40, %s22115_s6 }
0x1492   :  { %v4036_v33 = vpop.xlane.xlu1 %4035 }
0x1493   :  { %v4038_v53 = vsub.f32 %v4028_v52, %v4036_v33 }
0x1494   :  { %v4033_v5 = vpop.xlane.xlu0 %4032 }
0x1495   :  { %v4041_v38 = vmul.f32 1.442695, %v4038_v53  ;;  %v4037_v35 = vsub.f32 %v4023_v28, %v4033_v5 }
0x1496   :  { %v4056_v32 = vpop.permute.xlu1 %4055 }
0x1497   :  { %17784 = vpow2.f32 %v4041_v38  ;;  %v4039_v34 = vmul.f32 1.442695, %v4037_v35  ;;  %16808 = vmatprep.subr.mxu1 %v4056_v32 }
0x1498   :  { %16809 = vmatpush3.msra.mxu1 %v4056_v32 }
0x1499   :  { %17786 = vpow2.f32 %v4039_v34 }
0x149a   :  { %v4197_v54 = vpop.permute.xlu1 %4196 }
0x14a4   :  { %v17785_v49 = vpop.eup %17784 }
0x14a5   :  { %v4046_v23 = vsel %vm327_vm4, %v17785_v49, 0.0 }
0x14a6   :  { %v17787_v42 = vpop.eup %17786  ;;  %4047 = vadd.xlane.f32.xlu0 %v4046_v23 }
0x14a7   :  { %v4043_v43 = vsel %vm327_vm4, %v17787_v42, 0.0 }
0x14aa   :  { %4044 = vadd.xlane.f32.xlu0 %v4043_v43 }
0x14c0   :  { %4053 = vrot.lane.b32.xlu0 %v19052_v7, %s22113_s9 }
0x14c4   :  { %4190 = vrot.lane.b32.xlu0 %v19057_v36, %s22115_s6  ;;  %v4195_v36 = vpop.permute.xlu1 %4194 }
0x14c8   :  { %v4193_v14 = vpop.permute.xlu1 %4192 }
0x152f   :  { %v4048_v40 = vpop.xlane.xlu0 %4047 }
0x1530   :  { %17788 = vrcp.f32 %v4048_v40 }
0x1533   :  { %v4045_v47 = vpop.xlane.xlu0 %4044 }
0x1534   :  { %17790 = vrcp.f32 %v4045_v47 }
0x1537   :  { %v4054_v48 = vpop.permute.xlu0 %4053 }
0x1538   :  { %16810 = vmatprep.subr.mxu1 %v4054_v48 }
0x1539   :  { %16811 = vmatpush3.msra.mxu1 %v4054_v48  ;;  %v14379_v48 = vld [vmem:[%s22045_s13 + $0x1] ss:$0 sm:$0xff] }
0x153a   :  { %16821 = vmatprep.subr.msk.mxu1 %vm241_vm3, %v4197_v54 }
0x153b   :  { %v4191_v60 = vpop.permute.xlu0 %4190 }
0x153d   :  { %v17789_v55 = vpop.eup %17788 }
0x153e   :  { %v4052_v59 = vmul.f32 %v17789_v55, %v17785_v49 }
0x1541   :  { %v17791_v46 = vpop.eup %17790 }
0x1542   :  { %v4051_v57 = vmul.f32 %v17791_v46, %v17787_v42 }
0x1544   :  { %16812 = vmatprep.mubr.msk.f32.mxu1 %vm327_vm4, %v4051_v57 }
0x1545   :  { %16813 = vmatmul.mubr.msk.f32.vlgmr.msra.gmra.mxu1 %vm327_vm4, %v4052_v59 }
0x1546   :  { %16822 = vmatpush3.xpose.msk.msra.mxu1 %vm241_vm3, %v4197_v54  ;;  %16825 = vmatprep.mubr.msk.f32.mxu1 %vm241_vm3, %v4191_v60 }
0x1547   :  { %16823 = vmatprep.subr.msk.mxu1 %vm241_vm3, %v4195_v36 }
0x154a   :  { %16824 = vmatpush3.xpose.msk.msra.mxu1 %vm241_vm3, %v4195_v36 }
0x154b   :  { %16835 = vmatprep.subr.bf16.mxu1 %v18033_v1 }
0x154d   :  { %16826 = vmatmul.mubr.msk.f32.vlgmr.msra.gmra.mxu1 %vm241_vm3, %v4193_v14 }
0x154e   :  { %16837 = vmatprep.mubr.msk.bf16.mxu1 %vm18034_vm0, %v18033_v1 }
0x1605   :  { %v16814_v4 = vpop.f32.mrf.mxu1 }
0x1607   :  { %v4131_v25 = vpop.f32.mrf.mxu1 }
0x1608   :  { %v4140_v6 = vpack.c.bf16 %v16814_v4, %v4131_v25 }
0x160a   :  { %16818 = vmatmul.mubr.msk.bf16.vlgmr.msra.gmra.mxu0 %vm241_vm3, %v4140_v6 }
0x160d   :  { %v16827_v63 = vpop.f32.mrf.mxu1 }
0x160e   :  { %v4278_v8 = vadd.f32 %v19094_v11, %v16827_v63 }
0x160f   :  { %v4272_v0 = vpop.f32.mrf.mxu1 }
0x1610   :  { %v4273_v9 = vadd.f32 %v19100_v58, %v4272_v0  ;;  %v4284_v10 = vsel %vm327_vm4, %v4278_v8, -inf }
0x1611   :  { %4285 = vmax.xlane.f32.xlu1 %v4284_v10  ;;  %v14400_v10 = vld [vmem:[%s22048_s16 + $0x180] sm:$0xff] }
0x1612   :  { %v4281_v61 = vsel %vm327_vm4, %v4273_v9, -inf }
0x1613   :  { %4282 = vmax.xlane.f32.xlu0 %v4281_v61  ;;  %v14408_v61 = vld [vmem:[%s22048_s16 + $0x1c0] sm:$0xff] }
0x1622   :  { %4305 = vrot.lane.b32.xlu1 %v19059_v19, %s22116_s27 }
0x169a   :  { %v4286_v16 = vpop.xlane.xlu1 %4285 }
0x169b   :  { %v4288_v62 = vsub.f32 %v4278_v8, %v4286_v16  ;;  %v14401_v16 = vld [vmem:[%s22048_s16 + $0x188] sm:$0xff] }
0x169c   :  { %v4283_v17 = vpop.xlane.xlu0 %4282 }
0x169d   :  { %v4291_v18 = vmul.f32 1.442695, %v4288_v62  ;;  %v4287_v45 = vsub.f32 %v4273_v9, %v4283_v17  ;;  %v14435_v62 = vcombine.high %v14400_v10, %v14408_v61  ;;  %v14409_v17 = vld [vmem:[%s22048_s16 + $0x1c8] sm:$0xff] }
0x169e   :  { %v4306_v20 = vpop.permute.xlu1 %4305 }
0x169f   :  { %17792 = vpow2.f32 %v4291_v18  ;;  %v4289_v11 = vmul.f32 1.442695, %v4287_v45  ;;  %16828 = vmatprep.subr.mxu0 %v4306_v20  ;;  %v14434_v18 = vcombine.low %v14400_v10, %v14408_v61  ;;  %v14436_v45 = vcombine.low %v14401_v16, %v14409_v17  ;;  %v14388_v61 = vld [vmem:[%s22048_s16 + $0x120] sm:$0xff] }
0x16a0   :  { %16829 = vmatpush3.msra.mxu0 %v4306_v20  ;;  %v14437_v20 = vcombine.high %v14401_v16, %v14409_v17  ;;  %v14396_v16 = vld [vmem:[%s22048_s16 + $0x160] sm:$0xff]  ;;  %v14397_v17 = vld [vmem:[%s22048_s16 + $0x168] sm:$0xff] }
0x16a1   :  { %17794 = vpow2.f32 %v4289_v11  ;;  %v14384_v11 = vld [vmem:[%s22048_s16 + $0x100] sm:$0xff] }
0x16ac   :  { %v17793_v58 = vpop.eup %17792 }
0x16ad   :  { %v4296_v24 = vsel %vm327_vm4, %v17793_v58, 0.0 }
0x16ae   :  { %v17795_v26 = vpop.eup %17794  ;;  %4297 = vadd.xlane.f32.xlu0 %v4296_v24  ;;  %v14385_v24 = vld [vmem:[%s22048_s16 + $0x108] sm:$0xff] }
0x16af   :  { %v4293_v52 = vsel %vm327_vm4, %v17795_v26, 0.0 }
0x16b2   :  { %4294 = vadd.xlane.f32.xlu0 %v4293_v52  ;;  %v14393_v52 = vld [vmem:[%s22048_s16 + $0x148] sm:$0xff] }
0x16c8   :  { %4303 = vrot.lane.b32.xlu0 %v19052_v7, %s22116_s27  ;;  %v14349_v7 = vld [vmem:[%s22044_s12 + $0x1c] sm:$0xf] }
0x16ca   :  { %v4181_v19 = vpop.f32.mrf.mxu0 }
0x16cb   :  { %v4188_v27 = vadd.f32 %v4181_v19, %v19155_v44  ;;  %v4395_v44 = vsel %vm642_vm5, %v14349_v7, 0 }
0x16cc   :  { %v16819_v28 = vpop.f32.mrf.mxu0  ;;  %16836 = vmatpush3.bf16.msra.mxu1 %v4395_v44 }
0x16cd   :  { %4835 = vmatprep.subr.bf16.mxu1 %v14437_v20  ;;  %v14421_v28 = vcombine.high %v14385_v24, %v14393_v52  ;;  %v14427_v20 = vcombine.high %v14388_v61, %v14396_v16 }
0x16ce   :  { %v4184_v29 = vpop.f32.mrf.mxu0 }
0x16cf   :  { %v4189_v31 = vadd.f32 %v4184_v29, %v19157_v22  ;;  %v14402_v29 = vld [vmem:[%s22048_s16 + $0x190] sm:$0xff] }
0x16d0   :  { %v16820_v33 = vpop.f32.mrf.mxu0 }
0x16d1   :  { %v14403_v33 = vld [vmem:[%s22048_s16 + $0x198] sm:$0xff] }
0x1737   :  { %v4298_v53 = vpop.xlane.xlu0 %4297 }
0x1738   :  { %17796 = vrcp.f32 %v4298_v53 }
0x173b   :  { %v4295_v5 = vpop.xlane.xlu0 %4294 }
0x173c   :  { %17798 = vrcp.f32 %v4295_v5  ;;  %v14411_v5 = vld [vmem:[%s22048_s16 + $0x1d8] sm:$0xff] }
0x173f   :  { %v4304_v38 = vpop.permute.xlu0 %4303 }
0x1740   :  { %16830 = vmatprep.subr.mxu0 %v4304_v38 }
0x1741   :  { %16831 = vmatpush3.msra.mxu0 %v4304_v38 }
0x1742   :  { %4792 = vmatprep.subr.bf16.mxu0 %v14435_v62  ;;  %v14389_v62 = vld [vmem:[%s22048_s16 + $0x128] sm:$0xff] }
0x1745   :  { %v17797_v35 = vpop.eup %17796 }
0x1746   :  { %v4302_v49 = vmul.f32 %v17797_v35, %v17793_v58  ;;  %v14392_v58 = vld [vmem:[%s22048_s16 + $0x140] sm:$0xff]  ;;  %v14440_v35 = vcombine.low %v14403_v33, %v14411_v5 }
0x1747   :  { %v14418_v19 = vcombine.low %v14384_v11, %v14392_v58 }
0x1749   :  { %v17799_v32 = vpop.eup %17798 }
0x174a   :  { %v4301_v34 = vmul.f32 %v17799_v32, %v17795_v26  ;;  %v14419_v26 = vcombine.high %v14384_v11, %v14392_v58  ;;  %v14441_v32 = vcombine.high %v14403_v33, %v14411_v5  ;;  %v14429_v11 = vcombine.high %v14389_v62, %v14397_v17  ;;  %v14406_v58 = vld [vmem:[%s22048_s16 + $0x1b0] sm:$0xff]  ;;  %v14399_v5 = vld [vmem:[%s22048_s16 + $0x178] sm:$0xff] }
0x174b   :  { %v14398_v33 = vld [vmem:[%s22048_s16 + $0x170] sm:$0xff] }
0x174c   :  { %16832 = vmatprep.mubr.msk.f32.mxu0 %vm327_vm4, %v4301_v34 }
0x174d   :  { %16833 = vmatmul.mubr.msk.f32.vlgmr.msra.gmra.mxu0 %vm327_vm4, %v4302_v49 }
0x174e   :  { %4812 = vmatprep.mubr.bf16.mxu0 %v18046_v41  ;;  %4793 = vmatpush1.bf16.msra.mxu0 %v14434_v18 }
0x174f   :  { %4794 = vmatprep.subr.bf16.mxu0 %v14419_v26  ;;  %v14407_v26 = vld [vmem:[%s22048_s16 + $0x1b8] sm:$0xff] }
0x1752   :  { %4795 = vmatpush1.bf16.msra.mxu0 %v14418_v19  ;;  %v14426_v19 = vcombine.low %v14388_v61, %v14396_v16  ;;  %v17362_v61 = vld [vmem:[%s22050_s18 + $0x408] sm:$0xff]  }
0x1753   :  { %v17363_v16 = vld [vmem:[%s22050_s18 + $0x488] sm:$0xff]  }
0x180d   :  { %v16834_v22 = vpop.f32.mrf.mxu0 }
0x180f   :  { %v4381_v23 = vpop.f32.mrf.mxu0 }
0x1810   :  { %v4390_v42 = vpack.c.bf16 %v16834_v22, %v4381_v23 }
0x1812   :  { %16838 = vmatmul.mubr.msk.bf16.vlgmr.msra.gmra.mxu1 %vm241_vm3, %v4390_v42 }
0x1813   :  { %4855 = vmatprep.mubr.bf16.mxu1 %v18046_v41  ;;  %4836 = vmatpush1.bf16.msra.mxu1 %v14436_v45 }
0x1814   :  { %4837 = vmatprep.subr.bf16.mxu1 %v14421_v28 }
0x18d2   :  { %v4431_v43 = vpop.f32.mrf.mxu1 }
0x18d3   :  { %v4438_v40 = vadd.f32 %v4431_v43, %v4188_v27  ;;  %v14420_v27 = vcombine.low %v14385_v24, %v14393_v52  ;;  %v14414_v24 = vld [vmem:[%s22048_s16 + $0x1f0] sm:$0xff]  ;;  %v14415_v52 = vld [vmem:[%s22048_s16 + $0x1f8] sm:$0xff] }
0x18d4   :  { %v16839_v47 = vpop.f32.mrf.mxu1  ;;  %v14447_v28 = vcombine.high %v14406_v58, %v14414_v24 }
0x18d5   :  { %v4440_v54 = vadd.f32 %v4438_v40, %v19042_v56  ;;  %4838 = vmatpush1.bf16.msra.mxu1 %v14420_v27  ;;  %v14382_v40 = vld [vmem:[%s22046_s14 + $0x1] ss:$0 sm:$0xff]  ;;  %v14428_v27 = vcombine.low %v14389_v62, %v14397_v17 }
0x18d6   :  { %v4434_v55 = vpop.f32.mrf.mxu1  ;;  %4921 = vmatprep.subr.bf16.mxu1 %v14441_v32  ;;  %v17364_v62 = vld [vmem:[%s22050_s18 + $0x440] sm:$0xff]  }
0x18d7   :  { %v4439_v46 = vadd.f32 %v4434_v55, %v4189_v31  ;;  %v4450_v57 = vadd.f32 %v14379_v48, %v4440_v54  ;;  %v14410_v31 = vld [vmem:[%s22048_s16 + $0x1d0] sm:$0xff]  ;;  %v14383_v55 = vld [vmem:[%s22047_s15 + $0x1] ss:$0 sm:$0xff] }
0x18d8   :  { %v16840_v59 = vpop.f32.mrf.mxu1  ;;  %v14439_v53 = vcombine.high %v14402_v29, %v14410_v31  ;;  %v14438_v38 = vcombine.low %v14402_v29, %v14410_v31  ;;  %v14449_v29 = vcombine.high %v14407_v26, %v14415_v52  ;;  %v14390_v31 = vld [vmem:[%s22048_s16 + $0x130] sm:$0xff]  ;;  %v17365_v17 = vld [vmem:[%s22050_s18 + $0x4c0] sm:$0xff]  }
0x18d9   :  { %v4441_v60 = vadd.f32 %v4439_v46, %v19044_v37  ;;  %v4456_v36 = vsel %vm184_vm2, %v4450_v57, 0.0  ;;  %v14394_v59 = vld [vmem:[%s22048_s16 + $0x150] sm:$0xff]  ;;  %v14431_v32 = vcombine.high %v14390_v31, %v14398_v33 }
0x18da   :  { %4457 = vadd.xlane.f32.xlu1 %v4456_v36  ;;  %4878 = vmatprep.subr.bf16.mxu0 %v14439_v53  ;;  %v14395_v36 = vld [vmem:[%s22048_s16 + $0x158] sm:$0xff] }
0x18db   :  { %v4451_v14 = vadd.f32 %v14379_v48, %v4441_v60  ;;  %v14387_v60 = vld [vmem:[%s22048_s16 + $0x118] sm:$0xff] }
0x18dc   :  { %v14391_v53 = vld [vmem:[%s22048_s16 + $0x138] sm:$0xff] }
0x18dd   :  { %v4459_v2 = vsel %vm184_vm2, %v4451_v14, 0.0 }
0x18de   :  { %4460 = vadd.xlane.f32.xlu0 %v4459_v2 }
0x1963   :  { %v4458_v3 = vpop.xlane.xlu1 %4457 }
0x1964   :  { %v4462_v4 = vmul.f32 0.03125, %v4458_v3 }
0x1966   :  { %v4464_v25 = vsub.f32 %v4450_v57, %v4462_v4  ;;  %v14386_v57 = vld [vmem:[%s22048_s16 + $0x110] sm:$0xff] }
0x1967   :  { %v4461_v6 = vpop.xlane.xlu0 %4460  ;;  %v14423_v4 = vcombine.high %v14386_v57, %v14394_v59 }
0x1968   :  { %v4463_v63 = vmul.f32 0.03125, %v4461_v6  ;;  %v4466_v8 = vmul.f32 %v4464_v25, %v4464_v25  ;;  %v14404_v6 = vld [vmem:[%s22048_s16 + $0x1a0] sm:$0xff] }
0x196a   :  { %v4465_v56 = vsub.f32 %v4451_v14, %v4463_v63  ;;  %v4468_v0 = vsel %vm184_vm2, %v4466_v8, 0.0  ;;  %v14412_v63 = vld [vmem:[%s22048_s16 + $0x1e0] sm:$0xff]  ;;  %v14405_v8 = vld [vmem:[%s22048_s16 + $0x1a8] sm:$0xff] }
0x196b   :  { %4469 = vadd.xlane.f32.xlu1 %v4468_v0  ;;  %v14422_v0 = vcombine.low %v14386_v57, %v14394_v59  ;;  %v14442_v18 = vcombine.low %v14404_v6, %v14412_v63  ;;  %v17347_v57 = vld [vmem:[%s22050_s18 + $0x4a8] sm:$0xff]   ;;  %v17348_v59 = vld [vmem:[%s22050_s18 + $0x460] sm:$0xff]  }
0x196c   :  { %v4467_v9 = vmul.f32 %v4465_v56, %v4465_v56 }
0x196e   :  { %v4471_v37 = vsel %vm184_vm2, %v4467_v9, 0.0  ;;  %v14424_v9 = vcombine.low %v14387_v60, %v14395_v36 }
0x196f   :  { %4472 = vadd.xlane.f32.xlu0 %v4471_v37  ;;  %v14443_v37 = vcombine.high %v14404_v6, %v14412_v63  ;;  %v17354_v6 = vld [vmem:[%s22050_s18 + $0x418] sm:$0xff]  }
0x1970   :  { %v17355_v63 = vld [vmem:[%s22050_s18 + $0x498] sm:$0xff]  }
0x19f4   :  { %v4470_v34 = vpop.xlane.xlu1 %4469 }
0x19f5   :  { %v4474_v49 = vmul.f32 0.03125, %v4470_v34  ;;  %v14433_v34 = vcombine.high %v14391_v53, %v14399_v5 }
0x19f7   :  { %v4476_v7 = vadd.f32 1e-05, %v4474_v49  ;;  %v14430_v49 = vcombine.low %v14390_v31, %v14398_v33 }
0x19f8   :  { %v4473_v44 = vpop.xlane.xlu0 %4472 }
0x19f9   :  { %17800 = vrsqrt.f32 %v4476_v7  ;;  %v4475_v22 = vmul.f32 0.03125, %v4473_v44  ;;  %v14432_v7 = vcombine.low %v14391_v53, %v14399_v5  ;;  %v17336_v44 = vld [vmem:[%s22050_s18 + $0x478] sm:$0xff]  }
0x19fb   :  { %v4477_v23 = vadd.f32 1e-05, %v4475_v22  ;;  %v17337_v22 = vld [vmem:[%s22050_s18 + $0x4f8] sm:$0xff]  }
0x19fd   :  { %17802 = vrsqrt.f32 %v4477_v23  ;;  %v17338_v23 = vld [vmem:[%s22050_s18 + $0x438] sm:$0xff]  }
0x1a06   :  { %v17801_v42 = vpop.eup %17800 }
0x1a07   :  { %v4480_v43 = vmul.f32 %v17801_v42, %v4464_v25  ;;  %v14425_v25 = vcombine.high %v14387_v60, %v14395_v36  ;;  %v17339_v42 = vld [vmem:[%s22050_s18 + $0x4b8] sm:$0xff]   ;;  %v17349_v60 = vld [vmem:[%s22050_s18 + $0x4e0] sm:$0xff]  }
0x1a08   :  { %v17350_v36 = vld [vmem:[%s22050_s18 + $0x420] sm:$0xff]  }
0x1a09   :  { %v4488_v48 = vmul.f32 %v14382_v40, %v4480_v43  ;;  %v17340_v43 = vld [vmem:[%s22050_s18 + $0x470] sm:$0xff]  }
0x1a0a   :  { %v17803_v47 = vpop.eup %17802 }
0x1a0b   :  { %v4481_v54 = vmul.f32 %v17803_v47, %v4465_v56  ;;  %v19277_v14 = vadd.f32 %v14383_v55, %v4488_v48  ;;  %v14413_v56 = vld [vmem:[%s22048_s16 + $0x1e8] sm:$0xff]  ;;  %v17342_v47 = vld [vmem:[%s22050_s18 + $0x430] sm:$0xff]  }
0x1a0c   :  { %v14445_v10 = vcombine.high %v14405_v8, %v14413_v56  ;;  %v14444_v45 = vcombine.low %v14405_v8, %v14413_v56  ;;  %v17343_v48 = vld [vmem:[%s22050_s18 + $0x4b0] sm:$0xff]  }
0x1a0d   :  { %v4489_v46 = vmul.f32 %v14382_v40, %v4481_v54  ;;  %v17341_v40 = vld [vmem:[%s22050_s18 + $0x4f0] sm:$0xff]   ;;  %v17344_v54 = vld [vmem:[%s22050_s18 + $0x468] sm:$0xff]  }
0x1a0e   :  { %v17356_v8 = vld [vmem:[%s22050_s18 + $0x450] sm:$0xff]  }
0x1a0f   :  { %v19279_v2 = vadd.f32 %v14383_v55, %v4489_v46  ;;  %v17345_v55 = vld [vmem:[%s22050_s18 + $0x4e8] sm:$0xff]   ;;  %v17357_v56 = vld [vmem:[%s22050_s18 + $0x4d0] sm:$0xff]  }
0x1a10   :  { %v17346_v46 = vld [vmem:[%s22050_s18 + $0x428] sm:$0xff]  }
0x1a11   :  { %v19283_v3 = vpack.c.bf16 %v19279_v2, %v19277_v14 }
0x1a13   :  { %14450 = vmatmul.mubr.msk.bf16.vlgmr.msra.gmra.mxu0 %vm184_vm2, %v19283_v3  ;;  %14451 = vmatmul.mubr.msk.bf16.vlgmr.msra.gmra.mxu1 %vm184_vm2, %v19283_v3 }
0x1a14   :  { %4879 = vmatpush1.bf16.msra.mxu0 %v14438_v38  ;;  %4922 = vmatpush1.bf16.msra.mxu1 %v14440_v35  ;;  %v14446_v38 = vcombine.low %v14406_v58, %v14414_v24  ;;  %v14448_v35 = vcombine.low %v14407_v26, %v14415_v52  ;;  %v19460_v58 = vld [vmem:[%s22049_s17 + $0x10] sm:$0xff] }
0x1a15   :  { %4880 = vmatprep.subr.bf16.mxu0 %v14423_v4  ;;  %4923 = vmatprep.subr.bf16.mxu1 %v14425_v25  ;;  %v17352_v4 = vld [vmem:[%s22050_s18 + $0x458] sm:$0xff]   ;;  %v4544_v52 = vrot.slane %v19460_v58, %v18634_v12 }
0x1a16   :  { %4898 = vmatprep.mubr.bf16.mxu0 %v18046_v41  ;;  %4941 = vmatprep.mubr.bf16.mxu1 %v18046_v41  ;;  %v17353_v25 = vld [vmem:[%s22050_s18 + $0x4d8] sm:$0xff]  }
0x1a18   :  { %4881 = vmatpush1.bf16.msra.mxu0 %v14422_v0  ;;  %4924 = vmatpush1.bf16.msra.mxu1 %v14424_v9  ;;  %v17358_v0 = vld [vmem:[%s22050_s18 + $0x410] sm:$0xff]  }
0x1a19   :  { %4964 = vmatprep.subr.bf16.mxu0 %v14443_v37  ;;  %5007 = vmatprep.subr.bf16.mxu1 %v14445_v10  ;;  %v17359_v9 = vld [vmem:[%s22050_s18 + $0x490] sm:$0xff]   ;;  %v17360_v37 = vld [vmem:[%s22050_s18 + $0x448] sm:$0xff]  }
0x1a1a   :  { %v17361_v10 = vld [vmem:[%s22050_s18 + $0x4c8] sm:$0xff]  }
0x1a1b   :  { %14452 = vmatmul.mubr.msk.bf16.vlgmr.msra.gmra.mxu0 %vm184_vm2, %v19283_v3  ;;  %14453 = vmatmul.mubr.msk.bf16.vlgmr.msra.gmra.mxu1 %vm184_vm2, %v19283_v3 }
0x1a1c   :  { %4965 = vmatpush1.bf16.msra.mxu0 %v14442_v18  ;;  %5008 = vmatpush1.bf16.msra.mxu1 %v14444_v45  ;;  %v17366_v18 = vld [vmem:[%s22050_s18 + $0x400] sm:$0xff]  }
0x1a1d   :  { %4966 = vmatprep.subr.bf16.mxu0 %v14427_v20  ;;  %5009 = vmatprep.subr.bf16.mxu1 %v14429_v11  ;;  %v17367_v45 = vld [vmem:[%s22050_s18 + $0x480] sm:$0xff]   ;;  %v17368_v20 = vld [vmem:[%s22050_s18 + $0x578] sm:$0xff]  }
0x1a1e   :  { %4984 = vmatprep.mubr.bf16.mxu0 %v18046_v41  ;;  %5027 = vmatprep.mubr.bf16.mxu1 %v18046_v41  ;;  %v17369_v11 = vld [vmem:[%s22050_s18 + $0x5f8] sm:$0xff]  }
0x1a20   :  { %4967 = vmatpush1.bf16.msra.mxu0 %v14426_v19  ;;  %5010 = vmatpush1.bf16.msra.mxu1 %v14428_v27  ;;  %v4552_v19 = vrot.slane %v19460_v58, %v18637_v13  ;;  %v4540_v27 = vrot.slane %v19460_v58, %v18640_v21 }
0x1a21   :  { %5050 = vmatprep.subr.bf16.mxu0 %v14447_v28  ;;  %5093 = vmatprep.subr.bf16.mxu1 %v14449_v29  ;;  %v4548_v28 = vrot.slane %v19460_v58, %v18643_v15 }
0x1a23   :  { %14454 = vmatmul.mubr.msk.bf16.vlgmr.msra.gmra.mxu0 %vm184_vm2, %v19283_v3  ;;  %14455 = vmatmul.mubr.msk.bf16.vlgmr.msra.gmra.mxu1 %vm184_vm2, %v19283_v3 }
0x1a24   :  { %5051 = vmatpush1.bf16.msra.mxu0 %v14446_v38  ;;  %5094 = vmatpush1.bf16.msra.mxu1 %v14448_v35 }
0x1a25   :  { %5052 = vmatprep.subr.bf16.mxu0 %v14431_v32  ;;  %5095 = vmatprep.subr.bf16.mxu1 %v14433_v34 }
0x1a26   :  { %5070 = vmatprep.mubr.bf16.mxu0 %v18046_v41  ;;  %5113 = vmatprep.mubr.bf16.mxu1 %v18046_v41 }
0x1a28   :  { %5053 = vmatpush1.bf16.msra.mxu0 %v14430_v49  ;;  %5096 = vmatpush1.bf16.msra.mxu1 %v14432_v7 }
0x1a29   :  { %15890 = vmatprep.subr.bf16.mxu0 %v17336_v44  ;;  %15912 = vmatprep.subr.bf16.mxu1 %v17337_v22 }
0x1a2b   :  { %14456 = vmatmul.mubr.msk.bf16.vlgmr.msra.gmra.mxu0 %vm184_vm2, %v19283_v3  ;;  %14457 = vmatmul.mubr.msk.bf16.vlgmr.msra.gmra.mxu1 %vm184_vm2, %v19283_v3  ;;  %v17351_v3 = vld [vmem:[%s22050_s18 + $0x4a0] sm:$0xff]  }
0x1a2c   :  { %15891 = vmatpush3.bf16.msra.mxu0 %v17338_v23  ;;  %15913 = vmatpush3.bf16.msra.mxu1 %v17339_v42 }
0x1a2d   :  { %15892 = vmatprep.subr.bf16.mxu0 %v17340_v43  ;;  %15914 = vmatprep.subr.bf16.mxu1 %v17341_v40 }
0x1a30   :  { %15893 = vmatpush3.bf16.msra.mxu0 %v17342_v47  ;;  %15915 = vmatpush3.bf16.msra.mxu1 %v17343_v48  ;;  %v4560_v48 = vrot.slane %v19460_v58, %v18662_v39 }
0x1a31   :  { %15894 = vmatprep.subr.bf16.mxu0 %v17344_v54  ;;  %15916 = vmatprep.subr.bf16.mxu1 %v17345_v55 }
0x1a34   :  { %15895 = vmatpush3.bf16.msra.mxu0 %v17346_v46  ;;  %15917 = vmatpush3.bf16.msra.mxu1 %v17347_v57 }
0x1a35   :  { %15896 = vmatprep.subr.bf16.mxu0 %v17348_v59  ;;  %15918 = vmatprep.subr.bf16.mxu1 %v17349_v60 }
0x1a38   :  { %15897 = vmatpush3.bf16.msra.mxu0 %v17350_v36  ;;  %15919 = vmatpush3.bf16.msra.mxu1 %v17351_v3  ;;  %v4568_v3 = vrot.slane %v19460_v58, %v18659_v30 }
0x1a39   :  { %15898 = vmatprep.subr.bf16.mxu0 %v17352_v4  ;;  %15920 = vmatprep.subr.bf16.mxu1 %v17353_v25 }
0x1a3c   :  { %15899 = vmatpush3.bf16.msra.mxu0 %v17354_v6  ;;  %15921 = vmatpush3.bf16.msra.mxu1 %v17355_v63  ;;  %v17370_v63 = vld [vmem:[%s22050_s18 + $0x538] sm:$0xff]  }
0x1a3d   :  { %15900 = vmatprep.subr.bf16.mxu0 %v17356_v8  ;;  %15922 = vmatprep.subr.bf16.mxu1 %v17357_v56  ;;  %v17371_v8 = vld [vmem:[%s22050_s18 + $0x5b8] sm:$0xff]  }
0x1a40   :  { %15901 = vmatpush3.bf16.msra.mxu0 %v17358_v0  ;;  %15923 = vmatpush3.bf16.msra.mxu1 %v17359_v9 }
0x1a41   :  { %15902 = vmatprep.subr.bf16.mxu0 %v17360_v37  ;;  %15924 = vmatprep.subr.bf16.mxu1 %v17361_v10  ;;  %v17372_v10 = vld [vmem:[%s22050_s18 + $0x570] sm:$0xff]  }
0x1a44   :  { %15903 = vmatpush3.bf16.msra.mxu0 %v17362_v61  ;;  %15925 = vmatpush3.bf16.msra.mxu1 %v17363_v16  ;;  %v17373_v61 = vld [vmem:[%s22050_s18 + $0x5f0] sm:$0xff]  }
0x1a45   :  { %15904 = vmatprep.subr.bf16.mxu0 %v17364_v62  ;;  %15926 = vmatprep.subr.bf16.mxu1 %v17365_v17 }
0x1a48   :  { %15905 = vmatpush3.bf16.msra.mxu0 %v17366_v18  ;;  %15927 = vmatpush3.bf16.msra.mxu1 %v17367_v45 }
0x1a49   :  { %15934 = vmatprep.subr.bf16.mxu0 %v17368_v20  ;;  %15956 = vmatprep.subr.bf16.mxu1 %v17369_v11  ;;  %v17374_v11 = vld [vmem:[%s22050_s18 + $0x530] sm:$0xff]  }
0x1ad3   :  { %v4814_v24 = vpop.f32.mrf.mxu0  ;;  %v4857_v26 = vpop.f32.mrf.mxu1 }
0x1ad4   :  { %v4815_v34 = vadd.f32 %v4814_v24, %v4540_v27  ;;  %v4858_v49 = vadd.f32 %v4857_v26, %v4548_v28  ;;  %v17375_v24 = vld [vmem:[%s22050_s18 + $0x5b0] sm:$0xff]   ;;  %v17376_v26 = vld [vmem:[%s22050_s18 + $0x568] sm:$0xff]  }
0x1ad5   :  { %v4816_v29 = vpop.f32.mrf.mxu0  ;;  %v4859_v31 = vpop.f32.mrf.mxu1 }
0x1ad6   :  { %v4817_v5 = vadd.f32 %v4816_v29, %v4544_v52  ;;  %v4860_v38 = vadd.f32 %v4859_v31, %v4552_v19  ;;  %v5124_v59 = vmax.f32 %v4815_v34, 0.0  ;;  %v5126_v60 = vmax.f32 %v4858_v49, 0.0  ;;  %v17382_v49 = vld [vmem:[%s22050_s18 + $0x520] sm:$0xff]  }
0x1ad7   :  { %v4818_v33 = vpop.f32.mrf.mxu0  ;;  %v4861_v53 = vpop.f32.mrf.mxu1 }
0x1ad8   :  { %v4819_v35 = vadd.f32 %v4818_v33, %v4540_v27  ;;  %v4862_v32 = vadd.f32 %v4861_v53, %v4548_v28  ;;  %v5125_v54 = vmax.f32 %v4817_v5, 0.0  ;;  %v5127_v55 = vmax.f32 %v4860_v38, 0.0  ;;  %v17378_v33 = vld [vmem:[%s22050_s18 + $0x528] sm:$0xff]   ;;  %v17380_v38 = vld [vmem:[%s22050_s18 + $0x560] sm:$0xff]  }
0x1ad9   :  { %v4820_v7 = vpop.f32.mrf.mxu0  ;;  %v4863_v44 = vpop.f32.mrf.mxu1  ;;  %v17379_v53 = vld [vmem:[%s22050_s18 + $0x5a8] sm:$0xff]  }
0x1ada   :  { %v4821_v22 = vadd.f32 %v4820_v7, %v4544_v52  ;;  %v4864_v23 = vadd.f32 %v4863_v44, %v4552_v19  ;;  %v5140_v42 = vmax.f32 %v4819_v35, 0.0  ;;  %v5142_v43 = vmax.f32 %v4862_v32, 0.0  ;;  %v17377_v52 = vld [vmem:[%s22050_s18 + $0x5e8] sm:$0xff]   ;;  %v17381_v35 = vld [vmem:[%s22050_s18 + $0x5e0] sm:$0xff]   ;;  %v17384_v44 = vld [vmem:[%s22050_s18 + $0x558] sm:$0xff]  }
0x1adb   :  { %v19470_v40 = vpop.f32.mrf.mxu0  ;;  %v19472_v47 = vpop.f32.mrf.mxu1  ;;  %v17383_v7 = vld [vmem:[%s22050_s18 + $0x5a0] sm:$0xff]  }
0x1adc   :  { %v5141_v46 = vmax.f32 %v4821_v22, 0.0  ;;  %v5143_v57 = vmax.f32 %v4864_v23, 0.0  ;;  %v5156_v56 = vpack.c.bf16 %v5140_v42, %v5124_v59  ;;  %v5158_v0 = vpack.c.bf16 %v5142_v43, %v5126_v60  ;;  %v17385_v22 = vld [vmem:[%s22050_s18 + $0x5d8] sm:$0xff]   ;;  %v17390_v59 = vld [vmem:[%s22050_s18 + $0x510] sm:$0xff]  }
0x1add   :  { %v4902_v36 = vpop.f32.mrf.mxu0  ;;  %v4945_v4 = vpop.f32.mrf.mxu1  ;;  %v17386_v43 = vld [vmem:[%s22050_s18 + $0x518] sm:$0xff]   ;;  %v17391_v60 = vld [vmem:[%s22050_s18 + $0x590] sm:$0xff]  }
0x1ade   :  { %v5157_v25 = vpack.c.bf16 %v5141_v46, %v5125_v54  ;;  %v5159_v6 = vpack.c.bf16 %v5143_v57, %v5127_v55  ;;  %v4903_v16 = vadd.f32 %v4902_v36, %v4560_v48  ;;  %v4946_v62 = vadd.f32 %v4945_v4, %v4568_v3  ;;  %v17388_v54 = vld [vmem:[%s22050_s18 + $0x550] sm:$0xff]   ;;  %v17392_v36 = vld [vmem:[%s22050_s18 + $0x548] sm:$0xff]  }
0x1adf   :  { %v19484_v9 = vpop.f32.mrf.mxu0  ;;  %v19486_v37 = vpop.f32.mrf.mxu1  ;;  %v17389_v55 = vld [vmem:[%s22050_s18 + $0x5d0] sm:$0xff]   ;;  %v4556_v4 = vrot.slane %v19460_v58, %v18741_v50 }
0x1ae0   :  { %6237 = vmatprep.mubr.bf16.mxu0 %v5157_v25  ;;  %6278 = vmatprep.mubr.bf16.mxu1 %v5159_v6  ;;  %v5129_v19 = vmax.f32 %v4903_v16, 0.0  ;;  %v5131_v29 = vmax.f32 %v4946_v62, 0.0  ;;  %v4564_v25 = vrot.slane %v19460_v58, %v18744_v51  ;;  %v19569_v6 = vld [vmem:[%s22049_s17 + $0x18] sm:$0xff]  ;;  %v17395_v58 = vld [vmem:[%s22050_s18 + $0x588] sm:$0xff]   ;;  %v17396_v62 = vld [vmem:[%s22050_s18 + $0x540] sm:$0xff]  }
0x1ae1   :  { %v4906_v17 = vpop.f32.mrf.mxu0  ;;  %v4949_v18 = vpop.f32.mrf.mxu1  ;;  %6238 = vmatmul.mubr.bf16.vlgmr.msra.gmra.mxu0 %v5156_v56  ;;  %6279 = vmatmul.mubr.bf16.vlgmr.msra.gmra.mxu1 %v5158_v0  ;;  %v17394_v0 = vld [vmem:[%s22050_s18 + $0x508] sm:$0xff]   ;;  %v4584_v16 = vrot.slane %v19569_v6, %v18637_v13 }
0x1ae2   :  { %v4907_v45 = vadd.f32 %v4906_v17, %v4560_v48  ;;  %v4950_v20 = vadd.f32 %v4949_v18, %v4568_v3  ;;  %15935 = vmatpush3.bf16.msra.mxu0 %v17370_v63  ;;  %15957 = vmatpush3.bf16.msra.mxu1 %v17371_v8  ;;  %v17387_v48 = vld [vmem:[%s22050_s18 + $0x598] sm:$0xff]   ;;  %v17393_v3 = vld [vmem:[%s22050_s18 + $0x5c8] sm:$0xff]   ;;  %v4576_v8 = vrot.slane %v19569_v6, %v18634_v12  ;;  %v17397_v17 = vld [vmem:[%s22050_s18 + $0x5c0] sm:$0xff]  }
0x1ae3   :  { %15936 = vmatprep.subr.bf16.mxu0 %v17372_v10  ;;  %15958 = vmatprep.subr.bf16.mxu1 %v17373_v61  ;;  %v19518_v32 = vpop.f32.mrf.mxu0  ;;  %v19520_v34 = vpop.f32.mrf.mxu1  ;;  %v4905_v10 = vadd.f32 %v19484_v9, %v4556_v4  ;;  %v4948_v61 = vadd.f32 %v19486_v37, %v4564_v25  ;;  %v4944_v9 = vadd.f32 %v19472_v47, %v4564_v25  ;;  %v17401_v47 = vld [vmem:[%s22050_s18 + $0x6f8] sm:$0xff]  }
0x1ae4   :  { %v5145_v27 = vmax.f32 %v4907_v45, 0.0  ;;  %v5147_v28 = vmax.f32 %v4950_v20, 0.0  ;;  %v4901_v45 = vadd.f32 %v19470_v40, %v4556_v4  ;;  %v17400_v40 = vld [vmem:[%s22050_s18 + $0x678] sm:$0xff]   ;;  %v17414_v4 = vld [vmem:[%s22050_s18 + $0x620] sm:$0xff]  }
0x1ae5   :  { %v4988_v23 = vpop.f32.mrf.mxu0  ;;  %v5031_v42 = vpop.f32.mrf.mxu1 }
0x1ae6   :  { %v5161_v31 = vpack.c.bf16 %v5145_v27, %v5129_v19  ;;  %15937 = vmatpush3.bf16.msra.mxu0 %v17374_v11  ;;  %15959 = vmatpush3.bf16.msra.mxu1 %v17375_v24  ;;  %v5163_v5 = vpack.c.bf16 %v5147_v28, %v5131_v29  ;;  %v4989_v37 = vadd.f32 %v4988_v23, %v4576_v8  ;;  %v17398_v11 = vld [vmem:[%s22050_s18 + $0x500] sm:$0xff]   ;;  %v5128_v28 = vmax.f32 %v4901_v45, 0.0 }
0x1ae7   :  { %15938 = vmatprep.subr.bf16.mxu0 %v17376_v26  ;;  %15960 = vmatprep.subr.bf16.mxu1 %v17377_v52  ;;  %v19546_v46 = vpop.f32.mrf.mxu0  ;;  %v19548_v57 = vpop.f32.mrf.mxu1  ;;  %v17399_v24 = vld [vmem:[%s22050_s18 + $0x580] sm:$0xff]   ;;  %v5144_v26 = vmax.f32 %v4905_v10, 0.0  ;;  %v5146_v52 = vmax.f32 %v4948_v61, 0.0  ;;  %v5032_v19 = vadd.f32 %v5031_v42, %v4584_v16  ;;  %v5130_v29 = vmax.f32 %v4944_v9, 0.0  ;;  %v17406_v42 = vld [vmem:[%s22050_s18 + $0x630] sm:$0xff]   ;;  %v17419_v61 = vld [vmem:[%s22050_s18 + $0x698] sm:$0xff]  }
0x1ae8   :  { %6319 = vmatprep.mubr.bf16.mxu0 %v5161_v31  ;;  %6360 = vmatprep.mubr.bf16.mxu1 %v5163_v5  ;;  %v17423_v9 = vld [vmem:[%s22050_s18 + $0x690] sm:$0xff]  }
0x1ae9   :  { %v4992_v63 = vpop.f32.mrf.mxu0  ;;  %v5035_v56 = vpop.f32.mrf.mxu1  ;;  %v5160_v5 = vpack.c.bf16 %v5144_v26, %v5128_v28  ;;  %v17428_v28 = vld [vmem:[%s22050_s18 + $0x640] sm:$0xff]  }
0x1aea   :  { %15939 = vmatpush3.bf16.msra.mxu0 %v17378_v33  ;;  %15961 = vmatpush3.bf16.msra.mxu1 %v17379_v53  ;;  %v4993_v18 = vadd.f32 %v4992_v63, %v4576_v8  ;;  %v5036_v20 = vadd.f32 %v5035_v56, %v4584_v16  ;;  %v5133_v33 = vmax.f32 %v4989_v37, 0.0  ;;  %v17402_v53 = vld [vmem:[%s22050_s18 + $0x638] sm:$0xff]   ;;  %v17415_v63 = vld [vmem:[%s22050_s18 + $0x6a0] sm:$0xff]   ;;  %v17420_v16 = vld [vmem:[%s22050_s18 + $0x650] sm:$0xff]  }
0x1aeb   :  { %15940 = vmatprep.subr.bf16.mxu0 %v17380_v38  ;;  %15962 = vmatprep.subr.bf16.mxu1 %v17381_v35  ;;  %v5162_v38 = vpack.c.bf16 %v5146_v52, %v5130_v29  ;;  %v5135_v35 = vmax.f32 %v5032_v19, 0.0  ;;  %v19644_v25 = vpop.f32.mrf.mxu1  ;;  %v17416_v8 = vld [vmem:[%s22050_s18 + $0x658] sm:$0xff]   ;;  %v17425_v37 = vld [vmem:[%s22050_s18 + $0x6c8] sm:$0xff]  }
0x1aec   :  { %v5149_v27 = vmax.f32 %v4993_v18, 0.0  ;;  %v5151_v31 = vmax.f32 %v5036_v20, 0.0  ;;  %v17417_v56 = vld [vmem:[%s22050_s18 + $0x6d8] sm:$0xff]   ;;  %v17422_v18 = vld [vmem:[%s22050_s18 + $0x610] sm:$0xff]   ;;  %v17424_v20 = vld [vmem:[%s22050_s18 + $0x648] sm:$0xff]  }
0x1aed   :  { %v5117_v10 = vpop.f32.mrf.mxu1  ;;  %v17426_v52 = vld [vmem:[%s22050_s18 + $0x608] sm:$0xff]  }
0x1aee   :  { %15941 = vmatpush3.bf16.msra.mxu0 %v17382_v49  ;;  %15963 = vmatpush3.bf16.msra.mxu1 %v17383_v7  ;;  %v17403_v49 = vld [vmem:[%s22050_s18 + $0x6b8] sm:$0xff]   ;;  %v5165_v7 = vpack.c.bf16 %v5149_v27, %v5133_v33  ;;  %v5167_v23 = vpack.c.bf16 %v5151_v31, %v5135_v35  ;;  %v17427_v27 = vld [vmem:[%s22050_s18 + $0x688] sm:$0xff]   ;;  %v4600_v31 = vrot.slane %v19569_v6, %v18659_v30  ;;  %v17430_v35 = vld [vmem:[%s22050_s18 + $0x600] sm:$0xff]  }
0x1aef   :  { %15942 = vmatprep.subr.bf16.mxu0 %v17384_v44  ;;  %15964 = vmatprep.subr.bf16.mxu1 %v17385_v22  ;;  %v17404_v44 = vld [vmem:[%s22050_s18 + $0x670] sm:$0xff]   ;;  %v19672_v45 = vpop.f32.mrf.mxu1 }
0x1af0   :  { %v17405_v22 = vld [vmem:[%s22050_s18 + $0x6f0] sm:$0xff]  }
0x1af2   :  { %15943 = vmatpush3.bf16.msra.mxu0 %v17386_v43  ;;  %15965 = vmatpush3.bf16.msra.mxu1 %v17387_v48  ;;  %v17407_v43 = vld [vmem:[%s22050_s18 + $0x6b0] sm:$0xff]   ;;  %v17408_v48 = vld [vmem:[%s22050_s18 + $0x668] sm:$0xff]  }
0x1af3   :  { %15944 = vmatprep.subr.bf16.mxu0 %v17388_v54  ;;  %15966 = vmatprep.subr.bf16.mxu1 %v17389_v55  ;;  %v17409_v54 = vld [vmem:[%s22050_s18 + $0x6e8] sm:$0xff]  }
0x1af4   :  { %v17410_v55 = vld [vmem:[%s22050_s18 + $0x628] sm:$0xff]  }
0x1af6   :  { %15945 = vmatpush3.bf16.msra.mxu0 %v17390_v59  ;;  %15967 = vmatpush3.bf16.msra.mxu1 %v17391_v60  ;;  %v17411_v59 = vld [vmem:[%s22050_s18 + $0x6a8] sm:$0xff]   ;;  %v17412_v60 = vld [vmem:[%s22050_s18 + $0x660] sm:$0xff]  }
0x1af7   :  { %15946 = vmatprep.subr.bf16.mxu0 %v17392_v36  ;;  %15968 = vmatprep.subr.bf16.mxu1 %v17393_v3  ;;  %v17413_v36 = vld [vmem:[%s22050_s18 + $0x6e0] sm:$0xff]   ;;  %v19639_v3 = vpop.f32.mrf.mxu0 }
0x1afa   :  { %15947 = vmatpush3.bf16.msra.mxu0 %v17394_v0  ;;  %15969 = vmatpush3.bf16.msra.mxu1 %v17395_v58  ;;  %v5074_v0 = vpop.f32.mrf.mxu0  ;;  %v17418_v58 = vld [vmem:[%s22050_s18 + $0x618] sm:$0xff]  }
0x1afb   :  { %15948 = vmatprep.subr.bf16.mxu0 %v17396_v62  ;;  %15970 = vmatprep.subr.bf16.mxu1 %v17397_v17  ;;  %v17421_v62 = vld [vmem:[%s22050_s18 + $0x6d0] sm:$0xff]  }
0x1afc   :  { %v19667_v17 = vpop.f32.mrf.mxu0 }
0x1afe   :  { %15949 = vmatpush3.bf16.msra.mxu0 %v17398_v11  ;;  %15971 = vmatpush3.bf16.msra.mxu1 %v17399_v24  ;;  %v4572_v11 = vrot.slane %v19569_v6, %v18640_v21  ;;  %v4580_v24 = vrot.slane %v19569_v6, %v18643_v15  ;;  %v5078_v26 = vpop.f32.mrf.mxu0 }
0x1aff   :  { %15978 = vmatprep.subr.bf16.mxu0 %v17400_v40  ;;  %16000 = vmatprep.subr.bf16.mxu1 %v17401_v47  ;;  %v4592_v40 = vrot.slane %v19569_v6, %v18662_v39  ;;  %v5121_v47 = vpop.f32.mrf.mxu1 }
0x1b00   :  { %v4991_v19 = vadd.f32 %v19546_v46, %v4572_v11  ;;  %v5034_v29 = vadd.f32 %v19548_v57, %v4580_v24  ;;  %v17429_v46 = vld [vmem:[%s22050_s18 + $0x6c0] sm:$0xff]   ;;  %v4987_v33 = vadd.f32 %v19518_v32, %v4572_v11  ;;  %v17432_v32 = vld [vmem:[%s22050_s18 + $0x778] sm:$0xff]  }
0x1b01   :  { %6320 = vmatmul.mubr.bf16.vlgmr.msra.gmra.mxu0 %v5160_v5  ;;  %6361 = vmatmul.mubr.bf16.vlgmr.msra.gmra.mxu1 %v5162_v38  ;;  %v5030_v5 = vadd.f32 %v19520_v34, %v4580_v24  ;;  %v5122_v38 = vadd.f32 %v5121_v47, %v4600_v31  ;;  %v5118_v34 = vadd.f32 %v5117_v10, %v4600_v31  ;;  %v17439_v10 = vld [vmem:[%s22050_s18 + $0x7b0] sm:$0xff]   ;;  %v17447_v11 = vld [vmem:[%s22050_s18 + $0x7a0] sm:$0xff]   ;;  %v17448_v24 = vld [vmem:[%s22050_s18 + $0x758] sm:$0xff]  }
0x1b02   :  { %15979 = vmatpush3.bf16.msra.mxu0 %v17402_v53  ;;  %6401 = vmatprep.mubr.bf16.mxu0 %v5165_v7  ;;  %v5079_v53 = vadd.f32 %v5078_v26, %v4592_v40  ;;  %v5148_v57 = vmax.f32 %v4991_v19, 0.0  ;;  %v17431_v7 = vld [vmem:[%s22050_s18 + $0x680] sm:$0xff]   ;;  %v17449_v26 = vld [vmem:[%s22050_s18 + $0x7d8] sm:$0xff]   ;;  %v17453_v47 = vld [vmem:[%s22050_s18 + $0x7d0] sm:$0xff]  }
0x1b03   :  { %16001 = vmatpush3.bf16.msra.mxu1 %v17403_v49  ;;  %6442 = vmatprep.mubr.bf16.mxu1 %v5167_v23  ;;  %v5075_v49 = vadd.f32 %v5074_v0, %v4592_v40  ;;  %v5132_v23 = vmax.f32 %v4987_v33, 0.0  ;;  %v17451_v19 = vld [vmem:[%s22050_s18 + $0x798] sm:$0xff]   ;;  %v17452_v40 = vld [vmem:[%s22050_s18 + $0x750] sm:$0xff]   ;;  %v17457_v31 = vld [vmem:[%s22050_s18 + $0x7c8] sm:$0xff]   ;;  %v4596_v33 = vrot.slane %v19569_v6, %v18744_v51 }
0x1b04   :  { %15980 = vmatprep.subr.bf16.mxu0 %v17404_v44  ;;  %16002 = vmatprep.subr.bf16.mxu1 %v17405_v22  ;;  %v5150_v44 = vmax.f32 %v5034_v29, 0.0  ;;  %v17433_v22 = vld [vmem:[%s22050_s18 + $0x7f8] sm:$0xff]   ;;  %v17456_v29 = vld [vmem:[%s22050_s18 + $0x748] sm:$0xff]  }
0x1b06   :  { %15981 = vmatpush3.bf16.msra.mxu0 %v17406_v42  ;;  %v5153_v42 = vmax.f32 %v5079_v53, 0.0  ;;  %v17458_v53 = vld [vmem:[%s22050_s18 + $0x708] sm:$0xff]  }
0x1b07   :  { %16003 = vmatpush3.bf16.msra.mxu1 %v17407_v43  ;;  %15982 = vmatprep.subr.bf16.mxu0 %v17408_v48  ;;  %v5134_v43 = vmax.f32 %v5030_v5, 0.0  ;;  %v5155_v48 = vmax.f32 %v5122_v38, 0.0  ;;  %v17459_v38 = vld [vmem:[%s22050_s18 + $0x788] sm:$0xff]  }
0x1b08   :  { %16004 = vmatprep.subr.bf16.mxu1 %v17409_v54  ;;  %v17434_v54 = vld [vmem:[%s22050_s18 + $0x738] sm:$0xff]  }
0x1b0a   :  { %15983 = vmatpush3.bf16.msra.mxu0 %v17410_v55  ;;  %v5164_v55 = vpack.c.bf16 %v5148_v57, %v5132_v23  ;;  %v5120_v57 = vadd.f32 %v19672_v45, %v4596_v33  ;;  %v17463_v45 = vld [vmem:[%s22050_s18 + $0x780] sm:$0xff]   ;;  %v17464_v23 = vld [vmem:[%s22117_s26 + $0x18] sm:$0xff]  }
0x1b0b   :  { %16005 = vmatpush3.bf16.msra.mxu1 %v17411_v59  ;;  %15984 = vmatprep.subr.bf16.mxu0 %v17412_v60  ;;  %v5137_v59 = vmax.f32 %v5075_v49, 0.0  ;;  %v17435_v60 = vld [vmem:[%s22050_s18 + $0x7b8] sm:$0xff]  }
0x1b0c   :  { %16006 = vmatprep.subr.bf16.mxu1 %v17413_v36  ;;  %v5166_v36 = vpack.c.bf16 %v5150_v44, %v5134_v43  ;;  %v5154_v44 = vmax.f32 %v5120_v57, 0.0  ;;  %v6683_v43 = vld [vmem:[%s22118_s2] sm:$0xff] }
0x1b0e   :  { %15985 = vmatpush3.bf16.msra.mxu0 %v17414_v4  ;;  %v5139_v4 = vmax.f32 %v5118_v34, 0.0 }
0x1b0f   :  { %16007 = vmatpush3.bf16.msra.mxu1 %v17415_v63  ;;  %15986 = vmatprep.subr.bf16.mxu0 %v17416_v8  ;;  %v17436_v63 = vld [vmem:[%s22050_s18 + $0x770] sm:$0xff]   ;;  %v5169_v8 = vpack.c.bf16 %v5153_v42, %v5137_v59  ;;  %v17467_v59 = vld [vmem:[%s22117_s26] sm:$0xff]  }
0x1b10   :  { %16008 = vmatprep.subr.bf16.mxu1 %v17417_v56  ;;  %v17437_v56 = vld [vmem:[%s22050_s18 + $0x7f0] sm:$0xff]   ;;  %v5171_v0 = vpack.c.bf16 %v5155_v48, %v5139_v4  ;;  %v6684_v48 = vld [vmem:[%s22118_s2 + $0x8] sm:$0xff] }
0x1b11   :  { %v17465_v42 = vld [vmem:[%s22117_s26 + $0x10] sm:$0xff]  }
0x1b12   :  { %15987 = vmatpush3.bf16.msra.mxu0 %v17418_v58  ;;  %v17438_v58 = vld [vmem:[%s22050_s18 + $0x730] sm:$0xff]  }
0x1b13   :  { %16009 = vmatpush3.bf16.msra.mxu1 %v17419_v61  ;;  %15988 = vmatprep.subr.bf16.mxu0 %v17420_v16  ;;  %v17440_v61 = vld [vmem:[%s22050_s18 + $0x768] sm:$0xff]  }
0x1b14   :  { %16010 = vmatprep.subr.bf16.mxu1 %v17421_v62  ;;  %v17441_v16 = vld [vmem:[%s22050_s18 + $0x7e8] sm:$0xff]  }
0x1b15   :  { %v17442_v62 = vld [vmem:[%s22050_s18 + $0x728] sm:$0xff]  }
0x1b16   :  { %15989 = vmatpush3.bf16.msra.mxu0 %v17422_v18  ;;  %v17443_v18 = vld [vmem:[%s22050_s18 + $0x7a8] sm:$0xff]  }
0x1b17   :  { %16011 = vmatpush3.bf16.msra.mxu1 %v17423_v9  ;;  %15990 = vmatprep.subr.bf16.mxu0 %v17424_v20  ;;  %v17444_v9 = vld [vmem:[%s22050_s18 + $0x760] sm:$0xff]  }
0x1b18   :  { %16012 = vmatprep.subr.bf16.mxu1 %v17425_v37  ;;  %v17445_v20 = vld [vmem:[%s22050_s18 + $0x7e0] sm:$0xff]  }
0x1b19   :  { %v17446_v37 = vld [vmem:[%s22050_s18 + $0x720] sm:$0xff]  }
0x1b1a   :  { %15991 = vmatpush3.bf16.msra.mxu0 %v17426_v52  ;;  %v17450_v52 = vld [vmem:[%s22050_s18 + $0x718] sm:$0xff]  }
0x1b1b   :  { %16013 = vmatpush3.bf16.msra.mxu1 %v17427_v27  ;;  %15992 = vmatprep.subr.bf16.mxu0 %v17428_v28  ;;  %v17454_v27 = vld [vmem:[%s22050_s18 + $0x710] sm:$0xff]  }
0x1b1c   :  { %16014 = vmatprep.subr.bf16.mxu1 %v17429_v46  ;;  %v17455_v28 = vld [vmem:[%s22050_s18 + $0x790] sm:$0xff]   ;;  %v4588_v46 = vrot.slane %v19569_v6, %v18741_v50  ;;  %v17461_v6 = vld [vmem:[%s22050_s18 + $0x7c0] sm:$0xff]  }
0x1b1e   :  { %15993 = vmatpush3.bf16.msra.mxu0 %v17430_v35  ;;  %v5077_v5 = vadd.f32 %v19667_v17, %v4588_v46  ;;  %v17460_v35 = vld [vmem:[%s22050_s18 + $0x740] sm:$0xff]   ;;  %v5073_v49 = vadd.f32 %v19639_v3, %v4588_v46  ;;  %v5116_v17 = vadd.f32 %v19644_v25, %v4596_v33 }
0x1b1f   :  { %16015 = vmatpush3.bf16.msra.mxu1 %v17431_v7  ;;  %16022 = vmatprep.subr.bf16.mxu0 %v17432_v32  ;;  %v17462_v7 = vld [vmem:[%s22050_s18 + $0x700] sm:$0xff]  }
0x1b20   :  { %16044 = vmatprep.subr.bf16.mxu1 %v17433_v22  ;;  %v5152_v32 = vmax.f32 %v5077_v5, 0.0  ;;  %v5136_v34 = vmax.f32 %v5073_v49, 0.0  ;;  %v5138_v22 = vmax.f32 %v5116_v17, 0.0 }
0x1b21   :  { %6402 = vmatmul.mubr.bf16.vlgmr.msra.gmra.mxu0 %v5164_v55  ;;  %v17466_v55 = vld [vmem:[%s22117_s26 + $0x8] sm:$0xff]   ;;  %s22128_s26 = sld [smem:[#allocation24_spill]] }
0x1b22   :  { %6443 = vmatmul.mubr.bf16.vlgmr.msra.gmra.mxu1 %v5166_v36  ;;  %16023 = vmatpush3.bf16.msra.mxu0 %v17434_v54  ;;  %v5168_v3 = vpack.c.bf16 %v5152_v32, %v5136_v34  ;;  %v5170_v25 = vpack.c.bf16 %v5154_v44, %v5138_v22  ;;  %v6686_v54 = vpack.c.bf16 %v6684_v48, %v6683_v43 }
0x1b23   :  { %6483 = vmatprep.mubr.bf16.mxu0 %v5169_v8  ;;  %16045 = vmatpush3.bf16.msra.mxu1 %v17435_v60  ;;  %v6685_v60 = vld [vmem:[%s22118_s2 + $0x10] sm:$0xff] }
0x1b24   :  { %6524 = vmatprep.mubr.bf16.mxu1 %v5171_v0  ;;  %16024 = vmatprep.subr.bf16.mxu0 %v17436_v63  ;;  %v6687_v36 = vpack.c.bf16 %v6685_v60, %v6685_v60 }
0x1b25   :  { %16046 = vmatprep.subr.bf16.mxu1 %v17437_v56 }
0x1b26   :  { %16025 = vmatpush3.bf16.msra.mxu0 %v17438_v58 }
0x1b27   :  { %16047 = vmatpush3.bf16.msra.mxu1 %v17439_v10  ;;  %16026 = vmatprep.subr.bf16.mxu0 %v17440_v61 }
0x1b28   :  { %16048 = vmatprep.subr.bf16.mxu1 %v17441_v16 }
0x1b2a   :  { %16027 = vmatpush3.bf16.msra.mxu0 %v17442_v62 }
0x1b2b   :  { %16049 = vmatpush3.bf16.msra.mxu1 %v17443_v18  ;;  %16028 = vmatprep.subr.bf16.mxu0 %v17444_v9 }
0x1b2c   :  { %16050 = vmatprep.subr.bf16.mxu1 %v17445_v20 }
0x1b2e   :  { %16029 = vmatpush3.bf16.msra.mxu0 %v17446_v37 }
0x1b2f   :  { %16051 = vmatpush3.bf16.msra.mxu1 %v17447_v11  ;;  %16030 = vmatprep.subr.bf16.mxu0 %v17448_v24 }
0x1b30   :  { %16052 = vmatprep.subr.bf16.mxu1 %v17449_v26  ;;  %v14715_v26 = vld [vmem:[%s22051_s19 + $0x1] ss:$0 sm:$0xff] }
0x1b32   :  { %16031 = vmatpush3.bf16.msra.mxu0 %v17450_v52 }
0x1b33   :  { %16053 = vmatpush3.bf16.msra.mxu1 %v17451_v19  ;;  %16032 = vmatprep.subr.bf16.mxu0 %v17452_v40 }
0x1b34   :  { %16054 = vmatprep.subr.bf16.mxu1 %v17453_v47 }
0x1b36   :  { %16033 = vmatpush3.bf16.msra.mxu0 %v17454_v27 }
0x1b37   :  { %16055 = vmatpush3.bf16.msra.mxu1 %v17455_v28  ;;  %16034 = vmatprep.subr.bf16.mxu0 %v17456_v29 }
0x1b38   :  { %16056 = vmatprep.subr.bf16.mxu1 %v17457_v31 }
0x1b3a   :  { %16035 = vmatpush3.bf16.msra.mxu0 %v17458_v53 }
0x1b3b   :  { %16057 = vmatpush3.bf16.msra.mxu1 %v17459_v38  ;;  %16036 = vmatprep.subr.bf16.mxu0 %v17460_v35 }
0x1b3c   :  { %16058 = vmatprep.subr.bf16.mxu1 %v17461_v6 }
0x1b3e   :  { %16037 = vmatpush3.bf16.msra.mxu0 %v17462_v7 }
0x1b3f   :  { %16059 = vmatpush3.bf16.msra.mxu1 %v17463_v45  ;;  %16841 = vmatprep.subr.mxu0 %v18033_v1 }
0x1b40   :  { %16848 = vmatprep.subr.bf16.mxu1 %v17464_v23 }
0x1b41   :  { %6484 = vmatmul.mubr.bf16.vlgmr.msra.gmra.mxu0 %v5168_v3 }
0x1b42   :  { %6525 = vmatmul.mubr.bf16.vlgmr.msra.gmra.mxu1 %v5170_v25  ;;  %16845 = vmatprep.mubr.msk.f32.mxu0 %vm18034_vm0, %v18033_v1 }
0x1b43   :  { %16849 = vmatpush3.bf16.msra.mxu1 %v17464_v23  ;;  %16856 = vmatprep.mubr.msk.bf16.mxu1 %vm6727_vm6, %v6686_v54 }
0x1b44   :  { %16850 = vmatprep.subr.bf16.mxu1 %v17465_v42 }
0x1b47   :  { %16851 = vmatpush3.bf16.msra.mxu1 %v17465_v42 }
0x1b48   :  { %16852 = vmatprep.subr.bf16.mxu1 %v17466_v55 }
0x1b4b   :  { %16853 = vmatpush3.bf16.msra.mxu1 %v17466_v55 }
0x1b4c   :  { %16854 = vmatprep.subr.bf16.mxu1 %v17467_v59 }
0x1b4f   :  { %16855 = vmatpush3.bf16.msra.mxu1 %v17467_v59 }
0x1b50   :  { %16883 = vmatprep.subr.mxu1 %v18033_v1 }
0x1b52   :  { %16857 = vmatmul.mubr.msk.bf16.vlgmr.msra.gmra.mxu1 %vm6727_vm6, %v6687_v36 }
0x1b53   :  { %16889 = vmatprep.mubr.msk.f32.mxu1 %vm18034_vm0, %v18033_v1 }
0x1ba1   :  { %v15906_v4 = vpop.f32.mrf.mxu0  ;;  %v15928_v63 = vpop.f32.mrf.mxu1 }
0x1ba3   :  { %v15907_v8 = vpop.f32.mrf.mxu0  ;;  %v15929_v56 = vpop.f32.mrf.mxu1 }
0x1ba4   :  { %v15908_v24 = vadd.f32 %v15907_v8, %v15906_v4  ;;  %v15930_v29 = vadd.f32 %v15929_v56, %v15928_v63 }
0x1ba5   :  { %v15909_v0 = vpop.f32.mrf.mxu0  ;;  %v15931_v58 = vpop.f32.mrf.mxu1 }
0x1ba6   :  { %v6240_v40 = vadd.f32 %v15908_v24, %v14715_v26 }
0x1ba7   :  { %v15910_v10 = vpop.f32.mrf.mxu0  ;;  %v15932_v16 = vpop.f32.mrf.mxu1 }
0x1ba8   :  { %v15911_v47 = vadd.f32 %v15910_v10, %v15909_v0  ;;  %v6281_v46 = vadd.f32 %v15930_v29, %v6240_v40  ;;  %v15933_v38 = vadd.f32 %v15932_v16, %v15931_v58 }
0x1baa   :  { %v6243_v33 = vadd.f32 %v15911_v47, %v14715_v26 }
0x1bac   :  { %v6284_v6 = vadd.f32 %v15933_v38, %v6243_v33 }
0x1bc1   :  { %v15950_v61 = vpop.f32.mrf.mxu0  ;;  %v15972_v62 = vpop.f32.mrf.mxu1 }
0x1bc3   :  { %v15951_v18 = vpop.f32.mrf.mxu0  ;;  %v15973_v9 = vpop.f32.mrf.mxu1 }
0x1bc4   :  { %v15952_v31 = vadd.f32 %v15951_v18, %v15950_v61  ;;  %v15974_v49 = vadd.f32 %v15973_v9, %v15972_v62 }
0x1bc5   :  { %v15953_v20 = vpop.f32.mrf.mxu0  ;;  %v15975_v37 = vpop.f32.mrf.mxu1 }
0x1bc6   :  { %v6322_v35 = vadd.f32 %v15952_v31, %v6281_v46 }
0x1bc7   :  { %v15954_v11 = vpop.f32.mrf.mxu0  ;;  %v15976_v19 = vpop.f32.mrf.mxu1 }
0x1bc8   :  { %v15955_v57 = vadd.f32 %v15954_v11, %v15953_v20  ;;  %v6363_v45 = vadd.f32 %v15974_v49, %v6322_v35  ;;  %v15977_v34 = vadd.f32 %v15976_v19, %v15975_v37 }
0x1bca   :  { %v6325_v44 = vadd.f32 %v15955_v57, %v6284_v6 }
0x1bcc   :  { %v6366_v42 = vadd.f32 %v15977_v34, %v6325_v44  ;;  %v14846_v34 = vld [vmem:[%s22052_s20 + $0x1] ss:$0 sm:$0xff] }
0x1be1   :  { %v15994_v52 = vpop.f32.mrf.mxu0 }
0x1be2   :  { %v16016_v27 = vpop.f32.mrf.mxu1 }
0x1be3   :  { %v15995_v28 = vpop.f32.mrf.mxu0 }
0x1be4   :  { %v16017_v53 = vpop.f32.mrf.mxu1  ;;  %v15996_v17 = vadd.f32 %v15995_v28, %v15994_v52 }
0x1be5   :  { %v15997_v5 = vpop.f32.mrf.mxu0  ;;  %v16018_v43 = vadd.f32 %v16017_v53, %v16016_v27 }
0x1be6   :  { %v16019_v7 = vpop.f32.mrf.mxu1  ;;  %v6404_v22 = vadd.f32 %v15996_v17, %v6363_v45  ;;  %v14849_v45 = vld [vmem:[%s22119_s4] ss:$0 sm:$0xff]  ;;  %s22123_s4 = smov 64  }
0x1be7   :  { %v15998_v32 = vpop.f32.mrf.mxu0 }
0x1be8   :  { %v15999_v3 = vadd.f32 %v15998_v32, %v15997_v5  ;;  %v16020_v25 = vpop.f32.mrf.mxu1  ;;  %v6445_v55 = vadd.f32 %v16018_v43, %v6404_v22  ;;  %v14847_v43 = vld [vmem:[%s22053_s21 + $0x1] ss:$0 sm:$0xff] }
0x1be9   :  { %v16021_v63 = vadd.f32 %v16020_v25, %v16019_v7 }
0x1bea   :  { %v6407_v59 = vadd.f32 %v15999_v3, %v6366_v42 }
0x1bec   :  { %v6448_v10 = vadd.f32 %v16021_v63, %v6407_v59 }
0x1c01   :  { %v16038_v23 = vpop.f32.mrf.mxu0 }
0x1c02   :  { %v16060_v48 = vpop.f32.mrf.mxu1 }
0x1c03   :  { %v16039_v54 = vpop.f32.mrf.mxu0 }
0x1c04   :  { %v16040_v60 = vadd.f32 %v16039_v54, %v16038_v23  ;;  %v16061_v36 = vpop.f32.mrf.mxu1  ;;  %v17468_v54 = vld [vmem:[%s22042_s10 + $0x8] sm:$0xff]  }
0x1c05   :  { %v16041_v4 = vpop.f32.mrf.mxu0  ;;  %v16062_v56 = vadd.f32 %v16061_v36, %v16060_v48  ;;  %v17469_v36 = vld [vmem:[%s22042_s10] sm:$0xff]  }
0x1c06   :  { %v6486_v8 = vadd.f32 %v16040_v60, %v6445_v55  ;;  %v16063_v0 = vpop.f32.mrf.mxu1  ;;  %v6595_v60 = vld [vmem:[%s22120_s29] sm:$0x3] }
0x1c07   :  { %v16042_v58 = vpop.f32.mrf.mxu0 }
0x1c08   :  { %v6527_v61 = vadd.f32 %v16062_v56, %v6486_v8  ;;  %v16043_v16 = vadd.f32 %v16042_v58, %v16041_v4  ;;  %v16064_v62 = vpop.f32.mrf.mxu1 }
0x1c09   :  { %v16065_v9 = vadd.f32 %v16064_v62, %v16063_v0  ;;  %v14856_v0 = vld [vmem:[%s22043_s11] ss:$0 sm:$0xff] }
0x1c0a   :  { %v6489_v18 = vadd.f32 %v16043_v16, %v6448_v10  ;;  %v6533_v20 = vadd.f32 %v6527_v61, %v19277_v14 }
0x1c0c   :  { %v6530_v37 = vadd.f32 %v16065_v9, %v6489_v18  ;;  %v6539_v11 = vsel %vm184_vm2, %v6533_v20, 0.0 }
0x1c0d   :  { %6540 = vadd.xlane.f32.xlu0 %v6539_v11 }
0x1c0e   :  { %v6534_v24 = vadd.f32 %v6530_v37, %v19279_v2 }
0x1c10   :  { %v6542_v26 = vsel %vm184_vm2, %v6534_v24, 0.0 }
0x1c11   :  { %6543 = vadd.xlane.f32.xlu1 %v6542_v26 }
0x1c12   :  { %v16858_v33 = vpop.f32.mrf.mxu1 }
0x1c13   :  { %v19888_v4 = vadd.f32 %v16858_v33, %v14849_v45  ;;  %v19956_v33 = vld [vmem:[%s22122_s0 + $0x10] sm:$0xff] }
0x1c14   :  { %v6768_v53 = vpop.f32.mrf.mxu1 }
0x1c15   :  { %v19861_v3 = vadd.f32 %v14849_v45, %v6768_v53  ;;  %v6783_v63 = vpack.c.bf16 %v19888_v4, %v19888_v4 }
0x1c16   :  { %v16859_v2 = vpop.f32.mrf.mxu1 }
0x1c18   :  { %v6771_v44 = vpop.f32.mrf.mxu1 }
0x1c19   :  { %v19863_v25 = vadd.f32 %v14849_v45, %v6771_v44 }
0x1c1b   :  { %v6782_v55 = vpack.c.bf16 %v19863_v25, %v19861_v3 }
0x1c96   :  { %v6541_v52 = vpop.xlane.xlu0 %6540 }
0x1c97   :  { %v6545_v19 = vmul.f32 0.03125, %v6541_v52 }
0x1c99   :  { %v6547_v40 = vsub.f32 %v6533_v20, %v6545_v19  ;;  %v19943_v19 = vld [vmem:[%s22122_s0] sm:$0xff] }
0x1c9a   :  { %v6544_v47 = vpop.xlane.xlu1 %6543 }
0x1c9b   :  { %v6546_v27 = vmul.f32 0.03125, %v6544_v47  ;;  %v6549_v28 = vmul.f32 %v6547_v40, %v6547_v40 }
0x1c9d   :  { %v6548_v29 = vsub.f32 %v6534_v24, %v6546_v27  ;;  %v6551_v31 = vsel %vm184_vm2, %v6549_v28, 0.0  ;;  %v19949_v28 = vld [vmem:[%s22122_s0 + $0x8] sm:$0xff] }
0x1c9e   :  { %6552 = vadd.xlane.f32.xlu0 %v6551_v31 }
0x1c9f   :  { %v6550_v14 = vmul.f32 %v6548_v29, %v6548_v29 }
0x1ca1   :  { %v6554_v46 = vsel %vm184_vm2, %v6550_v14, 0.0 }
0x1ca2   :  { %6555 = vadd.xlane.f32.xlu1 %v6554_v46 }
0x1d27   :  { %v6553_v5 = vpop.xlane.xlu0 %6552 }
0x1d28   :  { %v6557_v38 = vmul.f32 0.03125, %v6553_v5 }
0x1d2a   :  { %v6559_v35 = vadd.f32 1e-05, %v6557_v38 }
0x1d2b   :  { %v6556_v57 = vpop.xlane.xlu1 %6555 }
0x1d2c   :  { %17804 = vrsqrt.f32 %v6559_v35  ;;  %v6558_v6 = vmul.f32 0.03125, %v6556_v57 }
0x1d2e   :  { %v6560_v49 = vadd.f32 1e-05, %v6558_v6 }
0x1d30   :  { %17806 = vrsqrt.f32 %v6560_v49 }
0x1d39   :  { %v17805_v17 = vpop.eup %17804 }
0x1d3a   :  { %v6563_v7 = vmul.f32 %v17805_v17, %v6547_v40 }
0x1d3c   :  { %v6571_v42 = vmul.f32 %v14846_v34, %v6563_v7 }
0x1d3d   :  { %v17807_v32 = vpop.eup %17806 }
0x1d3e   :  { %v6564_v22 = vmul.f32 %v17807_v32, %v6548_v29  ;;  %v19876_v59 = vadd.f32 %v14847_v43, %v6571_v42 }
0x1d40   :  { %v6572_v23 = vmul.f32 %v14846_v34, %v6564_v22 }
0x1d42   :  { %v19868_v48 = vadd.f32 %v14847_v43, %v6572_v23 }
0x1d44   :  { %16842 = vmatpush3.msra.mxu0 %v19868_v48 }
0x1d45   :  { %16843 = vmatprep.subr.mxu0 %v18033_v1 }
0x1d46   :  { %16844 = vmatpush3.msra.mxu0 %v19876_v59 }
0x1d47   :  { %16846 = vmatmul.mubr.msk.f32.vlgmr.msra.gmra.mxu0 %vm327_vm4, %v6595_v60  ;;  %16860 = vmatprep.subr.bf16.mxu0 %v17468_v54 }
0x1d48   :  { %16861 = vmatpush3.bf16.msra.mxu0 %v17468_v54  ;;  %16864 = vmatprep.mubr.msk.bf16.mxu0 %vm184_vm2, %v6782_v55 }
0x1d49   :  { %16862 = vmatprep.subr.bf16.mxu0 %v17469_v36 }
0x1d4c   :  { %16863 = vmatpush3.bf16.msra.mxu0 %v17469_v36 }
0x1d4d   :  { %16868 = vmatprep.subr.mxu0 %v18033_v1 }
0x1d4f   :  { %16865 = vmatmul.mubr.msk.bf16.vlgmr.msra.gmra.mxu0 %vm184_vm2, %v6783_v63 }
0x1d50   :  { %16874 = vmatprep.mubr.msk.f32.mxu0 %vm18034_vm0, %v18033_v1 }
0x1e07   :  { %v19896_v8 = vpop.f32.mrf.mxu0 }
0x1e09   :  { %v16847_v56 = vpop.f32.mrf.mxu0 }
0x1e0f   :  { %v16866_v58 = vpop.f32.mrf.mxu0 }
0x1e10   :  { %v19901_v10 = vadd.f32 %v16866_v58, %v14856_v0 }
0x1e11   :  { %v6847_v61 = vpop.f32.mrf.mxu0 }
0x1e12   :  { %6875 = vrot.lane.b32.xlu1 %v19901_v10, %s22121_s25  ;;  %v19905_v62 = vadd.f32 %v14856_v0, %v6847_v61  ;;  %v19934_v52 = vmul.f32 0.35355338, %v19901_v10 }
0x1e13   :  { %v16867_v16 = vpop.f32.mrf.mxu0 }
0x1e14   :  { %v19919_v24 = vmul.f32 0.35355338, %v19905_v62 }
0x1e15   :  { %v6850_v18 = vpop.f32.mrf.mxu0 }
0x1e16   :  { %v19907_v9 = vadd.f32 %v14856_v0, %v6850_v18  ;;  %6871 = vrot.lane.b32.xlu1 %v19905_v62, %s22121_s25 }
0x1e18   :  { %6873 = vrot.lane.b32.xlu0 %v19907_v9, %s22121_s25  ;;  %v19927_v26 = vmul.f32 0.35355338, %v19907_v9 }
0x1e84   :  { %v6876_v20 = vpop.permute.xlu1 %6875 }
0x1e85   :  { %16869 = vmatpush3.xpose.msk.msra.mxu0 %vm241_vm3, %v6876_v20 }
0x1e86   :  { %16870 = vmatprep.subr.mxu0 %v18033_v1 }
0x1e88   :  { %v6872_v11 = vpop.permute.xlu1 %6871 }
0x1e8a   :  { %v6874_v37 = vpop.permute.xlu0 %6873 }
0x1e8b   :  { %16871 = vmatpush3.xpose.msk.msra.mxu0 %vm241_vm3, %v6874_v37 }
0x1e8c   :  { %16872 = vmatprep.subr.mxu0 %v18033_v1 }
0x1e8f   :  { %16873 = vmatpush3.xpose.msk.msra.mxu0 %vm241_vm3, %v6872_v11 }
0x1e90   :  { %16913 = vmatprep.subr.mxu0 %v18033_v1 }
0x1e92   :  { %16875 = vmatmul.mubr.msk.f32.vlgmr.msra.gmra.mxu0 %vm241_vm3, %v19919_v24 }
0x1e93   :  { %16877 = vmatprep.mubr.msk.f32.mxu0 %vm18034_vm0, %v18033_v1 }
0x1e96   :  { %16878 = vmatmul.mubr.msk.f32.gmra.mxu0 %vm241_vm3, %v19927_v26 }
0x1e97   :  { %16880 = vmatprep.mubr.msk.f32.mxu0 %vm18034_vm0, %v18033_v1 }
0x1e9a   :  { %16881 = vmatmul.mubr.msk.f32.gmra.mxu0 %vm241_vm3, %v19934_v52 }
0x1e9b   :  { %16919 = vmatprep.mubr.msk.f32.mxu0 %vm18034_vm0, %v18033_v1 }
0x1f52   :  { %v6958_v40 = vpop.f32.mrf.mxu0 }
0x1f53   :  { %v6959_v47 = vadd.f32 %v6958_v40, %v19943_v19 }
0x1f54   :  { %v16876_v27 = vpop.f32.mrf.mxu0 }
0x1f55   :  { %v6973_v29 = vsel %vm6972_vm7, %v6959_v47, -inf }
0x1f56   :  { %6974 = vmax.xlane.f32.xlu1 %v6973_v29  ;;  %v6963_v31 = vpop.f32.mrf.mxu0 }
0x1f57   :  { %v6964_v14 = vadd.f32 %v6963_v31, %v19949_v28 }
0x1f58   :  { %v16879_v46 = vpop.f32.mrf.mxu0 }
0x1f59   :  { %v6976_v53 = vsel %vm6972_vm7, %v6964_v14, -inf }
0x1f5a   :  { %6977 = vmax.xlane.f32.xlu0 %v6976_v53  ;;  %v6968_v2 = vpop.f32.mrf.mxu0 }
0x1f5b   :  { %v6969_v5 = vadd.f32 %v6968_v2, %v19956_v33 }
0x1f5c   :  { %v16882_v38 = vpop.f32.mrf.mxu0 }
0x1f5d   :  { %v6979_v35 = vsel %vm6972_vm7, %v6969_v5, -inf }
0x1f5e   :  { %6980 = vmax.xlane.f32.xlu0 %v6979_v35 }
0x1f67   :  { %7008 = vrot.lane.b32.xlu1 %v19907_v9, %s22123_s4 }
0x1f6b   :  { %7006 = vrot.lane.b32.xlu1 %v19905_v62, %s22123_s4 }
0x1f74   :  { %7010 = vrot.lane.b32.xlu0 %v19901_v10, %s22123_s4 }
0x1fdf   :  { %v6975_v57 = vpop.xlane.xlu1 %6974 }
0x1fe0   :  { %v6982_v6 = vsub.f32 %v6959_v47, %v6975_v57 }
0x1fe2   :  { %v6985_v49 = vmul.f32 1.442695, %v6982_v6 }
0x1fe3   :  { %v6978_v17 = vpop.xlane.xlu0 %6977  ;;  %v7009_v44 = vpop.permute.xlu1 %7008 }
0x1fe4   :  { %17808 = vpow2.f32 %v6985_v49  ;;  %v6983_v7 = vsub.f32 %v6964_v14, %v6978_v17 }
0x1fe6   :  { %v6987_v32 = vmul.f32 1.442695, %v6983_v7 }
0x1fe7   :  { %v6981_v45 = vpop.xlane.xlu0 %6980  ;;  %v7007_v22 = vpop.permute.xlu1 %7006 }
0x1fe8   :  { %17810 = vpow2.f32 %v6987_v32  ;;  %v6984_v55 = vsub.f32 %v6969_v5, %v6981_v45 }
0x1fea   :  { %v6989_v60 = vmul.f32 1.442695, %v6984_v55 }
0x1feb   :  { %v7011_v34 = vpop.permute.xlu0 %7010 }
0x1fec   :  { %16884 = vmatpush3.msra.mxu1 %v7011_v34  ;;  %17812 = vpow2.f32 %v6989_v60 }
0x1fed   :  { %16885 = vmatprep.subr.mxu1 %v18033_v1 }
0x1fee   :  { %16886 = vmatpush3.msra.mxu1 %v7009_v44 }
0x1fef   :  { %16887 = vmatprep.subr.mxu1 %v18033_v1 }
0x1ff0   :  { %16888 = vmatpush3.msra.mxu1 %v7007_v22 }
0x1ff1   :  { %v17809_v23 = vpop.eup %17808  ;;  %16898 = vmatprep.subr.mxu1 %v18033_v1 }
0x1ff2   :  { %v6991_v42 = vsel %vm6972_vm7, %v17809_v23, 0.0 }
0x1ff3   :  { %6992 = vadd.xlane.f32.xlu1 %v6991_v42 }
0x1ff5   :  { %v17811_v43 = vpop.eup %17810 }
0x1ff6   :  { %v6994_v54 = vsel %vm6972_vm7, %v17811_v43, 0.0 }
0x1ff7   :  { %6995 = vadd.xlane.f32.xlu0 %v6994_v54 }
0x1ff9   :  { %v17813_v36 = vpop.eup %17812 }
0x1ffa   :  { %v6997_v63 = vsel %vm6972_vm7, %v17813_v36, 0.0 }
0x2004   :  { %7114 = vrot.lane.b32.xlu1 %v19907_v9, %s22124_s3 }
0x200d   :  { %7116 = vrot.lane.b32.xlu0 %v19901_v10, %s22124_s3 }
0x2011   :  { %7112 = vrot.lane.b32.xlu0 %v19905_v62, %s22124_s3 }
0x2015   :  { %7108 = vrot.lane.b32.xlu0 %v19927_v26, %s22125_s24 }
0x2028   :  { %6998 = vadd.xlane.f32.xlu1 %v6997_v63 }
0x2039   :  { %7106 = vrot.lane.b32.xlu1 %v19919_v24, %s22125_s24 }
0x203d   :  { %7110 = vrot.lane.b32.xlu1 %v19934_v52, %s22125_s24 }
0x207c   :  { %v6993_v56 = vpop.xlane.xlu1 %6992 }
0x207d   :  { %17814 = vrcp.f32 %v6993_v56 }
0x2080   :  { %v6996_v0 = vpop.xlane.xlu0 %6995  ;;  %v7115_v37 = vpop.permute.xlu1 %7114 }
0x2081   :  { %17816 = vrcp.f32 %v6996_v0 }
0x2084   :  { %v7117_v16 = vpop.permute.xlu0 %7116 }
0x2088   :  { %v7113_v11 = vpop.permute.xlu0 %7112 }
0x208a   :  { %v17815_v58 = vpop.eup %17814 }
0x208b   :  { %v7003_v61 = vmul.f32 %v17815_v58, %v17809_v23 }
0x208c   :  { %v7109_v31 = vpop.permute.xlu0 %7108 }
0x208d   :  { %16890 = vmatmul.mubr.msk.f32.vlgmr.msra.gmra.mxu1 %vm6972_vm7, %v7003_v61 }
0x208e   :  { %v17817_v18 = vpop.eup %17816  ;;  %16899 = vmatpush3.xpose.msk.msra.mxu1 %vm241_vm3, %v7117_v16  ;;  %16892 = vmatprep.mubr.msk.f32.mxu1 %vm18034_vm0, %v18033_v1 }
0x208f   :  { %16900 = vmatprep.subr.mxu1 %v18033_v1  ;;  %v7004_v20 = vmul.f32 %v17817_v18, %v17811_v43 }
0x2091   :  { %16893 = vmatmul.mubr.msk.f32.gmra.mxu1 %vm6972_vm7, %v7004_v20 }
0x2092   :  { %16901 = vmatpush3.xpose.msk.msra.mxu1 %vm241_vm3, %v7115_v37  ;;  %16895 = vmatprep.mubr.msk.f32.mxu1 %vm18034_vm0, %v18033_v1 }
0x2093   :  { %16902 = vmatprep.subr.mxu1 %v18033_v1 }
0x2096   :  { %16903 = vmatpush3.xpose.msk.msra.mxu1 %vm241_vm3, %v7113_v11 }
0x20b1   :  { %v6999_v40 = vpop.xlane.xlu1 %6998 }
0x20b2   :  { %17818 = vrcp.f32 %v6999_v40 }
0x20b5   :  { %v7107_v29 = vpop.permute.xlu1 %7106 }
0x20b9   :  { %v7111_v14 = vpop.permute.xlu1 %7110 }
0x20bf   :  { %v17819_v47 = vpop.eup %17818 }
0x20c0   :  { %v7005_v27 = vmul.f32 %v17819_v47, %v17813_v36 }
0x20c2   :  { %16896 = vmatmul.mubr.msk.f32.gmra.mxu1 %vm6972_vm7, %v7005_v27 }
0x20c3   :  { %16904 = vmatprep.mubr.msk.f32.mxu1 %vm18034_vm0, %v18033_v1 }
0x20c6   :  { %16905 = vmatmul.mubr.msk.f32.vlgmr.msra.gmra.mxu1 %vm241_vm3, %v7107_v29 }
0x20c7   :  { %16907 = vmatprep.mubr.msk.f32.mxu1 %vm18034_vm0, %v18033_v1 }
0x20ca   :  { %16908 = vmatmul.mubr.msk.f32.gmra.mxu1 %vm241_vm3, %v7109_v31 }
0x20cb   :  { %16910 = vmatprep.mubr.msk.f32.mxu1 %vm18034_vm0, %v18033_v1 }
0x20ce   :  { %16911 = vmatmul.mubr.msk.f32.gmra.mxu1 %vm241_vm3, %v7111_v14 }
0x214d   :  { %v20006_v46 = vpop.f32.mrf.mxu1 }
0x214f   :  { %v16891_v53 = vpop.f32.mrf.mxu1 }
0x2151   :  { %v20008_v2 = vpop.f32.mrf.mxu1 }
0x2152   :  { %v7104_v5 = vpack.c.bf16 %v20008_v2, %v20006_v46 }
0x2153   :  { %v16894_v38 = vpop.f32.mrf.mxu1 }
0x2182   :  { %v20012_v35 = vpop.f32.mrf.mxu1 }
0x2184   :  { %v16897_v57 = vpop.f32.mrf.mxu1 }
0x2186   :  { %v7196_v6 = vpop.f32.mrf.mxu1 }
0x2187   :  { %v7197_v49 = vadd.f32 %v7196_v6, %v19943_v19 }
0x2188   :  { %v16906_v17 = vpop.f32.mrf.mxu1 }
0x2189   :  { %v7210_v7 = vsel %vm6972_vm7, %v7197_v49, -inf }
0x218a   :  { %7211 = vmax.xlane.f32.xlu0 %v7210_v7  ;;  %v7201_v32 = vpop.f32.mrf.mxu1  ;;  %v7105_v7 = vpack.c.bf16 %v20012_v35, %v20012_v35 }
0x218b   :  { %v7202_v45 = vadd.f32 %v7201_v32, %v19949_v28  ;;  %v6862_v32 = vld [vmem:[%s22044_s12 + $0x4] sm:$0xf] }
0x218c   :  { %v16909_v44 = vpop.f32.mrf.mxu1  ;;  %17173 = vmatprep.subr.msk.bf16.mxu1 %vm642_vm5, %v6862_v32 }
0x218d   :  { %v7213_v34 = vsel %vm6972_vm7, %v7202_v45, -inf }
0x218e   :  { %7214 = vmax.xlane.f32.xlu1 %v7213_v34  ;;  %v7206_v22 = vpop.f32.mrf.mxu1 }
0x218f   :  { %v7207_v23 = vadd.f32 %v7206_v22, %v19956_v33 }
0x2190   :  { %v16912_v42 = vpop.f32.mrf.mxu1 }
0x2191   :  { %v7216_v43 = vsel %vm6972_vm7, %v7207_v23, -inf }
0x2192   :  { %7217 = vmax.xlane.f32.xlu0 %v7216_v43 }
0x219f   :  { %7247 = vrot.lane.b32.xlu1 %v19901_v10, %s22110_s28 }
0x2213   :  { %v7212_v54 = vpop.xlane.xlu0 %7211 }
0x2214   :  { %v7219_v55 = vsub.f32 %v7197_v49, %v7212_v54 }
0x2216   :  { %v7222_v60 = vmul.f32 1.442695, %v7219_v55 }
0x2217   :  { %v7215_v36 = vpop.xlane.xlu1 %7214 }
0x2218   :  { %17820 = vpow2.f32 %v7222_v60  ;;  %v7220_v63 = vsub.f32 %v7202_v45, %v7215_v36  ;;  %v7350_v45 = vsel %vm642_vm5, %v6862_v32, 0 }
0x2219   :  { %16929 = vmatpush3.bf16.msra.mxu1 %v7350_v45 }
0x221a   :  { %v7224_v56 = vmul.f32 1.442695, %v7220_v63  ;;  %16940 = vmatprep.subr.mxu1 %v18033_v1 }
0x221b   :  { %v7248_v0 = vpop.permute.xlu1 %7247  ;;  %v7218_v58 = vpop.xlane.xlu0 %7217 }
0x221c   :  { %17822 = vpow2.f32 %v7224_v56  ;;  %v7221_v61 = vsub.f32 %v7207_v23, %v7218_v58  ;;  %16914 = vmatpush3.msra.mxu0 %v7248_v0 }
0x221d   :  { %16915 = vmatprep.subr.mxu0 %v18033_v1 }
0x221e   :  { %v7226_v16 = vmul.f32 1.442695, %v7221_v61 }
0x2220   :  { %17824 = vpow2.f32 %v7226_v16 }
0x2225   :  { %v17821_v18 = vpop.eup %17820 }
0x2226   :  { %v7228_v20 = vsel %vm6972_vm7, %v17821_v18, 0.0 }
0x2227   :  { %7229 = vadd.xlane.f32.xlu0 %v7228_v20 }
0x2229   :  { %v17823_v37 = vpop.eup %17822 }
0x222a   :  { %v7231_v11 = vsel %vm6972_vm7, %v17823_v37, 0.0 }
0x222b   :  { %7232 = vadd.xlane.f32.xlu1 %v7231_v11 }
0x222d   :  { %v17825_v40 = vpop.eup %17824 }
0x222e   :  { %v7234_v47 = vsel %vm6972_vm7, %v17825_v40, 0.0 }
0x222f   :  { %7235 = vadd.xlane.f32.xlu0 %v7234_v47 }
0x223c   :  { %7243 = vrot.lane.b32.xlu1 %v19905_v62, %s22110_s28 }
0x2240   :  { %7467 = vrot.lane.b32.xlu1 %v19901_v10, %s22111_s30 }
0x2244   :  { %7463 = vrot.lane.b32.xlu1 %v19905_v62, %s22111_s30 }
0x2245   :  { %7245 = vrot.lane.b32.xlu0 %v19907_v9, %s22110_s28 }
0x2248   :  { %7459 = vrot.lane.b32.xlu1 %v19927_v26, %s22112_s7 }
0x2249   :  { %7465 = vrot.lane.b32.xlu0 %v19907_v9, %s22111_s30 }
0x224c   :  { %7764 = vrot.lane.b32.xlu1 %v19901_v10, %s22114_s5 }
0x224d   :  { %7457 = vrot.lane.b32.xlu0 %v19919_v24, %s22112_s7 }
0x2250   :  { %7760 = vrot.lane.b32.xlu1 %v19905_v62, %s22114_s5 }
0x2251   :  { %7461 = vrot.lane.b32.xlu0 %v19934_v52, %s22112_s7 }
0x2254   :  { %7756 = vrot.lane.b32.xlu1 %v19927_v26, %s22115_s6  ;;  %v6861_v26 = vld [vmem:[%s22044_s12] sm:$0xf] }
0x2255   :  { %7762 = vrot.lane.b32.xlu0 %v19907_v9, %s22114_s5 }
0x2259   :  { %7754 = vrot.lane.b32.xlu0 %v19919_v24, %s22115_s6 }
0x225d   :  { %7758 = vrot.lane.b32.xlu0 %v19934_v52, %s22115_s6  ;;  %v7407_v52 = vsel %vm642_vm5, %v6861_v26, 0 }
0x22b0   :  { %v7230_v27 = vpop.xlane.xlu0 %7229 }
0x22b1   :  { %17826 = vrcp.f32 %v7230_v27 }
0x22b4   :  { %v7233_v29 = vpop.xlane.xlu1 %7232 }
0x22b5   :  { %17828 = vrcp.f32 %v7233_v29 }
0x22b8   :  { %v7236_v31 = vpop.xlane.xlu0 %7235  ;;  %v7244_v38 = vpop.permute.xlu1 %7243 }
0x22b9   :  { %17830 = vrcp.f32 %v7236_v31 }
0x22bc   :  { %v7246_v14 = vpop.permute.xlu0 %7245  ;;  %v7468_v35 = vpop.permute.xlu1 %7467 }
0x22bd   :  { %16916 = vmatpush3.msra.mxu0 %v7246_v14 }
0x22be   :  { %v17827_v53 = vpop.eup %17826  ;;  %16917 = vmatprep.subr.mxu0 %v18033_v1 }
0x22bf   :  { %v7240_v24 = vmul.f32 %v17827_v53, %v17821_v18  ;;  %16918 = vmatpush3.msra.mxu0 %v7244_v38 }
0x22c0   :  { %17174 = vmatprep.subr.msk.bf16.mxu0 %vm642_vm5, %v6861_v26  ;;  %v7466_v23 = vpop.permute.xlu0 %7465  ;;  %v7464_v54 = vpop.permute.xlu1 %7463 }
0x22c1   :  { %16920 = vmatmul.mubr.msk.f32.vlgmr.msra.gmra.mxu0 %vm6972_vm7, %v7240_v24 }
0x22c2   :  { %v17829_v57 = vpop.eup %17828  ;;  %16922 = vmatprep.mubr.msk.f32.mxu0 %vm18034_vm0, %v18033_v1  ;;  %16935 = vmatpush3.bf16.msra.mxu0 %v7407_v52 }
0x22c3   :  { %v7241_v6 = vmul.f32 %v17829_v57, %v17823_v37  ;;  %16955 = vmatprep.subr.mxu0 %v18033_v1 }
0x22c4   :  { %v7458_v36 = vpop.permute.xlu0 %7457  ;;  %v7460_v56 = vpop.permute.xlu1 %7459 }
0x22c5   :  { %16923 = vmatmul.mubr.msk.f32.gmra.mxu0 %vm6972_vm7, %v7241_v6 }
0x22c6   :  { %v17831_v49 = vpop.eup %17830  ;;  %16925 = vmatprep.mubr.msk.f32.mxu0 %vm18034_vm0, %v18033_v1 }
0x22c7   :  { %v7242_v17 = vmul.f32 %v17831_v49, %v17825_v40 }
0x22c8   :  { %v7462_v0 = vpop.permute.xlu0 %7461  ;;  %v7765_v58 = vpop.permute.xlu1 %7764 }
0x22c9   :  { %16926 = vmatmul.mubr.msk.f32.gmra.mxu0 %vm6972_vm7, %v7242_v17 }
0x22ca   :  { %16936 = vmatprep.mubr.msk.bf16.mxu0 %vm241_vm3, %v7104_v5 }
0x22cc   :  { %v7763_v61 = vpop.permute.xlu0 %7762  ;;  %v7761_v16 = vpop.permute.xlu1 %7760 }
0x22cd   :  { %16937 = vmatmul.mubr.msk.bf16.vlgmr.msra.gmra.mxu0 %vm241_vm3, %v7105_v7 }
0x22ce   :  { %16961 = vmatprep.mubr.msk.f32.mxu0 %vm18034_vm0, %v18033_v1 }
0x22d0   :  { %v7755_v18 = vpop.permute.xlu0 %7754  ;;  %v7757_v20 = vpop.permute.xlu1 %7756 }
0x22d4   :  { %v7759_v37 = vpop.permute.xlu0 %7758 }
0x2381   :  { %v7327_v46 = vpop.f32.mrf.mxu0 }
0x2383   :  { %v16921_v2 = vpop.f32.mrf.mxu0 }
0x2385   :  { %v7332_v5 = vpop.f32.mrf.mxu0 }
0x2386   :  { %v7341_v44 = vpack.c.bf16 %v7332_v5, %v7327_v46 }
0x2387   :  { %v16924_v34 = vpop.f32.mrf.mxu0 }
0x2388   :  { %16930 = vmatprep.mubr.msk.bf16.mxu1 %vm241_vm3, %v7341_v44 }
0x2389   :  { %v7337_v22 = vpop.f32.mrf.mxu0 }
0x238a   :  { %v7342_v42 = vpack.c.bf16 %v7337_v22, %v7337_v22 }
0x238b   :  { %v16927_v43 = vpop.f32.mrf.mxu0 }
0x238c   :  { %16931 = vmatmul.mubr.msk.bf16.vlgmr.msra.gmra.mxu1 %vm241_vm3, %v7342_v42 }
0x238d   :  { %16941 = vmatpush3.xpose.msk.msra.mxu1 %vm241_vm3, %v7468_v35  ;;  %v20086_v55 = vpop.f32.mrf.mxu0  ;;  %16946 = vmatprep.mubr.msk.f32.mxu1 %vm18034_vm0, %v18033_v1 }
0x238e   :  { %16942 = vmatprep.subr.mxu1 %v18033_v1 }
0x238f   :  { %v20091_v60 = vpop.f32.mrf.mxu0 }
0x2391   :  { %16943 = vmatpush3.xpose.msk.msra.mxu1 %vm241_vm3, %v7466_v23  ;;  %v16939_v63 = vpop.f32.mrf.mxu0 }
0x2392   :  { %16944 = vmatprep.subr.mxu1 %v18033_v1 }
0x2395   :  { %16945 = vmatpush3.xpose.msk.msra.mxu1 %vm241_vm3, %v7464_v54 }
0x2396   :  { %16976 = vmatprep.subr.mxu1 %v18033_v1 }
0x2398   :  { %16947 = vmatmul.mubr.msk.f32.vlgmr.msra.gmra.mxu1 %vm241_vm3, %v7458_v36 }
0x2399   :  { %16977 = vmatpush3.xpose.msk.msra.mxu1 %vm241_vm3, %v7765_v58  ;;  %16949 = vmatprep.mubr.msk.f32.mxu1 %vm18034_vm0, %v18033_v1 }
0x239a   :  { %16978 = vmatprep.subr.mxu1 %v18033_v1 }
0x239c   :  { %16950 = vmatmul.mubr.msk.f32.gmra.mxu1 %vm241_vm3, %v7460_v56 }
0x239d   :  { %16979 = vmatpush3.xpose.msk.msra.mxu1 %vm241_vm3, %v7763_v61  ;;  %16952 = vmatprep.mubr.msk.f32.mxu1 %vm18034_vm0, %v18033_v1 }
0x239e   :  { %16980 = vmatprep.subr.mxu1 %v18033_v1 }
0x23a0   :  { %16953 = vmatmul.mubr.msk.f32.gmra.mxu1 %vm241_vm3, %v7462_v0 }
0x23a1   :  { %16981 = vmatpush3.xpose.msk.msra.mxu1 %vm241_vm3, %v7761_v16  ;;  %16982 = vmatprep.mubr.msk.f32.mxu1 %vm18034_vm0, %v18033_v1 }
0x23a4   :  { %16983 = vmatmul.mubr.msk.f32.vlgmr.msra.gmra.mxu1 %vm241_vm3, %v7755_v18 }
0x23a5   :  { %16985 = vmatprep.mubr.msk.f32.mxu1 %vm18034_vm0, %v18033_v1 }
0x23a8   :  { %16986 = vmatmul.mubr.msk.f32.gmra.mxu1 %vm241_vm3, %v7757_v20 }
0x23a9   :  { %16988 = vmatprep.mubr.msk.f32.mxu1 %vm18034_vm0, %v18033_v1 }
0x23ac   :  { %16989 = vmatmul.mubr.msk.f32.gmra.mxu1 %vm241_vm3, %v7759_v37 }
0x244c   :  { %v20118_v11 = vpop.f32.mrf.mxu1 }
0x244e   :  { %v20120_v40 = vpop.f32.mrf.mxu1 }
0x2450   :  { %v16933_v47 = vpop.f32.mrf.mxu1 }
0x2452   :  { %v20122_v27 = vpop.f32.mrf.mxu1 }
0x2458   :  { %v7547_v29 = vpop.f32.mrf.mxu1 }
0x2459   :  { %v7548_v31 = vadd.f32 %v7547_v29, %v19943_v19 }
0x245a   :  { %v16948_v14 = vpop.f32.mrf.mxu1 }
0x245b   :  { %v7561_v26 = vsel %vm6972_vm7, %v7548_v31, -inf }
0x245c   :  { %7562 = vmax.xlane.f32.xlu1 %v7561_v26  ;;  %v7552_v53 = vpop.f32.mrf.mxu1 }
0x245d   :  { %v7553_v38 = vadd.f32 %v7552_v53, %v19949_v28 }
0x245e   :  { %v16951_v24 = vpop.f32.mrf.mxu1 }
0x245f   :  { %v7564_v52 = vsel %vm6972_vm7, %v7553_v38, -inf }
0x2460   :  { %7565 = vmax.xlane.f32.xlu0 %v7564_v52  ;;  %v7557_v57 = vpop.f32.mrf.mxu1 }
0x2461   :  { %v7558_v6 = vadd.f32 %v7557_v57, %v19956_v33 }
0x2462   :  { %v16954_v49 = vpop.f32.mrf.mxu1 }
0x2463   :  { %v7567_v17 = vsel %vm6972_vm7, %v7558_v6, -inf }
0x2464   :  { %7568 = vmax.xlane.f32.xlu0 %v7567_v17  ;;  %v7844_v7 = vpop.f32.mrf.mxu1 }
0x2465   :  { %v7845_v16 = vadd.f32 %v7844_v7, %v19943_v19 }
0x2466   :  { %v16984_v32 = vpop.f32.mrf.mxu1 }
0x2467   :  { %v7858_v37 = vsel %vm6972_vm7, %v7845_v16, -inf }
0x2468   :  { %v7849_v45 = vpop.f32.mrf.mxu1 }
0x2469   :  { %v7850_v29 = vadd.f32 %v7849_v45, %v19949_v28 }
0x246a   :  { %v16987_v46 = vpop.f32.mrf.mxu1 }
0x246c   :  { %v7854_v2 = vpop.f32.mrf.mxu1 }
0x246d   :  { %v7855_v20 = vadd.f32 %v7854_v2, %v19956_v33 }
0x246e   :  { %v16990_v5 = vpop.f32.mrf.mxu1 }
0x246f   :  { %v7864_v47 = vsel %vm6972_vm7, %v7855_v20, -inf }
0x24e5   :  { %v7563_v35 = vpop.xlane.xlu1 %7562 }
0x24e6   :  { %v7570_v44 = vsub.f32 %v7548_v31, %v7563_v35  ;;  %v7861_v31 = vsel %vm6972_vm7, %v7850_v29, -inf }
0x24e8   :  { %v7573_v34 = vmul.f32 1.442695, %v7570_v44 }
0x24e9   :  { %v7566_v22 = vpop.xlane.xlu0 %7565 }
0x24ea   :  { %17832 = vpow2.f32 %v7573_v34  ;;  %v7571_v23 = vsub.f32 %v7553_v38, %v7566_v22 }
0x24ec   :  { %v7575_v42 = vmul.f32 1.442695, %v7571_v23 }
0x24ed   :  { %v7569_v56 = vpop.xlane.xlu0 %7568 }
0x24ee   :  { %17834 = vpow2.f32 %v7575_v42  ;;  %v7572_v0 = vsub.f32 %v7558_v6, %v7569_v56 }
0x24f0   :  { %v7577_v58 = vmul.f32 1.442695, %v7572_v0 }
0x24f2   :  { %17836 = vpow2.f32 %v7577_v58 }
0x24f7   :  { %v17833_v43 = vpop.eup %17832 }
0x24f8   :  { %v7579_v54 = vsel %vm6972_vm7, %v17833_v43, 0.0 }
0x24f9   :  { %7580 = vadd.xlane.f32.xlu1 %v7579_v54  ;;  %v6863_v54 = vld [vmem:[%s22044_s12 + $0x8] sm:$0xf] }
0x24fb   :  { %v17835_v36 = vpop.eup %17834 }
0x24fc   :  { %v7582_v63 = vsel %vm6972_vm7, %v17835_v36, 0.0 }
0x24fd   :  { %7583 = vadd.xlane.f32.xlu0 %v7582_v63 }
0x24ff   :  { %v17837_v61 = vpop.eup %17836 }
0x2500   :  { %v7585_v18 = vsel %vm6972_vm7, %v17837_v61, 0.0 }
0x250a   :  { %7596 = vrot.lane.b32.xlu1 %v19907_v9, %s22113_s9 }
0x2513   :  { %7598 = vrot.lane.b32.xlu0 %v19901_v10, %s22113_s9 }
0x252e   :  { %7586 = vadd.xlane.f32.xlu1 %v7585_v18 }
0x2532   :  { %7859 = vmax.xlane.f32.xlu0 %v7858_v37 }
0x2536   :  { %7865 = vmax.xlane.f32.xlu0 %v7864_v47 }
0x253f   :  { %7594 = vrot.lane.b32.xlu1 %v19905_v62, %s22113_s9 }
0x2563   :  { %7862 = vmax.xlane.f32.xlu1 %v7861_v31 }
0x2574   :  { %7895 = vrot.lane.b32.xlu1 %v19901_v10, %s22116_s27 }
0x2582   :  { %v7581_v19 = vpop.xlane.xlu1 %7580 }
0x2583   :  { %17838 = vrcp.f32 %v7581_v19 }
0x2586   :  { %v7584_v14 = vpop.xlane.xlu0 %7583  ;;  %v7597_v26 = vpop.permute.xlu1 %7596 }
0x2587   :  { %17840 = vrcp.f32 %v7584_v14 }
0x258a   :  { %v7599_v33 = vpop.permute.xlu0 %7598 }
0x258b   :  { %16956 = vmatpush3.msra.mxu0 %v7599_v33 }
0x258c   :  { %16957 = vmatprep.subr.mxu0 %v18033_v1 }
0x258d   :  { %16958 = vmatpush3.msra.mxu0 %v7597_v26 }
0x258e   :  { %16959 = vmatprep.subr.mxu0 %v18033_v1 }
0x2590   :  { %v17839_v28 = vpop.eup %17838 }
0x2591   :  { %v7591_v38 = vmul.f32 %v17839_v28, %v17833_v43 }
0x2594   :  { %v17841_v57 = vpop.eup %17840 }
0x2595   :  { %v7592_v17 = vmul.f32 %v17841_v57, %v17835_v36  ;;  %v7701_v36 = vsel %vm642_vm5, %v6863_v54, 0  ;;  %v7452_v57 = vadd.f32 %v20086_v55, %v20118_v11  ;;  %v7444_v55 = vadd.f32 %v20091_v60, %v20120_v40 }
0x25b7   :  { %v7587_v53 = vpop.xlane.xlu1 %7586 }
0x25b8   :  { %17842 = vrcp.f32 %v7587_v53 }
0x25bb   :  { %v7595_v24 = vpop.permute.xlu1 %7594  ;;  %v7860_v52 = vpop.xlane.xlu0 %7859 }
0x25bc   :  { %v7867_v10 = vsub.f32 %v7845_v16, %v7860_v52  ;;  %16960 = vmatpush3.msra.mxu0 %v7595_v24  ;;  %v6864_v24 = vld [vmem:[%s22044_s12 + $0xc] sm:$0xf] }
0x25bd   :  { %16962 = vmatmul.mubr.msk.f32.vlgmr.msra.gmra.mxu0 %vm6972_vm7, %v7591_v38  ;;  %17175 = vmatprep.subr.msk.bf16.mxu0 %vm642_vm5, %v6863_v54  ;;  %v7998_v52 = vsel %vm642_vm5, %v6864_v24, 0 }
0x25be   :  { %v7870_v6 = vmul.f32 1.442695, %v7867_v10  ;;  %16964 = vmatprep.mubr.msk.f32.mxu0 %vm18034_vm0, %v18033_v1  ;;  %16971 = vmatpush3.bf16.msra.mxu0 %v7701_v36 }
0x25bf   :  { %v7866_v49 = vpop.xlane.xlu0 %7865  ;;  %16991 = vmatprep.subr.mxu0 %v18033_v1  ;;  %17176 = vmatprep.subr.msk.bf16.mxu1 %vm642_vm5, %v6864_v24 }
0x25c0   :  { %17844 = vpow2.f32 %v7870_v6  ;;  %v7869_v7 = vsub.f32 %v7855_v20, %v7866_v49  ;;  %17007 = vmatpush3.bf16.msra.mxu1 %v7998_v52  ;;  %v8141_v52 = vld [vmem:[%s22048_s16 + $0x80] sm:$0xff] }
0x25c1   :  { %16965 = vmatmul.mubr.msk.f32.gmra.mxu0 %vm6972_vm7, %v7592_v17 }
0x25c2   :  { %v7874_v32 = vmul.f32 1.442695, %v7869_v7  ;;  %16967 = vmatprep.mubr.msk.f32.mxu0 %vm18034_vm0, %v18033_v1 }
0x25c4   :  { %17846 = vpow2.f32 %v7874_v32 }
0x25c5   :  { %v17843_v45 = vpop.eup %17842 }
0x25c6   :  { %v7593_v46 = vmul.f32 %v17843_v45, %v17837_v61 }
0x25c8   :  { %16968 = vmatmul.mubr.msk.f32.gmra.mxu0 %vm6972_vm7, %v7593_v46 }
0x25cd   :  { %v17845_v2 = vpop.eup %17844 }
0x25ce   :  { %v7876_v5 = vsel %vm6972_vm7, %v17845_v2, 0.0 }
0x25cf   :  { %7877 = vadd.xlane.f32.xlu0 %v7876_v5 }
0x25d1   :  { %v17847_v35 = vpop.eup %17846 }
0x25d2   :  { %v7882_v44 = vsel %vm6972_vm7, %v17847_v35, 0.0 }
0x25d3   :  { %7883 = vadd.xlane.f32.xlu0 %v7882_v44 }
0x25e9   :  { %7893 = vrot.lane.b32.xlu0 %v19907_v9, %s22116_s27  ;;  %v20169_v9 = vpop.f32.mrf.mxu0 }
0x25ec   :  { %v7863_v34 = vpop.xlane.xlu1 %7862 }
0x25ed   :  { %v7868_v22 = vsub.f32 %v7850_v29, %v7863_v34 }
0x25ef   :  { %v7872_v23 = vmul.f32 1.442695, %v7868_v22 }
0x25f0   :  { %v7896_v18 = vpop.permute.xlu1 %7895 }
0x25f1   :  { %17848 = vpow2.f32 %v7872_v23 }
0x25fe   :  { %v17849_v42 = vpop.eup %17848 }
0x25ff   :  { %v7879_v43 = vsel %vm6972_vm7, %v17849_v42, 0.0 }
0x2600   :  { %7880 = vadd.xlane.f32.xlu1 %v7879_v43 }
0x2611   :  { %7891 = vrot.lane.b32.xlu1 %v19905_v62, %s22116_s27 }
0x2658   :  { %v7878_v56 = vpop.xlane.xlu0 %7877 }
0x2659   :  { %17850 = vrcp.f32 %v7878_v56 }
0x265c   :  { %v7884_v20 = vpop.xlane.xlu0 %7883 }
0x2660   :  { %v7894_v62 = vpop.permute.xlu0 %7893 }
0x2666   :  { %v17851_v14 = vpop.eup %17850 }
0x2667   :  { %v7888_v33 = vmul.f32 %v17851_v14, %v17845_v2 }
0x267d   :  { %v7678_v63 = vpop.f32.mrf.mxu0 }
0x267f   :  { %v16963_v0 = vpop.f32.mrf.mxu0 }
0x2681   :  { %v7683_v58 = vpop.f32.mrf.mxu0 }
0x2682   :  { %v7692_v61 = vpack.c.bf16 %v7683_v58, %v7678_v63  ;;  %v14905_v58 = vld [vmem:[%s22045_s13] ss:$0 sm:$0xff] }
0x2683   :  { %v16966_v16 = vpop.f32.mrf.mxu0 }
0x2684   :  { %16972 = vmatprep.mubr.msk.bf16.mxu0 %vm241_vm3, %v7692_v61 }
0x2688   :  { %v7688_v37 = vpop.f32.mrf.mxu0 }
0x2689   :  { %v7693_v47 = vpack.c.bf16 %v7688_v37, %v7688_v37  ;;  %v7881_v29 = vpop.xlane.xlu1 %7880 }
0x268a   :  { %17852 = vrcp.f32 %v7881_v29  ;;  %v16969_v31 = vpop.f32.mrf.mxu0 }
0x268b   :  { %16973 = vmatmul.mubr.msk.bf16.vlgmr.msra.gmra.mxu0 %vm241_vm3, %v7693_v47  ;;  %17854 = vrcp.f32 %v7884_v20 }
0x268c   :  { %16992 = vmatpush3.msra.mxu0 %v7896_v18  ;;  %16997 = vmatprep.mubr.msk.f32.mxu0 %vm18034_vm0, %v18033_v1 }
0x268d   :  { %16993 = vmatprep.subr.mxu0 %v18033_v1  ;;  %v7892_v19 = vpop.permute.xlu1 %7891 }
0x268e   :  { %16994 = vmatpush3.msra.mxu0 %v7894_v62 }
0x268f   :  { %16995 = vmatprep.subr.mxu0 %v18033_v1 }
0x2690   :  { %16996 = vmatpush3.msra.mxu0 %v7892_v19 }
0x2693   :  { %16998 = vmatmul.mubr.msk.f32.vlgmr.msra.gmra.mxu0 %vm6972_vm7, %v7888_v33 }
0x2694   :  { %17000 = vmatprep.mubr.msk.f32.mxu0 %vm18034_vm0, %v18033_v1 }
0x2697   :  { %v17853_v26 = vpop.eup %17852 }
0x2698   :  { %v7889_v53 = vmul.f32 %v17853_v26, %v17849_v42  ;;  %v17855_v28 = vpop.eup %17854  ;;  %v7447_v42 = vadd.f32 %v20169_v9, %v20122_v27 }
0x2699   :  { %v7890_v38 = vmul.f32 %v17855_v28, %v17847_v35 }
0x269a   :  { %17001 = vmatmul.mubr.msk.f32.gmra.mxu0 %vm6972_vm7, %v7889_v53 }
0x269b   :  { %17003 = vmatprep.mubr.msk.f32.mxu0 %vm18034_vm0, %v18033_v1 }
0x269e   :  { %17004 = vmatmul.mubr.msk.f32.gmra.mxu0 %vm6972_vm7, %v7890_v38 }
0x269f   :  { %8439 = vmatprep.mubr.bf16.mxu0 %v18046_v41 }
0x274b   :  { %v16974_v10 = vpop.f32.mrf.mxu0 }
0x274c   :  { %v7753_v6 = vadd.f32 %v16974_v10, %v7452_v57  ;;  %v8149_v57 = vld [vmem:[%s22048_s16 + $0xc0] sm:$0xff]  ;;  %v8142_v10 = vld [vmem:[%s22048_s16 + $0x88] sm:$0xff] }
0x274d   :  { %v7737_v49 = vpop.f32.mrf.mxu0 }
0x274e   :  { %v7751_v22 = vadd.f32 %v7737_v49, %v7444_v55  ;;  %v8150_v49 = vld [vmem:[%s22048_s16 + $0xc8] sm:$0xff] }
0x274f   :  { %v16975_v17 = vpop.f32.mrf.mxu0 }
0x2750   :  { %v14924_v17 = vcombine.low %v8141_v52, %v8149_v57 }
0x2751   :  { %v7740_v7 = vpop.f32.mrf.mxu0 }
0x2752   :  { %v7752_v36 = vadd.f32 %v7740_v7, %v7447_v42  ;;  %v14926_v7 = vcombine.low %v8142_v10, %v8150_v49 }
0x2753   :  { %v7975_v32 = vpop.f32.mrf.mxu0 }
0x2755   :  { %v16999_v45 = vpop.f32.mrf.mxu0 }
0x2756   :  { %v8125_v45 = vld [vmem:[%s22048_s16] sm:$0xff] }
0x275a   :  { %v7980_v46 = vpop.f32.mrf.mxu0 }
0x275b   :  { %v7989_v2 = vpack.c.bf16 %v7980_v46, %v7975_v32  ;;  %v14927_v32 = vcombine.high %v8142_v10, %v8150_v49  ;;  %v8133_v46 = vld [vmem:[%s22048_s16 + $0x40] sm:$0xff]  ;;  %v8146_v49 = vld [vmem:[%s22048_s16 + $0xa8] sm:$0xff] }
0x275c   :  { %v17002_v5 = vpop.f32.mrf.mxu0 }
0x275d   :  { %17008 = vmatprep.mubr.msk.bf16.mxu1 %vm241_vm3, %v7989_v2  ;;  %8470 = vmatprep.subr.bf16.mxu1 %v14927_v32  ;;  %v8126_v2 = vld [vmem:[%s22048_s16 + $0x8] sm:$0xff]  ;;  %v14909_v5 = vcombine.high %v8125_v45, %v8133_v46 }
0x275e   :  { %v7985_v35 = vpop.f32.mrf.mxu0 }
0x275f   :  { %v7990_v44 = vpack.c.bf16 %v7985_v35, %v7985_v35  ;;  %v8134_v35 = vld [vmem:[%s22048_s16 + $0x48] sm:$0xff] }
0x2760   :  { %v17005_v34 = vpop.f32.mrf.mxu0  ;;  %v14911_v55 = vcombine.high %v8126_v2, %v8134_v35 }
0x2761   :  { %17009 = vmatmul.mubr.msk.bf16.vlgmr.msra.gmra.mxu1 %vm241_vm3, %v7990_v44  ;;  %v14908_v44 = vcombine.low %v8125_v45, %v8133_v46  ;;  %v14910_v34 = vcombine.low %v8126_v2, %v8134_v35  ;;  %v8129_v35 = vld [vmem:[%s22048_s16 + $0x20] sm:$0xff] }
0x2762   :  { %8490 = vmatprep.mubr.bf16.mxu1 %v18046_v41  ;;  %8471 = vmatpush1.bf16.msra.mxu1 %v14926_v7 }
0x2763   :  { %8472 = vmatprep.subr.bf16.mxu1 %v14911_v55  ;;  %v8138_v55 = vld [vmem:[%s22048_s16 + $0x68] sm:$0xff] }
0x2766   :  { %8473 = vmatpush1.bf16.msra.mxu1 %v14910_v34  ;;  %v8130_v34 = vld [vmem:[%s22048_s16 + $0x28] sm:$0xff] }
0x2821   :  { %v17010_v11 = vpop.f32.mrf.mxu1 }
0x2822   :  { %v8050_v63 = vadd.f32 %v17010_v11, %v7753_v6  ;;  %v14925_v6 = vcombine.high %v8141_v52, %v8149_v57  ;;  %v8143_v11 = vld [vmem:[%s22048_s16 + $0x90] sm:$0xff] }
0x2823   :  { %v8034_v23 = vpop.f32.mrf.mxu1 }
0x2824   :  { %v8048_v43 = vadd.f32 %v8034_v23, %v7751_v22  ;;  %v8053_v60 = vadd.f32 %v8050_v63, %v19888_v4  ;;  %8419 = vmatprep.subr.bf16.mxu0 %v14925_v6  ;;  %v8151_v22 = vld [vmem:[%s22048_s16 + $0xd0] sm:$0xff]  ;;  %v8144_v23 = vld [vmem:[%s22048_s16 + $0x98] sm:$0xff]  ;;  %v8153_v6 = vld [vmem:[%s22048_s16 + $0xe0] sm:$0xff] }
0x2825   :  { %v17011_v54 = vpop.f32.mrf.mxu1  ;;  %8420 = vmatpush1.bf16.msra.mxu0 %v14924_v17  ;;  %v14929_v42 = vcombine.high %v8143_v11, %v8151_v22  ;;  %v8154_v17 = vld [vmem:[%s22048_s16 + $0xe8] sm:$0xff] }
0x2826   :  { %v8051_v56 = vadd.f32 %v8048_v43, %v19861_v3  ;;  %v8063_v20 = vadd.f32 %v14905_v58, %v8053_v60  ;;  %8421 = vmatprep.subr.bf16.mxu0 %v14909_v5  ;;  %v8152_v43 = vld [vmem:[%s22048_s16 + $0xd8] sm:$0xff]  ;;  %v14928_v54 = vcombine.low %v8143_v11, %v8151_v22  ;;  %v14935_v2 = vcombine.high %v8146_v49, %v8154_v17 }
0x2827   :  { %v8037_v0 = vpop.f32.mrf.mxu1  ;;  %v14931_v63 = vcombine.high %v8144_v23, %v8152_v43  ;;  %v14934_v22 = vcombine.low %v8146_v49, %v8154_v17  ;;  %v17485_v49 = vld [vmem:[%s22050_s18 + $0xa0] sm:$0xff]   ;;  %v17486_v17 = vld [vmem:[%s22050_s18 + $0x58] sm:$0xff]  }
0x2828   :  { %v8049_v61 = vadd.f32 %v8037_v0, %v7752_v36  ;;  %v8061_v16 = vadd.f32 %v14905_v58, %v8051_v56  ;;  %v8072_v3 = vsel %vm184_vm2, %v8063_v20, 0.0  ;;  %v14930_v36 = vcombine.low %v8144_v23, %v8152_v43  ;;  %v8147_v43 = vld [vmem:[%s22048_s16 + $0xb0] sm:$0xff] }
0x2829   :  { %8422 = vmatpush1.bf16.msra.mxu0 %v14908_v44  ;;  %8572 = vmatprep.subr.bf16.mxu1 %v14931_v63  ;;  %v8137_v44 = vld [vmem:[%s22048_s16 + $0x60] sm:$0xff]  ;;  %v8156_v63 = vld [vmem:[%s22048_s16 + $0xf8] sm:$0xff] }
0x282a   :  { %v8052_v40 = vadd.f32 %v8049_v61, %v19863_v25  ;;  %v8066_v18 = vsel %vm184_vm2, %v8061_v16, 0.0  ;;  %8521 = vmatprep.subr.bf16.mxu0 %v14929_v42  ;;  %v14917_v23 = vcombine.high %v8129_v35, %v8137_v44  ;;  %v14919_v42 = vcombine.high %v8130_v34, %v8138_v55 }
0x282b   :  { %8067 = vadd.xlane.f32.xlu1 %v8066_v18 }
0x282c   :  { %v8062_v27 = vadd.f32 %v14905_v58, %v8052_v40 }
0x282e   :  { %v8069_v9 = vsel %vm184_vm2, %v8062_v27, 0.0 }
0x282f   :  { %8070 = vadd.xlane.f32.xlu0 %v8069_v9 }
0x2833   :  { %8073 = vadd.xlane.f32.xlu0 %v8072_v3  ;;  %v14906_v3 = vld [vmem:[%s22046_s14] ss:$0 sm:$0xff] }
0x28b4   :  { %v8068_v37 = vpop.xlane.xlu1 %8067 }
0x28b5   :  { %v8075_v47 = vmul.f32 0.03125, %v8068_v37 }
0x28b7   :  { %v20208_v29 = vsub.f32 %v8061_v16, %v8075_v47 }
0x28b8   :  { %v8071_v31 = vpop.xlane.xlu0 %8070 }
0x28b9   :  { %v8076_v62 = vmul.f32 0.03125, %v8071_v31  ;;  %v8081_v25 = vmul.f32 %v20208_v29, %v20208_v29 }
0x28bb   :  { %v20212_v4 = vsub.f32 %v8062_v27, %v8076_v62  ;;  %v8084_v19 = vsel %vm184_vm2, %v8081_v25, 0.0  ;;  %v14907_v62 = vld [vmem:[%s22047_s15] ss:$0 sm:$0xff]  ;;  %s22126_s15 = sld [smem:[#allocation22_spill]] }
0x28bc   :  { %v8074_v14 = vpop.xlane.xlu0 %8073  ;;  %8085 = vadd.xlane.f32.xlu1 %v8084_v19 }
0x28bd   :  { %v8077_v33 = vmul.f32 0.03125, %v8074_v14  ;;  %v8082_v26 = vmul.f32 %v20212_v4, %v20212_v4  ;;  %v8127_v14 = vld [vmem:[%s22048_s16 + $0x10] sm:$0xff] }
0x28bf   :  { %v20217_v53 = vsub.f32 %v8063_v20, %v8077_v33  ;;  %v8087_v28 = vsel %vm184_vm2, %v8082_v26, 0.0 }
0x28c0   :  { %8088 = vadd.xlane.f32.xlu0 %v8087_v28  ;;  %v8128_v28 = vld [vmem:[%s22048_s16 + $0x18] sm:$0xff] }
0x28c1   :  { %v8083_v38 = vmul.f32 %v20217_v53, %v20217_v53 }
0x28c3   :  { %v8090_v24 = vsel %vm184_vm2, %v8083_v38, 0.0  ;;  %v8136_v38 = vld [vmem:[%s22048_s16 + $0x58] sm:$0xff] }
0x28c4   :  { %8091 = vadd.xlane.f32.xlu1 %v8090_v24  ;;  %v14915_v10 = vcombine.high %v8128_v28, %v8136_v38  ;;  %v14914_v45 = vcombine.low %v8128_v28, %v8136_v38  ;;  %v17477_v28 = vld [vmem:[%s22050_s18 + $0xb0] sm:$0xff]   ;;  %v17478_v38 = vld [vmem:[%s22050_s18 + $0x68] sm:$0xff]  }
0x2945   :  { %v8086_v56 = vpop.xlane.xlu1 %8085 }
0x2946   :  { %v8093_v0 = vmul.f32 0.03125, %v8086_v56  ;;  %v14916_v56 = vcombine.low %v8129_v35, %v8137_v44  ;;  %v17492_v35 = vld [vmem:[%s22050_s18 + $0x10] sm:$0xff]  }
0x2947   :  { %v17493_v44 = vld [vmem:[%s22050_s18 + $0x90] sm:$0xff]  }
0x2948   :  { %v8096_v58 = vadd.f32 1e-05, %v8093_v0  ;;  %v14918_v0 = vcombine.low %v8130_v34, %v8138_v55  ;;  %v17494_v34 = vld [vmem:[%s22050_s18 + $0x48] sm:$0xff]  }
0x2949   :  { %v8089_v61 = vpop.xlane.xlu0 %8088  ;;  %v17495_v55 = vld [vmem:[%s22050_s18 + $0xc8] sm:$0xff]  }
0x294a   :  { %17856 = vrsqrt.f32 %v8096_v58  ;;  %v8094_v16 = vmul.f32 0.03125, %v8089_v61 }
0x294c   :  { %v8097_v60 = vadd.f32 1e-05, %v8094_v16  ;;  %v8131_v16 = vld [vmem:[%s22048_s16 + $0x30] sm:$0xff] }
0x294d   :  { %v8092_v40 = vpop.xlane.xlu1 %8091 }
0x294e   :  { %17858 = vrsqrt.f32 %v8097_v60  ;;  %v8095_v18 = vmul.f32 0.03125, %v8092_v40  ;;  %v8139_v60 = vld [vmem:[%s22048_s16 + $0x70] sm:$0xff]  ;;  %v8132_v40 = vld [vmem:[%s22048_s16 + $0x38] sm:$0xff] }
0x2950   :  { %v8098_v27 = vadd.f32 1e-05, %v8095_v18  ;;  %v8140_v18 = vld [vmem:[%s22048_s16 + $0x78] sm:$0xff] }
0x2952   :  { %17860 = vrsqrt.f32 %v8098_v27 }
0x2957   :  { %v17857_v9 = vpop.eup %17856 }
0x2958   :  { %v8102_v20 = vmul.f32 %v17857_v9, %v20208_v29 }
0x295a   :  { %v8111_v47 = vmul.f32 %v14906_v3, %v8102_v20  ;;  %v14921_v20 = vcombine.high %v8131_v16, %v8139_v60 }
0x295b   :  { %v17859_v37 = vpop.eup %17858 }
0x295c   :  { %v8103_v31 = vmul.f32 %v17859_v37, %v20212_v4  ;;  %v20270_v33 = vadd.f32 %v14907_v62, %v8111_v47  ;;  %v8135_v4 = vld [vmem:[%s22048_s16 + $0x50] sm:$0xff]  ;;  %v14920_v37 = vcombine.low %v8131_v16, %v8139_v60  ;;  %v14922_v47 = vcombine.low %v8132_v40, %v8140_v18 }
0x295d   :  { %v14913_v57 = vcombine.high %v8127_v14, %v8135_v4  ;;  %v14912_v32 = vcombine.low %v8127_v14, %v8135_v4  ;;  %v17474_v14 = vld [vmem:[%s22050_s18 + $0x70] sm:$0xff]  }
0x295e   :  { %v8112_v25 = vmul.f32 %v14906_v3, %v8103_v31  ;;  %v17470_v31 = vld [vmem:[%s22050_s18 + $0x78] sm:$0xff]   ;;  %v17476_v4 = vld [vmem:[%s22050_s18 + $0x30] sm:$0xff]  }
0x295f   :  { %v17861_v19 = vpop.eup %17860 }
0x2960   :  { %v20272_v29 = vadd.f32 %v14907_v62, %v8112_v25  ;;  %v8104_v26 = vmul.f32 %v17861_v19, %v20217_v53  ;;  %v8145_v53 = vld [vmem:[%s22048_s16 + $0xa0] sm:$0xff]  ;;  %v17472_v25 = vld [vmem:[%s22050_s18 + $0x38] sm:$0xff]  }
0x2961   :  { %v14933_v46 = vcombine.high %v8145_v53, %v8153_v6  ;;  %v14932_v11 = vcombine.low %v8145_v53, %v8153_v6  ;;  %v17473_v19 = vld [vmem:[%s22050_s18 + $0xb8] sm:$0xff]   ;;  %v17483_v53 = vld [vmem:[%s22050_s18 + $0xe0] sm:$0xff]  }
0x2962   :  { %v20286_v24 = vpack.c.bf16 %v20272_v29, %v20270_v33  ;;  %v8113_v52 = vmul.f32 %v14906_v3, %v8104_v26  ;;  %v14923_v3 = vcombine.high %v8132_v40, %v8140_v18  ;;  %v17475_v26 = vld [vmem:[%s22050_s18 + $0xf0] sm:$0xff]   ;;  %v17484_v6 = vld [vmem:[%s22050_s18 + $0x20] sm:$0xff]  }
0x2964   :  { %14940 = vmatmul.mubr.msk.bf16.vlgmr.msra.gmra.mxu0 %vm184_vm2, %v20286_v24  ;;  %14942 = vmatmul.mubr.msk.bf16.vlgmr.msra.gmra.mxu1 %vm184_vm2, %v20286_v24  ;;  %v20306_v7 = vadd.f32 %v14907_v62, %v8113_v52  ;;  %v17471_v62 = vld [vmem:[%s22050_s18 + $0xf8] sm:$0xff]   ;;  %v17480_v52 = vld [vmem:[%s22050_s18 + $0x28] sm:$0xff]  }
0x2965   :  { %8449 = vmatprep.mubr.bf16.mxu0 %v18046_v41  ;;  %8500 = vmatprep.mubr.bf16.mxu1 %v18046_v41 }
0x2966   :  { %8522 = vmatpush1.bf16.msra.mxu0 %v14928_v54  ;;  %8573 = vmatpush1.bf16.msra.mxu1 %v14930_v36  ;;  %v20310_v5 = vpack.c.bf16 %v20306_v7, %v20306_v7  ;;  %v8155_v54 = vld [vmem:[%s22048_s16 + $0xf0] sm:$0xff]  ;;  %v8148_v36 = vld [vmem:[%s22048_s16 + $0xb8] sm:$0xff] }
0x2967   :  { %8523 = vmatprep.subr.bf16.mxu0 %v14913_v57  ;;  %8574 = vmatprep.subr.bf16.mxu1 %v14915_v10  ;;  %v14937_v58 = vcombine.high %v8147_v43, %v8155_v54  ;;  %v14939_v61 = vcombine.high %v8148_v36, %v8156_v63  ;;  %v14936_v27 = vcombine.low %v8147_v43, %v8155_v54  ;;  %v17481_v57 = vld [vmem:[%s22050_s18 + $0xa8] sm:$0xff]   ;;  %v17482_v10 = vld [vmem:[%s22050_s18 + $0x60] sm:$0xff]  }
0x2968   :  { %v14938_v9 = vcombine.low %v8148_v36, %v8156_v63  ;;  %v17500_v43 = vld [vmem:[%s22050_s18] sm:$0xff]   ;;  %v17502_v36 = vld [vmem:[%s22050_s18 + $0x178] sm:$0xff]  }
0x2969   :  { %v17501_v54 = vld [vmem:[%s22050_s18 + $0x80] sm:$0xff]   ;;  %v17503_v63 = vld [vmem:[%s22050_s18 + $0x1f8] sm:$0xff]  }
0x296a   :  { %8524 = vmatpush1.bf16.msra.mxu0 %v14912_v32  ;;  %8575 = vmatpush1.bf16.msra.mxu1 %v14914_v45  ;;  %v17487_v32 = vld [vmem:[%s22050_s18 + $0xd8] sm:$0xff]  }
0x296b   :  { %8623 = vmatprep.subr.bf16.mxu0 %v14933_v46  ;;  %8674 = vmatprep.subr.bf16.mxu1 %v14935_v2  ;;  %v17488_v45 = vld [vmem:[%s22050_s18 + $0x18] sm:$0xff]   ;;  %v17490_v2 = vld [vmem:[%s22050_s18 + $0x50] sm:$0xff]  }
0x296c   :  { %14941 = vmatmul.mubr.msk.bf16.gmra.mxu0 %vm184_vm2, %v20310_v5  ;;  %14943 = vmatmul.mubr.msk.bf16.gmra.mxu1 %vm184_vm2, %v20310_v5  ;;  %v17489_v46 = vld [vmem:[%s22050_s18 + $0x98] sm:$0xff]  }
0x296d   :  { %8541 = vmatprep.mubr.bf16.mxu0 %v18046_v41  ;;  %8592 = vmatprep.mubr.bf16.mxu1 %v18046_v41 }
0x2974   :  { %14944 = vmatmul.mubr.msk.bf16.vlgmr.msra.gmra.mxu0 %vm184_vm2, %v20286_v24  ;;  %14946 = vmatmul.mubr.msk.bf16.vlgmr.msra.gmra.mxu1 %vm184_vm2, %v20286_v24 }
0x2975   :  { %8551 = vmatprep.mubr.bf16.mxu0 %v18046_v41  ;;  %8602 = vmatprep.mubr.bf16.mxu1 %v18046_v41 }
0x2976   :  { %8624 = vmatpush1.bf16.msra.mxu0 %v14932_v11  ;;  %8675 = vmatpush1.bf16.msra.mxu1 %v14934_v22  ;;  %v17496_v11 = vld [vmem:[%s22050_s18 + $0x8] sm:$0xff]  }
0x2977   :  { %8625 = vmatprep.subr.bf16.mxu0 %v14917_v23  ;;  %8676 = vmatprep.subr.bf16.mxu1 %v14919_v42  ;;  %v17497_v22 = vld [vmem:[%s22050_s18 + $0x88] sm:$0xff]   ;;  %v17498_v23 = vld [vmem:[%s22050_s18 + $0x40] sm:$0xff]  }
0x2978   :  { %v17499_v42 = vld [vmem:[%s22050_s18 + $0xc0] sm:$0xff]  }
0x297a   :  { %8626 = vmatpush1.bf16.msra.mxu0 %v14916_v56  ;;  %8677 = vmatpush1.bf16.msra.mxu1 %v14918_v0  ;;  %v20493_v56 = vld [vmem:[%s22049_s17] sm:$0xff] }
0x297b   :  { %8725 = vmatprep.subr.bf16.mxu0 %v14937_v58  ;;  %8776 = vmatprep.subr.bf16.mxu1 %v14939_v61  ;;  %v8168_v61 = vrot.slane %v20493_v56, %v18634_v12  ;;  %v8176_v16 = vrot.slane %v20493_v56, %v18637_v13  ;;  %v8164_v60 = vrot.slane %v20493_v56, %v18640_v21 }
0x297c   :  { %14945 = vmatmul.mubr.msk.bf16.gmra.mxu0 %vm184_vm2, %v20310_v5  ;;  %14947 = vmatmul.mubr.msk.bf16.gmra.mxu1 %vm184_vm2, %v20310_v5  ;;  %v8172_v40 = vrot.slane %v20493_v56, %v18643_v15 }
0x297d   :  { %8643 = vmatprep.mubr.bf16.mxu0 %v18046_v41  ;;  %8694 = vmatprep.mubr.bf16.mxu1 %v18046_v41 }
0x2984   :  { %14948 = vmatmul.mubr.msk.bf16.vlgmr.msra.gmra.mxu0 %vm184_vm2, %v20286_v24  ;;  %14950 = vmatmul.mubr.msk.bf16.vlgmr.msra.gmra.mxu1 %vm184_vm2, %v20286_v24 }
0x2985   :  { %8653 = vmatprep.mubr.bf16.mxu0 %v18046_v41  ;;  %8704 = vmatprep.mubr.bf16.mxu1 %v18046_v41 }
0x2986   :  { %8726 = vmatpush1.bf16.msra.mxu0 %v14936_v27  ;;  %8777 = vmatpush1.bf16.msra.mxu1 %v14938_v9 }
0x2987   :  { %8727 = vmatprep.subr.bf16.mxu0 %v14921_v20  ;;  %8778 = vmatprep.subr.bf16.mxu1 %v14923_v3 }
0x298a   :  { %8728 = vmatpush1.bf16.msra.mxu0 %v14920_v37  ;;  %8779 = vmatpush1.bf16.msra.mxu1 %v14922_v47 }
0x298b   :  { %16139 = vmatprep.subr.bf16.mxu0 %v17470_v31  ;;  %16167 = vmatprep.subr.bf16.mxu1 %v17471_v62 }
0x298c   :  { %14949 = vmatmul.mubr.msk.bf16.gmra.mxu0 %vm184_vm2, %v20310_v5  ;;  %14951 = vmatmul.mubr.msk.bf16.gmra.mxu1 %vm184_vm2, %v20310_v5 }
0x298d   :  { %8745 = vmatprep.mubr.bf16.mxu0 %v18046_v41  ;;  %8796 = vmatprep.mubr.bf16.mxu1 %v18046_v41 }
0x2994   :  { %14952 = vmatmul.mubr.msk.bf16.vlgmr.msra.gmra.mxu0 %vm184_vm2, %v20286_v24  ;;  %14954 = vmatmul.mubr.msk.bf16.vlgmr.msra.gmra.mxu1 %vm184_vm2, %v20286_v24  ;;  %v17479_v24 = vld [vmem:[%s22050_s18 + $0xe8] sm:$0xff]  }
0x2995   :  { %8755 = vmatprep.mubr.bf16.mxu0 %v18046_v41  ;;  %8806 = vmatprep.mubr.bf16.mxu1 %v18046_v41 }
0x2996   :  { %16140 = vmatpush3.bf16.msra.mxu0 %v17472_v25  ;;  %16168 = vmatpush3.bf16.msra.mxu1 %v17473_v19 }
0x2997   :  { %16141 = vmatprep.subr.bf16.mxu0 %v17474_v14  ;;  %16169 = vmatprep.subr.bf16.mxu1 %v17475_v26 }
0x299a   :  { %16142 = vmatpush3.bf16.msra.mxu0 %v17476_v4  ;;  %16170 = vmatpush3.bf16.msra.mxu1 %v17477_v28 }
0x299b   :  { %16143 = vmatprep.subr.bf16.mxu0 %v17478_v38  ;;  %16171 = vmatprep.subr.bf16.mxu1 %v17479_v24 }
0x299c   :  { %14953 = vmatmul.mubr.msk.bf16.gmra.mxu0 %vm184_vm2, %v20310_v5  ;;  %14955 = vmatmul.mubr.msk.bf16.gmra.mxu1 %vm184_vm2, %v20310_v5  ;;  %v17491_v5 = vld [vmem:[%s22050_s18 + $0xd0] sm:$0xff]  }
0x299e   :  { %16144 = vmatpush3.bf16.msra.mxu0 %v17480_v52  ;;  %16172 = vmatpush3.bf16.msra.mxu1 %v17481_v57 }
0x299f   :  { %16145 = vmatprep.subr.bf16.mxu0 %v17482_v10  ;;  %16173 = vmatprep.subr.bf16.mxu1 %v17483_v53 }
0x29a2   :  { %16146 = vmatpush3.bf16.msra.mxu0 %v17484_v6  ;;  %16174 = vmatpush3.bf16.msra.mxu1 %v17485_v49 }
0x29a3   :  { %16147 = vmatprep.subr.bf16.mxu0 %v17486_v17  ;;  %16175 = vmatprep.subr.bf16.mxu1 %v17487_v32 }
0x29a6   :  { %16148 = vmatpush3.bf16.msra.mxu0 %v17488_v45  ;;  %16176 = vmatpush3.bf16.msra.mxu1 %v17489_v46 }
0x29a7   :  { %16149 = vmatprep.subr.bf16.mxu0 %v17490_v2  ;;  %16177 = vmatprep.subr.bf16.mxu1 %v17491_v5 }
0x29aa   :  { %16150 = vmatpush3.bf16.msra.mxu0 %v17492_v35  ;;  %16178 = vmatpush3.bf16.msra.mxu1 %v17493_v44  ;;  %v17504_v44 = vld [vmem:[%s22050_s18 + $0x138] sm:$0xff]  }
0x29ab   :  { %16151 = vmatprep.subr.bf16.mxu0 %v17494_v34  ;;  %16179 = vmatprep.subr.bf16.mxu1 %v17495_v55  ;;  %v17505_v34 = vld [vmem:[%s22050_s18 + $0x1b8] sm:$0xff]  }
0x29ae   :  { %16152 = vmatpush3.bf16.msra.mxu0 %v17496_v11  ;;  %16180 = vmatpush3.bf16.msra.mxu1 %v17497_v22 }
0x29af   :  { %16153 = vmatprep.subr.bf16.mxu0 %v17498_v23  ;;  %16181 = vmatprep.subr.bf16.mxu1 %v17499_v42 }
0x29b2   :  { %16154 = vmatpush3.bf16.msra.mxu0 %v17500_v43  ;;  %16182 = vmatpush3.bf16.msra.mxu1 %v17501_v54  ;;  %v17506_v54 = vld [vmem:[%s22050_s18 + $0x170] sm:$0xff]  }
0x29b3   :  { %16195 = vmatprep.subr.bf16.mxu0 %v17502_v36  ;;  %16223 = vmatprep.subr.bf16.mxu1 %v17503_v63  ;;  %v17507_v36 = vld [vmem:[%s22050_s18 + $0x1f0] sm:$0xff]  }
0x2a24   :  { %v8441_v0 = vpop.f32.mrf.mxu0  ;;  %v8492_v58 = vpop.f32.mrf.mxu1 }
0x2a25   :  { %v8442_v62 = vadd.f32 %v8441_v0, %v8164_v60  ;;  %v8493_v25 = vadd.f32 %v8492_v58, %v8172_v40 }
0x2a26   :  { %v8443_v18 = vpop.f32.mrf.mxu0  ;;  %v8494_v27 = vpop.f32.mrf.mxu1 }
0x2a27   :  { %v8444_v3 = vadd.f32 %v8443_v18, %v8168_v61  ;;  %v8495_v37 = vadd.f32 %v8494_v27, %v8176_v16  ;;  %v8815_v49 = vmax.f32 %v8442_v62, 0.0  ;;  %v8817_v17 = vmax.f32 %v8493_v25, 0.0  ;;  %v17509_v18 = vld [vmem:[%s22050_s18 + $0x1b0] sm:$0xff]  }
0x2a28   :  { %v8445_v9 = vpop.f32.mrf.mxu0  ;;  %v8496_v20 = vpop.f32.mrf.mxu1  ;;  %v20537_v25 = vrot.slane %v20493_v56, %v18659_v30 }
0x2a29   :  { %v8446_v47 = vadd.f32 %v8445_v9, %v8164_v60  ;;  %v8497_v31 = vadd.f32 %v8496_v20, %v8172_v40  ;;  %v8816_v57 = vmax.f32 %v8444_v3, 0.0  ;;  %v8818_v10 = vmax.f32 %v8495_v37, 0.0  ;;  %v17510_v37 = vld [vmem:[%s22050_s18 + $0x168] sm:$0xff]  }
0x2a2a   :  { %v8447_v19 = vpop.f32.mrf.mxu0  ;;  %v8498_v14 = vpop.f32.mrf.mxu1 }
0x2a2b   :  { %v8448_v26 = vadd.f32 %v8447_v19, %v8168_v61  ;;  %v8499_v4 = vadd.f32 %v8498_v14, %v8176_v16  ;;  %v8831_v28 = vmax.f32 %v8446_v47, 0.0  ;;  %v8833_v38 = vmax.f32 %v8497_v31, 0.0  ;;  %v17511_v47 = vld [vmem:[%s22050_s18 + $0x1e8] sm:$0xff]  }
0x2a2c   :  { %v8451_v24 = vpop.f32.mrf.mxu0  ;;  %v8502_v52 = vpop.f32.mrf.mxu1  ;;  %v20533_v31 = vrot.slane %v20493_v56, %v18662_v39  ;;  %v17512_v14 = vld [vmem:[%s22050_s18 + $0x128] sm:$0xff]  }
0x2a2d   :  { %v8832_v53 = vmax.f32 %v8448_v26, 0.0  ;;  %v8834_v6 = vmax.f32 %v8499_v4, 0.0  ;;  %v8863_v55 = vpack.c.bf16 %v8831_v28, %v8815_v49  ;;  %v8865_v11 = vpack.c.bf16 %v8833_v38, %v8817_v17  ;;  %v17513_v26 = vld [vmem:[%s22050_s18 + $0x1a8] sm:$0xff]  }
0x2a2e   :  { %v8453_v32 = vpop.f32.mrf.mxu0  ;;  %v8504_v45 = vpop.f32.mrf.mxu1  ;;  %v8452_v22 = vadd.f32 %v8451_v24, %v8164_v60  ;;  %v8503_v23 = vadd.f32 %v8502_v52, %v8172_v40  ;;  %v17508_v40 = vld [vmem:[%s22050_s18 + $0x130] sm:$0xff]   ;;  %v17514_v52 = vld [vmem:[%s22050_s18 + $0x160] sm:$0xff]  }
0x2a2f   :  { %v8454_v46 = vadd.f32 %v8453_v32, %v8168_v61  ;;  %v8505_v2 = vadd.f32 %v8504_v45, %v8176_v16  ;;  %v8864_v5 = vpack.c.bf16 %v8832_v53, %v8816_v57  ;;  %v8866_v35 = vpack.c.bf16 %v8834_v6, %v8818_v10  ;;  %v17515_v57 = vld [vmem:[%s22050_s18 + $0x1e0] sm:$0xff]  }
0x2a30   :  { %v8455_v42 = vpop.f32.mrf.mxu0  ;;  %v8506_v43 = vpop.f32.mrf.mxu1  ;;  %v8847_v27 = vmax.f32 %v8452_v22, 0.0  ;;  %v8849_v9 = vmax.f32 %v8503_v23, 0.0  ;;  %v17516_v45 = vld [vmem:[%s22050_s18 + $0x120] sm:$0xff]  }
0x2a31   :  { %v8848_v63 = vmax.f32 %v8454_v46, 0.0  ;;  %v8850_v0 = vmax.f32 %v8505_v2, 0.0  ;;  %9958 = vmatprep.mubr.bf16.mxu0 %v8864_v5  ;;  %10006 = vmatprep.mubr.bf16.mxu1 %v8866_v35  ;;  %v17517_v46 = vld [vmem:[%s22050_s18 + $0x1a0] sm:$0xff]   ;;  %v17518_v35 = vld [vmem:[%s22050_s18 + $0x158] sm:$0xff]  }
0x2a32   :  { %v8456_v58 = vpop.f32.mrf.mxu0  ;;  %v8507_v61 = vpop.f32.mrf.mxu1  ;;  %9959 = vmatmul.mubr.bf16.vlgmr.msra.gmra.mxu0 %v8863_v55  ;;  %10007 = vmatmul.mubr.bf16.vlgmr.msra.gmra.mxu1 %v8865_v11  ;;  %v8879_v4 = vpack.c.bf16 %v8847_v27, %v8847_v27  ;;  %v8881_v28 = vpack.c.bf16 %v8849_v9, %v8849_v9  ;;  %v17525_v27 = vld [vmem:[%s22050_s18 + $0x190] sm:$0xff]  }
0x2a33   :  { %v8880_v16 = vpack.c.bf16 %v8848_v63, %v8848_v63  ;;  %v8882_v60 = vpack.c.bf16 %v8850_v0, %v8850_v0  ;;  %16196 = vmatpush3.bf16.msra.mxu0 %v17504_v44  ;;  %16224 = vmatpush3.bf16.msra.mxu1 %v17505_v34  ;;  %v17519_v44 = vld [vmem:[%s22050_s18 + $0x1d8] sm:$0xff]   ;;  %v17522_v61 = vld [vmem:[%s22050_s18 + $0x150] sm:$0xff]  }
0x2a34   :  { %v20521_v20 = vpop.f32.mrf.mxu0  ;;  %v20523_v3 = vpop.f32.mrf.mxu1  ;;  %16197 = vmatprep.subr.bf16.mxu0 %v17506_v54  ;;  %16225 = vmatprep.subr.bf16.mxu1 %v17507_v36  ;;  %v17520_v54 = vld [vmem:[%s22050_s18 + $0x118] sm:$0xff]  }
0x2a35   :  { %9966 = vmatprep.mubr.bf16.mxu0 %v8880_v16  ;;  %10014 = vmatprep.mubr.bf16.mxu1 %v8882_v60  ;;  %v17521_v36 = vld [vmem:[%s22050_s18 + $0x198] sm:$0xff]   ;;  %v17523_v16 = vld [vmem:[%s22050_s18 + $0x1d0] sm:$0xff]  }
0x2a36   :  { %v8545_v62 = vpop.f32.mrf.mxu0  ;;  %v8596_v19 = vpop.f32.mrf.mxu1 }
0x2a37   :  { %16198 = vmatpush3.bf16.msra.mxu0 %v17508_v40  ;;  %16226 = vmatpush3.bf16.msra.mxu1 %v17509_v18  ;;  %v8546_v10 = vadd.f32 %v8545_v62, %v20533_v31  ;;  %v8597_v53 = vadd.f32 %v8596_v19, %v20537_v25  ;;  %v17524_v18 = vld [vmem:[%s22050_s18 + $0x110] sm:$0xff]   ;;  %v17527_v62 = vld [vmem:[%s22050_s18 + $0x1c8] sm:$0xff]   ;;  %v8180_v19 = vrot.slane %v20493_v56, %v18741_v50 }
0x2a38   :  { %v8547_v38 = vpop.f32.mrf.mxu0  ;;  %v20545_v24 = vpop.f32.mrf.mxu1  ;;  %16199 = vmatprep.subr.bf16.mxu0 %v17510_v37  ;;  %16227 = vmatprep.subr.bf16.mxu1 %v17511_v47  ;;  %v17526_v47 = vld [vmem:[%s22050_s18 + $0x148] sm:$0xff]  }
0x2a39   :  { %v8820_v34 = vmax.f32 %v8546_v10, 0.0  ;;  %v8822_v22 = vmax.f32 %v8597_v53, 0.0 }
0x2a3a   :  { %v8549_v6 = vpop.f32.mrf.mxu0  ;;  %v8600_v49 = vpop.f32.mrf.mxu1  ;;  %9967 = vmatmul.mubr.bf16.gmra.mxu0 %v8879_v4  ;;  %10015 = vmatmul.mubr.bf16.gmra.mxu1 %v8881_v28  ;;  %v8548_v28 = vadd.f32 %v8547_v38, %v8180_v19  ;;  %v17530_v38 = vld [vmem:[%s22050_s18 + $0x140] sm:$0xff]  }
0x2a3b   :  { %v8550_v17 = vadd.f32 %v8549_v6, %v20533_v31  ;;  %v8601_v32 = vadd.f32 %v8600_v49, %v20537_v25  ;;  %16200 = vmatpush3.bf16.msra.mxu0 %v17512_v14  ;;  %16228 = vmatpush3.bf16.msra.mxu1 %v17513_v26  ;;  %v8188_v14 = vrot.slane %v20493_v56, %v18744_v51  ;;  %v17531_v6 = vld [vmem:[%s22050_s18 + $0x1c0] sm:$0xff]  }
0x2a3c   :  { %v20563_v2 = vpop.f32.mrf.mxu0  ;;  %v20565_v5 = vpop.f32.mrf.mxu1  ;;  %16201 = vmatprep.subr.bf16.mxu0 %v17514_v52  ;;  %16229 = vmatprep.subr.bf16.mxu1 %v17515_v57  ;;  %v17528_v52 = vld [vmem:[%s22050_s18 + $0x108] sm:$0xff]   ;;  %v8544_v49 = vadd.f32 %v20521_v20, %v8180_v19 }
0x2a3d   :  { %v8836_v55 = vmax.f32 %v8550_v17, 0.0  ;;  %v8838_v11 = vmax.f32 %v8601_v32, 0.0  ;;  %v17529_v57 = vld [vmem:[%s22050_s18 + $0x188] sm:$0xff]   ;;  %v8599_v10 = vadd.f32 %v20545_v24, %v8188_v14  ;;  %v8595_v32 = vadd.f32 %v20523_v3, %v8188_v14  ;;  %v17534_v3 = vld [vmem:[%s22050_s18 + $0x278] sm:$0xff]  }
0x2a3e   :  { %v8555_v23 = vpop.f32.mrf.mxu0  ;;  %v8606_v42 = vpop.f32.mrf.mxu1 }
0x2a3f   :  { %16202 = vmatpush3.bf16.msra.mxu0 %v17516_v45  ;;  %16230 = vmatpush3.bf16.msra.mxu1 %v17517_v46  ;;  %v8868_v43 = vpack.c.bf16 %v8836_v55, %v8820_v34  ;;  %v8870_v58 = vpack.c.bf16 %v8838_v11, %v8822_v22  ;;  %v8556_v17 = vadd.f32 %v8555_v23, %v20533_v31  ;;  %v17533_v34 = vld [vmem:[%s22050_s18 + $0x180] sm:$0xff]   ;;  %v8837_v20 = vmax.f32 %v8599_v10, 0.0 }
0x2a40   :  { %v8557_v63 = vpop.f32.mrf.mxu0  ;;  %v8608_v0 = vpop.f32.mrf.mxu1  ;;  %16203 = vmatprep.subr.bf16.mxu0 %v17518_v35  ;;  %16231 = vmatprep.subr.bf16.mxu1 %v17519_v44  ;;  %v8607_v24 = vadd.f32 %v8606_v42, %v20537_v25  ;;  %v8835_v35 = vmax.f32 %v8548_v28, 0.0  ;;  %v17532_v44 = vld [vmem:[%s22050_s18 + $0x100] sm:$0xff]   ;;  %v17535_v25 = vld [vmem:[%s22050_s18 + $0x2f8] sm:$0xff]   ;;  %v8819_v11 = vmax.f32 %v8544_v49, 0.0  ;;  %v8821_v42 = vmax.f32 %v8595_v32, 0.0  ;;  %v17540_v32 = vld [vmem:[%s22050_s18 + $0x230] sm:$0xff]  }
0x2a41   :  { %10054 = vmatprep.mubr.bf16.mxu0 %v8868_v43  ;;  %10102 = vmatprep.mubr.bf16.mxu1 %v8870_v58  ;;  %v8852_v22 = vmax.f32 %v8556_v17, 0.0  ;;  %v20649_v43 = vld [vmem:[%s22049_s17 + $0x8] sm:$0xff] }
0x2a42   :  { %v8558_v60 = vpop.f32.mrf.mxu0  ;;  %v8609_v40 = vpop.f32.mrf.mxu1  ;;  %v8854_v23 = vmax.f32 %v8607_v24, 0.0  ;;  %v8867_v63 = vpack.c.bf16 %v8835_v35, %v8819_v11  ;;  %v20657_v0 = vrot.slane %v20649_v43, %v18634_v12  ;;  %v20661_v58 = vrot.slane %v20649_v43, %v18637_v13  ;;  %v17543_v35 = vld [vmem:[%s22050_s18 + $0x2e8] sm:$0xff]  }
0x2a43   :  { %16204 = vmatpush3.bf16.msra.mxu0 %v17520_v54  ;;  %16232 = vmatpush3.bf16.msra.mxu1 %v17521_v36  ;;  %v8605_v60 = vadd.f32 %v20565_v5, %v8188_v14  ;;  %v17538_v5 = vld [vmem:[%s22050_s18 + $0x270] sm:$0xff]  }
0x2a44   :  { %v20591_v9 = vpop.f32.mrf.mxu0  ;;  %v20593_v37 = vpop.f32.mrf.mxu1  ;;  %16205 = vmatprep.subr.bf16.mxu0 %v17522_v61  ;;  %16233 = vmatprep.subr.bf16.mxu1 %v17523_v16  ;;  %v8869_v61 = vpack.c.bf16 %v8837_v20, %v8821_v42  ;;  %v8554_v16 = vadd.f32 %v20563_v2, %v8180_v19  ;;  %v8886_v28 = vpack.c.bf16 %v8854_v23, %v8854_v23  ;;  %v17539_v19 = vld [vmem:[%s22050_s18 + $0x2f0] sm:$0xff]   ;;  %v17544_v42 = vld [vmem:[%s22050_s18 + $0x228] sm:$0xff]  }
0x2a45   :  { %v8853_v49 = vmax.f32 %v8605_v60, 0.0  ;;  %v17546_v60 = vld [vmem:[%s22050_s18 + $0x260] sm:$0xff]  }
0x2a46   :  { %v20605_v26 = vpop.f32.mrf.mxu0  ;;  %v20607_v4 = vpop.f32.mrf.mxu1 }
0x2a47   :  { %16206 = vmatpush3.bf16.msra.mxu0 %v17524_v18  ;;  %16234 = vmatpush3.bf16.msra.mxu1 %v17525_v27  ;;  %v17536_v27 = vld [vmem:[%s22050_s18 + $0x238] sm:$0xff]   ;;  %v8648_v10 = vadd.f32 %v20605_v26, %v20657_v0  ;;  %v17541_v26 = vld [vmem:[%s22050_s18 + $0x2b0] sm:$0xff]   ;;  %v8885_v11 = vpack.c.bf16 %v8853_v49, %v8853_v49 }
0x2a48   :  { %v20616_v53 = vpop.f32.mrf.mxu0  ;;  %v20618_v56 = vpop.f32.mrf.mxu1  ;;  %16207 = vmatprep.subr.bf16.mxu0 %v17526_v47  ;;  %16235 = vmatprep.subr.bf16.mxu1 %v17527_v62  ;;  %v17537_v47 = vld [vmem:[%s22050_s18 + $0x2b8] sm:$0xff]   ;;  %v8884_v62 = vpack.c.bf16 %v8852_v22, %v8852_v22  ;;  %v17554_v49 = vld [vmem:[%s22050_s18 + $0x250] sm:$0xff]  }
0x2a49   :  { %v8824_v20 = vmax.f32 %v8648_v10, 0.0 }
0x2a4a   :  { %v8651_v45 = vpop.f32.mrf.mxu0  ;;  %v8702_v46 = vpop.f32.mrf.mxu1 }
0x2a4b   :  { %16208 = vmatpush3.bf16.msra.mxu0 %v17528_v52  ;;  %16236 = vmatpush3.bf16.msra.mxu1 %v17529_v57  ;;  %v8652_v52 = vadd.f32 %v8651_v45, %v20657_v0  ;;  %v8703_v2 = vadd.f32 %v8702_v46, %v20661_v58  ;;  %v17542_v46 = vld [vmem:[%s22050_s18 + $0x268] sm:$0xff]  }
0x2a4c   :  { %v20636_v55 = vpop.f32.mrf.mxu0  ;;  %v20638_v31 = vpop.f32.mrf.mxu1  ;;  %16209 = vmatprep.subr.bf16.mxu0 %v17530_v38  ;;  %16237 = vmatprep.subr.bf16.mxu1 %v17531_v6  ;;  %v8699_v38 = vadd.f32 %v20607_v4, %v20661_v58  ;;  %v8851_v6 = vmax.f32 %v8554_v16, 0.0 }
0x2a4d   :  { %v8840_v45 = vmax.f32 %v8652_v52, 0.0  ;;  %v8842_v4 = vmax.f32 %v8703_v2, 0.0  ;;  %v17549_v52 = vld [vmem:[%s22050_s18 + $0x2a0] sm:$0xff]   ;;  %v17550_v2 = vld [vmem:[%s22050_s18 + $0x258] sm:$0xff]  }
0x2a4e   :  { %v20651_v54 = vpop.f32.mrf.mxu0  ;;  %v20653_v36 = vpop.f32.mrf.mxu1 }
0x2a4f   :  { %16210 = vmatpush3.bf16.msra.mxu0 %v17532_v44  ;;  %16238 = vmatpush3.bf16.msra.mxu1 %v17533_v34 }
0x2a50   :  { %v8659_v40 = vpop.f32.mrf.mxu0  ;;  %v8710_v18 = vpop.f32.mrf.mxu1  ;;  %16251 = vmatprep.subr.bf16.mxu0 %v17534_v3  ;;  %16279 = vmatprep.subr.bf16.mxu1 %v17535_v25  ;;  %v8826_v3 = vmax.f32 %v8699_v38, 0.0  ;;  %v8883_v25 = vpack.c.bf16 %v8851_v6, %v8851_v6  ;;  %v17552_v38 = vld [vmem:[%s22050_s18 + $0x218] sm:$0xff]  }
0x2a51   :  { %v17547_v40 = vld [vmem:[%s22050_s18 + $0x2e0] sm:$0xff]   ;;  %v17553_v6 = vld [vmem:[%s22050_s18 + $0x298] sm:$0xff]  }
0x2a52   :  { %10055 = vmatmul.mubr.bf16.vlgmr.msra.gmra.mxu0 %v8867_v63  ;;  %10103 = vmatmul.mubr.bf16.vlgmr.msra.gmra.mxu1 %v8869_v61  ;;  %v8660_v14 = vpop.f32.mrf.mxu0  ;;  %v8711_v57 = vpop.f32.mrf.mxu1  ;;  %v17545_v63 = vld [vmem:[%s22050_s18 + $0x2a8] sm:$0xff]   ;;  %v8872_v61 = vpack.c.bf16 %v8840_v45, %v8824_v20  ;;  %v8874_v16 = vpack.c.bf16 %v8842_v4, %v8826_v3  ;;  %v17556_v4 = vld [vmem:[%s22050_s18 + $0x210] sm:$0xff]   ;;  %v8196_v3 = vrot.slane %v20649_v43, %v18640_v21 }
0x2a53   :  { %10062 = vmatprep.mubr.bf16.mxu0 %v8884_v62  ;;  %10110 = vmatprep.mubr.bf16.mxu1 %v8886_v28  ;;  %v17548_v28 = vld [vmem:[%s22050_s18 + $0x220] sm:$0xff]   ;;  %v17559_v20 = vld [vmem:[%s22050_s18 + $0x2c8] sm:$0xff]  }
0x2a54   :  { %16252 = vmatpush3.bf16.msra.mxu0 %v17536_v27  ;;  %16280 = vmatpush3.bf16.msra.mxu1 %v17537_v47  ;;  %v20683_v17 = vpop.f32.mrf.mxu0  ;;  %v20685_v24 = vpop.f32.mrf.mxu1 }
0x2a55   :  { %16253 = vmatprep.subr.bf16.mxu0 %v17538_v5  ;;  %16281 = vmatprep.subr.bf16.mxu1 %v17539_v19  ;;  %v17551_v5 = vld [vmem:[%s22050_s18 + $0x2d8] sm:$0xff]  }
0x2a56   :  { %v20699_v44 = vpop.f32.mrf.mxu0  ;;  %v20701_v34 = vpop.f32.mrf.mxu1 }
0x2a58   :  { %16254 = vmatpush3.bf16.msra.mxu0 %v17540_v32  ;;  %16282 = vmatpush3.bf16.msra.mxu1 %v17541_v26  ;;  %v20703_v22 = vpop.f32.mrf.mxu0  ;;  %v20705_v23 = vpop.f32.mrf.mxu1  ;;  %v17555_v32 = vld [vmem:[%s22050_s18 + $0x2d0] sm:$0xff]  }
0x2a59   :  { %16255 = vmatprep.subr.bf16.mxu0 %v17542_v46  ;;  %16283 = vmatprep.subr.bf16.mxu1 %v17543_v35  ;;  %v17557_v46 = vld [vmem:[%s22050_s18 + $0x290] sm:$0xff]   ;;  %v17558_v35 = vld [vmem:[%s22050_s18 + $0x248] sm:$0xff]  }
0x2a5a   :  { %10063 = vmatmul.mubr.bf16.gmra.mxu0 %v8883_v25  ;;  %10111 = vmatmul.mubr.bf16.gmra.mxu1 %v8885_v11  ;;  %v20719_v18 = vpop.f32.mrf.mxu0  ;;  %v20721_v27 = vpop.f32.mrf.mxu1  ;;  %v8204_v25 = vrot.slane %v20649_v43, %v18643_v15  ;;  %v8650_v11 = vadd.f32 %v20616_v53, %v8196_v3  ;;  %v17563_v53 = vld [vmem:[%s22050_s18 + $0x2c0] sm:$0xff]  }
0x2a5b   :  { %10150 = vmatprep.mubr.bf16.mxu0 %v8872_v61  ;;  %10198 = vmatprep.mubr.bf16.mxu1 %v8874_v16  ;;  %v17562_v16 = vld [vmem:[%s22050_s18 + $0x240] sm:$0xff]  }
0x2a5c   :  { %16256 = vmatpush3.bf16.msra.mxu0 %v17544_v42  ;;  %16284 = vmatpush3.bf16.msra.mxu1 %v17545_v63  ;;  %v20723_v47 = vpop.f32.mrf.mxu0  ;;  %v20725_v62 = vpop.f32.mrf.mxu1  ;;  %v17560_v42 = vld [vmem:[%s22050_s18 + $0x208] sm:$0xff]   ;;  %v8701_v61 = vadd.f32 %v20618_v56, %v8204_v25  ;;  %v8697_v56 = vadd.f32 %v20593_v37, %v8204_v25  ;;  %v17567_v37 = vld [vmem:[%s22050_s18 + $0x3f8] sm:$0xff]  }
0x2a5d   :  { %16257 = vmatprep.subr.bf16.mxu0 %v17546_v60  ;;  %16285 = vmatprep.subr.bf16.mxu1 %v17547_v40  ;;  %v17561_v63 = vld [vmem:[%s22050_s18 + $0x288] sm:$0xff]   ;;  %v8646_v60 = vadd.f32 %v20591_v9, %v8196_v3  ;;  %v8658_v40 = vadd.f32 %v20651_v54, %v20657_v0  ;;  %v17566_v54 = vld [vmem:[%s22050_s18 + $0x378] sm:$0xff]  }
0x2a5e   :  { %v20739_v19 = vpop.f32.mrf.mxu0  ;;  %v20741_v14 = vpop.f32.mrf.mxu1  ;;  %v8841_v9 = vmax.f32 %v8701_v61, 0.0 }
0x2a5f   :  { %v8856_v0 = vmax.f32 %v8658_v40, 0.0 }
0x2a60   :  { %16258 = vmatpush3.bf16.msra.mxu0 %v17548_v28  ;;  %16286 = vmatpush3.bf16.msra.mxu1 %v17549_v52  ;;  %v8761_v57 = vpop.f32.mrf.mxu0  ;;  %v8812_v10 = vpop.f32.mrf.mxu1  ;;  %v8709_v28 = vadd.f32 %v20653_v36, %v20661_v58  ;;  %v8839_v52 = vmax.f32 %v8650_v11, 0.0  ;;  %v8823_v36 = vmax.f32 %v8646_v60, 0.0 }
0x2a61   :  { %16259 = vmatprep.subr.bf16.mxu0 %v17550_v2  ;;  %16287 = vmatprep.subr.bf16.mxu1 %v17551_v5  ;;  %v17564_v2 = vld [vmem:[%s22050_s18 + $0x200] sm:$0xff]   ;;  %v8825_v57 = vmax.f32 %v8697_v56, 0.0  ;;  %v17576_v56 = vld [vmem:[%s22050_s18 + $0x328] sm:$0xff]  }
0x2a62   :  { %v8762_v26 = vpop.f32.mrf.mxu0  ;;  %v8813_v45 = vpop.f32.mrf.mxu1  ;;  %v17565_v5 = vld [vmem:[%s22050_s18 + $0x280] sm:$0xff]   ;;  %v8858_v58 = vmax.f32 %v8709_v28, 0.0  ;;  %v8871_v10 = vpack.c.bf16 %v8839_v52, %v8823_v36  ;;  %v17577_v52 = vld [vmem:[%s22050_s18 + $0x3a8] sm:$0xff]  }
0x2a63   :  { %v8707_v26 = vadd.f32 %v20638_v31, %v8204_v25  ;;  %v17568_v45 = vld [vmem:[%s22050_s18 + $0x338] sm:$0xff]   ;;  %v17570_v31 = vld [vmem:[%s22050_s18 + $0x370] sm:$0xff]   ;;  %v17581_v36 = vld [vmem:[%s22050_s18 + $0x3a0] sm:$0xff]  }
0x2a64   :  { %16260 = vmatpush3.bf16.msra.mxu0 %v17552_v38  ;;  %16288 = vmatpush3.bf16.msra.mxu1 %v17553_v6  ;;  %v20805_v38 = vrot.slane %v20649_v43, %v18662_v39  ;;  %v20809_v6 = vrot.slane %v20649_v43, %v18659_v30 }
0x2a65   :  { %16261 = vmatprep.subr.bf16.mxu0 %v17554_v49  ;;  %16289 = vmatprep.subr.bf16.mxu1 %v17555_v32  ;;  %v8873_v49 = vpack.c.bf16 %v8841_v9, %v8825_v57  ;;  %v8656_v32 = vadd.f32 %v20636_v55, %v8196_v3  ;;  %v17571_v3 = vld [vmem:[%s22050_s18 + $0x3f0] sm:$0xff]   ;;  %v17578_v9 = vld [vmem:[%s22050_s18 + $0x360] sm:$0xff]   ;;  %v17584_v57 = vld [vmem:[%s22050_s18 + $0x318] sm:$0xff]  }
0x2a66   :  { %v8805_v55 = vadd.f32 %v20721_v27, %v20809_v6  ;;  %v8750_v25 = vadd.f32 %v20699_v44, %v20805_v38  ;;  %v8801_v11 = vadd.f32 %v20701_v34, %v20809_v6  ;;  %v8857_v27 = vmax.f32 %v8707_v26, 0.0  ;;  %v17574_v44 = vld [vmem:[%s22050_s18 + $0x368] sm:$0xff]   ;;  %v17588_v26 = vld [vmem:[%s22050_s18 + $0x310] sm:$0xff]  }
0x2a67   :  { %v17575_v34 = vld [vmem:[%s22050_s18 + $0x3e8] sm:$0xff]  }
0x2a68   :  { %16262 = vmatpush3.bf16.msra.mxu0 %v17556_v4  ;;  %16290 = vmatpush3.bf16.msra.mxu1 %v17557_v46  ;;  %v17569_v4 = vld [vmem:[%s22050_s18 + $0x3b8] sm:$0xff]   ;;  %v8888_v46 = vpack.c.bf16 %v8856_v0, %v8856_v0  ;;  %v8830_v60 = vmax.f32 %v8801_v11, 0.0  ;;  %v8889_v28 = vpack.c.bf16 %v8857_v27, %v8857_v27  ;;  %v17595_v11 = vld [vmem:[%s22050_s18 + $0x3c0] sm:$0xff]   ;;  %v8811_v27 = vadd.f32 %v20741_v14, %v20809_v6 }
0x2a69   :  { %16263 = vmatprep.subr.bf16.mxu0 %v17558_v35  ;;  %16291 = vmatprep.subr.bf16.mxu1 %v17559_v20  ;;  %v8890_v35 = vpack.c.bf16 %v8858_v58, %v8858_v58  ;;  %v8754_v20 = vadd.f32 %v20719_v18, %v20805_v38  ;;  %v8855_v18 = vmax.f32 %v8656_v32, 0.0  ;;  %v17582_v0 = vld [vmem:[%s22050_s18 + $0x358] sm:$0xff]   ;;  %v17587_v32 = vld [vmem:[%s22050_s18 + $0x3d0] sm:$0xff]  }
0x2a6a   :  { %v17583_v58 = vld [vmem:[%s22050_s18 + $0x3d8] sm:$0xff]   ;;  %v8862_v14 = vmax.f32 %v8811_v27, 0.0 }
0x2a6b   :  { %v8844_v61 = vmax.f32 %v8754_v20, 0.0  ;;  %v8887_v40 = vpack.c.bf16 %v8855_v18, %v8855_v18  ;;  %v8220_v20 = vrot.slane %v20649_v43, %v18744_v51  ;;  %v8760_v18 = vadd.f32 %v20739_v19, %v20805_v38 }
0x2a6c   :  { %16264 = vmatpush3.bf16.msra.mxu0 %v17560_v42  ;;  %16292 = vmatpush3.bf16.msra.mxu1 %v17561_v63  ;;  %v17572_v42 = vld [vmem:[%s22050_s18 + $0x330] sm:$0xff]  }
0x2a6d   :  { %16265 = vmatprep.subr.bf16.mxu0 %v17562_v16  ;;  %16293 = vmatprep.subr.bf16.mxu1 %v17563_v53  ;;  %v17573_v63 = vld [vmem:[%s22050_s18 + $0x3b0] sm:$0xff]   ;;  %v8846_v16 = vmax.f32 %v8805_v55, 0.0  ;;  %v8828_v53 = vmax.f32 %v8750_v25, 0.0  ;;  %v17592_v55 = vld [vmem:[%s22050_s18 + $0x308] sm:$0xff]   ;;  %v8803_v25 = vadd.f32 %v20705_v23, %v8220_v20  ;;  %v8799_v23 = vadd.f32 %v20685_v24, %v8220_v20 }
0x2a6e   :  { %v8860_v19 = vmax.f32 %v8760_v18, 0.0 }
0x2a70   :  { %16266 = vmatpush3.bf16.msra.mxu0 %v17564_v2  ;;  %16294 = vmatpush3.bf16.msra.mxu1 %v17565_v5  ;;  %v8876_v2 = vpack.c.bf16 %v8844_v61, %v8828_v53  ;;  %v8878_v5 = vpack.c.bf16 %v8846_v16, %v8830_v60  ;;  %v8845_v16 = vmax.f32 %v8803_v25, 0.0  ;;  %v8892_v53 = vpack.c.bf16 %v8860_v19, %v8860_v19 }
0x2a71   :  { %16307 = vmatprep.subr.bf16.mxu0 %v17566_v54  ;;  %16335 = vmatprep.subr.bf16.mxu1 %v17567_v37  ;;  %v17579_v54 = vld [vmem:[%s22050_s18 + $0x3e0] sm:$0xff]   ;;  %v8894_v60 = vpack.c.bf16 %v8862_v14, %v8862_v14 }
0x2a72   :  { %v17580_v37 = vld [vmem:[%s22050_s18 + $0x320] sm:$0xff]  }
0x2a73   :  { %10151 = vmatmul.mubr.bf16.vlgmr.msra.gmra.mxu0 %v8871_v10  ;;  %10199 = vmatmul.mubr.bf16.vlgmr.msra.gmra.mxu1 %v8873_v49  ;;  %v17585_v10 = vld [vmem:[%s22050_s18 + $0x398] sm:$0xff]   ;;  %v17586_v49 = vld [vmem:[%s22050_s18 + $0x350] sm:$0xff]  }
0x2a74   :  { %10158 = vmatprep.mubr.bf16.mxu0 %v8888_v46  ;;  %10206 = vmatprep.mubr.bf16.mxu1 %v8890_v35  ;;  %v17591_v46 = vld [vmem:[%s22050_s18 + $0x3c8] sm:$0xff]   ;;  %v8212_v35 = vrot.slane %v20649_v43, %v18741_v50  ;;  %v17594_v43 = vld [vmem:[%s22050_s18 + $0x340] sm:$0xff]  }
0x2a75   :  { %16308 = vmatpush3.bf16.msra.mxu0 %v17568_v45  ;;  %16336 = vmatpush3.bf16.msra.mxu1 %v17569_v4  ;;  %v17589_v45 = vld [vmem:[%s22050_s18 + $0x390] sm:$0xff]   ;;  %v17590_v4 = vld [vmem:[%s22050_s18 + $0x348] sm:$0xff]  }
0x2a76   :  { %16309 = vmatprep.subr.bf16.mxu0 %v17570_v31  ;;  %16337 = vmatprep.subr.bf16.mxu1 %v17571_v3  ;;  %v17593_v31 = vld [vmem:[%s22050_s18 + $0x388] sm:$0xff]   ;;  %v8752_v3 = vadd.f32 %v20703_v22, %v8212_v35  ;;  %v8748_v22 = vadd.f32 %v20683_v17, %v8212_v35  ;;  %v8829_v17 = vmax.f32 %v8799_v23, 0.0 }
0x2a78   :  { %v8843_v61 = vmax.f32 %v8752_v3, 0.0  ;;  %v8827_v38 = vmax.f32 %v8748_v22, 0.0  ;;  %v8877_v6 = vpack.c.bf16 %v8845_v16, %v8829_v17 }
0x2a79   :  { %16310 = vmatpush3.bf16.msra.mxu0 %v17572_v42  ;;  %16338 = vmatpush3.bf16.msra.mxu1 %v17573_v63  ;;  %v17596_v42 = vld [vmem:[%s22050_s18 + $0x300] sm:$0xff]  }
0x2a7a   :  { %16311 = vmatprep.subr.bf16.mxu0 %v17574_v44  ;;  %16339 = vmatprep.subr.bf16.mxu1 %v17575_v34  ;;  %v17597_v63 = vld [vmem:[%s22050_s18 + $0x380] sm:$0xff]   ;;  %v8875_v24 = vpack.c.bf16 %v8843_v61, %v8827_v38  ;;  %v8758_v44 = vadd.f32 %v20723_v47, %v8212_v35  ;;  %v8809_v34 = vadd.f32 %v20725_v62, %v8220_v20 }
0x2a7b   :  { %10159 = vmatmul.mubr.bf16.gmra.mxu0 %v8887_v40  ;;  %10207 = vmatmul.mubr.bf16.gmra.mxu1 %v8889_v28  ;;  %v14956_v62 = vld [vmem:[%s22051_s19] ss:$0 sm:$0xff] }
0x2a7c   :  { %10246 = vmatprep.mubr.bf16.mxu0 %v8876_v2  ;;  %10294 = vmatprep.mubr.bf16.mxu1 %v8878_v5  ;;  %v8859_v40 = vmax.f32 %v8758_v44, 0.0  ;;  %v8861_v28 = vmax.f32 %v8809_v34, 0.0 }
0x2a7d   :  { %16312 = vmatpush3.bf16.msra.mxu0 %v17576_v56  ;;  %16340 = vmatpush3.bf16.msra.mxu1 %v17577_v52 }
0x2a7e   :  { %16313 = vmatprep.subr.bf16.mxu0 %v17578_v9  ;;  %16341 = vmatprep.subr.bf16.mxu1 %v17579_v54  ;;  %v8891_v56 = vpack.c.bf16 %v8859_v40, %v8859_v40  ;;  %v8893_v52 = vpack.c.bf16 %v8861_v28, %v8861_v28 }
0x2a81   :  { %16314 = vmatpush3.bf16.msra.mxu0 %v17580_v37  ;;  %16342 = vmatpush3.bf16.msra.mxu1 %v17581_v36 }
0x2a82   :  { %16315 = vmatprep.subr.bf16.mxu0 %v17582_v0  ;;  %16343 = vmatprep.subr.bf16.mxu1 %v17583_v58 }
0x2a85   :  { %16316 = vmatpush3.bf16.msra.mxu0 %v17584_v57  ;;  %16344 = vmatpush3.bf16.msra.mxu1 %v17585_v10 }
0x2a86   :  { %16317 = vmatprep.subr.bf16.mxu0 %v17586_v49  ;;  %16345 = vmatprep.subr.bf16.mxu1 %v17587_v32 }
0x2a89   :  { %16318 = vmatpush3.bf16.msra.mxu0 %v17588_v26  ;;  %16346 = vmatpush3.bf16.msra.mxu1 %v17589_v45 }
0x2a8a   :  { %16319 = vmatprep.subr.bf16.mxu0 %v17590_v4  ;;  %16347 = vmatprep.subr.bf16.mxu1 %v17591_v46 }
0x2a8d   :  { %16320 = vmatpush3.bf16.msra.mxu0 %v17592_v55  ;;  %16348 = vmatpush3.bf16.msra.mxu1 %v17593_v31 }
0x2a8e   :  { %16321 = vmatprep.subr.bf16.mxu0 %v17594_v43  ;;  %16349 = vmatprep.subr.bf16.mxu1 %v17595_v11 }
0x2a91   :  { %16322 = vmatpush3.bf16.msra.mxu0 %v17596_v42  ;;  %16350 = vmatpush3.bf16.msra.mxu1 %v17597_v63 }
0x2a92   :  { %17020 = vmatprep.subr.mxu1 %v18033_v1 }
0x2a94   :  { %10247 = vmatmul.mubr.bf16.vlgmr.msra.gmra.mxu0 %v8875_v24  ;;  %10295 = vmatmul.mubr.bf16.vlgmr.msra.gmra.mxu1 %v8877_v6 }
0x2a95   :  { %10254 = vmatprep.mubr.bf16.mxu0 %v8892_v53  ;;  %10302 = vmatprep.mubr.bf16.mxu1 %v8894_v60 }
0x2a9c   :  { %10255 = vmatmul.mubr.bf16.gmra.mxu0 %v8891_v56  ;;  %10303 = vmatmul.mubr.bf16.gmra.mxu1 %v8893_v52 }
0x2a9d   :  { %17026 = vmatprep.mubr.msk.f32.mxu1 %vm18034_vm0, %v18033_v1 }
0x2af2   :  { %v16155_v47 = vpop.f32.mrf.mxu0  ;;  %v16183_v2 = vpop.f32.mrf.mxu1 }
0x2af4   :  { %v16156_v5 = vpop.f32.mrf.mxu0  ;;  %v16184_v9 = vpop.f32.mrf.mxu1 }
0x2af5   :  { %v16157_v54 = vadd.f32 %v16156_v5, %v16155_v47  ;;  %v16185_v37 = vadd.f32 %v16184_v9, %v16183_v2 }
0x2af6   :  { %v16158_v36 = vpop.f32.mrf.mxu0  ;;  %v16186_v0 = vpop.f32.mrf.mxu1 }
0x2af7   :  { %v9961_v58 = vadd.f32 %v16157_v54, %v14956_v62 }
0x2af8   :  { %v16159_v57 = vpop.f32.mrf.mxu0  ;;  %v16187_v10 = vpop.f32.mrf.mxu1 }
0x2af9   :  { %v10009_v49 = vadd.f32 %v16185_v37, %v9961_v58  ;;  %v16160_v32 = vadd.f32 %v16159_v57, %v16158_v36  ;;  %v16188_v46 = vadd.f32 %v16187_v10, %v16186_v0 }
0x2afa   :  { %v16161_v26 = vpop.f32.mrf.mxu0  ;;  %v16189_v45 = vpop.f32.mrf.mxu1 }
0x2afb   :  { %v9964_v4 = vadd.f32 %v16160_v32, %v14956_v62 }
0x2afc   :  { %v16162_v35 = vpop.f32.mrf.mxu0  ;;  %v16190_v20 = vpop.f32.mrf.mxu1 }
0x2afd   :  { %v10012_v55 = vadd.f32 %v16188_v46, %v9964_v4  ;;  %v16163_v31 = vadd.f32 %v16162_v35, %v16161_v26  ;;  %v16191_v3 = vadd.f32 %v16190_v20, %v16189_v45 }
0x2afe   :  { %v16164_v25 = vpop.f32.mrf.mxu0  ;;  %v16192_v43 = vpop.f32.mrf.mxu1 }
0x2aff   :  { %v9969_v11 = vadd.f32 %v16163_v31, %v14956_v62 }
0x2b00   :  { %v16165_v18 = vpop.f32.mrf.mxu0  ;;  %v16193_v27 = vpop.f32.mrf.mxu1 }
0x2b01   :  { %v10017_v22 = vadd.f32 %v16191_v3, %v9969_v11 }
0x2b12   :  { %v16211_v23 = vpop.f32.mrf.mxu0  ;;  %v16239_v42 = vpop.f32.mrf.mxu1 }
0x2b14   :  { %v16212_v63 = vpop.f32.mrf.mxu0  ;;  %v16240_v61 = vpop.f32.mrf.mxu1 }
0x2b15   :  { %v16213_v26 = vadd.f32 %v16212_v63, %v16211_v23  ;;  %v16241_v46 = vadd.f32 %v16240_v61, %v16239_v42 }
0x2b16   :  { %v16214_v16 = vpop.f32.mrf.mxu0  ;;  %v16242_v19 = vpop.f32.mrf.mxu1 }
0x2b17   :  { %v10057_v45 = vadd.f32 %v16213_v26, %v10009_v49 }
0x2b18   :  { %v16215_v14 = vpop.f32.mrf.mxu0  ;;  %v16243_v38 = vpop.f32.mrf.mxu1 }
0x2b19   :  { %v16216_v4 = vadd.f32 %v16215_v14, %v16214_v16  ;;  %v10105_v20 = vadd.f32 %v16241_v46, %v10057_v45  ;;  %v16244_v25 = vadd.f32 %v16243_v38, %v16242_v19 }
0x2b1a   :  { %v16217_v17 = vpop.f32.mrf.mxu0  ;;  %v16245_v24 = vpop.f32.mrf.mxu1 }
0x2b1b   :  { %v10060_v31 = vadd.f32 %v16216_v4, %v10012_v55 }
0x2b1c   :  { %v16218_v6 = vpop.f32.mrf.mxu0  ;;  %v16246_v44 = vpop.f32.mrf.mxu1 }
0x2b1d   :  { %v16219_v3 = vadd.f32 %v16218_v6, %v16217_v17 }
0x2b1e   :  { %v16220_v34 = vpop.f32.mrf.mxu0  ;;  %v16248_v53 = vpop.f32.mrf.mxu1 }
0x2b1f   :  { %v10108_v34 = vadd.f32 %v16244_v25, %v10060_v31  ;;  %v10065_v53 = vadd.f32 %v16219_v3, %v10017_v22 }
0x2b20   :  { %v16221_v60 = vpop.f32.mrf.mxu0  ;;  %v16249_v40 = vpop.f32.mrf.mxu1 }
0x2b21   :  { %v16247_v40 = vadd.f32 %v16246_v44, %v16245_v24 }
0x2b23   :  { %v10113_v16 = vadd.f32 %v16247_v40, %v10065_v53 }
0x2b33   :  { %v16267_v28 = vpop.f32.mrf.mxu0  ;;  %v16295_v56 = vpop.f32.mrf.mxu1 }
0x2b35   :  { %v16268_v52 = vpop.f32.mrf.mxu0  ;;  %v16296_v47 = vpop.f32.mrf.mxu1 }
0x2b36   :  { %v16269_v35 = vadd.f32 %v16268_v52, %v16267_v28  ;;  %v16297_v60 = vadd.f32 %v16296_v47, %v16295_v56 }
0x2b37   :  { %v16270_v2 = vpop.f32.mrf.mxu0  ;;  %v16298_v62 = vpop.f32.mrf.mxu1 }
0x2b38   :  { %v10153_v43 = vadd.f32 %v16269_v35, %v10105_v20 }
0x2b39   :  { %v16271_v5 = vpop.f32.mrf.mxu0  ;;  %v16299_v9 = vpop.f32.mrf.mxu1 }
0x2b3a   :  { %v16272_v11 = vadd.f32 %v16271_v5, %v16270_v2  ;;  %v16300_v55 = vadd.f32 %v16299_v9, %v16298_v62 }
0x2b3b   :  { %v16273_v54 = vpop.f32.mrf.mxu0  ;;  %v16301_v37 = vpop.f32.mrf.mxu1 }
0x2b3c   :  { %v10156_v23 = vadd.f32 %v16272_v11, %v10108_v34 }
0x2b3d   :  { %v16274_v36 = vpop.f32.mrf.mxu0  ;;  %v16302_v0 = vpop.f32.mrf.mxu1 }
0x2b3e   :  { %v16275_v49 = vadd.f32 %v16274_v36, %v16273_v54  ;;  %v10204_v6 = vadd.f32 %v16300_v55, %v10156_v23  ;;  %v16303_v44 = vadd.f32 %v16302_v0, %v16301_v37 }
0x2b3f   :  { %v16276_v58 = vpop.f32.mrf.mxu0  ;;  %v16304_v57 = vpop.f32.mrf.mxu1 }
0x2b40   :  { %v10161_v28 = vadd.f32 %v16275_v49, %v10113_v16 }
0x2b41   :  { %v16277_v10 = vpop.f32.mrf.mxu0  ;;  %v16305_v32 = vpop.f32.mrf.mxu1 }
0x2b42   :  { %v10201_v10 = vadd.f32 %v16297_v60, %v10153_v43  ;;  %v10209_v32 = vadd.f32 %v16303_v44, %v10161_v28 }
0x2b54   :  { %v16323_v18 = vpop.f32.mrf.mxu0  ;;  %v16351_v27 = vpop.f32.mrf.mxu1 }
0x2b56   :  { %v16324_v58 = vpop.f32.mrf.mxu0  ;;  %v16352_v57 = vpop.f32.mrf.mxu1 }
0x2b57   :  { %v16325_v63 = vadd.f32 %v16324_v58, %v16323_v18  ;;  %v16353_v19 = vadd.f32 %v16352_v57, %v16351_v27 }
0x2b58   :  { %v16326_v42 = vpop.f32.mrf.mxu0  ;;  %v16354_v61 = vpop.f32.mrf.mxu1 }
0x2b59   :  { %v10249_v14 = vadd.f32 %v16325_v63, %v10201_v10  ;;  %v17598_v63 = vld [vmem:[%s22042_s10 + $0x18] sm:$0xff]  }
0x2b5a   :  { %v16327_v38 = vpop.f32.mrf.mxu0  ;;  %v16355_v17 = vpop.f32.mrf.mxu1  ;;  %17012 = vmatprep.subr.bf16.mxu0 %v17598_v63 }
0x2b5b   :  { %v10297_v52 = vadd.f32 %v16353_v19, %v10249_v14  ;;  %v16328_v22 = vadd.f32 %v16327_v38, %v16326_v42  ;;  %v16356_v2 = vadd.f32 %v16355_v17, %v16354_v61  ;;  %v17599_v42 = vld [vmem:[%s22042_s10 + $0x10] sm:$0xff]   ;;  %17013 = vmatpush3.bf16.msra.mxu0 %v17598_v63 }
0x2b5c   :  { %v16329_v56 = vpop.f32.mrf.mxu0  ;;  %v16357_v24 = vpop.f32.mrf.mxu1  ;;  %17014 = vmatprep.subr.bf16.mxu0 %v17599_v42 }
0x2b5d   :  { %v10252_v47 = vadd.f32 %v16328_v22, %v10204_v6  ;;  %v10310_v5 = vadd.f32 %v10297_v52, %v20270_v33 }
0x2b5e   :  { %v16330_v54 = vpop.f32.mrf.mxu0  ;;  %v16358_v36 = vpop.f32.mrf.mxu1 }
0x2b5f   :  { %v10300_v26 = vadd.f32 %v16356_v2, %v10252_v47  ;;  %v16331_v62 = vadd.f32 %v16330_v54, %v16329_v56  ;;  %v10315_v9 = vsel %vm184_vm2, %v10310_v5, 0.0  ;;  %v16359_v35 = vadd.f32 %v16358_v36, %v16357_v24  ;;  %17015 = vmatpush3.bf16.msra.mxu0 %v17599_v42  ;;  %v15085_v56 = vld [vmem:[%s22052_s20] ss:$0 sm:$0xff] }
0x2b60   :  { %v16332_v45 = vpop.f32.mrf.mxu0  ;;  %v16360_v4 = vpop.f32.mrf.mxu1  ;;  %10316 = vadd.xlane.f32.xlu0 %v10315_v9  ;;  %17035 = vmatprep.subr.mxu0 %v18033_v1  ;;  %v15086_v2 = vld [vmem:[%s22053_s21] ss:$0 sm:$0xff] }
0x2b61   :  { %v10257_v46 = vadd.f32 %v16331_v62, %v10209_v32  ;;  %v10311_v20 = vadd.f32 %v10300_v26, %v20272_v29 }
0x2b62   :  { %v16333_v31 = vpop.f32.mrf.mxu0  ;;  %v16361_v37 = vpop.f32.mrf.mxu1 }
0x2b63   :  { %v10305_v0 = vadd.f32 %v16359_v35, %v10257_v46  ;;  %v10318_v3 = vsel %vm184_vm2, %v10311_v20, 0.0  ;;  %v15092_v46 = vld [vmem:[%s22043_s11 + $0x1] ss:$0 sm:$0xff] }
0x2b64   :  { %10319 = vadd.xlane.f32.xlu1 %v10318_v3 }
0x2b65   :  { %v10312_v33 = vadd.f32 %v10305_v0, %v20306_v7 }
0x2b67   :  { %v10321_v25 = vsel %vm184_vm2, %v10312_v33, 0.0 }
0x2b68   :  { %10322 = vadd.xlane.f32.xlu0 %v10321_v25 }
0x2be9   :  { %v10317_v43 = vpop.xlane.xlu0 %10316 }
0x2bea   :  { %v10324_v11 = vmul.f32 0.03125, %v10317_v43 }
0x2bec   :  { %v10327_v18 = vsub.f32 %v10310_v5, %v10324_v11 }
0x2bed   :  { %v10320_v27 = vpop.xlane.xlu1 %10319 }
0x2bee   :  { %v10325_v34 = vmul.f32 0.03125, %v10320_v27  ;;  %v10330_v53 = vmul.f32 %v10327_v18, %v10327_v18 }
0x2bf0   :  { %v10328_v60 = vsub.f32 %v10311_v20, %v10325_v34  ;;  %v10333_v29 = vsel %vm184_vm2, %v10330_v53, 0.0 }
0x2bf1   :  { %10334 = vadd.xlane.f32.xlu1 %v10333_v29  ;;  %v10323_v40 = vpop.xlane.xlu0 %10322 }
0x2bf2   :  { %v10326_v58 = vmul.f32 0.03125, %v10323_v40  ;;  %v10331_v57 = vmul.f32 %v10328_v60, %v10328_v60 }
0x2bf4   :  { %v10329_v10 = vsub.f32 %v10312_v33, %v10326_v58  ;;  %v10336_v23 = vsel %vm184_vm2, %v10331_v57, 0.0 }
0x2bf5   :  { %10337 = vadd.xlane.f32.xlu0 %v10336_v23  ;;  %v21036_v23 = vld [vmem:[%s22122_s0] sm:$0xff] }
0x2bf6   :  { %v10332_v7 = vmul.f32 %v10329_v10, %v10329_v10 }
0x2bf8   :  { %v10339_v49 = vsel %vm184_vm2, %v10332_v7, 0.0 }
0x2bf9   :  { %10340 = vadd.xlane.f32.xlu1 %v10339_v49 }
0x2c7a   :  { %v10335_v61 = vpop.xlane.xlu1 %10334 }
0x2c7b   :  { %v10342_v16 = vmul.f32 0.03125, %v10335_v61  ;;  %v21043_v61 = vld [vmem:[%s22122_s0 + $0x8] sm:$0xff] }
0x2c7d   :  { %v10345_v55 = vadd.f32 1e-05, %v10342_v16 }
0x2c7e   :  { %v10338_v14 = vpop.xlane.xlu0 %10337 }
0x2c7f   :  { %17862 = vrsqrt.f32 %v10345_v55  ;;  %v10343_v19 = vmul.f32 0.03125, %v10338_v14 }
0x2c81   :  { %v10346_v38 = vadd.f32 1e-05, %v10343_v19 }
0x2c82   :  { %v10341_v17 = vpop.xlane.xlu1 %10340 }
0x2c83   :  { %17864 = vrsqrt.f32 %v10346_v38  ;;  %v10344_v6 = vmul.f32 0.03125, %v10341_v17  ;;  %v21050_v38 = vld [vmem:[%s22122_s0 + $0x10] sm:$0xff] }
0x2c85   :  { %v10347_v28 = vadd.f32 1e-05, %v10344_v6 }
0x2c87   :  { %17866 = vrsqrt.f32 %v10347_v28 }
0x2c8c   :  { %v17863_v52 = vpop.eup %17862 }
0x2c8d   :  { %v10351_v22 = vmul.f32 %v17863_v52, %v10327_v18 }
0x2c8f   :  { %v10360_v47 = vmul.f32 %v15085_v56, %v10351_v22 }
0x2c90   :  { %v17865_v24 = vpop.eup %17864 }
0x2c91   :  { %v10352_v44 = vmul.f32 %v17865_v24, %v10328_v60  ;;  %v20953_v32 = vadd.f32 %v15086_v2, %v10360_v47 }
0x2c93   :  { %v10361_v5 = vmul.f32 %v15085_v56, %v10352_v44 }
0x2c94   :  { %v17867_v54 = vpop.eup %17866 }
0x2c95   :  { %v10353_v36 = vmul.f32 %v17867_v54, %v10329_v10  ;;  %v20955_v26 = vadd.f32 %v15086_v2, %v10361_v5 }
0x2c97   :  { %v10362_v62 = vmul.f32 %v15085_v56, %v10353_v36  ;;  %v10372_v9 = vpack.c.bf16 %v20955_v26, %v20953_v32 }
0x2c99   :  { %v20959_v45 = vadd.f32 %v15086_v2, %v10362_v62  ;;  %17016 = vmatprep.mubr.msk.bf16.mxu0 %vm184_vm2, %v10372_v9 }
0x2c9b   :  { %v10373_v4 = vpack.c.bf16 %v20959_v45, %v20959_v45 }
0x2c9d   :  { %17017 = vmatmul.mubr.msk.bf16.vlgmr.msra.gmra.mxu0 %vm184_vm2, %v10373_v4 }
0x2c9e   :  { %17041 = vmatprep.mubr.msk.f32.mxu0 %vm18034_vm0, %v18033_v1 }
0x2d5d   :  { %v17018_v35 = vpop.f32.mrf.mxu0 }
0x2d5e   :  { %v20970_v20 = vadd.f32 %v17018_v35, %v15092_v46 }
0x2d5f   :  { %v10437_v31 = vpop.f32.mrf.mxu0 }
0x2d60   :  { %10465 = vrot.lane.b32.xlu0 %v20970_v20, %s22121_s25  ;;  %v20978_v33 = vadd.f32 %v15092_v46, %v10437_v31  ;;  %v20999_v11 = vmul.f32 0.35355338, %v20970_v20 }
0x2d61   :  { %v17019_v37 = vpop.f32.mrf.mxu0 }
0x2d62   :  { %v20994_v43 = vmul.f32 0.35355338, %v20978_v33 }
0x2d63   :  { %v10440_v0 = vpop.f32.mrf.mxu0 }
0x2d64   :  { %v20974_v3 = vadd.f32 %v15092_v46, %v10440_v0  ;;  %10705 = vrot.lane.b32.xlu0 %v20970_v20, %s22124_s3 }
0x2d66   :  { %10463 = vrot.lane.b32.xlu1 %v20974_v3, %s22121_s25  ;;  %v20987_v25 = vmul.f32 0.35355338, %v20974_v3 }
0x2d68   :  { %10701 = vrot.lane.b32.xlu0 %v20978_v33, %s22124_s3 }
0x2d6a   :  { %10461 = vrot.lane.b32.xlu1 %v20978_v33, %s22121_s25 }
0x2d6c   :  { %10697 = vrot.lane.b32.xlu0 %v20987_v25, %s22125_s24 }
0x2d6e   :  { %10703 = vrot.lane.b32.xlu1 %v20974_v3, %s22124_s3 }
0x2d72   :  { %10695 = vrot.lane.b32.xlu1 %v20994_v43, %s22125_s24 }
0x2d76   :  { %10699 = vrot.lane.b32.xlu1 %v20999_v11, %s22125_s24 }
0x2dd2   :  { %v10466_v18 = vpop.permute.xlu0 %10465 }
0x2dd3   :  { %17021 = vmatpush3.xpose.msk.msra.mxu1 %vm241_vm3, %v10466_v18 }
0x2dd4   :  { %17022 = vmatprep.subr.mxu1 %v18033_v1 }
0x2dd6   :  { %v10706_v53 = vpop.permute.xlu0 %10705 }
0x2dd8   :  { %v10464_v27 = vpop.permute.xlu1 %10463 }
0x2dd9   :  { %17023 = vmatpush3.xpose.msk.msra.mxu1 %vm241_vm3, %v10464_v27 }
0x2dda   :  { %17024 = vmatprep.subr.mxu1 %v18033_v1  ;;  %v10702_v29 = vpop.permute.xlu0 %10701 }
0x2ddc   :  { %v10462_v34 = vpop.permute.xlu1 %10461 }
0x2ddd   :  { %17025 = vmatpush3.xpose.msk.msra.mxu1 %vm241_vm3, %v10462_v34 }
0x2dde   :  { %17050 = vmatprep.subr.mxu1 %v18033_v1  ;;  %v10698_v58 = vpop.permute.xlu0 %10697 }
0x2de0   :  { %17027 = vmatmul.mubr.msk.f32.vlgmr.msra.gmra.mxu1 %vm241_vm3, %v20994_v43  ;;  %v10704_v60 = vpop.permute.xlu1 %10703 }
0x2de1   :  { %17051 = vmatpush3.xpose.msk.msra.mxu1 %vm241_vm3, %v10706_v53  ;;  %17029 = vmatprep.mubr.msk.f32.mxu1 %vm18034_vm0, %v18033_v1 }
0x2de2   :  { %17052 = vmatprep.subr.mxu1 %v18033_v1 }
0x2de4   :  { %17030 = vmatmul.mubr.msk.f32.gmra.mxu1 %vm241_vm3, %v20987_v25  ;;  %v10696_v40 = vpop.permute.xlu1 %10695 }
0x2de5   :  { %17053 = vmatpush3.xpose.msk.msra.mxu1 %vm241_vm3, %v10704_v60  ;;  %17032 = vmatprep.mubr.msk.f32.mxu1 %vm18034_vm0, %v18033_v1 }
0x2de6   :  { %17054 = vmatprep.subr.mxu1 %v18033_v1 }
0x2de8   :  { %17033 = vmatmul.mubr.msk.f32.gmra.mxu1 %vm241_vm3, %v20999_v11  ;;  %v10700_v57 = vpop.permute.xlu1 %10699 }
0x2de9   :  { %17055 = vmatpush3.xpose.msk.msra.mxu1 %vm241_vm3, %v10702_v29  ;;  %17056 = vmatprep.mubr.msk.f32.mxu1 %vm18034_vm0, %v18033_v1 }
0x2dec   :  { %17057 = vmatmul.mubr.msk.f32.vlgmr.msra.gmra.mxu1 %vm241_vm3, %v10696_v40 }
0x2ded   :  { %17059 = vmatprep.mubr.msk.f32.mxu1 %vm18034_vm0, %v18033_v1 }
0x2df0   :  { %17060 = vmatmul.mubr.msk.f32.gmra.mxu1 %vm241_vm3, %v10698_v58 }
0x2df1   :  { %17062 = vmatprep.mubr.msk.f32.mxu1 %vm18034_vm0, %v18033_v1 }
0x2df4   :  { %17063 = vmatmul.mubr.msk.f32.gmra.mxu1 %vm241_vm3, %v10700_v57 }
0x2ea0   :  { %v10548_v10 = vpop.f32.mrf.mxu1 }
0x2ea1   :  { %v10549_v7 = vadd.f32 %v21036_v23, %v10548_v10 }
0x2ea2   :  { %v17028_v49 = vpop.f32.mrf.mxu1 }
0x2ea3   :  { %v10562_v63 = vsel %vm6972_vm7, %v10549_v7, -inf }
0x2ea4   :  { %10563 = vmax.xlane.f32.xlu0 %v10562_v63  ;;  %v10553_v42 = vpop.f32.mrf.mxu1 }
0x2ea5   :  { %v10554_v16 = vadd.f32 %v21043_v61, %v10553_v42 }
0x2ea6   :  { %v17031_v55 = vpop.f32.mrf.mxu1 }
0x2ea7   :  { %v10565_v14 = vsel %vm6972_vm7, %v10554_v16, -inf }
0x2ea8   :  { %10566 = vmax.xlane.f32.xlu1 %v10565_v14  ;;  %v10558_v19 = vpop.f32.mrf.mxu1 }
0x2ea9   :  { %v10559_v17 = vadd.f32 %v21050_v38, %v10558_v19 }
0x2eaa   :  { %v17034_v6 = vpop.f32.mrf.mxu1 }
0x2eab   :  { %v10568_v28 = vsel %vm6972_vm7, %v10559_v17, -inf }
0x2eac   :  { %10569 = vmax.xlane.f32.xlu0 %v10568_v28  ;;  %v10785_v52 = vpop.f32.mrf.mxu1 }
0x2ead   :  { %v10786_v22 = vadd.f32 %v21036_v23, %v10785_v52 }
0x2eae   :  { %v17058_v56 = vpop.f32.mrf.mxu1 }
0x2eaf   :  { %v10799_v24 = vsel %vm6972_vm7, %v10786_v22, -inf }
0x2eb0   :  { %10800 = vmax.xlane.f32.xlu0 %v10799_v24  ;;  %v10790_v44 = vpop.f32.mrf.mxu1 }
0x2eb1   :  { %v10791_v47 = vadd.f32 %v21043_v61, %v10790_v44 }
0x2eb2   :  { %v17061_v2 = vpop.f32.mrf.mxu1 }
0x2eb3   :  { %v10802_v5 = vsel %vm6972_vm7, %v10791_v47, -inf }
0x2eb4   :  { %10803 = vmax.xlane.f32.xlu1 %v10802_v5  ;;  %v10795_v54 = vpop.f32.mrf.mxu1 }
0x2eb5   :  { %v10796_v36 = vadd.f32 %v21050_v38, %v10795_v54 }
0x2eb6   :  { %v17064_v62 = vpop.f32.mrf.mxu1 }
0x2eb7   :  { %v10805_v9 = vsel %vm6972_vm7, %v10796_v36, -inf }
0x2eb8   :  { %10806 = vmax.xlane.f32.xlu0 %v10805_v9 }
0x2ec5   :  { %10599 = vrot.lane.b32.xlu1 %v20970_v20, %s22123_s4 }
0x2ec9   :  { %10595 = vrot.lane.b32.xlu1 %v20978_v33, %s22123_s4 }
0x2ecd   :  { %10836 = vrot.lane.b32.xlu1 %v20970_v20, %s22110_s28 }
0x2ece   :  { %10597 = vrot.lane.b32.xlu0 %v20974_v3, %s22123_s4 }
0x2f2d   :  { %v10564_v4 = vpop.xlane.xlu0 %10563 }
0x2f2e   :  { %v10571_v46 = vsub.f32 %v10549_v7, %v10564_v4 }
0x2f30   :  { %v10574_v35 = vmul.f32 1.442695, %v10571_v46 }
0x2f31   :  { %v10567_v31 = vpop.xlane.xlu1 %10566 }
0x2f32   :  { %17868 = vpow2.f32 %v10574_v35  ;;  %v10572_v37 = vsub.f32 %v10554_v16, %v10567_v31 }
0x2f34   :  { %v10576_v0 = vmul.f32 1.442695, %v10572_v37 }
0x2f35   :  { %v10570_v18 = vpop.xlane.xlu0 %10569 }
0x2f36   :  { %17870 = vpow2.f32 %v10576_v0  ;;  %v10573_v27 = vsub.f32 %v10559_v17, %v10570_v18 }
0x2f38   :  { %v10578_v34 = vmul.f32 1.442695, %v10573_v27 }
0x2f39   :  { %v10801_v53 = vpop.xlane.xlu0 %10800 }
0x2f3a   :  { %17872 = vpow2.f32 %v10578_v34  ;;  %v10808_v60 = vsub.f32 %v10786_v22, %v10801_v53 }
0x2f3c   :  { %v10811_v29 = vmul.f32 1.442695, %v10808_v60 }
0x2f3d   :  { %v10804_v40 = vpop.xlane.xlu1 %10803 }
0x2f3e   :  { %17874 = vpow2.f32 %v10811_v29  ;;  %v10809_v58 = vsub.f32 %v10791_v47, %v10804_v40 }
0x2f3f   :  { %v17869_v57 = vpop.eup %17868 }
0x2f40   :  { %v10813_v10 = vmul.f32 1.442695, %v10809_v58  ;;  %v10580_v7 = vsel %vm6972_vm7, %v17869_v57, 0.0 }
0x2f41   :  { %10581 = vadd.xlane.f32.xlu1 %v10580_v7  ;;  %v10600_v49 = vpop.permute.xlu1 %10599  ;;  %v10807_v63 = vpop.xlane.xlu0 %10806 }
0x2f42   :  { %17876 = vpow2.f32 %v10813_v10  ;;  %v10810_v42 = vsub.f32 %v10796_v36, %v10807_v63  ;;  %17036 = vmatpush3.msra.mxu0 %v10600_v49  ;;  %v15097_v10 = vld [vmem:[%s22044_s12 + $0x10] sm:$0xf]  ;;  %v15098_v49 = vld [vmem:[%s22044_s12 + $0x14] sm:$0xf] }
0x2f43   :  { %v17871_v16 = vpop.eup %17870  ;;  %17037 = vmatprep.subr.mxu0 %v18033_v1  ;;  %v10996_v7 = vsel %vm642_vm5, %v15097_v10, 0  ;;  %17177 = vmatprep.subr.msk.bf16.mxu1 %vm642_vm5, %v15098_v49  ;;  %v10939_v63 = vsel %vm642_vm5, %v15098_v49, 0 }
0x2f44   :  { %v10815_v55 = vmul.f32 1.442695, %v10810_v42  ;;  %v10583_v14 = vsel %vm6972_vm7, %v17871_v16, 0.0  ;;  %17081 = vmatpush3.bf16.msra.mxu1 %v10939_v63 }
0x2f45   :  { %10584 = vadd.xlane.f32.xlu0 %v10583_v14  ;;  %v10598_v19 = vpop.permute.xlu0 %10597  ;;  %v10596_v6 = vpop.permute.xlu1 %10595  ;;  %17092 = vmatprep.subr.mxu1 %v18033_v1 }
0x2f46   :  { %17878 = vpow2.f32 %v10815_v55  ;;  %17038 = vmatpush3.msra.mxu0 %v10598_v19 }
0x2f47   :  { %v17873_v17 = vpop.eup %17872  ;;  %17039 = vmatprep.subr.mxu0 %v18033_v1 }
0x2f48   :  { %17040 = vmatpush3.msra.mxu0 %v10596_v6  ;;  %v10586_v28 = vsel %vm6972_vm7, %v17873_v17, 0.0 }
0x2f49   :  { %10587 = vadd.xlane.f32.xlu1 %v10586_v28  ;;  %17065 = vmatprep.subr.mxu0 %v18033_v1  ;;  %v10837_v2 = vpop.permute.xlu1 %10836 }
0x2f4b   :  { %v17875_v52 = vpop.eup %17874 }
0x2f4c   :  { %v10817_v22 = vsel %vm6972_vm7, %v17875_v52, 0.0 }
0x2f4d   :  { %10818 = vadd.xlane.f32.xlu0 %v10817_v22 }
0x2f4f   :  { %v17877_v56 = vpop.eup %17876 }
0x2f50   :  { %v10820_v24 = vsel %vm6972_vm7, %v17877_v56, 0.0 }
0x2f51   :  { %10821 = vadd.xlane.f32.xlu1 %v10820_v24 }
0x2f53   :  { %v17879_v44 = vpop.eup %17878 }
0x2f54   :  { %v10823_v47 = vsel %vm6972_vm7, %v17879_v44, 0.0 }
0x2f55   :  { %10824 = vadd.xlane.f32.xlu0 %v10823_v47 }
0x2f62   :  { %10832 = vrot.lane.b32.xlu1 %v20978_v33, %s22110_s28 }
0x2f66   :  { %11054 = vrot.lane.b32.xlu1 %v20974_v3, %s22111_s30 }
0x2f6a   :  { %11046 = vrot.lane.b32.xlu1 %v20994_v43, %s22112_s7 }
0x2f6b   :  { %10834 = vrot.lane.b32.xlu0 %v20974_v3, %s22110_s28 }
0x2f6e   :  { %11050 = vrot.lane.b32.xlu1 %v20999_v11, %s22112_s7 }
0x2f6f   :  { %11056 = vrot.lane.b32.xlu0 %v20970_v20, %s22111_s30 }
0x2f73   :  { %11052 = vrot.lane.b32.xlu0 %v20978_v33, %s22111_s30 }
0x2f77   :  { %11048 = vrot.lane.b32.xlu0 %v20987_v25, %s22112_s7 }
0x2fca   :  { %v10582_v5 = vpop.xlane.xlu1 %10581 }
0x2fcb   :  { %17880 = vrcp.f32 %v10582_v5 }
0x2fce   :  { %v10585_v54 = vpop.xlane.xlu0 %10584 }
0x2fcf   :  { %17882 = vrcp.f32 %v10585_v54 }
0x2fd2   :  { %v10588_v36 = vpop.xlane.xlu1 %10587 }
0x2fd3   :  { %17884 = vrcp.f32 %v10588_v36 }
0x2fd6   :  { %v10819_v62 = vpop.xlane.xlu0 %10818 }
0x2fd7   :  { %17886 = vrcp.f32 %v10819_v62 }
0x2fd8   :  { %v17881_v9 = vpop.eup %17880 }
0x2fd9   :  { %v10592_v4 = vmul.f32 %v17881_v9, %v17869_v57 }
0x2fda   :  { %v10822_v46 = vpop.xlane.xlu1 %10821 }
0x2fdb   :  { %17888 = vrcp.f32 %v10822_v46  ;;  %17042 = vmatmul.mubr.msk.f32.vlgmr.msra.gmra.mxu0 %vm6972_vm7, %v10592_v4 }
0x2fdc   :  { %v17883_v35 = vpop.eup %17882  ;;  %17066 = vmatpush3.msra.mxu0 %v10837_v2  ;;  %17044 = vmatprep.mubr.msk.f32.mxu0 %vm18034_vm0, %v18033_v1 }
0x2fdd   :  { %v10593_v31 = vmul.f32 %v17883_v35, %v17871_v16  ;;  %17067 = vmatprep.subr.mxu0 %v18033_v1 }
0x2fde   :  { %v10825_v37 = vpop.xlane.xlu0 %10824  ;;  %v10833_v60 = vpop.permute.xlu1 %10832 }
0x2fdf   :  { %17890 = vrcp.f32 %v10825_v37  ;;  %17045 = vmatmul.mubr.msk.f32.gmra.mxu0 %vm6972_vm7, %v10593_v31 }
0x2fe0   :  { %v17885_v0 = vpop.eup %17884  ;;  %17047 = vmatprep.mubr.msk.f32.mxu0 %vm18034_vm0, %v18033_v1 }
0x2fe1   :  { %v10594_v18 = vmul.f32 %v17885_v0, %v17873_v17 }
0x2fe2   :  { %v10835_v27 = vpop.permute.xlu0 %10834  ;;  %v11055_v36 = vpop.permute.xlu1 %11054 }
0x2fe3   :  { %17048 = vmatmul.mubr.msk.f32.gmra.mxu0 %vm6972_vm7, %v10594_v18 }
0x2fe4   :  { %v17887_v34 = vpop.eup %17886  ;;  %17068 = vmatpush3.msra.mxu0 %v10835_v27  ;;  %17071 = vmatprep.mubr.msk.f32.mxu0 %vm18034_vm0, %v18033_v1 }
0x2fe5   :  { %v10829_v53 = vmul.f32 %v17887_v34, %v17875_v52  ;;  %17069 = vmatprep.subr.mxu0 %v18033_v1 }
0x2fe6   :  { %17070 = vmatpush3.msra.mxu0 %v10833_v60  ;;  %v11057_v54 = vpop.permute.xlu0 %11056  ;;  %v11047_v9 = vpop.permute.xlu1 %11046 }
0x2fe7   :  { %17072 = vmatmul.mubr.msk.f32.vlgmr.msra.gmra.mxu0 %vm6972_vm7, %v10829_v53  ;;  %17178 = vmatprep.subr.msk.bf16.mxu0 %vm642_vm5, %v15097_v10 }
0x2fe8   :  { %v17889_v29 = vpop.eup %17888  ;;  %17074 = vmatprep.mubr.msk.f32.mxu0 %vm18034_vm0, %v18033_v1  ;;  %17087 = vmatpush3.bf16.msra.mxu0 %v10996_v7 }
0x2fe9   :  { %v10830_v40 = vmul.f32 %v17889_v29, %v17877_v56  ;;  %17107 = vmatprep.subr.mxu0 %v18033_v1 }
0x2fea   :  { %v11053_v62 = vpop.permute.xlu0 %11052  ;;  %v11051_v46 = vpop.permute.xlu1 %11050 }
0x2feb   :  { %17075 = vmatmul.mubr.msk.f32.gmra.mxu0 %vm6972_vm7, %v10830_v40 }
0x2fec   :  { %v17891_v58 = vpop.eup %17890  ;;  %17077 = vmatprep.mubr.msk.f32.mxu0 %vm18034_vm0, %v18033_v1 }
0x2fed   :  { %v10831_v57 = vmul.f32 %v17891_v58, %v17879_v44 }
0x2fee   :  { %v11049_v4 = vpop.permute.xlu0 %11048 }
0x2fef   :  { %17078 = vmatmul.mubr.msk.f32.gmra.mxu0 %vm6972_vm7, %v10831_v57 }
0x309b   :  { %v10679_v42 = vpop.f32.mrf.mxu0 }
0x309d   :  { %v17043_v16 = vpop.f32.mrf.mxu0 }
0x309f   :  { %v10684_v55 = vpop.f32.mrf.mxu0 }
0x30a0   :  { %v10693_v14 = vpack.c.bf16 %v10684_v55, %v10679_v42 }
0x30a1   :  { %v17046_v19 = vpop.f32.mrf.mxu0 }
0x30a2   :  { %17088 = vmatprep.mubr.msk.bf16.mxu0 %vm241_vm3, %v10693_v14 }
0x30a3   :  { %v10689_v17 = vpop.f32.mrf.mxu0 }
0x30a4   :  { %v10694_v6 = vpack.c.bf16 %v10689_v17, %v10689_v17 }
0x30a5   :  { %v17049_v28 = vpop.f32.mrf.mxu0 }
0x30a6   :  { %17089 = vmatmul.mubr.msk.bf16.vlgmr.msra.gmra.mxu0 %vm241_vm3, %v10694_v6 }
0x30a7   :  { %v10916_v52 = vpop.f32.mrf.mxu0  ;;  %17113 = vmatprep.mubr.msk.f32.mxu0 %vm18034_vm0, %v18033_v1 }
0x30a9   :  { %v17073_v22 = vpop.f32.mrf.mxu0 }
0x30ab   :  { %v10921_v56 = vpop.f32.mrf.mxu0 }
0x30ac   :  { %v10930_v24 = vpack.c.bf16 %v10921_v56, %v10916_v52 }
0x30ad   :  { %v17076_v44 = vpop.f32.mrf.mxu0 }
0x30ae   :  { %17082 = vmatprep.mubr.msk.bf16.mxu1 %vm241_vm3, %v10930_v24 }
0x30af   :  { %v10926_v47 = vpop.f32.mrf.mxu0 }
0x30b0   :  { %v10931_v2 = vpack.c.bf16 %v10926_v47, %v10926_v47 }
0x30b1   :  { %v17079_v5 = vpop.f32.mrf.mxu0 }
0x30b2   :  { %17083 = vmatmul.mubr.msk.bf16.vlgmr.msra.gmra.mxu1 %vm241_vm3, %v10931_v2 }
0x30b3   :  { %17093 = vmatpush3.xpose.msk.msra.mxu1 %vm241_vm3, %v11057_v54  ;;  %17098 = vmatprep.mubr.msk.f32.mxu1 %vm18034_vm0, %v18033_v1 }
0x30b4   :  { %17094 = vmatprep.subr.mxu1 %v18033_v1 }
0x30b7   :  { %17095 = vmatpush3.xpose.msk.msra.mxu1 %vm241_vm3, %v11055_v36 }
0x30b8   :  { %17096 = vmatprep.subr.mxu1 %v18033_v1 }
0x30bb   :  { %17097 = vmatpush3.xpose.msk.msra.mxu1 %vm241_vm3, %v11053_v62 }
0x30be   :  { %17099 = vmatmul.mubr.msk.f32.vlgmr.msra.gmra.mxu1 %vm241_vm3, %v11047_v9 }
0x30bf   :  { %17101 = vmatprep.mubr.msk.f32.mxu1 %vm18034_vm0, %v18033_v1 }
0x30c2   :  { %17102 = vmatmul.mubr.msk.f32.gmra.mxu1 %vm241_vm3, %v11049_v4 }
0x30c3   :  { %17104 = vmatprep.mubr.msk.f32.mxu1 %vm18034_vm0, %v18033_v1 }
0x30c6   :  { %17105 = vmatmul.mubr.msk.f32.gmra.mxu1 %vm241_vm3, %v11051_v46 }
0x3166   :  { %v17090_v35 = vpop.f32.mrf.mxu0 }
0x3168   :  { %v11032_v31 = vpop.f32.mrf.mxu0 }
0x316a   :  { %v17091_v37 = vpop.f32.mrf.mxu0 }
0x3172   :  { %v17084_v0 = vpop.f32.mrf.mxu1 }
0x3173   :  { %v21143_v18 = vadd.f32 %v17090_v35, %v17084_v0 }
0x3174   :  { %v10975_v27 = vpop.f32.mrf.mxu1 }
0x3175   :  { %v21145_v34 = vadd.f32 %v11032_v31, %v10975_v27 }
0x3176   :  { %v17085_v53 = vpop.f32.mrf.mxu1 }
0x3178   :  { %v21147_v60 = vpop.f32.mrf.mxu1 }
0x317e   :  { %v11136_v29 = vpop.f32.mrf.mxu1 }
0x317f   :  { %v11137_v40 = vadd.f32 %v21036_v23, %v11136_v29 }
0x3180   :  { %v17100_v58 = vpop.f32.mrf.mxu1 }
0x3181   :  { %v11150_v57 = vsel %vm6972_vm7, %v11137_v40, -inf }
0x3182   :  { %11151 = vmax.xlane.f32.xlu0 %v11150_v57  ;;  %v11141_v10 = vpop.f32.mrf.mxu1 }
0x3183   :  { %v11142_v7 = vadd.f32 %v21043_v61, %v11141_v10 }
0x3184   :  { %v17103_v49 = vpop.f32.mrf.mxu1 }
0x3185   :  { %v11153_v63 = vsel %vm6972_vm7, %v11142_v7, -inf  ;;  %v15099_v49 = vld [vmem:[%s22044_s12 + $0x18] sm:$0xf] }
0x3186   :  { %11154 = vmax.xlane.f32.xlu1 %v11153_v63  ;;  %v11146_v42 = vpop.f32.mrf.mxu1  ;;  %17179 = vmatprep.subr.msk.bf16.mxu1 %vm642_vm5, %v15099_v49  ;;  %v11290_v63 = vsel %vm642_vm5, %v15099_v49, 0 }
0x3187   :  { %v11147_v16 = vadd.f32 %v21050_v38, %v11146_v42  ;;  %17123 = vmatpush3.bf16.msra.mxu1 %v11290_v63  ;;  %v21206_v42 = vpop.f32.mrf.mxu0 }
0x3188   :  { %v17106_v55 = vpop.f32.mrf.mxu1  ;;  %17143 = vmatprep.subr.mxu1 %v18033_v1 }
0x3189   :  { %v11156_v14 = vsel %vm6972_vm7, %v11147_v16, -inf }
0x318a   :  { %11157 = vmax.xlane.f32.xlu0 %v11156_v14 }
0x3197   :  { %11187 = vrot.lane.b32.xlu1 %v20970_v20, %s22113_s9 }
0x319b   :  { %11183 = vrot.lane.b32.xlu1 %v20978_v33, %s22113_s9 }
0x319f   :  { %11353 = vrot.lane.b32.xlu1 %v20970_v20, %s22114_s5 }
0x31a0   :  { %11185 = vrot.lane.b32.xlu0 %v20974_v3, %s22113_s9 }
0x320b   :  { %v11152_v19 = vpop.xlane.xlu0 %11151 }
0x320c   :  { %v11159_v17 = vsub.f32 %v11137_v40, %v11152_v19 }
0x320e   :  { %v11162_v6 = vmul.f32 1.442695, %v11159_v17 }
0x320f   :  { %v11155_v28 = vpop.xlane.xlu1 %11154 }
0x3210   :  { %17892 = vpow2.f32 %v11162_v6  ;;  %v11160_v52 = vsub.f32 %v11142_v7, %v11155_v28 }
0x3212   :  { %v11164_v22 = vmul.f32 1.442695, %v11160_v52 }
0x3213   :  { %v11188_v56 = vpop.permute.xlu1 %11187  ;;  %v11158_v24 = vpop.xlane.xlu0 %11157 }
0x3214   :  { %17894 = vpow2.f32 %v11164_v22  ;;  %v11161_v44 = vsub.f32 %v11147_v16, %v11158_v24  ;;  %17108 = vmatpush3.msra.mxu0 %v11188_v56 }
0x3215   :  { %17109 = vmatprep.subr.mxu0 %v18033_v1 }
0x3216   :  { %v11166_v47 = vmul.f32 1.442695, %v11161_v44 }
0x3217   :  { %v11186_v2 = vpop.permute.xlu0 %11185  ;;  %v11184_v5 = vpop.permute.xlu1 %11183 }
0x3218   :  { %17896 = vpow2.f32 %v11166_v47  ;;  %17110 = vmatpush3.msra.mxu0 %v11186_v2 }
0x3219   :  { %17111 = vmatprep.subr.mxu0 %v18033_v1 }
0x321a   :  { %17112 = vmatpush3.msra.mxu0 %v11184_v5 }
0x321b   :  { %17128 = vmatprep.subr.mxu0 %v18033_v1  ;;  %v11354_v35 = vpop.permute.xlu1 %11353 }
0x321d   :  { %v17893_v54 = vpop.eup %17892 }
0x321e   :  { %v11168_v36 = vsel %vm6972_vm7, %v17893_v54, 0.0 }
0x321f   :  { %11169 = vadd.xlane.f32.xlu0 %v11168_v36 }
0x3221   :  { %v17895_v62 = vpop.eup %17894 }
0x3222   :  { %v11171_v9 = vsel %vm6972_vm7, %v17895_v62, 0.0 }
0x3223   :  { %11172 = vadd.xlane.f32.xlu1 %v11171_v9 }
0x3225   :  { %v17897_v4 = vpop.eup %17896 }
0x3226   :  { %v11174_v46 = vsel %vm6972_vm7, %v17897_v4, 0.0 }
0x3227   :  { %11175 = vadd.xlane.f32.xlu0 %v11174_v46 }
0x3234   :  { %11349 = vrot.lane.b32.xlu1 %v20978_v33, %s22114_s5 }
0x3238   :  { %11345 = vrot.lane.b32.xlu1 %v20987_v25, %s22115_s6 }
0x323d   :  { %11351 = vrot.lane.b32.xlu0 %v20974_v3, %s22114_s5  ;;  %s22129_s5 = sld [smem:[#allocation15_spill]] }
0x3241   :  { %11343 = vrot.lane.b32.xlu0 %v20994_v43, %s22115_s6 }
0x3245   :  { %11347 = vrot.lane.b32.xlu0 %v20999_v11, %s22115_s6 }
0x32a8   :  { %v11170_v31 = vpop.xlane.xlu0 %11169 }
0x32a9   :  { %17898 = vrcp.f32 %v11170_v31 }
0x32ac   :  { %v11173_v37 = vpop.xlane.xlu1 %11172 }
0x32ad   :  { %17900 = vrcp.f32 %v11173_v37 }
0x32b0   :  { %v11176_v0 = vpop.xlane.xlu0 %11175  ;;  %v11350_v58 = vpop.permute.xlu1 %11349 }
0x32b1   :  { %17902 = vrcp.f32 %v11176_v0 }
0x32b4   :  { %v11352_v11 = vpop.permute.xlu0 %11351  ;;  %v11346_v10 = vpop.permute.xlu1 %11345 }
0x32b6   :  { %v17899_v27 = vpop.eup %17898 }
0x32b7   :  { %v11180_v53 = vmul.f32 %v17899_v27, %v17893_v54 }
0x32b8   :  { %v11344_v57 = vpop.permute.xlu0 %11343 }
0x32b9   :  { %17114 = vmatmul.mubr.msk.f32.vlgmr.msra.gmra.mxu0 %vm6972_vm7, %v11180_v53 }
0x32ba   :  { %v17901_v25 = vpop.eup %17900  ;;  %17129 = vmatpush3.xpose.msk.msra.mxu0 %vm241_vm3, %v11354_v35  ;;  %17116 = vmatprep.mubr.msk.f32.mxu0 %vm18034_vm0, %v18033_v1 }
0x32bb   :  { %17130 = vmatprep.subr.mxu0 %v18033_v1  ;;  %v11181_v43 = vmul.f32 %v17901_v25, %v17895_v62 }
0x32bc   :  { %v11348_v7 = vpop.permute.xlu0 %11347 }
0x32bd   :  { %17117 = vmatmul.mubr.msk.f32.gmra.mxu0 %vm6972_vm7, %v11181_v43 }
0x32be   :  { %v17903_v29 = vpop.eup %17902  ;;  %17131 = vmatpush3.xpose.msk.msra.mxu0 %vm241_vm3, %v11352_v11  ;;  %17119 = vmatprep.mubr.msk.f32.mxu0 %vm18034_vm0, %v18033_v1 }
0x32bf   :  { %17132 = vmatprep.subr.mxu0 %v18033_v1  ;;  %v11182_v40 = vmul.f32 %v17903_v29, %v17897_v4 }
0x32c1   :  { %17120 = vmatmul.mubr.msk.f32.gmra.mxu0 %vm6972_vm7, %v11182_v40 }
0x32c2   :  { %17133 = vmatpush3.xpose.msk.msra.mxu0 %vm241_vm3, %v11350_v58  ;;  %17134 = vmatprep.mubr.msk.f32.mxu0 %vm18034_vm0, %v18033_v1 }
0x32c5   :  { %17135 = vmatmul.mubr.msk.f32.vlgmr.msra.gmra.mxu0 %vm241_vm3, %v11344_v57 }
0x32c6   :  { %17137 = vmatprep.mubr.msk.f32.mxu0 %vm18034_vm0, %v18033_v1 }
0x32c9   :  { %17138 = vmatmul.mubr.msk.f32.gmra.mxu0 %vm241_vm3, %v11346_v10 }
0x32ca   :  { %17140 = vmatprep.mubr.msk.f32.mxu0 %vm18034_vm0, %v18033_v1 }
0x32cd   :  { %17141 = vmatmul.mubr.msk.f32.gmra.mxu0 %vm241_vm3, %v11348_v7 }
0x3379   :  { %v11267_v16 = vpop.f32.mrf.mxu0 }
0x337b   :  { %v17115_v55 = vpop.f32.mrf.mxu0 }
0x337d   :  { %v11272_v14 = vpop.f32.mrf.mxu0 }
0x337e   :  { %v11281_v19 = vpack.c.bf16 %v11272_v14, %v11267_v16 }
0x337f   :  { %v17118_v17 = vpop.f32.mrf.mxu0 }
0x3380   :  { %17124 = vmatprep.mubr.msk.bf16.mxu1 %vm241_vm3, %v11281_v19 }
0x3381   :  { %v11277_v6 = vpop.f32.mrf.mxu0 }
0x3382   :  { %v11282_v28 = vpack.c.bf16 %v11277_v6, %v11277_v6 }
0x3383   :  { %v17121_v52 = vpop.f32.mrf.mxu0 }
0x3384   :  { %17125 = vmatmul.mubr.msk.bf16.vlgmr.msra.gmra.mxu1 %vm241_vm3, %v11282_v28  ;;  %v15100_v28 = vld [vmem:[%s22044_s12 + $0x1c] sm:$0xf] }
0x3385   :  { %v11433_v22 = vpop.f32.mrf.mxu0  ;;  %17149 = vmatprep.mubr.msk.f32.mxu1 %vm18034_vm0, %v18033_v1  ;;  %17180 = vmatprep.subr.msk.bf16.mxu0 %vm642_vm5, %v15100_v28  ;;  %v11587_v52 = vsel %vm642_vm5, %v15100_v28, 0 }
0x3386   :  { %v11434_v56 = vadd.f32 %v21036_v23, %v11433_v22  ;;  %17159 = vmatpush3.bf16.msra.mxu0 %v11587_v52 }
0x3387   :  { %v17136_v24 = vpop.f32.mrf.mxu0 }
0x3388   :  { %v11447_v44 = vsel %vm6972_vm7, %v11434_v56, -inf }
0x3389   :  { %11448 = vmax.xlane.f32.xlu1 %v11447_v44  ;;  %v11438_v47 = vpop.f32.mrf.mxu0 }
0x338a   :  { %v11439_v2 = vadd.f32 %v21043_v61, %v11438_v47 }
0x338b   :  { %v17139_v5 = vpop.f32.mrf.mxu0 }
0x338c   :  { %v11450_v54 = vsel %vm6972_vm7, %v11439_v2, -inf }
0x338d   :  { %11451 = vmax.xlane.f32.xlu0 %v11450_v54  ;;  %v11443_v36 = vpop.f32.mrf.mxu0 }
0x338e   :  { %v11444_v62 = vadd.f32 %v21050_v38, %v11443_v36 }
0x338f   :  { %v17142_v9 = vpop.f32.mrf.mxu0 }
0x3390   :  { %v11453_v4 = vsel %vm6972_vm7, %v11444_v62, -inf }
0x3391   :  { %11454 = vmax.xlane.f32.xlu0 %v11453_v4 }
0x3412   :  { %v11449_v46 = vpop.xlane.xlu1 %11448 }
0x3413   :  { %v11456_v23 = vsub.f32 %v11434_v56, %v11449_v46  ;;  %v11036_v46 = vadd.f32 %v21206_v42, %v21147_v60 }
0x3415   :  { %v11459_v35 = vmul.f32 1.442695, %v11456_v23 }
0x3416   :  { %v11452_v31 = vpop.xlane.xlu0 %11451 }
0x3417   :  { %17904 = vpow2.f32 %v11459_v35  ;;  %v11457_v37 = vsub.f32 %v11439_v2, %v11452_v31 }
0x3419   :  { %v11461_v0 = vmul.f32 1.442695, %v11457_v37 }
0x341a   :  { %v11455_v38 = vpop.xlane.xlu0 %11454 }
0x341b   :  { %17906 = vpow2.f32 %v11461_v0  ;;  %v11458_v43 = vsub.f32 %v11444_v62, %v11455_v38 }
0x341d   :  { %v11463_v40 = vmul.f32 1.442695, %v11458_v43 }
0x341f   :  { %17908 = vpow2.f32 %v11463_v40 }
0x3424   :  { %v17905_v61 = vpop.eup %17904 }
0x3425   :  { %v11465_v27 = vsel %vm6972_vm7, %v17905_v61, 0.0 }
0x3426   :  { %11466 = vadd.xlane.f32.xlu1 %v11465_v27  ;;  %v15146_v27 = vld [vmem:[%s22126_s15 + $0x1] ss:$0 sm:$0xff] }
0x3428   :  { %v17907_v53 = vpop.eup %17906 }
0x3429   :  { %v11468_v25 = vsel %vm6972_vm7, %v17907_v53, 0.0 }
0x342a   :  { %11469 = vadd.xlane.f32.xlu0 %v11468_v25 }
0x342c   :  { %v17909_v7 = vpop.eup %17908 }
0x342d   :  { %v11471_v49 = vsel %vm6972_vm7, %v17909_v7, 0.0 }
0x3437   :  { %11482 = vrot.lane.b32.xlu1 %v20974_v3, %s22116_s27 }
0x3440   :  { %11484 = vrot.lane.b32.xlu0 %v20970_v20, %s22116_s27 }
0x3444   :  { %v17126_v11 = vpop.f32.mrf.mxu1 }
0x3445   :  { %v11342_v29 = vadd.f32 %v17126_v11, %v21143_v18 }
0x3446   :  { %v11326_v58 = vpop.f32.mrf.mxu1 }
0x3447   :  { %v11340_v57 = vadd.f32 %v11326_v58, %v21145_v34 }
0x3448   :  { %v17127_v10 = vpop.f32.mrf.mxu1 }
0x344a   :  { %v11329_v22 = vpop.f32.mrf.mxu1 }
0x344b   :  { %v11341_v31 = vadd.f32 %v11329_v22, %v11036_v46  ;;  %v15151_v22 = vld [vmem:[%s22048_s16 + $0x100] sm:$0xff]  ;;  %v15178_v46 = vld [vmem:[%s22048_s16 + $0x1d8] sm:$0xff] }
0x345b   :  { %11472 = vadd.xlane.f32.xlu1 %v11471_v49 }
0x346c   :  { %11480 = vrot.lane.b32.xlu1 %v20978_v33, %s22116_s27  ;;  %s18048_s27 = smov [#allocation2]  }
0x346d   :  { %s14072_s12 = sshll.u32 %s18048_s27, 4  ;;  %s14073_s12 = int_to_ptr.vmem [resolvable:$true] %s14072_s12 }
0x34af   :  { %v11467_v3 = vpop.xlane.xlu1 %11466 }
0x34b0   :  { %17910 = vrcp.f32 %v11467_v3 }
0x34b3   :  { %v11470_v63 = vpop.xlane.xlu0 %11469  ;;  %v11483_v16 = vpop.permute.xlu1 %11482 }
0x34b4   :  { %17912 = vrcp.f32 %v11470_v63 }
0x34b7   :  { %v11485_v20 = vpop.permute.xlu0 %11484 }
0x34b8   :  { %17144 = vmatpush3.msra.mxu1 %v11485_v20 }
0x34b9   :  { %17145 = vmatprep.subr.mxu1 %v18033_v1 }
0x34ba   :  { %17146 = vmatpush3.msra.mxu1 %v11483_v16 }
0x34bb   :  { %17147 = vmatprep.subr.mxu1 %v18033_v1 }
0x34bd   :  { %v17911_v34 = vpop.eup %17910 }
0x34be   :  { %v11477_v55 = vmul.f32 %v17911_v34, %v17905_v61 }
0x34c1   :  { %v17913_v19 = vpop.eup %17912 }
0x34c2   :  { %v11478_v33 = vmul.f32 %v17913_v19, %v17907_v53  ;;  %v15168_v19 = vld [vmem:[%s22048_s16 + $0x188] sm:$0xff] }
0x34e4   :  { %v11473_v18 = vpop.xlane.xlu1 %11472 }
0x34e5   :  { %17914 = vrcp.f32 %v11473_v18 }
0x34e8   :  { %v11481_v14 = vpop.permute.xlu1 %11480 }
0x34e9   :  { %17148 = vmatpush3.msra.mxu1 %v11481_v14  ;;  %v15175_v14 = vld [vmem:[%s22048_s16 + $0x1c0] sm:$0xff] }
0x34ea   :  { %17150 = vmatmul.mubr.msk.f32.vlgmr.msra.gmra.mxu1 %vm6972_vm7, %v11477_v55  ;;  %v15167_v55 = vld [vmem:[%s22048_s16 + $0x180] sm:$0xff] }
0x34eb   :  { %17152 = vmatprep.mubr.msk.f32.mxu1 %vm18034_vm0, %v18033_v1 }
0x34ee   :  { %17153 = vmatmul.mubr.msk.f32.gmra.mxu1 %vm6972_vm7, %v11478_v33  ;;  %v15202_v33 = vcombine.high %v15167_v55, %v15175_v14 }
0x34ef   :  { %17155 = vmatprep.mubr.msk.f32.mxu1 %vm18034_vm0, %v18033_v1 }
0x34f0   :  { %12008 = vmatprep.subr.bf16.mxu1 %v15202_v33  ;;  %v15179_v33 = vld [vmem:[%s22048_s16 + $0x1e0] sm:$0xff] }
0x34f2   :  { %v17915_v17 = vpop.eup %17914 }
0x34f3   :  { %v11479_v6 = vmul.f32 %v17915_v17, %v17909_v7  ;;  %v15176_v17 = vld [vmem:[%s22048_s16 + $0x1c8] sm:$0xff] }
0x34f4   :  { %v15203_v28 = vcombine.low %v15168_v19, %v15176_v17  ;;  %v15204_v52 = vcombine.high %v15168_v19, %v15176_v17  ;;  %v15171_v19 = vld [vmem:[%s22048_s16 + $0x1a0] sm:$0xff]  ;;  %v15172_v17 = vld [vmem:[%s22048_s16 + $0x1a8] sm:$0xff] }
0x34f5   :  { %17156 = vmatmul.mubr.msk.f32.gmra.mxu1 %vm6972_vm7, %v11479_v6  ;;  %v15201_v6 = vcombine.low %v15167_v55, %v15175_v14 }
0x34f6   :  { %12028 = vmatprep.mubr.bf16.mxu1 %v18046_v41  ;;  %12059 = vmatprep.subr.bf16.mxu0 %v15204_v52 }
0x34f7   :  { %12009 = vmatpush1.bf16.msra.mxu1 %v15201_v6  ;;  %v15180_v6 = vld [vmem:[%s22048_s16 + $0x1e8] sm:$0xff] }
0x35aa   :  { %v11564_v56 = vpop.f32.mrf.mxu1 }
0x35ac   :  { %v17151_v24 = vpop.f32.mrf.mxu1 }
0x35ad   :  { %v15152_v24 = vld [vmem:[%s22048_s16 + $0x108] sm:$0xff] }
0x35ae   :  { %v11569_v44 = vpop.f32.mrf.mxu1 }
0x35af   :  { %v11578_v47 = vpack.c.bf16 %v11569_v44, %v11564_v56  ;;  %v15159_v56 = vld [vmem:[%s22048_s16 + $0x140] sm:$0xff] }
0x35b0   :  { %v17154_v2 = vpop.f32.mrf.mxu1  ;;  %v15186_v44 = vcombine.high %v15151_v22, %v15159_v56 }
0x35b1   :  { %17160 = vmatprep.mubr.msk.bf16.mxu0 %vm241_vm3, %v11578_v47  ;;  %v15160_v47 = vld [vmem:[%s22048_s16 + $0x148] sm:$0xff]  ;;  %v15185_v2 = vcombine.low %v15151_v22, %v15159_v56  ;;  %v15210_v56 = vcombine.high %v15171_v19, %v15179_v33 }
0x35b2   :  { %12010 = vmatprep.subr.bf16.mxu1 %v15186_v44 }
0x35b3   :  { %12011 = vmatpush1.bf16.msra.mxu1 %v15185_v2  ;;  %v15163_v2 = vld [vmem:[%s22048_s16 + $0x160] sm:$0xff] }
0x35b5   :  { %v11574_v5 = vpop.f32.mrf.mxu1 }
0x35b6   :  { %v11579_v54 = vpack.c.bf16 %v11574_v5, %v11574_v5  ;;  %v15187_v5 = vcombine.low %v15152_v24, %v15160_v47 }
0x35b7   :  { %v17157_v36 = vpop.f32.mrf.mxu1 }
0x35b8   :  { %17161 = vmatmul.mubr.msk.bf16.vlgmr.msra.gmra.mxu0 %vm241_vm3, %v11579_v54  ;;  %v15188_v54 = vcombine.high %v15152_v24, %v15160_v47  ;;  %v15169_v36 = vld [vmem:[%s22048_s16 + $0x190] sm:$0xff]  ;;  %v15212_v24 = vcombine.high %v15172_v17, %v15180_v6  ;;  %v15155_v47 = vld [vmem:[%s22048_s16 + $0x120] sm:$0xff] }
0x35b9   :  { %12079 = vmatprep.mubr.bf16.mxu0 %v18046_v41  ;;  %12060 = vmatpush1.bf16.msra.mxu0 %v15203_v28 }
0x35ba   :  { %12061 = vmatprep.subr.bf16.mxu0 %v15188_v54  ;;  %v15164_v54 = vld [vmem:[%s22048_s16 + $0x168] sm:$0xff] }
0x35bd   :  { %12062 = vmatpush1.bf16.msra.mxu0 %v15187_v5  ;;  %v15156_v5 = vld [vmem:[%s22048_s16 + $0x128] sm:$0xff] }
0x3678   :  { %v17162_v62 = vpop.f32.mrf.mxu0 }
0x3679   :  { %v11639_v9 = vadd.f32 %v17162_v62, %v11342_v29  ;;  %v15177_v62 = vld [vmem:[%s22048_s16 + $0x1d0] sm:$0xff] }
0x367a   :  { %v11623_v4 = vpop.f32.mrf.mxu0 }
0x367b   :  { %v11637_v23 = vadd.f32 %v11623_v4, %v11340_v57  ;;  %v11642_v37 = vadd.f32 %v11639_v9, %v20959_v45  ;;  %v15170_v9 = vld [vmem:[%s22048_s16 + $0x198] sm:$0xff]  ;;  %v15206_v4 = vcombine.high %v15169_v36, %v15177_v62 }
0x367c   :  { %v17163_v35 = vpop.f32.mrf.mxu0 }
0x367d   :  { %v11640_v0 = vadd.f32 %v11637_v23, %v20953_v32  ;;  %v11652_v11 = vadd.f32 %v15146_v27, %v11642_v37  ;;  %v15205_v23 = vcombine.low %v15169_v36, %v15177_v62  ;;  %v15207_v35 = vcombine.low %v15170_v9, %v15178_v46  ;;  %12110 = vmatprep.subr.bf16.mxu1 %v15206_v4 }
0x367e   :  { %v11626_v61 = vpop.f32.mrf.mxu0  ;;  %v15209_v36 = vcombine.low %v15171_v19, %v15179_v33  ;;  %v15211_v62 = vcombine.low %v15172_v17, %v15180_v6  ;;  %v15196_v4 = vcombine.high %v15156_v5, %v15164_v54  ;;  %v17614_v19 = vld [vmem:[%s22050_s18 + $0x420] sm:$0xff]   ;;  %v17616_v17 = vld [vmem:[%s22050_s18 + $0x458] sm:$0xff]  }
0x367f   :  { %v11638_v53 = vadd.f32 %v11626_v61, %v11341_v31  ;;  %v11650_v25 = vadd.f32 %v15146_v27, %v11640_v0  ;;  %v11661_v42 = vsel %vm184_vm2, %v11652_v11, 0.0  ;;  %v15208_v31 = vcombine.high %v15170_v9, %v15178_v46  ;;  %v15173_v46 = vld [vmem:[%s22048_s16 + $0x1b0] sm:$0xff]  ;;  %v17615_v33 = vld [vmem:[%s22050_s18 + $0x4a0] sm:$0xff]   ;;  %v17617_v6 = vld [vmem:[%s22050_s18 + $0x4d8] sm:$0xff]  }
0x3680   :  { %v15194_v9 = vcombine.high %v15155_v47, %v15163_v2 }
0x3681   :  { %v11641_v38 = vadd.f32 %v11638_v53, %v20955_v26  ;;  %v11655_v43 = vsel %vm184_vm2, %v11650_v25, 0.0  ;;  %12161 = vmatprep.subr.bf16.mxu0 %v15208_v31  ;;  %v15182_v31 = vld [vmem:[%s22048_s16 + $0x1f8] sm:$0xff] }
0x3682   :  { %11656 = vadd.xlane.f32.xlu0 %v11655_v43 }
0x3683   :  { %v11651_v60 = vadd.f32 %v15146_v27, %v11641_v38 }
0x3685   :  { %v11658_v45 = vsel %vm184_vm2, %v11651_v60, 0.0 }
0x3686   :  { %11662 = vadd.xlane.f32.xlu0 %v11661_v42  ;;  %11659 = vadd.xlane.f32.xlu1 %v11658_v45  ;;  %v15149_v45 = vld [vmem:[%s22127_s1 + $0x1] ss:$0 sm:$0xff] }
0x370b   :  { %v11657_v32 = vpop.xlane.xlu0 %11656 }
0x370c   :  { %v11664_v29 = vmul.f32 0.03125, %v11657_v32 }
0x370e   :  { %v21258_v40 = vsub.f32 %v11650_v25, %v11664_v29 }
0x370f   :  { %v11663_v58 = vpop.xlane.xlu0 %11662  ;;  %v11660_v57 = vpop.xlane.xlu1 %11659 }
0x3710   :  { %v11666_v10 = vmul.f32 0.03125, %v11663_v58  ;;  %v11665_v7 = vmul.f32 0.03125, %v11660_v57  ;;  %v11670_v26 = vmul.f32 %v21258_v40, %v21258_v40 }
0x3712   :  { %v21262_v49 = vsub.f32 %v11652_v11, %v11666_v10  ;;  %v11668_v3 = vsub.f32 %v11651_v60, %v11665_v7  ;;  %v11673_v63 = vsel %vm184_vm2, %v11670_v26, 0.0  ;;  %v15150_v10 = vld [vmem:[%s22128_s26 + $0x1] ss:$0 sm:$0xff] }
0x3713   :  { %11674 = vadd.xlane.f32.xlu0 %v11673_v63  ;;  %v15153_v63 = vld [vmem:[%s22048_s16 + $0x110] sm:$0xff] }
0x3714   :  { %v11672_v20 = vmul.f32 %v21262_v49, %v21262_v49  ;;  %v11671_v16 = vmul.f32 %v11668_v3, %v11668_v3 }
0x3716   :  { %v11679_v18 = vsel %vm184_vm2, %v11672_v20, 0.0  ;;  %v11676_v34 = vsel %vm184_vm2, %v11671_v16, 0.0  ;;  %v15161_v16 = vld [vmem:[%s22048_s16 + $0x150] sm:$0xff] }
0x3717   :  { %11680 = vadd.xlane.f32.xlu0 %v11679_v18  ;;  %11677 = vadd.xlane.f32.xlu1 %v11676_v34  ;;  %v15190_v55 = vcombine.high %v15153_v63, %v15161_v16  ;;  %v15189_v52 = vcombine.low %v15153_v63, %v15161_v16  ;;  %v17605_v63 = vld [vmem:[%s22050_s18 + $0x4f0] sm:$0xff]  }
0x3718   :  { %v17606_v16 = vld [vmem:[%s22050_s18 + $0x430] sm:$0xff]  }
0x379c   :  { %v11675_v37 = vpop.xlane.xlu0 %11674 }
0x379d   :  { %v11682_v0 = vmul.f32 0.03125, %v11675_v37  ;;  %v15193_v37 = vcombine.low %v15155_v47, %v15163_v2  ;;  %v17623_v47 = vld [vmem:[%s22050_s18 + $0x490] sm:$0xff]   ;;  %v17624_v2 = vld [vmem:[%s22050_s18 + $0x448] sm:$0xff]  }
0x379f   :  { %v11685_v61 = vadd.f32 1e-05, %v11682_v0  ;;  %v15195_v0 = vcombine.low %v15156_v5, %v15164_v54  ;;  %v17625_v5 = vld [vmem:[%s22050_s18 + $0x4c8] sm:$0xff]  }
0x37a0   :  { %v11681_v27 = vpop.xlane.xlu0 %11680  ;;  %v11678_v53 = vpop.xlane.xlu1 %11677  ;;  %v17626_v54 = vld [vmem:[%s22050_s18 + $0x408] sm:$0xff]  }
0x37a1   :  { %17916 = vrsqrt.f32 %v11685_v61  ;;  %v11684_v25 = vmul.f32 0.03125, %v11681_v27  ;;  %v11683_v38 = vmul.f32 0.03125, %v11678_v53  ;;  %v15157_v53 = vld [vmem:[%s22048_s16 + $0x130] sm:$0xff] }
0x37a3   :  { %v11687_v43 = vadd.f32 1e-05, %v11684_v25  ;;  %v11686_v11 = vadd.f32 1e-05, %v11683_v38  ;;  %v15165_v25 = vld [vmem:[%s22048_s16 + $0x170] sm:$0xff]  ;;  %v15158_v38 = vld [vmem:[%s22048_s16 + $0x138] sm:$0xff] }
0x37a5   :  { %17918 = vrsqrt.f32 %v11687_v43  ;;  %v15166_v43 = vld [vmem:[%s22048_s16 + $0x178] sm:$0xff] }
0x37a6   :  { %17920 = vrsqrt.f32 %v11686_v11 }
0x37ae   :  { %v17917_v60 = vpop.eup %17916 }
0x37af   :  { %v11691_v42 = vmul.f32 %v17917_v60, %v21258_v40 }
0x37b1   :  { %v11700_v58 = vmul.f32 %v15149_v45, %v11691_v42  ;;  %v15198_v42 = vcombine.high %v15157_v53, %v15165_v25 }
0x37b2   :  { %v17919_v32 = vpop.eup %17918 }
0x37b3   :  { %v17921_v29 = vpop.eup %17920  ;;  %v11693_v7 = vmul.f32 %v17919_v32, %v21262_v49  ;;  %v21316_v40 = vadd.f32 %v15150_v10, %v11700_v58  ;;  %v15162_v49 = vld [vmem:[%s22048_s16 + $0x158] sm:$0xff]  ;;  %v15197_v32 = vcombine.low %v15157_v53, %v15165_v25 }
0x37b4   :  { %v11692_v57 = vmul.f32 %v17921_v29, %v11668_v3  ;;  %v15154_v3 = vld [vmem:[%s22048_s16 + $0x118] sm:$0xff]  ;;  %v15199_v29 = vcombine.low %v15158_v38, %v15166_v43 }
0x37b5   :  { %v11702_v18 = vmul.f32 %v15149_v45, %v11693_v7  ;;  %v15192_v14 = vcombine.high %v15154_v3, %v15162_v49  ;;  %v15191_v22 = vcombine.low %v15154_v3, %v15162_v49  ;;  %v17600_v58 = vld [vmem:[%s22050_s18 + $0x478] sm:$0xff]   ;;  %v17607_v3 = vld [vmem:[%s22050_s18 + $0x4b0] sm:$0xff]   ;;  %v17608_v49 = vld [vmem:[%s22050_s18 + $0x468] sm:$0xff]  }
0x37b6   :  { %v11701_v26 = vmul.f32 %v15149_v45, %v11692_v57  ;;  %v15200_v45 = vcombine.high %v15158_v38, %v15166_v43  ;;  %v17601_v57 = vld [vmem:[%s22050_s18 + $0x4f8] sm:$0xff]  }
0x37b7   :  { %v21351_v28 = vadd.f32 %v15150_v10, %v11702_v18  ;;  %v17603_v7 = vld [vmem:[%s22050_s18 + $0x4b8] sm:$0xff]   ;;  %v17610_v18 = vld [vmem:[%s22050_s18 + $0x428] sm:$0xff]  }
0x37b8   :  { %v21318_v20 = vadd.f32 %v15150_v10, %v11701_v26  ;;  %v17602_v10 = vld [vmem:[%s22050_s18 + $0x438] sm:$0xff]   ;;  %v17604_v26 = vld [vmem:[%s22050_s18 + $0x470] sm:$0xff]  }
0x37b9   :  { %v21355_v44 = vpack.c.bf16 %v21351_v28, %v21351_v28 }
0x37ba   :  { %v21331_v34 = vpack.c.bf16 %v21318_v20, %v21316_v40 }
0x37bc   :  { %15217 = vmatmul.mubr.msk.bf16.vlgmr.msra.gmra.mxu1 %vm184_vm2, %v21331_v34  ;;  %15219 = vmatmul.mubr.msk.bf16.vlgmr.msra.gmra.mxu0 %vm184_vm2, %v21331_v34 }
0x37bd   :  { %12038 = vmatprep.mubr.bf16.mxu1 %v18046_v41  ;;  %12089 = vmatprep.mubr.bf16.mxu0 %v18046_v41 }
0x37be   :  { %12111 = vmatpush1.bf16.msra.mxu1 %v15205_v23  ;;  %12162 = vmatpush1.bf16.msra.mxu0 %v15207_v35  ;;  %v15181_v23 = vld [vmem:[%s22048_s16 + $0x1f0] sm:$0xff]  ;;  %v15174_v35 = vld [vmem:[%s22048_s16 + $0x1b8] sm:$0xff]  ;;  %s18047_s16 = smov [#allocation4]  }
0x37bf   :  { %12112 = vmatprep.subr.bf16.mxu1 %v15190_v55  ;;  %12163 = vmatprep.subr.bf16.mxu0 %v15192_v14  ;;  %v15214_v61 = vcombine.high %v15173_v46, %v15181_v23  ;;  %v15216_v27 = vcombine.high %v15174_v35, %v15182_v31  ;;  %v15213_v11 = vcombine.low %v15173_v46, %v15181_v23  ;;  %v17612_v55 = vld [vmem:[%s22050_s18 + $0x460] sm:$0xff]   ;;  %v17632_v23 = vld [vmem:[%s22050_s18 + $0x578] sm:$0xff]   ;;  %s14085_s6 = sshll.u32 %s18047_s16, 4  ;;  %s14086_s6 = int_to_ptr.vmem [resolvable:$true] %s14085_s6 }
0x37c0   :  { %v15215_v60 = vcombine.low %v15174_v35, %v15182_v31  ;;  %v17613_v14 = vld [vmem:[%s22050_s18 + $0x4e0] sm:$0xff]   ;;  %v17633_v35 = vld [vmem:[%s22050_s18 + $0x5f8] sm:$0xff]   ;;  %v21538_v31 = vld [vmem:[%s22049_s17 + $0x10] sm:$0xff]  ;;  %s17947_s4 = scalar_lea.vmem %s14086_s6, 32  ;;  %p17952_p1 = scmp.lt.s32.totalorder %s14086_s6, %s14086_s6 }
0x37c1   :  { %v17631_v46 = vld [vmem:[%s22050_s18 + $0x480] sm:$0xff]   ;;  %v11753_v53 = vrot.slane %v21538_v31, %v18640_v21  ;;  %v11761_v25 = vrot.slane %v21538_v31, %v18643_v15  ;;  %p17948_p0 = scmp.ne.s32.totalorder %s14086_s6, %s17947_s4  ;;  %p17953_p2 = scmp.lt.s32.totalorder %s17947_s4, %s17947_s4 }
0x37c2   :  { %12113 = vmatpush1.bf16.msra.mxu1 %v15189_v52  ;;  %12164 = vmatpush1.bf16.msra.mxu0 %v15191_v22  ;;  %v17618_v52 = vld [vmem:[%s22050_s18 + $0x418] sm:$0xff]  }
0x37c3   :  { %12212 = vmatprep.subr.bf16.mxu1 %v15210_v56  ;;  %12263 = vmatprep.subr.bf16.mxu0 %v15212_v24  ;;  %v17619_v22 = vld [vmem:[%s22050_s18 + $0x498] sm:$0xff]   ;;  %v17620_v56 = vld [vmem:[%s22050_s18 + $0x450] sm:$0xff]   ;;  %p17954_p3 = por %p17953_p2, %p17952_p1 }
0x37c4   :  { %15218 = vmatmul.mubr.msk.bf16.gmra.mxu1 %vm184_vm2, %v21355_v44  ;;  %15220 = vmatmul.mubr.msk.bf16.gmra.mxu0 %vm184_vm2, %v21355_v44  ;;  %v17621_v24 = vld [vmem:[%s22050_s18 + $0x4d0] sm:$0xff]  }
0x37c5   :  { %12130 = vmatprep.mubr.bf16.mxu1 %v18046_v41  ;;  %12181 = vmatprep.mubr.bf16.mxu0 %v18046_v41  ;;  %p17955_p4 = pnand %p17954_p3, %p17948_p0 }
0x37cc   :  { %15221 = vmatmul.mubr.msk.bf16.vlgmr.msra.gmra.mxu1 %vm184_vm2, %v21331_v34  ;;  %15223 = vmatmul.mubr.msk.bf16.vlgmr.msra.gmra.mxu0 %vm184_vm2, %v21331_v34 }
0x37cd   :  { %12140 = vmatprep.mubr.bf16.mxu1 %v18046_v41  ;;  %12191 = vmatprep.mubr.bf16.mxu0 %v18046_v41 }
0x37ce   :  { %12213 = vmatpush1.bf16.msra.mxu1 %v15209_v36  ;;  %12264 = vmatpush1.bf16.msra.mxu0 %v15211_v62  ;;  %v17627_v36 = vld [vmem:[%s22050_s18 + $0x488] sm:$0xff]   ;;  %v17628_v62 = vld [vmem:[%s22050_s18 + $0x440] sm:$0xff]  }
0x37cf   :  { %12214 = vmatprep.subr.bf16.mxu1 %v15194_v9  ;;  %12265 = vmatprep.subr.bf16.mxu0 %v15196_v4  ;;  %v17629_v9 = vld [vmem:[%s22050_s18 + $0x4c0] sm:$0xff]  }
0x37d0   :  { %v17630_v4 = vld [vmem:[%s22050_s18 + $0x400] sm:$0xff]  }
0x37d2   :  { %12215 = vmatpush1.bf16.msra.mxu1 %v15193_v37  ;;  %12266 = vmatpush1.bf16.msra.mxu0 %v15195_v0 }
0x37d3   :  { %12314 = vmatprep.subr.bf16.mxu1 %v15214_v61  ;;  %12365 = vmatprep.subr.bf16.mxu0 %v15216_v27  ;;  %v11757_v61 = vrot.slane %v21538_v31, %v18634_v12  ;;  %v11765_v27 = vrot.slane %v21538_v31, %v18637_v13 }
0x37d4   :  { %15222 = vmatmul.mubr.msk.bf16.gmra.mxu1 %vm184_vm2, %v21355_v44  ;;  %15224 = vmatmul.mubr.msk.bf16.gmra.mxu0 %vm184_vm2, %v21355_v44 }
0x37d5   :  { %12232 = vmatprep.mubr.bf16.mxu1 %v18046_v41  ;;  %12283 = vmatprep.mubr.bf16.mxu0 %v18046_v41 }
0x37dc   :  { %15225 = vmatmul.mubr.msk.bf16.vlgmr.msra.gmra.mxu1 %vm184_vm2, %v21331_v34  ;;  %15227 = vmatmul.mubr.msk.bf16.vlgmr.msra.gmra.mxu0 %vm184_vm2, %v21331_v34 }
0x37dd   :  { %12242 = vmatprep.mubr.bf16.mxu1 %v18046_v41  ;;  %12293 = vmatprep.mubr.bf16.mxu0 %v18046_v41 }
0x37de   :  { %12315 = vmatpush1.bf16.msra.mxu1 %v15213_v11  ;;  %12366 = vmatpush1.bf16.msra.mxu0 %v15215_v60 }
0x37df   :  { %12316 = vmatprep.subr.bf16.mxu1 %v15198_v42  ;;  %12367 = vmatprep.subr.bf16.mxu0 %v15200_v45 }
0x37e2   :  { %12317 = vmatpush1.bf16.msra.mxu1 %v15197_v32  ;;  %12368 = vmatpush1.bf16.msra.mxu0 %v15199_v29 }
0x37e3   :  { %16427 = vmatprep.subr.bf16.mxu1 %v17600_v58  ;;  %16455 = vmatprep.subr.bf16.mxu0 %v17601_v57 }
0x37e4   :  { %15226 = vmatmul.mubr.msk.bf16.gmra.mxu1 %vm184_vm2, %v21355_v44  ;;  %15228 = vmatmul.mubr.msk.bf16.gmra.mxu0 %vm184_vm2, %v21355_v44 }
0x37e5   :  { %12334 = vmatprep.mubr.bf16.mxu1 %v18046_v41  ;;  %12385 = vmatprep.mubr.bf16.mxu0 %v18046_v41 }
0x37ec   :  { %15229 = vmatmul.mubr.msk.bf16.vlgmr.msra.gmra.mxu1 %vm184_vm2, %v21331_v34  ;;  %15231 = vmatmul.mubr.msk.bf16.vlgmr.msra.gmra.mxu0 %vm184_vm2, %v21331_v34  ;;  %v17611_v34 = vld [vmem:[%s22050_s18 + $0x4a8] sm:$0xff]  }
0x37ed   :  { %12344 = vmatprep.mubr.bf16.mxu1 %v18046_v41  ;;  %12395 = vmatprep.mubr.bf16.mxu0 %v18046_v41  ;;  %v17609_v41 = vld [vmem:[%s22050_s18 + $0x4e8] sm:$0xff]  }
0x37ee   :  { %16428 = vmatpush3.bf16.msra.mxu1 %v17602_v10  ;;  %16456 = vmatpush3.bf16.msra.mxu0 %v17603_v7 }
0x37ef   :  { %16429 = vmatprep.subr.bf16.mxu1 %v17604_v26  ;;  %16457 = vmatprep.subr.bf16.mxu0 %v17605_v63 }
0x37f2   :  { %16430 = vmatpush3.bf16.msra.mxu1 %v17606_v16  ;;  %16458 = vmatpush3.bf16.msra.mxu0 %v17607_v3 }
0x37f3   :  { %16431 = vmatprep.subr.bf16.mxu1 %v17608_v49  ;;  %16459 = vmatprep.subr.bf16.mxu0 %v17609_v41 }
0x37f4   :  { %15230 = vmatmul.mubr.msk.bf16.gmra.mxu1 %vm184_vm2, %v21355_v44  ;;  %15232 = vmatmul.mubr.msk.bf16.gmra.mxu0 %vm184_vm2, %v21355_v44  ;;  %v17622_v44 = vld [vmem:[%s22050_s18 + $0x410] sm:$0xff]  }
0x37f6   :  { %16432 = vmatpush3.bf16.msra.mxu1 %v17610_v18  ;;  %16460 = vmatpush3.bf16.msra.mxu0 %v17611_v34 }
0x37f7   :  { %16433 = vmatprep.subr.bf16.mxu1 %v17612_v55  ;;  %16461 = vmatprep.subr.bf16.mxu0 %v17613_v14 }
0x37fa   :  { %16434 = vmatpush3.bf16.msra.mxu1 %v17614_v19  ;;  %16462 = vmatpush3.bf16.msra.mxu0 %v17615_v33 }
0x37fb   :  { %16435 = vmatprep.subr.bf16.mxu1 %v17616_v17  ;;  %16463 = vmatprep.subr.bf16.mxu0 %v17617_v6 }
0x37fe   :  { %16436 = vmatpush3.bf16.msra.mxu1 %v17618_v52  ;;  %16464 = vmatpush3.bf16.msra.mxu0 %v17619_v22 }
0x37ff   :  { %16437 = vmatprep.subr.bf16.mxu1 %v17620_v56  ;;  %16465 = vmatprep.subr.bf16.mxu0 %v17621_v24 }
0x3802   :  { %16438 = vmatpush3.bf16.msra.mxu1 %v17622_v44  ;;  %16466 = vmatpush3.bf16.msra.mxu0 %v17623_v47  ;;  %v17634_v44 = vld [vmem:[%s22050_s18 + $0x538] sm:$0xff]  }
0x3803   :  { %16439 = vmatprep.subr.bf16.mxu1 %v17624_v2  ;;  %16467 = vmatprep.subr.bf16.mxu0 %v17625_v5  ;;  %v17635_v47 = vld [vmem:[%s22050_s18 + $0x5b8] sm:$0xff]  }
0x3806   :  { %16440 = vmatpush3.bf16.msra.mxu1 %v17626_v54  ;;  %16468 = vmatpush3.bf16.msra.mxu0 %v17627_v36 }
0x3807   :  { %16441 = vmatprep.subr.bf16.mxu1 %v17628_v62  ;;  %16469 = vmatprep.subr.bf16.mxu0 %v17629_v9 }
0x380a   :  { %16442 = vmatpush3.bf16.msra.mxu1 %v17630_v4  ;;  %16470 = vmatpush3.bf16.msra.mxu0 %v17631_v46  ;;  %v17636_v4 = vld [vmem:[%s22050_s18 + $0x570] sm:$0xff]  }
0x380b   :  { %16483 = vmatprep.subr.bf16.mxu1 %v17632_v23  ;;  %16511 = vmatprep.subr.bf16.mxu0 %v17633_v35  ;;  %v17637_v46 = vld [vmem:[%s22050_s18 + $0x5f0] sm:$0xff]  }
0x387c   :  { %v12030_v37 = vpop.f32.mrf.mxu1  ;;  %v12081_v0 = vpop.f32.mrf.mxu0 }
0x387d   :  { %v12031_v58 = vadd.f32 %v12030_v37, %v11753_v53  ;;  %v12082_v57 = vadd.f32 %v12081_v0, %v11761_v25 }
0x387e   :  { %v12032_v38 = vpop.f32.mrf.mxu1  ;;  %v12083_v43 = vpop.f32.mrf.mxu0 }
0x387f   :  { %v12033_v42 = vadd.f32 %v12032_v38, %v11757_v61  ;;  %v12084_v45 = vadd.f32 %v12083_v43, %v11765_v27  ;;  %v12404_v19 = vmax.f32 %v12031_v58, 0.0  ;;  %v12406_v33 = vmax.f32 %v12082_v57, 0.0 }
0x3880   :  { %v12034_v11 = vpop.f32.mrf.mxu1  ;;  %v12085_v60 = vpop.f32.mrf.mxu0 }
0x3881   :  { %v12035_v32 = vadd.f32 %v12034_v11, %v11753_v53  ;;  %v12086_v29 = vadd.f32 %v12085_v60, %v11761_v25  ;;  %v12405_v18 = vmax.f32 %v12033_v42, 0.0  ;;  %v12407_v34 = vmax.f32 %v12084_v45, 0.0  ;;  %v17640_v42 = vld [vmem:[%s22050_s18 + $0x568] sm:$0xff]  }
0x3882   :  { %v12036_v10 = vpop.f32.mrf.mxu1  ;;  %v12087_v7 = vpop.f32.mrf.mxu0  ;;  %v17641_v45 = vld [vmem:[%s22050_s18 + $0x5e8] sm:$0xff]  }
0x3883   :  { %v12037_v26 = vadd.f32 %v12036_v10, %v11757_v61  ;;  %v12088_v63 = vadd.f32 %v12087_v7, %v11765_v27  ;;  %v12420_v16 = vmax.f32 %v12035_v32, 0.0  ;;  %v12422_v3 = vmax.f32 %v12086_v29, 0.0  ;;  %v17642_v10 = vld [vmem:[%s22050_s18 + $0x528] sm:$0xff]  }
0x3884   :  { %v12040_v49 = vpop.f32.mrf.mxu1  ;;  %v12091_v41 = vpop.f32.mrf.mxu0  ;;  %v21578_v32 = vrot.slane %v21538_v31, %v18662_v39  ;;  %v21582_v29 = vrot.slane %v21538_v31, %v18659_v30  ;;  %v17643_v7 = vld [vmem:[%s22050_s18 + $0x5a8] sm:$0xff]  }
0x3885   :  { %v12421_v55 = vmax.f32 %v12037_v26, 0.0  ;;  %v12423_v14 = vmax.f32 %v12088_v63, 0.0  ;;  %v12452_v2 = vpack.c.bf16 %v12420_v16, %v12404_v19  ;;  %v12454_v5 = vpack.c.bf16 %v12422_v3, %v12406_v33 }
0x3886   :  { %v12042_v17 = vpop.f32.mrf.mxu1  ;;  %v12093_v6 = vpop.f32.mrf.mxu0  ;;  %v12041_v54 = vadd.f32 %v12040_v49, %v11753_v53  ;;  %v12092_v36 = vadd.f32 %v12091_v41, %v11761_v25  ;;  %v17638_v53 = vld [vmem:[%s22050_s18 + $0x530] sm:$0xff]   ;;  %v17644_v49 = vld [vmem:[%s22050_s18 + $0x560] sm:$0xff]  }
0x3887   :  { %v12453_v52 = vpack.c.bf16 %v12421_v55, %v12405_v18  ;;  %v12455_v22 = vpack.c.bf16 %v12423_v14, %v12407_v34  ;;  %v12043_v56 = vadd.f32 %v12042_v17, %v11757_v61  ;;  %v12094_v24 = vadd.f32 %v12093_v6, %v11765_v27  ;;  %v17639_v25 = vld [vmem:[%s22050_s18 + $0x5b0] sm:$0xff]   ;;  %v17645_v41 = vld [vmem:[%s22050_s18 + $0x5e0] sm:$0xff]  }
0x3888   :  { %v12044_v62 = vpop.f32.mrf.mxu1  ;;  %v12095_v9 = vpop.f32.mrf.mxu0  ;;  %v12436_v38 = vmax.f32 %v12041_v54, 0.0  ;;  %v12438_v43 = vmax.f32 %v12092_v36, 0.0  ;;  %v17646_v17 = vld [vmem:[%s22050_s18 + $0x520] sm:$0xff]  }
0x3889   :  { %v12437_v23 = vmax.f32 %v12043_v56, 0.0  ;;  %v12439_v35 = vmax.f32 %v12094_v24, 0.0  ;;  %13547 = vmatprep.mubr.bf16.mxu1 %v12453_v52  ;;  %13595 = vmatprep.mubr.bf16.mxu0 %v12455_v22  ;;  %v17647_v22 = vld [vmem:[%s22050_s18 + $0x5a0] sm:$0xff]   ;;  %v17648_v56 = vld [vmem:[%s22050_s18 + $0x558] sm:$0xff]  }
0x388a   :  { %v12045_v37 = vpop.f32.mrf.mxu1  ;;  %v12096_v0 = vpop.f32.mrf.mxu0  ;;  %13548 = vmatmul.mubr.bf16.vlgmr.msra.gmra.mxu1 %v12452_v2  ;;  %13596 = vmatmul.mubr.bf16.vlgmr.msra.gmra.mxu0 %v12454_v5  ;;  %v12468_v26 = vpack.c.bf16 %v12436_v38, %v12436_v38  ;;  %v12470_v63 = vpack.c.bf16 %v12438_v43, %v12438_v43  ;;  %v17649_v5 = vld [vmem:[%s22050_s18 + $0x5d8] sm:$0xff]   ;;  %v17655_v43 = vld [vmem:[%s22050_s18 + $0x590] sm:$0xff]  }
0x388b   :  { %v12469_v61 = vpack.c.bf16 %v12437_v23, %v12437_v23  ;;  %v12471_v27 = vpack.c.bf16 %v12439_v35, %v12439_v35  ;;  %16484 = vmatpush3.bf16.msra.mxu1 %v17634_v44  ;;  %16512 = vmatpush3.bf16.msra.mxu0 %v17635_v47  ;;  %v17651_v35 = vld [vmem:[%s22050_s18 + $0x598] sm:$0xff]   ;;  %v17652_v37 = vld [vmem:[%s22050_s18 + $0x550] sm:$0xff]  }
0x388c   :  { %v21566_v11 = vpop.f32.mrf.mxu1  ;;  %v21568_v60 = vpop.f32.mrf.mxu0  ;;  %16485 = vmatprep.subr.bf16.mxu1 %v17636_v4  ;;  %16513 = vmatprep.subr.bf16.mxu0 %v17637_v46  ;;  %v17650_v4 = vld [vmem:[%s22050_s18 + $0x518] sm:$0xff]   ;;  %v17653_v0 = vld [vmem:[%s22050_s18 + $0x5d0] sm:$0xff]  }
0x388d   :  { %13555 = vmatprep.mubr.bf16.mxu1 %v12469_v61  ;;  %13603 = vmatprep.mubr.bf16.mxu0 %v12471_v27 }
0x388e   :  { %v12134_v58 = vpop.f32.mrf.mxu1  ;;  %v12185_v57 = vpop.f32.mrf.mxu0 }
0x388f   :  { %16486 = vmatpush3.bf16.msra.mxu1 %v17638_v53  ;;  %16514 = vmatpush3.bf16.msra.mxu0 %v17639_v25  ;;  %v12135_v18 = vadd.f32 %v12134_v58, %v21578_v32  ;;  %v12186_v34 = vadd.f32 %v12185_v57, %v21582_v29  ;;  %v17654_v53 = vld [vmem:[%s22050_s18 + $0x510] sm:$0xff]   ;;  %v11769_v58 = vrot.slane %v21538_v31, %v18741_v50 }
0x3890   :  { %v12136_v16 = vpop.f32.mrf.mxu1  ;;  %v21590_v3 = vpop.f32.mrf.mxu0  ;;  %16487 = vmatprep.subr.bf16.mxu1 %v17640_v42  ;;  %16515 = vmatprep.subr.bf16.mxu0 %v17641_v45  ;;  %v17656_v42 = vld [vmem:[%s22050_s18 + $0x548] sm:$0xff]  }
0x3891   :  { %v12409_v24 = vmax.f32 %v12135_v18, 0.0  ;;  %v12411_v44 = vmax.f32 %v12186_v34, 0.0  ;;  %v17657_v45 = vld [vmem:[%s22050_s18 + $0x5c8] sm:$0xff]  }
0x3892   :  { %v12138_v55 = vpop.f32.mrf.mxu1  ;;  %v12189_v14 = vpop.f32.mrf.mxu0  ;;  %13556 = vmatmul.mubr.bf16.gmra.mxu1 %v12468_v26  ;;  %13604 = vmatmul.mubr.bf16.gmra.mxu0 %v12470_v63  ;;  %v17658_v26 = vld [vmem:[%s22050_s18 + $0x508] sm:$0xff]   ;;  %v12137_v63 = vadd.f32 %v12136_v16, %v11769_v58  ;;  %v17661_v16 = vld [vmem:[%s22050_s18 + $0x5c0] sm:$0xff]  }
0x3893   :  { %v12139_v19 = vadd.f32 %v12138_v55, %v21578_v32  ;;  %v12190_v33 = vadd.f32 %v12189_v14, %v21582_v29  ;;  %16488 = vmatpush3.bf16.msra.mxu1 %v17642_v10  ;;  %16516 = vmatpush3.bf16.msra.mxu0 %v17643_v7  ;;  %v11777_v7 = vrot.slane %v21538_v31, %v18744_v51  ;;  %v17659_v18 = vld [vmem:[%s22050_s18 + $0x588] sm:$0xff]   ;;  %v17660_v31 = vld [vmem:[%s22050_s18 + $0x540] sm:$0xff]  }
0x3894   :  { %v21605_v6 = vpop.f32.mrf.mxu1  ;;  %v21607_v52 = vpop.f32.mrf.mxu0  ;;  %16489 = vmatprep.subr.bf16.mxu1 %v17644_v49  ;;  %16517 = vmatprep.subr.bf16.mxu0 %v17645_v41  ;;  %v12133_v14 = vadd.f32 %v21566_v11, %v11769_v58  ;;  %v17663_v11 = vld [vmem:[%s22050_s18 + $0x580] sm:$0xff]  }
0x3895   :  { %v12425_v47 = vmax.f32 %v12139_v19, 0.0  ;;  %v12427_v2 = vmax.f32 %v12190_v33, 0.0  ;;  %v12188_v34 = vadd.f32 %v21590_v3, %v11777_v7  ;;  %v17662_v3 = vld [vmem:[%s22050_s18 + $0x500] sm:$0xff]  }
0x3896   :  { %v12144_v54 = vpop.f32.mrf.mxu1  ;;  %v12195_v36 = vpop.f32.mrf.mxu0 }
0x3897   :  { %v12457_v62 = vpack.c.bf16 %v12425_v47, %v12409_v24  ;;  %v12459_v9 = vpack.c.bf16 %v12427_v2, %v12411_v44  ;;  %16490 = vmatpush3.bf16.msra.mxu1 %v17646_v17  ;;  %16518 = vmatpush3.bf16.msra.mxu0 %v17647_v22  ;;  %v12145_v55 = vadd.f32 %v12144_v54, %v21578_v32  ;;  %v17665_v47 = vld [vmem:[%s22050_s18 + $0x6f8] sm:$0xff]   ;;  %v12408_v2 = vmax.f32 %v12133_v14, 0.0 }
0x3898   :  { %v12146_v46 = vpop.f32.mrf.mxu1  ;;  %v12197_v23 = vpop.f32.mrf.mxu0  ;;  %16491 = vmatprep.subr.bf16.mxu1 %v17648_v56  ;;  %16519 = vmatprep.subr.bf16.mxu0 %v17649_v5  ;;  %v12196_v19 = vadd.f32 %v12195_v36, %v21582_v29  ;;  %v12184_v22 = vadd.f32 %v21568_v60, %v11777_v7  ;;  %v12424_v56 = vmax.f32 %v12137_v63, 0.0  ;;  %v17664_v60 = vld [vmem:[%s22050_s18 + $0x678] sm:$0xff]   ;;  %v12426_v29 = vmax.f32 %v12188_v34, 0.0 }
0x3899   :  { %13643 = vmatprep.mubr.bf16.mxu1 %v12457_v62  ;;  %13691 = vmatprep.mubr.bf16.mxu0 %v12459_v9  ;;  %v12441_v44 = vmax.f32 %v12145_v55, 0.0  ;;  %v21694_v54 = vld [vmem:[%s22049_s17 + $0x18] sm:$0xff]  ;;  %v12143_v23 = vadd.f32 %v21605_v6, %v11769_v58  ;;  %v17668_v6 = vld [vmem:[%s22050_s18 + $0x670] sm:$0xff]  }
0x389a   :  { %v12147_v61 = vpop.f32.mrf.mxu1  ;;  %v12198_v27 = vpop.f32.mrf.mxu0  ;;  %v12443_v5 = vmax.f32 %v12196_v19, 0.0  ;;  %v12410_v9 = vmax.f32 %v12184_v22, 0.0  ;;  %v12456_v46 = vpack.c.bf16 %v12424_v56, %v12408_v2  ;;  %v17670_v55 = vld [vmem:[%s22050_s18 + $0x630] sm:$0xff]   ;;  %v17673_v22 = vld [vmem:[%s22050_s18 + $0x6e8] sm:$0xff]  }
0x389b   :  { %16492 = vmatpush3.bf16.msra.mxu1 %v17650_v4  ;;  %16520 = vmatpush3.bf16.msra.mxu0 %v17651_v35  ;;  %v21702_v4 = vrot.slane %v21694_v54, %v18634_v12  ;;  %v21707_v35 = vrot.slane %v21694_v54, %v18637_v13  ;;  %v17666_v61 = vld [vmem:[%s22050_s18 + $0x638] sm:$0xff]   ;;  %v12194_v12 = vadd.f32 %v21607_v52, %v11777_v7  ;;  %v17669_v52 = vld [vmem:[%s22050_s18 + $0x6f0] sm:$0xff]   ;;  %v12440_v63 = vmax.f32 %v12143_v23, 0.0 }
0x389c   :  { %v21633_v25 = vpop.f32.mrf.mxu1  ;;  %v21635_v38 = vpop.f32.mrf.mxu0  ;;  %16493 = vmatprep.subr.bf16.mxu1 %v17652_v37  ;;  %16521 = vmatprep.subr.bf16.mxu0 %v17653_v0  ;;  %v12458_v27 = vpack.c.bf16 %v12426_v29, %v12410_v9  ;;  %v17667_v13 = vld [vmem:[%s22050_s18 + $0x6b8] sm:$0xff]   ;;  %v17676_v9 = vld [vmem:[%s22050_s18 + $0x660] sm:$0xff]  }
0x389d   :  { %v12472_v56 = vpack.c.bf16 %v12440_v63, %v12440_v63 }
0x389e   :  { %v21648_v57 = vpop.f32.mrf.mxu1  ;;  %v21650_v10 = vpop.f32.mrf.mxu0 }
0x389f   :  { %16494 = vmatpush3.bf16.msra.mxu1 %v17654_v53  ;;  %16522 = vmatpush3.bf16.msra.mxu0 %v17655_v43  ;;  %v12473_v53 = vpack.c.bf16 %v12441_v44, %v12441_v44  ;;  %v12237_v7 = vadd.f32 %v21648_v57, %v21702_v4  ;;  %v17671_v57 = vld [vmem:[%s22050_s18 + $0x6b0] sm:$0xff]   ;;  %v17674_v44 = vld [vmem:[%s22050_s18 + $0x628] sm:$0xff]  }
0x38a0   :  { %v21657_v49 = vpop.f32.mrf.mxu1  ;;  %v21659_v41 = vpop.f32.mrf.mxu0  ;;  %16495 = vmatprep.subr.bf16.mxu1 %v17656_v42  ;;  %16523 = vmatprep.subr.bf16.mxu0 %v17657_v45  ;;  %v12475_v42 = vpack.c.bf16 %v12443_v5, %v12443_v5  ;;  %v17675_v5 = vld [vmem:[%s22050_s18 + $0x6a8] sm:$0xff]  }
0x38a2   :  { %v12240_v33 = vpop.f32.mrf.mxu1  ;;  %v12291_v17 = vpop.f32.mrf.mxu0 }
0x38a3   :  { %16496 = vmatpush3.bf16.msra.mxu1 %v17658_v26  ;;  %16524 = vmatpush3.bf16.msra.mxu0 %v17659_v18  ;;  %v12241_v43 = vadd.f32 %v12240_v33, %v21702_v4  ;;  %v12292_v45 = vadd.f32 %v12291_v17, %v21707_v35  ;;  %v12288_v18 = vadd.f32 %v21650_v10, %v21707_v35  ;;  %v17672_v10 = vld [vmem:[%s22050_s18 + $0x668] sm:$0xff]  }
0x38a4   :  { %v21678_v32 = vpop.f32.mrf.mxu1  ;;  %v21680_v24 = vpop.f32.mrf.mxu0  ;;  %16497 = vmatprep.subr.bf16.mxu1 %v17660_v31  ;;  %16525 = vmatprep.subr.bf16.mxu0 %v17661_v16  ;;  %v12442_v16 = vmax.f32 %v12194_v12, 0.0  ;;  %v17678_v12 = vld [vmem:[%s22050_s18 + $0x620] sm:$0xff]  }
0x38a5   :  { %v12429_v14 = vmax.f32 %v12241_v43, 0.0  ;;  %v12431_v19 = vmax.f32 %v12292_v45, 0.0  ;;  %v17680_v43 = vld [vmem:[%s22050_s18 + $0x658] sm:$0xff]  }
0x38a6   :  { %v21696_v36 = vpop.f32.mrf.mxu1  ;;  %v21698_v62 = vpop.f32.mrf.mxu0 }
0x38a7   :  { %16498 = vmatpush3.bf16.msra.mxu1 %v17662_v3  ;;  %16526 = vmatpush3.bf16.msra.mxu0 %v17663_v11  ;;  %v12413_v3 = vmax.f32 %v12237_v7, 0.0  ;;  %v12415_v11 = vmax.f32 %v12288_v18, 0.0  ;;  %v17684_v7 = vld [vmem:[%s22050_s18 + $0x650] sm:$0xff]  }
0x38a8   :  { %v12248_v37 = vpop.f32.mrf.mxu1  ;;  %v12299_v0 = vpop.f32.mrf.mxu0  ;;  %16539 = vmatprep.subr.bf16.mxu1 %v17664_v60  ;;  %16567 = vmatprep.subr.bf16.mxu0 %v17665_v47  ;;  %v12474_v47 = vpack.c.bf16 %v12442_v16, %v12442_v16  ;;  %v17686_v16 = vld [vmem:[%s22050_s18 + $0x610] sm:$0xff]  }
0x38a9   :  { %v12461_v2 = vpack.c.bf16 %v12429_v14, %v12413_v3  ;;  %v17677_v0 = vld [vmem:[%s22050_s18 + $0x6e0] sm:$0xff]   ;;  %v17687_v14 = vld [vmem:[%s22050_s18 + $0x690] sm:$0xff]   ;;  %v17690_v3 = vld [vmem:[%s22050_s18 + $0x608] sm:$0xff]  }
0x38aa   :  { %13644 = vmatmul.mubr.bf16.vlgmr.msra.gmra.mxu1 %v12456_v46  ;;  %v12249_v58 = vpop.f32.mrf.mxu1  ;;  %v12300_v26 = vpop.f32.mrf.mxu0  ;;  %13692 = vmatmul.mubr.bf16.vlgmr.msra.gmra.mxu0 %v12458_v27  ;;  %v12463_v46 = vpack.c.bf16 %v12431_v19, %v12415_v11  ;;  %v11785_v19 = vrot.slane %v21694_v54, %v18640_v21  ;;  %v17691_v11 = vld [vmem:[%s22050_s18 + $0x688] sm:$0xff]   ;;  %v17692_v21 = vld [vmem:[%s22050_s18 + $0x640] sm:$0xff]  }
0x38ab   :  { %13651 = vmatprep.mubr.bf16.mxu1 %v12473_v53  ;;  %13699 = vmatprep.mubr.bf16.mxu0 %v12475_v42  ;;  %v17679_v53 = vld [vmem:[%s22050_s18 + $0x6a0] sm:$0xff]   ;;  %v17681_v42 = vld [vmem:[%s22050_s18 + $0x6d8] sm:$0xff]  }
0x38ac   :  { %16540 = vmatpush3.bf16.msra.mxu1 %v17666_v61  ;;  %v21728_v31 = vpop.f32.mrf.mxu1  ;;  %v21730_v34 = vpop.f32.mrf.mxu0  ;;  %16568 = vmatpush3.bf16.msra.mxu0 %v17667_v13  ;;  %v17682_v26 = vld [vmem:[%s22050_s18 + $0x618] sm:$0xff]  }
0x38ad   :  { %16541 = vmatprep.subr.bf16.mxu1 %v17668_v6  ;;  %16569 = vmatprep.subr.bf16.mxu0 %v17669_v52  ;;  %v17683_v52 = vld [vmem:[%s22050_s18 + $0x698] sm:$0xff]  }
0x38ae   :  { %v21741_v33 = vpop.f32.mrf.mxu1  ;;  %v21743_v17 = vpop.f32.mrf.mxu0 }
0x38b0   :  { %16542 = vmatpush3.bf16.msra.mxu1 %v17670_v55  ;;  %v21748_v60 = vpop.f32.mrf.mxu1  ;;  %v21750_v29 = vpop.f32.mrf.mxu0  ;;  %16570 = vmatpush3.bf16.msra.mxu0 %v17671_v57  ;;  %v17685_v55 = vld [vmem:[%s22050_s18 + $0x6d0] sm:$0xff]   ;;  %v17688_v57 = vld [vmem:[%s22050_s18 + $0x648] sm:$0xff]  }
0x38b1   :  { %16543 = vmatprep.subr.bf16.mxu1 %v17672_v10  ;;  %16571 = vmatprep.subr.bf16.mxu0 %v17673_v22  ;;  %v17689_v10 = vld [vmem:[%s22050_s18 + $0x6c8] sm:$0xff]   ;;  %v11793_v22 = vrot.slane %v21694_v54, %v18643_v15  ;;  %v12247_v15 = vadd.f32 %v21696_v36, %v21702_v4  ;;  %v17695_v36 = vld [vmem:[%s22050_s18 + $0x680] sm:$0xff]  }
0x38b2   :  { %13652 = vmatmul.mubr.bf16.gmra.mxu1 %v12472_v56  ;;  %v21761_v23 = vpop.f32.mrf.mxu1  ;;  %v21763_v37 = vpop.f32.mrf.mxu0  ;;  %13700 = vmatmul.mubr.bf16.gmra.mxu0 %v12474_v47  ;;  %v12239_v56 = vadd.f32 %v21657_v49, %v11785_v19  ;;  %v17693_v49 = vld [vmem:[%s22050_s18 + $0x6c0] sm:$0xff]   ;;  %v12235_v47 = vadd.f32 %v21633_v25, %v11785_v19  ;;  %v17696_v25 = vld [vmem:[%s22050_s18 + $0x778] sm:$0xff]  }
0x38b3   :  { %13739 = vmatprep.mubr.bf16.mxu1 %v12461_v2  ;;  %13787 = vmatprep.mubr.bf16.mxu0 %v12463_v46  ;;  %v12298_v2 = vadd.f32 %v21698_v62, %v21707_v35  ;;  %v12445_v62 = vmax.f32 %v12247_v15, 0.0  ;;  %v17708_v15 = vld [vmem:[%s22050_s18 + $0x760] sm:$0xff]  }
0x38b4   :  { %16544 = vmatpush3.bf16.msra.mxu1 %v17674_v44  ;;  %v21768_v61 = vpop.f32.mrf.mxu1  ;;  %v21770_v27 = vpop.f32.mrf.mxu0  ;;  %16572 = vmatpush3.bf16.msra.mxu0 %v17675_v5  ;;  %v12290_v44 = vadd.f32 %v21659_v41, %v11793_v22  ;;  %v12286_v5 = vadd.f32 %v21635_v38, %v11793_v22  ;;  %v17694_v41 = vld [vmem:[%s22050_s18 + $0x600] sm:$0xff]   ;;  %v17697_v38 = vld [vmem:[%s22050_s18 + $0x7f8] sm:$0xff]   ;;  %v12412_v35 = vmax.f32 %v12235_v47, 0.0 }
0x38b5   :  { %16545 = vmatprep.subr.bf16.mxu1 %v17676_v9  ;;  %16573 = vmatprep.subr.bf16.mxu0 %v17677_v0  ;;  %v12428_v9 = vmax.f32 %v12239_v56, 0.0  ;;  %v12447_v46 = vmax.f32 %v12298_v2, 0.0  ;;  %v17706_v56 = vld [vmem:[%s22050_s18 + $0x728] sm:$0xff]   ;;  %v17709_v47 = vld [vmem:[%s22050_s18 + $0x7e0] sm:$0xff]  }
0x38b6   :  { %v21781_v13 = vpop.f32.mrf.mxu1  ;;  %v21783_v6 = vpop.f32.mrf.mxu0  ;;  %v12430_v4 = vmax.f32 %v12290_v44, 0.0  ;;  %v12414_v0 = vmax.f32 %v12286_v5, 0.0  ;;  %v17707_v44 = vld [vmem:[%s22050_s18 + $0x7a8] sm:$0xff]   ;;  %v17710_v2 = vld [vmem:[%s22050_s18 + $0x720] sm:$0xff]  }
0x38b7   :  { %v17711_v5 = vld [vmem:[%s22050_s18 + $0x7a0] sm:$0xff]  }
0x38b8   :  { %16546 = vmatpush3.bf16.msra.mxu1 %v17678_v12  ;;  %v12350_v45 = vpop.f32.mrf.mxu1  ;;  %v12401_v58 = vpop.f32.mrf.mxu0  ;;  %16574 = vmatpush3.bf16.msra.mxu0 %v17679_v53  ;;  %v21850_v12 = vrot.slane %v21694_v54, %v18662_v39  ;;  %v12460_v53 = vpack.c.bf16 %v12428_v9, %v12412_v35  ;;  %v17713_v9 = vld [vmem:[%s22050_s18 + $0x7d8] sm:$0xff]   ;;  %v17719_v35 = vld [vmem:[%s22050_s18 + $0x790] sm:$0xff]  }
0x38b9   :  { %16547 = vmatprep.subr.bf16.mxu1 %v17680_v43  ;;  %16575 = vmatprep.subr.bf16.mxu0 %v17681_v42  ;;  %v12245_v43 = vadd.f32 %v21678_v32, %v11785_v19  ;;  %v21855_v42 = vrot.slane %v21694_v54, %v18659_v30  ;;  %v17698_v45 = vld [vmem:[%s22050_s18 + $0x738] sm:$0xff]   ;;  %v12462_v58 = vpack.c.bf16 %v12430_v4, %v12414_v0  ;;  %v17700_v30 = vld [vmem:[%s22050_s18 + $0x770] sm:$0xff]   ;;  %v17721_v0 = vld [vmem:[%s22050_s18 + $0x7c8] sm:$0xff]  }
0x38ba   :  { %v12351_v63 = vpop.f32.mrf.mxu1  ;;  %v12402_v18 = vpop.f32.mrf.mxu0  ;;  %v12343_v39 = vadd.f32 %v21761_v23, %v21850_v12  ;;  %v17699_v32 = vld [vmem:[%s22050_s18 + $0x7b8] sm:$0xff]   ;;  %v12339_v23 = vadd.f32 %v21741_v33, %v21850_v12  ;;  %v17703_v33 = vld [vmem:[%s22050_s18 + $0x7b0] sm:$0xff]  }
0x38bb   :  { %v12394_v63 = vadd.f32 %v21763_v37, %v21855_v42  ;;  %v12444_v18 = vmax.f32 %v12245_v43, 0.0  ;;  %v17702_v37 = vld [vmem:[%s22050_s18 + $0x730] sm:$0xff]   ;;  %v11809_v43 = vrot.slane %v21694_v54, %v18744_v51  ;;  %v12349_v51 = vadd.f32 %v21781_v13, %v21850_v12  ;;  %v17727_v13 = vld [vmem:[%s22050_s18 + $0x780] sm:$0xff]  }
0x38bc   :  { %16548 = vmatpush3.bf16.msra.mxu1 %v17682_v26  ;;  %16576 = vmatpush3.bf16.msra.mxu0 %v17683_v52  ;;  %v12296_v26 = vadd.f32 %v21680_v24, %v11793_v22  ;;  %v12477_v52 = vpack.c.bf16 %v12445_v62, %v12445_v62  ;;  %v17701_v24 = vld [vmem:[%s22050_s18 + $0x7f0] sm:$0xff]   ;;  %v12417_v19 = vmax.f32 %v12339_v23, 0.0 }
0x38bd   :  { %16549 = vmatprep.subr.bf16.mxu1 %v17684_v7  ;;  %16577 = vmatprep.subr.bf16.mxu0 %v17685_v55  ;;  %v12479_v7 = vpack.c.bf16 %v12447_v46, %v12447_v46  ;;  %v12390_v55 = vadd.f32 %v21743_v17, %v21855_v42  ;;  %v17705_v17 = vld [vmem:[%s22050_s18 + $0x7e8] sm:$0xff]   ;;  %v12476_v22 = vpack.c.bf16 %v12444_v18, %v12444_v18  ;;  %v17716_v4 = vld [vmem:[%s22050_s18 + $0x750] sm:$0xff]  }
0x38be   :  { %v17717_v62 = vld [vmem:[%s22050_s18 + $0x7d0] sm:$0xff]   ;;  %v17720_v46 = vld [vmem:[%s22050_s18 + $0x748] sm:$0xff]   ;;  %v12398_v23 = vadd.f32 %v21770_v27, %v11809_v43  ;;  %v15490_v27 = vld [vmem:[%s22051_s19 + $0x1] ss:$0 sm:$0xff] }
0x38c0   :  { %16550 = vmatpush3.bf16.msra.mxu1 %v17686_v16  ;;  %16578 = vmatpush3.bf16.msra.mxu0 %v17687_v14  ;;  %v12446_v16 = vmax.f32 %v12296_v26, 0.0  ;;  %v12433_v14 = vmax.f32 %v12343_v39, 0.0  ;;  %v17723_v26 = vld [vmem:[%s22050_s18 + $0x788] sm:$0xff]   ;;  %v12400_v39 = vadd.f32 %v21783_v6, %v21855_v42 }
0x38c1   :  { %16551 = vmatprep.subr.bf16.mxu1 %v17688_v57  ;;  %16579 = vmatprep.subr.bf16.mxu0 %v17689_v10  ;;  %v17704_v57 = vld [vmem:[%s22050_s18 + $0x768] sm:$0xff]   ;;  %v12435_v10 = vmax.f32 %v12394_v63, 0.0 }
0x38c2   :  { %v12451_v63 = vmax.f32 %v12400_v39, 0.0 }
0x38c4   :  { %16552 = vmatpush3.bf16.msra.mxu1 %v17690_v3  ;;  %16580 = vmatpush3.bf16.msra.mxu0 %v17691_v11  ;;  %v12419_v3 = vmax.f32 %v12390_v55, 0.0  ;;  %v12478_v11 = vpack.c.bf16 %v12446_v16, %v12446_v16  ;;  %v12483_v55 = vpack.c.bf16 %v12451_v63, %v12451_v63  ;;  %v12450_v16 = vmax.f32 %v12398_v23, 0.0 }
0x38c5   :  { %16553 = vmatprep.subr.bf16.mxu1 %v17692_v21  ;;  %16581 = vmatprep.subr.bf16.mxu0 %v17693_v49  ;;  %v12465_v21 = vpack.c.bf16 %v12433_v14, %v12417_v19 }
0x38c6   :  { %v12467_v49 = vpack.c.bf16 %v12435_v10, %v12419_v3 }
0x38c8   :  { %16554 = vmatpush3.bf16.msra.mxu1 %v17694_v41  ;;  %16582 = vmatpush3.bf16.msra.mxu0 %v17695_v36  ;;  %v17712_v41 = vld [vmem:[%s22050_s18 + $0x758] sm:$0xff]  }
0x38c9   :  { %16595 = vmatprep.subr.bf16.mxu1 %v17696_v25  ;;  %16623 = vmatprep.subr.bf16.mxu0 %v17697_v38  ;;  %v17714_v36 = vld [vmem:[%s22050_s18 + $0x718] sm:$0xff]   ;;  %v17718_v38 = vld [vmem:[%s22050_s18 + $0x710] sm:$0xff]  }
0x38ca   :  { %v17715_v25 = vld [vmem:[%s22050_s18 + $0x798] sm:$0xff]  }
0x38cb   :  { %13740 = vmatmul.mubr.bf16.vlgmr.msra.gmra.mxu1 %v12460_v53  ;;  %13788 = vmatmul.mubr.bf16.vlgmr.msra.gmra.mxu0 %v12462_v58  ;;  %v11801_v53 = vrot.slane %v21694_v54, %v18741_v50  ;;  %v17724_v50 = vld [vmem:[%s22050_s18 + $0x740] sm:$0xff]  }
0x38cc   :  { %13747 = vmatprep.mubr.bf16.mxu1 %v12477_v52  ;;  %13795 = vmatprep.mubr.bf16.mxu0 %v12479_v7  ;;  %v12392_v52 = vadd.f32 %v21750_v29, %v11809_v43  ;;  %v17725_v54 = vld [vmem:[%s22050_s18 + $0x7c0] sm:$0xff]   ;;  %v12449_v7 = vmax.f32 %v12349_v51, 0.0 }
0x38cd   :  { %16596 = vmatpush3.bf16.msra.mxu1 %v17698_v45  ;;  %16624 = vmatpush3.bf16.msra.mxu0 %v17699_v32  ;;  %v17722_v45 = vld [vmem:[%s22050_s18 + $0x708] sm:$0xff]   ;;  %v12341_v58 = vadd.f32 %v21748_v60, %v11801_v53  ;;  %v12337_v60 = vadd.f32 %v21728_v31, %v11801_v53  ;;  %v12388_v32 = vadd.f32 %v21730_v34, %v11809_v43  ;;  %v17726_v29 = vld [vmem:[%s22050_s18 + $0x700] sm:$0xff]  }
0x38ce   :  { %16597 = vmatprep.subr.bf16.mxu1 %v17700_v30  ;;  %16625 = vmatprep.subr.bf16.mxu0 %v17701_v24  ;;  %v12434_v12 = vmax.f32 %v12392_v52, 0.0  ;;  %v12347_v42 = vadd.f32 %v21768_v61, %v11801_v53  ;;  %v12481_v18 = vpack.c.bf16 %v12449_v7, %v12449_v7 }
0x38cf   :  { %v12432_v30 = vmax.f32 %v12341_v58, 0.0  ;;  %v12416_v31 = vmax.f32 %v12337_v60, 0.0  ;;  %v12418_v6 = vmax.f32 %v12388_v32, 0.0 }
0x38d1   :  { %16598 = vmatpush3.bf16.msra.mxu1 %v17702_v37  ;;  %16626 = vmatpush3.bf16.msra.mxu0 %v17703_v33  ;;  %v12464_v34 = vpack.c.bf16 %v12432_v30, %v12416_v31  ;;  %v12466_v24 = vpack.c.bf16 %v12434_v12, %v12418_v6  ;;  %v12448_v37 = vmax.f32 %v12347_v42, 0.0  ;;  %v12482_v33 = vpack.c.bf16 %v12450_v16, %v12450_v16 }
0x38d2   :  { %16599 = vmatprep.subr.bf16.mxu1 %v17704_v57  ;;  %16627 = vmatprep.subr.bf16.mxu0 %v17705_v17 }
0x38d3   :  { %13748 = vmatmul.mubr.bf16.gmra.mxu1 %v12476_v22  ;;  %13796 = vmatmul.mubr.bf16.gmra.mxu0 %v12478_v11  ;;  %v12480_v14 = vpack.c.bf16 %v12448_v37, %v12448_v37 }
0x38d4   :  { %13835 = vmatprep.mubr.bf16.mxu1 %v12465_v21  ;;  %13883 = vmatprep.mubr.bf16.mxu0 %v12467_v49 }
0x38d5   :  { %16600 = vmatpush3.bf16.msra.mxu1 %v17706_v56  ;;  %16628 = vmatpush3.bf16.msra.mxu0 %v17707_v44 }
0x38d6   :  { %16601 = vmatprep.subr.bf16.mxu1 %v17708_v15  ;;  %16629 = vmatprep.subr.bf16.mxu0 %v17709_v47 }
0x38d9   :  { %16602 = vmatpush3.bf16.msra.mxu1 %v17710_v2  ;;  %16630 = vmatpush3.bf16.msra.mxu0 %v17711_v5 }
0x38da   :  { %16603 = vmatprep.subr.bf16.mxu1 %v17712_v41  ;;  %16631 = vmatprep.subr.bf16.mxu0 %v17713_v9 }
0x38dd   :  { %16604 = vmatpush3.bf16.msra.mxu1 %v17714_v36  ;;  %16632 = vmatpush3.bf16.msra.mxu0 %v17715_v25 }
0x38de   :  { %16605 = vmatprep.subr.bf16.mxu1 %v17716_v4  ;;  %16633 = vmatprep.subr.bf16.mxu0 %v17717_v62 }
0x38e1   :  { %16606 = vmatpush3.bf16.msra.mxu1 %v17718_v38  ;;  %16634 = vmatpush3.bf16.msra.mxu0 %v17719_v35 }
0x38e2   :  { %16607 = vmatprep.subr.bf16.mxu1 %v17720_v46  ;;  %16635 = vmatprep.subr.bf16.mxu0 %v17721_v0 }
0x38e5   :  { %16608 = vmatpush3.bf16.msra.mxu1 %v17722_v45  ;;  %16636 = vmatpush3.bf16.msra.mxu0 %v17723_v26 }
0x38e6   :  { %16609 = vmatprep.subr.bf16.mxu1 %v17724_v50  ;;  %16637 = vmatprep.subr.bf16.mxu0 %v17725_v54 }
0x38e9   :  { %16610 = vmatpush3.bf16.msra.mxu1 %v17726_v29  ;;  %16638 = vmatpush3.bf16.msra.mxu0 %v17727_v13 }
0x38ea   :  { %17164 = vmatprep.subr.mxu1 %v18033_v1 }
0x38ec   :  { %13836 = vmatmul.mubr.bf16.vlgmr.msra.gmra.mxu1 %v12464_v34  ;;  %13884 = vmatmul.mubr.bf16.vlgmr.msra.gmra.mxu0 %v12466_v24 }
0x38ed   :  { %13843 = vmatprep.mubr.bf16.mxu1 %v12481_v18  ;;  %13891 = vmatprep.mubr.bf16.mxu0 %v12483_v55 }
0x38f4   :  { %13844 = vmatmul.mubr.bf16.gmra.mxu1 %v12480_v14  ;;  %13892 = vmatmul.mubr.bf16.gmra.mxu0 %v12482_v33 }
0x38f5   :  { %17170 = vmatprep.mubr.msk.f32.mxu1 %vm18034_vm0, %v18033_v1 }
0x394a   :  { %v16443_v61 = vpop.f32.mrf.mxu1  ;;  %v16471_v57 = vpop.f32.mrf.mxu0 }
0x394c   :  { %v16444_v10 = vpop.f32.mrf.mxu1  ;;  %v16472_v17 = vpop.f32.mrf.mxu0 }
0x394d   :  { %v16445_v19 = vadd.f32 %v16444_v10, %v16443_v61  ;;  %v16473_v22 = vadd.f32 %v16472_v17, %v16471_v57 }
0x394e   :  { %v16446_v3 = vpop.f32.mrf.mxu1  ;;  %v16474_v56 = vpop.f32.mrf.mxu0 }
0x394f   :  { %v13550_v11 = vadd.f32 %v16445_v19, %v15490_v27 }
0x3950   :  { %v16447_v21 = vpop.f32.mrf.mxu1  ;;  %v16475_v44 = vpop.f32.mrf.mxu0 }
0x3951   :  { %v13598_v15 = vadd.f32 %v16473_v22, %v13550_v11  ;;  %v16448_v49 = vadd.f32 %v16447_v21, %v16446_v3  ;;  %v16476_v47 = vadd.f32 %v16475_v44, %v16474_v56 }
0x3952   :  { %v16449_v2 = vpop.f32.mrf.mxu1  ;;  %v16477_v5 = vpop.f32.mrf.mxu0 }
0x3953   :  { %v13553_v41 = vadd.f32 %v16448_v49, %v15490_v27 }
0x3954   :  { %v16450_v9 = vpop.f32.mrf.mxu1  ;;  %v16478_v36 = vpop.f32.mrf.mxu0 }
0x3955   :  { %v13601_v25 = vadd.f32 %v16476_v47, %v13553_v41  ;;  %v16451_v4 = vadd.f32 %v16450_v9, %v16449_v2  ;;  %v16479_v62 = vadd.f32 %v16478_v36, %v16477_v5 }
0x3956   :  { %v16452_v38 = vpop.f32.mrf.mxu1  ;;  %v16480_v35 = vpop.f32.mrf.mxu0 }
0x3957   :  { %v13558_v46 = vadd.f32 %v16451_v4, %v15490_v27 }
0x3958   :  { %v16453_v0 = vpop.f32.mrf.mxu1  ;;  %v16481_v53 = vpop.f32.mrf.mxu0 }
0x3959   :  { %v13606_v43 = vadd.f32 %v16479_v62, %v13558_v46 }
0x396a   :  { %v16499_v45 = vpop.f32.mrf.mxu1  ;;  %v16527_v58 = vpop.f32.mrf.mxu0 }
0x396c   :  { %v16500_v26 = vpop.f32.mrf.mxu1  ;;  %v16528_v52 = vpop.f32.mrf.mxu0 }
0x396d   :  { %v16501_v50 = vadd.f32 %v16500_v26, %v16499_v45  ;;  %v16529_v51 = vadd.f32 %v16528_v52, %v16527_v58 }
0x396e   :  { %v16502_v54 = vpop.f32.mrf.mxu1  ;;  %v16530_v39 = vpop.f32.mrf.mxu0 }
0x396f   :  { %v13646_v60 = vadd.f32 %v16501_v50, %v13598_v15 }
0x3970   :  { %v16503_v32 = vpop.f32.mrf.mxu1  ;;  %v16531_v30 = vpop.f32.mrf.mxu0 }
0x3971   :  { %v13694_v29 = vadd.f32 %v16529_v51, %v13646_v60  ;;  %v16504_v56 = vadd.f32 %v16503_v32, %v16502_v54  ;;  %v16532_v44 = vadd.f32 %v16531_v30, %v16530_v39 }
0x3972   :  { %v16505_v13 = vpop.f32.mrf.mxu1  ;;  %v16533_v12 = vpop.f32.mrf.mxu0 }
0x3973   :  { %v13649_v11 = vadd.f32 %v16504_v56, %v13601_v25 }
0x3974   :  { %v16506_v7 = vpop.f32.mrf.mxu1  ;;  %v16534_v31 = vpop.f32.mrf.mxu0 }
0x3975   :  { %v16507_v21 = vadd.f32 %v16506_v7, %v16505_v13  ;;  %v13697_v47 = vadd.f32 %v16532_v44, %v13649_v11  ;;  %v16535_v36 = vadd.f32 %v16534_v31, %v16533_v12 }
0x3976   :  { %v16508_v63 = vpop.f32.mrf.mxu1  ;;  %v16536_v6 = vpop.f32.mrf.mxu0 }
0x3977   :  { %v13654_v2 = vadd.f32 %v16507_v21, %v13606_v43  ;;  %v6669_v21 = vmul.f32 %v19896_v8, %v19896_v8 }
0x3978   :  { %v16509_v34 = vpop.f32.mrf.mxu1  ;;  %v16537_v42 = vpop.f32.mrf.mxu0 }
0x3979   :  { %v13702_v46 = vadd.f32 %v16535_v36, %v13654_v2 }
0x398b   :  { %v16555_v24 = vpop.f32.mrf.mxu1  ;;  %v16583_v23 = vpop.f32.mrf.mxu0 }
0x398d   :  { %v16556_v18 = vpop.f32.mrf.mxu1  ;;  %v16584_v55 = vpop.f32.mrf.mxu0 }
0x398e   :  { %v16557_v5 = vadd.f32 %v16556_v18, %v16555_v24  ;;  %v16585_v58 = vadd.f32 %v16584_v55, %v16583_v23 }
0x398f   :  { %v16558_v37 = vpop.f32.mrf.mxu1  ;;  %v16586_v16 = vpop.f32.mrf.mxu0 }
0x3990   :  { %v13742_v0 = vadd.f32 %v16557_v5, %v13694_v29  ;;  %v6671_v5 = vsel %vm6670_vm8, %v6669_v21, 0.0 }
0x3991   :  { %v16559_v14 = vpop.f32.mrf.mxu1  ;;  %v16587_v33 = vpop.f32.mrf.mxu0 }
0x3992   :  { %v16560_v15 = vadd.f32 %v16559_v14, %v16558_v37  ;;  %v16588_v53 = vadd.f32 %v16587_v33, %v16586_v16  ;;  %v13790_v60 = vadd.f32 %v16585_v58, %v13742_v0 }
0x3993   :  { %v16561_v61 = vpop.f32.mrf.mxu1  ;;  %v16589_v57 = vpop.f32.mrf.mxu0 }
0x3994   :  { %v13745_v4 = vadd.f32 %v16560_v15, %v13697_v47 }
0x3995   :  { %v16562_v27 = vpop.f32.mrf.mxu1  ;;  %v16590_v10 = vpop.f32.mrf.mxu0 }
0x3996   :  { %v16563_v62 = vadd.f32 %v16562_v27, %v16561_v61  ;;  %v13793_v26 = vadd.f32 %v16588_v53, %v13745_v4  ;;  %v16591_v39 = vadd.f32 %v16590_v10, %v16589_v57 }
0x3997   :  { %v16564_v17 = vpop.f32.mrf.mxu1  ;;  %v16592_v19 = vpop.f32.mrf.mxu0 }
0x3998   :  { %v13750_v50 = vadd.f32 %v16563_v62, %v13702_v46  ;;  %v6581_v62 = vmul.f32 %v19876_v59, %v19876_v59 }
0x3999   :  { %v16565_v22 = vpop.f32.mrf.mxu1  ;;  %v16593_v3 = vpop.f32.mrf.mxu0 }
0x399a   :  { %v13798_v7 = vadd.f32 %v16591_v39, %v13750_v50 }
0x39ac   :  { %v16611_v49 = vpop.f32.mrf.mxu1  ;;  %v16639_v41 = vpop.f32.mrf.mxu0 }
0x39ae   :  { %v16612_v9 = vpop.f32.mrf.mxu1  ;;  %v16640_v38 = vpop.f32.mrf.mxu0 }
0x39af   :  { %v16613_v52 = vadd.f32 %v16612_v9, %v16611_v49  ;;  %v16641_v42 = vadd.f32 %v16640_v38, %v16639_v41  ;;  %v6582_v41 = vmul.f32 %v19868_v48, %v19868_v48  ;;  %v6583_v38 = vsel %vm184_vm2, %v6581_v62, 0.0 }
0x39b0   :  { %v16614_v35 = vpop.f32.mrf.mxu1  ;;  %v16642_v45 = vpop.f32.mrf.mxu0 }
0x39b1   :  { %v13838_v31 = vadd.f32 %v16613_v52, %v13790_v60  ;;  %v6586_v36 = vsel %vm184_vm2, %v6582_v41, 0.0 }
0x39b2   :  { %v16615_v25 = vpop.f32.mrf.mxu1  ;;  %v16643_v54 = vpop.f32.mrf.mxu0 }
0x39b3   :  { %v16616_v51 = vadd.f32 %v16615_v25, %v16614_v35  ;;  %v16644_v30 = vadd.f32 %v16643_v54, %v16642_v45  ;;  %v13886_v16 = vadd.f32 %v16641_v42, %v13838_v31 }
0x39b4   :  { %v16617_v43 = vpop.f32.mrf.mxu1  ;;  %v16645_v13 = vpop.f32.mrf.mxu0 }
0x39b5   :  { %v13841_v32 = vadd.f32 %v16616_v51, %v13793_v26  ;;  %v13899_v10 = vadd.f32 %v13886_v16, %v21316_v40 }
0x39b6   :  { %v16618_v12 = vpop.f32.mrf.mxu1  ;;  %v16646_v6 = vpop.f32.mrf.mxu0 }
0x39b7   :  { %v13889_v63 = vadd.f32 %v16644_v30, %v13841_v32  ;;  %v16619_v29 = vadd.f32 %v16618_v12, %v16617_v43  ;;  %v16647_v23 = vadd.f32 %v16646_v6, %v16645_v13  ;;  %v13904_v17 = vsel %vm184_vm2, %v13899_v10, 0.0  ;;  %v15621_v30 = vld [vmem:[%s22052_s20 + $0x1] ss:$0 sm:$0xff] }
0x39b8   :  { %v16620_v34 = vpop.f32.mrf.mxu1  ;;  %v16648_v18 = vpop.f32.mrf.mxu0 }
0x39b9   :  { %v13846_v24 = vadd.f32 %v16619_v29, %v13798_v7  ;;  %v13900_v55 = vadd.f32 %v13889_v63, %v21318_v20  ;;  %v15622_v7 = vld [vmem:[%s22053_s21 + $0x1] ss:$0 sm:$0xff] }
0x39ba   :  { %v16621_v37 = vpop.f32.mrf.mxu1  ;;  %v16649_v33 = vpop.f32.mrf.mxu0 }
0x39bb   :  { %v13894_v14 = vadd.f32 %v16647_v23, %v13846_v24  ;;  %v13907_v61 = vsel %vm184_vm2, %v13900_v55, 0.0 }
0x39bc   :  { %13908 = vadd.xlane.f32.xlu0 %v13907_v61 }
0x39bd   :  { %v13901_v57 = vadd.f32 %v13894_v14, %v21351_v28 }
0x39bf   :  { %v13910_v27 = vsel %vm184_vm2, %v13901_v57, 0.0 }
0x39c0   :  { %13911 = vadd.xlane.f32.xlu1 %v13910_v27 }
0x39c4   :  { %13905 = vadd.xlane.f32.xlu1 %v13904_v17 }
0x3a45   :  { %v13909_v19 = vpop.xlane.xlu0 %13908 }
0x3a46   :  { %v13914_v22 = vmul.f32 0.03125, %v13909_v19 }
0x3a48   :  { %v13917_v20 = vsub.f32 %v13900_v55, %v13914_v22 }
0x3a49   :  { %v13912_v3 = vpop.xlane.xlu1 %13911 }
0x3a4a   :  { %v13915_v56 = vmul.f32 0.03125, %v13912_v3  ;;  %v13920_v11 = vmul.f32 %v13917_v20, %v13917_v20 }
0x3a4c   :  { %v13918_v44 = vsub.f32 %v13901_v57, %v13915_v56  ;;  %v13925_v28 = vsel %vm184_vm2, %v13920_v11, 0.0 }
0x3a4d   :  { %13926 = vadd.xlane.f32.xlu1 %v13925_v28  ;;  %v13906_v15 = vpop.xlane.xlu1 %13905 }
0x3a4e   :  { %v13913_v40 = vmul.f32 0.03125, %v13906_v15  ;;  %v13921_v49 = vmul.f32 %v13918_v44, %v13918_v44 }
0x3a50   :  { %v13916_v47 = vsub.f32 %v13899_v10, %v13913_v40  ;;  %v13928_v2 = vsel %vm184_vm2, %v13921_v49, 0.0 }
0x3a51   :  { %13929 = vadd.xlane.f32.xlu0 %v13928_v2  ;;  %6672 = vadd.xlane.f32.xlu1 %v6671_v5 }
0x3a52   :  { %v13919_v9 = vmul.f32 %v13916_v47, %v13916_v47 }
0x3a54   :  { %v13922_v4 = vsel %vm184_vm2, %v13919_v9, 0.0 }
0x3a55   :  { %6587 = vadd.xlane.f32.xlu1 %v6586_v36  ;;  %13923 = vadd.xlane.f32.xlu0 %v13922_v4 }
0x3a59   :  { %6584 = vadd.xlane.f32.xlu0 %v6583_v38 }
0x3ad6   :  { %v13927_v35 = vpop.xlane.xlu1 %13926 }
0x3ad7   :  { %v13932_v46 = vmul.f32 0.03125, %v13927_v35 }
0x3ad9   :  { %v13935_v0 = vadd.f32 1e-05, %v13932_v46 }
0x3ada   :  { %v13930_v53 = vpop.xlane.xlu0 %13929  ;;  %v6673_v45 = vpop.xlane.xlu1 %6672 }
0x3adb   :  { %17922 = vrsqrt.f32 %v13935_v0  ;;  %v13933_v58 = vmul.f32 0.03125, %v13930_v53  ;;  %v6674_v25 = vmax.f32 %v6673_v45, 1e-24 }
0x3add   :  { %v13936_v26 = vadd.f32 1e-05, %v13933_v58  ;;  %17924 = vrsqrt.f32 %v6674_v25 }
0x3ade   :  { %v13924_v50 = vpop.xlane.xlu0 %13923  ;;  %v6588_v52 = vpop.xlane.xlu1 %6587 }
0x3adf   :  { %17926 = vrsqrt.f32 %v13936_v26  ;;  %v13931_v51 = vmul.f32 0.03125, %v13924_v50  ;;  %v6590_v54 = vmax.f32 %v6588_v52, 1e-24 }
0x3ae1   :  { %v13934_v43 = vadd.f32 1e-05, %v13931_v51  ;;  %17928 = vrsqrt.f32 %v6590_v54 }
0x3ae2   :  { %v6585_v60 = vpop.xlane.xlu0 %6584 }
0x3ae3   :  { %17930 = vrsqrt.f32 %v13934_v43  ;;  %v6589_v39 = vmax.f32 %v6585_v60, 1e-24 }
0x3ae5   :  { %17932 = vrsqrt.f32 %v6589_v39 }
0x3ae8   :  { %v17923_v32 = vpop.eup %17922 }
0x3ae9   :  { %v13941_v13 = vmul.f32 %v17923_v32, %v13917_v20 }
0x3aea   :  { %v17925_v12 = vpop.eup %17924 }
0x3aeb   :  { %v13950_v31 = vmul.f32 %v15621_v30, %v13941_v13  ;;  %v6676_v63 = vmul.f32 %v17925_v12, %v19896_v8 }
0x3aec   :  { %v17927_v29 = vpop.eup %17926 }
0x3aed   :  { %v13959_v6 = vadd.f32 %v15622_v7, %v13950_v31  ;;  %v13942_v34 = vmul.f32 %v17927_v29, %v13918_v44  ;;  %6679 = vst.msk [vmem:[#allocation4] sm:$0x3] %vm6670_vm8, %v6676_v63 }
0x3aee   :  { %v17929_v42 = vpop.eup %17928 }
0x3aef   :  { %v13962_v24 = vmul.f32 %v13959_v6, %v13959_v6  ;;  %v13951_v23 = vmul.f32 %v15621_v30, %v13942_v34  ;;  %v6594_v18 = vmul.f32 %v17929_v42, %v19868_v48  ;;  %v13982_v48 = vld [vmem:[%s22129_s5] sm:$0x3] }
0x3af0   :  { %v17931_v55 = vpop.eup %17930 }
0x3af1   :  { %v13967_v37 = vsel %vm184_vm2, %v13962_v24, 0.0  ;;  %v13960_v16 = vadd.f32 %v15622_v7, %v13951_v23  ;;  %v13940_v14 = vmul.f32 %v17931_v55, %v13916_v47  ;;  %6678 = vst.msk [vmem:[#allocation2 + $0x8] sm:$0xff] %vm184_vm2, %v6594_v18 }
0x3af2   :  { %v17933_v33 = vpop.eup %17932  ;;  %13968 = vadd.xlane.f32.xlu1 %v13967_v37 }
0x3af3   :  { %17165 = vmatpush3.msra.mxu1 %v13960_v16  ;;  %v13949_v8 = vmul.f32 %v15621_v30, %v13940_v14  ;;  %v6593_v61 = vmul.f32 %v17933_v33, %v19876_v59  ;;  %v13963_v17 = vmul.f32 %v13960_v16, %v13960_v16 }
0x3af4   :  { %17166 = vmatprep.subr.mxu1 %v18033_v1 }
0x3af5   :  { %17167 = vmatpush3.msra.mxu1 %v13959_v6  ;;  %v13958_v57 = vadd.f32 %v15622_v7, %v13949_v8  ;;  %6677 = vst.msk [vmem:[#allocation2] sm:$0xff] %vm184_vm2, %v6593_v61  ;;  %v13970_v59 = vsel %vm184_vm2, %v13963_v17, 0.0 }
0x3af6   :  { %17168 = vmatprep.subr.mxu1 %v18033_v1 }
0x3af7   :  { %17169 = vmatpush3.msra.mxu1 %v13958_v57  ;;  %v13961_v27 = vmul.f32 %v13958_v57, %v13958_v57 }
0x3af8   :  { %17171 = vmatmul.mubr.msk.f32.vlgmr.msra.gmra.mxu1 %vm6972_vm7, %v13982_v48 }
0x3af9   :  { %v13964_v10 = vsel %vm184_vm2, %v13961_v27, 0.0 }
0x3afa   :  { %13965 = vadd.xlane.f32.xlu0 %v13964_v10 }
0x3afe   :  { %13971 = vadd.xlane.f32.xlu0 %v13970_v59 }
0x3b7b   :  { %v13969_v19 = vpop.xlane.xlu1 %13968 }
0x3b7c   :  { %v13974_v22 = vmax.f32 %v13969_v19, 1e-24 }
0x3b7e   :  { %17934 = vrsqrt.f32 %v13974_v22 }
0x3b83   :  { %v13966_v20 = vpop.xlane.xlu0 %13965 }
0x3b84   :  { %v13973_v3 = vmax.f32 %v13966_v20, 1e-24 }
0x3b86   :  { %17936 = vrsqrt.f32 %v13973_v3 }
0x3b87   :  { %v13972_v56 = vpop.xlane.xlu0 %13971 }
0x3b88   :  { %v13975_v11 = vmax.f32 %v13972_v56, 1e-24 }
0x3b8a   :  { %17938 = vrsqrt.f32 %v13975_v11 }
0x3b8b   :  { %v17935_v1 = vpop.eup %17934 }
0x3b8c   :  { %v13980_v21 = vmul.f32 %v17935_v1, %v13959_v6 }
0x3b8e   :  { %14064 = vst.msk [vmem:[#allocation6 + $0x8] sm:$0xff] %vm184_vm2, %v13980_v21 }
0x3b93   :  { %v17937_v44 = vpop.eup %17936 }
0x3b94   :  { %v13979_v28 = vmul.f32 %v17937_v44, %v13958_v57 }
0x3b96   :  { %14063 = vst.msk [vmem:[#allocation6] sm:$0xff] %vm184_vm2, %v13979_v28 }
0x3b97   :  { %v17939_v15 = vpop.eup %17938 }
0x3b98   :  { %v13981_v40 = vmul.f32 %v17939_v15, %v13960_v16 }
0x3b9a   :  { %14065 = vst.msk [vmem:[#allocation6 + $0x10] sm:$0xff] %vm184_vm2, %v13981_v40 }
0x3bb8   :  { %v14052_v49 = vpop.f32.mrf.mxu1 }
0x3bb9   :  { %v14056_v47 = vmul.f32 %v14052_v49, %v14052_v49 }
0x3bba   :  { %v17172_v2 = vpop.f32.mrf.mxu1 }
0x3bbb   :  { %v14057_v5 = vsel %vm6670_vm8, %v14056_v47, 0.0 }
0x3bbc   :  { %14058 = vadd.xlane.f32.xlu1 %v14057_v5 }
0x3bbd   :  { %17958 = shalt.err (!%p17955_p4)
}
0x3bbe   :  { %s22130_s8 = sld [smem:[#allocation26_spill]]  ;;  %s17967_s1 = scalar_lea.vmem %s14073_s12, 256 }
0x3bbf   :  { %p17968_p5 = scmp.ne.s32.totalorder %s14073_s12, %s17967_s1  ;;  %p17972_p6 = scmp.lt.s32.totalorder %s14073_s12, %s14073_s12 }
0x3bc0   :  { %p17973_p7 = scmp.lt.s32.totalorder %s17967_s1, %s17967_s1 }
0x3bc2   :  { %p17974_p8 = por %p17973_p7, %p17972_p6 }
0x3bc4   :  { %14088 = dma.vmem_to_hbm [thread:$0]  %s14086_s6, 32, %s22130_s8, [#allocation5]  }
0x3bc5   :  { %p17975_p9 = pnand %p17974_p8, %p17968_p5 }
0x3bc7   :  { %17978 = shalt.err (!%p17975_p9)
}
0x3bc8   :  { %s18049_s10 = smov 128   ;;  %s18050_s22 = smov 8  }
0x3bc9   :  { %s22131_s23 = sld [smem:[#allocation25_spill]]  ;;  %s18051_s29 = smov [#allocation6]  }
0x3bca   :  { %s14094_s11 = sshll.u32 %s18051_s29, 4  ;;  %s14095_s11 = int_to_ptr.vmem [resolvable:$true] %s14094_s11 }
0x3bcb   :  { %s17987_s25 = scalar_lea.vmem %s14095_s11, 384  ;;  %p17992_p11 = scmp.lt.s32.totalorder %s14095_s11, %s14095_s11 }
0x3bcc   :  { %p17988_p10 = scmp.ne.s32.totalorder %s14095_s11, %s17987_s25  ;;  %p17993_p12 = scmp.lt.s32.totalorder %s17987_s25, %s17987_s25 }
0x3bce   :  { %p17994_p13 = por %p17993_p12, %p17992_p11 }
0x3bcf   :  { %14078 = dma.vmem_to_hbm [thread:$0]  %s14073_s12, 256, %s22131_s23, [#allocation3], %s18049_s10, %s18049_s10, %s18050_s22  }
0x3bd0   :  { %p17995_p0 = pnand %p17994_p13, %p17988_p10 }
0x3bd2   :  { %17998 = shalt.err (!%p17995_p0)
}
0x3bd3   :  { %s22132_s2 = sld [smem:[#allocation27_spill]]  ;;  %s18052_s14 = smov [#allocation7]  }
0x3bd4   :  { %s14107_s28 = sshll.u32 %s18052_s14, 4  ;;  %s14108_s28 = int_to_ptr.vmem [resolvable:$true] %s14107_s28 }
0x3bd5   :  { %s18007_s18 = scalar_lea.vmem %s14108_s28, 32  ;;  %p18012_p2 = scmp.lt.s32.totalorder %s14108_s28, %s14108_s28 }
0x3bd6   :  { %p18008_p1 = scmp.ne.s32.totalorder %s14108_s28, %s18007_s18  ;;  %p18013_p3 = scmp.lt.s32.totalorder %s18007_s18, %s18007_s18 }
0x3bd8   :  { %p18014_p4 = por %p18013_p3, %p18012_p2 }
0x3bd9   :  { %14100 = dma.vmem_to_hbm [thread:$0]  %s14095_s11, 384, %s22132_s2, [#allocation5], %s18049_s10, %s18049_s10, %s18050_s22  }
0x3bda   :  { %p18015_p5 = pnand %p18014_p4, %p18008_p1 }
0x3c45   :  { %v14059_v41 = vpop.xlane.xlu1 %14058 }
0x3c46   :  { %v14060_v9 = vmax.f32 %v14059_v41, 1e-24 }
0x3c48   :  { %17940 = vrsqrt.f32 %v14060_v9 }
0x3c55   :  { %v17941_v36 = vpop.eup %17940 }
0x3c56   :  { %v14062_v4 = vmul.f32 %v17941_v36, %v14052_v49 }
0x3c58   :  { %14066 = vst.msk [vmem:[#allocation7] sm:$0x3] %vm6670_vm8, %v14062_v4 }
0x3c59   :  { %18018 = shalt.err (!%p18015_p5)
}
0x3c5a   :  { %s22133_s7 = sld [smem:[#allocation28_spill]] }
0x3c60   :  { %14110 = dma.vmem_to_hbm [thread:$0]  %s14108_s28, 32, %s22133_s7, [#allocation8]  }
0x3c61   :  { %18027 = dma.done.wait [#allocation3], 256  }
0x3c62   :  { %18028 = vsyncadd [#allocation3], 4294967040 }
0x3c63   :  { %18029 = dma.done.wait [#allocation5], 416  }
0x3c64   :  { %18030 = vsyncadd [#allocation5], 4294966880 }
0x3c65   :  { %18031 = dma.done.wait [#allocation8], 32  }
0x3c66   :  { %18032 = vsyncadd [#allocation8], 4294967264 }
0x3c67   :  { %14123 = vsyncpa [#allocation3], 1 }
0x3c68   :  { %14124 = vsyncpa [#allocation5], 1 }
0x3c69   :  { %14125 = vsyncpa [#allocation8], 1 }

</bundles_post_ra>
